<compile_context>
chip_gen: v6e
topology: v6e:2x2x1
jax: 0.10.0
libtpu: 0.0.40
codegen_flags: <defaults>
</compile_context>

<pallas_src>
import jax
import jax.numpy as jnp
import numpy as np
from jax import lax
from jax.experimental import pallas as pl
from jax.experimental.pallas import tpu as pltpu

EPS = 1e-5
LANE = 128      # output channels padded to a full 128-lane vector inside the kernels
SUBLANE = 8     # input channels padded to a sublane multiple (MXU-friendly K)


def _round_up(x, m):
    return (x + m - 1) // m * m


def _vmem_limit_bytes():
    # Review: 32 MiB left 3/4 of v5e/v6e's 128 MiB VMEM unused; query the chip and leave
    # ~25% headroom (=> ~48 MiB on v7x's 64 MiB, ~96 MiB on v5e/v6e).
    cap = 64 * 1024 * 1024
    try:
        info = pltpu.get_tpu_info()
        cap = int(getattr(info, "vmem_capacity_bytes", cap) or cap)
    except Exception:
        pass
    return int(min(cap * 3 // 4, 100 * 1024 * 1024))


_VMEM_LIMIT = _vmem_limit_bytes()


# ----------------------------- Pallas kernels ------------------------------------------

def stage1_kernel(xp_ref, w1_ref, wsc_ref,
                  pre1_ref, scpre_ref, s1_ref, ss1_ref, ssc_ref, sssc_ref):
    """conv1 (3x3 as 9 shifted MXU dots, accumulated in REGISTERS) + 1x1 shortcut conv
    + per-block one-pass BN partial stats.

    xp_ref    : (1, H+2, W+2, Cinp) bf16  zero-padded input tile (one batch sample)
    w1_ref    : (3, 3, Cinp, Cp)    bf16  conv1 weights
    wsc_ref   : (Cinp, Cp)          bf16  shortcut 1x1 conv weights
    pre1_ref  : (1, H, W, Cp)       bf16  raw (pre-BN) conv1 output
    scpre_ref : (1, H, W, Cp)       bf16  raw (pre-BN) shortcut output
    s*/ss*    : (1, 1, Cp)          f32   per-block sum / sum-of-squares (from the f32 acc)
    """
    _, Hp, Wp, Cin = xp_ref.shape
    H, W = Hp - 2, Wp - 2
    Cp = pre1_ref.shape[3]

    # Register accumulation: no VMEM read-modify-write per tap (the compiler may spill the
    # (H*W, Cp) f32 accumulator for large tiles; split M in halves if that ever binds).
    acc = jnp.zeros((H * W, Cp), jnp.float32)
    for dy in range(3):
        for dx in range(3):
            tap = xp_ref[0, dy:dy + H, dx:dx + W, :].reshape(H * W, Cin)
            acc = acc + jnp.dot(tap, w1_ref[dy, dx],
                                preferred_element_type=jnp.float32)
    pre1_ref[...] = acc.reshape(1, H, W, Cp).astype(pre1_ref.dtype)
    s1_ref[...] = jnp.sum(acc, axis=0).reshape(1, 1, Cp)
    ss1_ref[...] = jnp.sum(acc * acc, axis=0).reshape(1, 1, Cp)

    # 1x1 projection shortcut reuses the centre tap (== the unpadded input tile).
    # (Could be fused into the centre-tap dot as an N=2*Cp matmul on v6e/v7x.)
    ctr = xp_ref[0, 1:1 + H, 1:1 + W, :].reshape(H * W, Cin)
    sc = jnp.dot(ctr, wsc_ref[...], preferred_element_type=jnp.float32)
    scpre_ref[...] = sc.reshape(1, H, W, Cp).astype(scpre_ref.dtype)
    ssc_ref[...] = jnp.sum(sc, axis=0).reshape(1, 1, Cp)
    sssc_ref[...] = jnp.sum(sc * sc, axis=0).reshape(1, 1, Cp)


def stage2_kernel(pre1_ref, w2_ref, sc1_ref, sh1_ref,
                  pre2_ref, s2_ref, ss2_ref,
                  ybuf_ref, col_ref):
    """BN1 (global affine) + ReLU + conv2 as ONE fat-K MXU dot over an in-VMEM im2col
    + per-block one-pass BN2 partial stats.

    pre1_ref : (1, H, W, Cp)  bf16  pre-BN conv1 output (unpadded; halo exists only in VMEM)
    w2_ref   : (9*Cp, Cp)     bf16  conv2 weights, taps stacked along K (dy-major, then dx)
    sc1/sh1  : (1, Cp)        f32   global BN1 scale / shift
    pre2_ref : (1, H, W, Cp)  bf16  raw (pre-BN) conv2 output
    s2/ss2   : (1, 1, Cp)     f32   per-block sum / sum-of-squares
    ybuf_ref : VMEM (H+2, W+2, Cp) f32   relu(bn1(conv1)) with an exact-zero 1-pixel halo
    col_ref  : VMEM (H*W, 9*Cp)    bf16  im2col staging buffer for the fat-K dot
    """
    _, H, W, Cp = pre1_ref.shape

    scale1 = sc1_ref[...].reshape(1, 1, Cp)
    shift1 = sh1_ref[...].reshape(1, 1, Cp)
    y = jnp.maximum(pre1_ref[0].astype(jnp.float32) * scale1 + shift1, 0.0)

    # Zero halo + interior-only activation write (replaces the old full-tile iota mask).
    # Re-zeroed every step: under dimension_semantics=("parallel",) each TensorCore has its
    # own scratch, so a program_id(0)==0 one-shot init would miss the second core.
    ybuf_ref[...] = jnp.zeros_like(ybuf_ref)
    ybuf_ref[1:H + 1, 1:W + 1, :] = y

    # In-VMEM im2col: nine lane-aligned 128-wide copies, then one K = 9*Cp dot that fills
    # the 256-deep MXU on v6e/v7x (vs 9 thin K=Cp dots + accumulator updates).
    t = 0
    for dy in range(3):
        for dx in range(3):
            col_ref[:, t * Cp:(t + 1) * Cp] = (
                ybuf_ref[dy:dy + H, dx:dx + W, :]
                .reshape(H * W, Cp).astype(jnp.bfloat16))
            t += 1
    acc = jnp.dot(col_ref[...], w2_ref[...], preferred_element_type=jnp.float32)

    pre2_ref[...] = acc.reshape(1, H, W, Cp).astype(pre2_ref.dtype)
    s2_ref[...] = jnp.sum(acc, axis=0).reshape(1, 1, Cp)
    ss2_ref[...] = jnp.sum(acc * acc, axis=0).reshape(1, 1, Cp)


def finalize_kernel(pre2_ref, scp_ref, sc2_ref, sh2_ref, scs_ref, shs_ref, out_ref):
    """BN2 + BN_shortcut (global affines) + residual add + final ReLU.

    The HBM output is written at the REAL Cout width (masked vst), so the wrapper slice
    disappears and the final HBM write is Cout/Cp of the padded version."""
    cout = out_ref.shape[1]
    main = pre2_ref[...].astype(jnp.float32) * sc2_ref[...] + sh2_ref[...]
    short = scp_ref[...].astype(jnp.float32) * scs_ref[...] + shs_ref[...]
    res = jnp.maximum(main + short, 0.0)
    out_ref[...] = res[:, :cout]


# ----------------------------- wrapper (glue) -------------------------------------------

def residual_block_forward(x_nchw, params, kernel_size=3, stride=1, padding=1):
    if not (kernel_size == 3 and stride == 1 and padding == 1):
        raise NotImplementedError("only kernel_size=3, stride=1, padding=1 is implemented")

    N, Cin, H, W = x_nchw.shape
    Cout = params["w1"].shape[0]
    if stride == 1 and Cin == Cout:
        # TODO(synk): identity-shortcut path (empty nn.Sequential) not implemented; only the
        #             1x1-conv + BN projection shortcut (Cin != Cout or stride != 1) is handled.
        raise NotImplementedError("identity-shortcut configuration not implemented")

    Cp = _round_up(Cout, LANE)        # lane-dense channels inside the kernels / MXU
    Cinp = _round_up(Cin, SUBLANE)    # sublane-aligned contraction dim
    rows = N * H * W
    count = float(rows)
    bf16 = jnp.bfloat16

    # bf16 network input: one cheap spatial halo pad + channel pad (NOT an im2col blow-up).
    x_nhwc = jnp.transpose(x_nchw, (0, 2, 3, 1))
    xp = jnp.pad(x_nhwc, ((0, 0), (1, 1), (1, 1), (0, Cinp - Cin))).astype(bf16)

    # conv biases are intentionally dropped: a per-channel bias immediately before
    # training-mode BatchNorm (batch statistics) is cancelled exactly by the mean
    # subtraction.  (Must be restored if eval-mode running stats are ever used.)
    w1 = jnp.pad(jnp.transpose(params["w1"], (2, 3, 1, 0)),
                 ((0, 0), (0, 0), (0, Cinp - Cin), (0, Cp - Cout))).astype(bf16)
    # conv2 weights reshaped ONCE for the in-kernel fat-K im2col dot; row order (dy, dx, cin)
    # matches the kernel's tap concatenation order.
    w2 = jnp.pad(jnp.transpose(params["w2"], (2, 3, 1, 0)),
                 ((0, 0), (0, 0), (0, Cp - Cout), (0, Cp - Cout)))
    w2 = w2.reshape(9 * Cp, Cp).astype(bf16)
    wsc = jnp.pad(jnp.transpose(params["wsc"][:, :, 0, 0], (1, 0)),
                  ((0, Cinp - Cin), (0, Cp - Cout))).astype(bf16)

    def pad_c(v):
        return jnp.pad(v.astype(jnp.float32), (0, Cp - Cout))

    g1, be1 = pad_c(params["g1"]), pad_c(params["be1"])
    g2, be2 = pad_c(params["g2"]), pad_c(params["be2"])
    gsc, besc = pad_c(params["gsc"]), pad_c(params["besc"])

    cparams = pltpu.CompilerParams(
        dimension_semantics=("parallel",),     # lets the grid shard across v7x's 2 TCs
        vmem_limit_bytes=_VMEM_LIMIT,
    )
    # TODO(synk): for large ResNet shapes (e.g. 56x56x128+) add spatial row-tiling
    #             grid=(N, H//TH) with a TH+2-row halo per block so VMEM stays bounded on
    #             v7x (64 MiB) and small-N batches still feed both TensorCores; consider
    #             pipeline_mode=pl.Buffered(3) on the activation input if DMA latency shows.

    # ---- kernel 1: conv1 + shortcut conv + per-sample one-pass BN partial stats ----
    pre1, scpre, s1, ss1, ssc, sssc = pl.pallas_call(
        stage1_kernel,
        grid=(N,),
        in_specs=[
            pl.BlockSpec((1, H + 2, W + 2, Cinp), lambda n: (n, 0, 0, 0)),
            pl.BlockSpec((3, 3, Cinp, Cp), lambda n: (0, 0, 0, 0)),   # VMEM-resident weights
            pl.BlockSpec((Cinp, Cp), lambda n: (0, 0)),
        ],
        out_specs=[
            pl.BlockSpec((1, H, W, Cp), lambda n: (n, 0, 0, 0)),
            pl.BlockSpec((1, H, W, Cp), lambda n: (n, 0, 0, 0)),
            pl.BlockSpec((1, 1, Cp), lambda n: (n, 0, 0)),
            pl.BlockSpec((1, 1, Cp), lambda n: (n, 0, 0)),
            pl.BlockSpec((1, 1, Cp), lambda n: (n, 0, 0)),
            pl.BlockSpec((1, 1, Cp), lambda n: (n, 0, 0)),
        ],
        out_shape=[
            jax.ShapeDtypeStruct((N, H, W, Cp), bf16),
            jax.ShapeDtypeStruct((N, H, W, Cp), bf16),
            jax.ShapeDtypeStruct((N, 1, Cp), jnp.float32),
            jax.ShapeDtypeStruct((N, 1, Cp), jnp.float32),
            jax.ShapeDtypeStruct((N, 1, Cp), jnp.float32),
            jax.ShapeDtypeStruct((N, 1, Cp), jnp.float32),
        ],
        compiler_params=cparams,
        cost_estimate=pl.CostEstimate(
            flops=int(2 * rows * (9 * Cinp + Cinp) * Cp),
            transcendentals=0,
            bytes_accessed=int(2 * (xp.size + 2 * rows * Cp))),
    )(xp, w1, wsc)

    # Tiny global-stats combine (O(C)) -> fold mean/var/gamma/beta into scale & shift.
    # NOTE: one-pass E[x^2] - E[x]^2 in f32 with a clamp; fine at these sizes, switch to a
    #       shifted/Welford combine if N*H*W or the activation mean grows large.
    def bn_affine(s, ss, gamma, beta):
        total = jnp.sum(s, axis=(0, 1))
        totsq = jnp.sum(ss, axis=(0, 1))
        mean = total / count
        var = jnp.maximum(totsq / count - mean * mean, 0.0)
        scale = gamma * lax.rsqrt(var + EPS)
        shift = beta - mean * scale
        return scale.reshape(1, Cp), shift.reshape(1, Cp)

    sc1, sh1 = bn_affine(s1, ss1, g1, be1)

    # ---- kernel 2: BN1 + ReLU + conv2 (fat-K im2col dot) + BN2 partial stats ----
    # (no wrapper-side pad pass: the 1-pixel halo lives only in the VMEM scratch)
    pre2, s2, ss2 = pl.pallas_call(
        stage2_kernel,
        grid=(N,),
        in_specs=[
            pl.BlockSpec((1, H, W, Cp), lambda n: (n, 0, 0, 0)),
            pl.BlockSpec((9 * Cp, Cp), lambda n: (0, 0)),
            pl.BlockSpec((1, Cp), lambda n: (0, 0)),
            pl.BlockSpec((1, Cp), lambda n: (0, 0)),
        ],
        out_specs=[
            pl.BlockSpec((1, H, W, Cp), lambda n: (n, 0, 0, 0)),
            pl.BlockSpec((1, 1, Cp), lambda n: (n, 0, 0)),
            pl.BlockSpec((1, 1, Cp), lambda n: (n, 0, 0)),
        ],
        out_shape=[
            jax.ShapeDtypeStruct((N, H, W, Cp), bf16),
            jax.ShapeDtypeStruct((N, 1, Cp), jnp.float32),
            jax.ShapeDtypeStruct((N, 1, Cp), jnp.float32),
        ],
        scratch_shapes=[pltpu.VMEM((H + 2, W + 2, Cp), jnp.float32),
                        pltpu.VMEM((H * W, 9 * Cp), jnp.bfloat16)],
        compiler_params=cparams,
        cost_estimate=pl.CostEstimate(
            flops=int(2 * rows * 9 * Cp * Cp),
            transcendentals=0,
            bytes_accessed=int(2 * 2 * rows * Cp)),
    )(pre1, w2, sc1, sh1)

    sc2, sh2 = bn_affine(s2, ss2, g2, be2)
    scs, shs = bn_affine(ssc, sssc, gsc, besc)

    # ---- kernel 3: BN2 + BN_sc + residual add + ReLU; output written at real Cout width ----
    pre2_f = pre2.reshape(rows, Cp)
    scpre_f = scpre.reshape(rows, Cp)
    tile = next((t for t in (2048, 1024, 512, 256, 128, 64, 32, 16, 8)
                 if rows % t == 0), rows)
    out_f = pl.pallas_call(
        finalize_kernel,
        grid=(rows // tile,),
        in_specs=[
            pl.BlockSpec((tile, Cp), lambda i: (i, 0)),
            pl.BlockSpec((tile, Cp), lambda i: (i, 0)),
            pl.BlockSpec((1, Cp), lambda i: (0, 0)),
            pl.BlockSpec((1, Cp), lambda i: (0, 0)),
            pl.BlockSpec((1, Cp), lambda i: (0, 0)),
            pl.BlockSpec((1, Cp), lambda i: (0, 0)),
        ],
        out_specs=pl.BlockSpec((tile, Cout), lambda i: (i, 0)),
        out_shape=jax.ShapeDtypeStruct((rows, Cout), jnp.float32),
        compiler_params=cparams,
    )(pre2_f, scpre_f, sc2, sh2, scs, shs)

    out = out_f.reshape(N, H, W, Cout)
    # TODO(synk): emit NCHW directly from the finalize kernel (in-kernel transpose so H*W
    #             sits in lanes) and optionally write pre1/scpre/pre2 at Cout width too,
    #             to remove this (now Cout-wide, 16x smaller) transpose pass as well.
    return jnp.transpose(out, (0, 3, 1, 2))                       # back to NCHW


# ----------------------------- pure-JAX reference (for sanity) --------------------------

def _reference(x, params, pad=1):
    def conv(x, w, b, p):
        y = jax.lax.conv_general_dilated(
            x, w, (1, 1), [(p, p), (p, p)],
            dimension_numbers=("NCHW", "OIHW", "NCHW"))
        return y + b[None, :, None, None]

    def bn(x, g, be):
        m = jnp.mean(x, axis=(0, 2, 3), keepdims=True)
        v = jnp.mean((x - m) ** 2, axis=(0, 2, 3), keepdims=True)
        return (x - m) * jax.lax.rsqrt(v + EPS) * g[None, :, None, None] + be[None, :, None, None]

    out = jax.nn.relu(bn(conv(x, params["w1"], params["b1"], pad), params["g1"], params["be1"]))
    out = bn(conv(out, params["w2"], params["b2"], pad), params["g2"], params["be2"])
    sc = bn(conv(x, params["wsc"], params["bsc"], 0), params["gsc"], params["besc"])
    return jax.nn.relu(out + sc)


# ----------------------------- main ------------------------------------------------------

if __name__ == "__main__":
    N, Cin, Cout, H, W = 2, 4, 8, 16, 16       # Cin != Cout -> projection shortcut path
    K, PAD = 3, 1

    key = jax.random.PRNGKey(0)
    k1, k2, k3, k4, k5, k6, kx = jax.random.split(key, 7)

    params = {
        # conv weights in PyTorch layout (Cout, Cin, kH, kW); biases present but cancel under BN
        "w1":  0.1 * jax.random.normal(k1, (Cout, Cin, K, K), jnp.float32),
        "b1":  0.1 * jax.random.normal(k2, (Cout,), jnp.float32),
        "w2":  0.1 * jax.random.normal(k3, (Cout, Cout, K, K), jnp.float32),
        "b2":  0.1 * jax.random.normal(k4, (Cout,), jnp.float32),
        "wsc": 0.1 * jax.random.normal(k5, (Cout, Cin, 1, 1), jnp.float32),
        "bsc": 0.1 * jax.random.normal(k6, (Cout,), jnp.float32),
        # BatchNorm affine params (PyTorch default init: gamma=1, beta=0)
        "g1":  jnp.ones((Cout,), jnp.float32),  "be1":  jnp.zeros((Cout,), jnp.float32),
        "g2":  jnp.ones((Cout,), jnp.float32),  "be2":  jnp.zeros((Cout,), jnp.float32),
        "gsc": jnp.ones((Cout,), jnp.float32),  "besc": jnp.zeros((Cout,), jnp.float32),
    }

    x = jax.random.normal(kx, (N, Cin, H, W), jnp.float32)   # NCHW, like PyTorch

    fwd = jax.jit(residual_block_forward,
                  static_argnames=("kernel_size", "stride", "padding"))
    out = jax.block_until_ready(fwd(x, params, kernel_size=K, stride=1, padding=PAD))

    ref = jax.block_until_ready(_reference(x, params, pad=PAD))
    # Tolerance reflects the deliberate bf16 MXU-operand / bf16 inter-stage activation tradeoff.
    np.testing.assert_allclose(np.asarray(out), np.asarray(ref), atol=7.5e-2, rtol=5e-2)

    print("KERNEL_OK")
</pallas_src>

<mosaic_0001>
module attributes {stable_mosaic.version = 11 : i64} {
  func.func @stage1_kernel(%arg0: i32, %arg1: memref<1x18x18x8xbf16, #tpu.memory_space<vmem>>, %arg2: memref<3x3x8x128xbf16, #tpu.memory_space<vmem>>, %arg3: memref<8x128xbf16, #tpu.memory_space<vmem>>, %arg4: memref<1x16x16x128xbf16, #tpu.memory_space<vmem>>, %arg5: memref<1x16x16x128xbf16, #tpu.memory_space<vmem>>, %arg6: memref<1x1x128xf32, #tpu.memory_space<vmem>>, %arg7: memref<1x1x128xf32, #tpu.memory_space<vmem>>, %arg8: memref<1x1x128xf32, #tpu.memory_space<vmem>>, %arg9: memref<1x1x128xf32, #tpu.memory_space<vmem>>) attributes {dimension_semantics = [#tpu.dimension_semantics<parallel>], iteration_bounds = array<i64: 2>, scalar_prefetch = 0 : i64, scratch_operands = 0 : i64, tpu.core_type = #tpu.core_type<tc>, window_params = [{transform_indices = @transform_0, window_bounds = array<i64: 1, 18, 18, 8>}, {pipeline_mode = #tpu.pipeline_mode<synchronous>, transform_indices = @transform_1, window_bounds = array<i64: 3, 3, 8, 128>}, {pipeline_mode = #tpu.pipeline_mode<synchronous>, transform_indices = @transform_2, window_bounds = array<i64: 8, 128>}, {transform_indices = @transform_3, window_bounds = array<i64: 1, 16, 16, 128>}, {transform_indices = @transform_4, window_bounds = array<i64: 1, 16, 16, 128>}, {transform_indices = @transform_5, window_bounds = array<i64: 1, 1, 128>}, {transform_indices = @transform_6, window_bounds = array<i64: 1, 1, 128>}, {transform_indices = @transform_7, window_bounds = array<i64: 1, 1, 128>}, {transform_indices = @transform_8, window_bounds = array<i64: 1, 1, 128>}]} {
    %cst = arith.constant 0.000000e+00 : f32
    %0 = vector.broadcast %cst : f32 to vector<256x128xf32>
    %c0 = arith.constant 0 : index
    %c0_0 = arith.constant 0 : index
    %c0_1 = arith.constant 0 : index
    %c0_2 = arith.constant 0 : index
    %1 = vector.load %arg1[%c0, %c0_0, %c0_1, %c0_2] : memref<1x18x18x8xbf16, #tpu.memory_space<vmem>>, vector<1x16x16x8xbf16>
    %2 = vector.shape_cast %1 : vector<1x16x16x8xbf16> to vector<16x16x8xbf16>
    %3 = vector.shape_cast %2 : vector<16x16x8xbf16> to vector<256x8xbf16>
    %c0_3 = arith.constant 0 : index
    %c0_4 = arith.constant 0 : index
    %c0_5 = arith.constant 0 : index
    %c0_6 = arith.constant 0 : index
    %4 = vector.load %arg2[%c0_3, %c0_4, %c0_5, %c0_6] : memref<3x3x8x128xbf16, #tpu.memory_space<vmem>>, vector<1x1x8x128xbf16>
    %5 = vector.shape_cast %4 : vector<1x1x8x128xbf16> to vector<8x128xbf16>
    %cst_7 = arith.constant dense<0.000000e+00> : vector<256x128xf32>
    %6 = tpu.matmul %3, %5, %cst_7 {dimension_numbers = #tpu.dot_dimension_numbers<[1], [0], [0], [1], [0, 0, 1, 1], [], []>} : vector<256x8xbf16>, vector<8x128xbf16>, vector<256x128xf32> -> vector<256x128xf32>
    %7 = arith.addf %0, %6 : vector<256x128xf32>
    %c0_8 = arith.constant 0 : index
    %c0_9 = arith.constant 0 : index
    %c1 = arith.constant 1 : index
    %c0_10 = arith.constant 0 : index
    %8 = vector.load %arg1[%c0_8, %c0_9, %c1, %c0_10] : memref<1x18x18x8xbf16, #tpu.memory_space<vmem>>, vector<1x16x16x8xbf16>
    %9 = vector.shape_cast %8 : vector<1x16x16x8xbf16> to vector<16x16x8xbf16>
    %10 = vector.shape_cast %9 : vector<16x16x8xbf16> to vector<256x8xbf16>
    %c0_11 = arith.constant 0 : index
    %c1_12 = arith.constant 1 : index
    %c0_13 = arith.constant 0 : index
    %c0_14 = arith.constant 0 : index
    %11 = vector.load %arg2[%c0_11, %c1_12, %c0_13, %c0_14] : memref<3x3x8x128xbf16, #tpu.memory_space<vmem>>, vector<1x1x8x128xbf16>
    %12 = vector.shape_cast %11 : vector<1x1x8x128xbf16> to vector<8x128xbf16>
    %cst_15 = arith.constant dense<0.000000e+00> : vector<256x128xf32>
    %13 = tpu.matmul %10, %12, %cst_15 {dimension_numbers = #tpu.dot_dimension_numbers<[1], [0], [0], [1], [0, 0, 1, 1], [], []>} : vector<256x8xbf16>, vector<8x128xbf16>, vector<256x128xf32> -> vector<256x128xf32>
    %14 = arith.addf %7, %13 : vector<256x128xf32>
    %c0_16 = arith.constant 0 : index
    %c0_17 = arith.constant 0 : index
    %c2 = arith.constant 2 : index
    %c0_18 = arith.constant 0 : index
    %15 = vector.load %arg1[%c0_16, %c0_17, %c2, %c0_18] : memref<1x18x18x8xbf16, #tpu.memory_space<vmem>>, vector<1x16x16x8xbf16>
    %16 = vector.shape_cast %15 : vector<1x16x16x8xbf16> to vector<16x16x8xbf16>
    %17 = vector.shape_cast %16 : vector<16x16x8xbf16> to vector<256x8xbf16>
    %c0_19 = arith.constant 0 : index
    %c2_20 = arith.constant 2 : index
    %c0_21 = arith.constant 0 : index
    %c0_22 = arith.constant 0 : index
    %18 = vector.load %arg2[%c0_19, %c2_20, %c0_21, %c0_22] : memref<3x3x8x128xbf16, #tpu.memory_space<vmem>>, vector<1x1x8x128xbf16>
    %19 = vector.shape_cast %18 : vector<1x1x8x128xbf16> to vector<8x128xbf16>
    %cst_23 = arith.constant dense<0.000000e+00> : vector<256x128xf32>
    %20 = tpu.matmul %17, %19, %cst_23 {dimension_numbers = #tpu.dot_dimension_numbers<[1], [0], [0], [1], [0, 0, 1, 1], [], []>} : vector<256x8xbf16>, vector<8x128xbf16>, vector<256x128xf32> -> vector<256x128xf32>
    %21 = arith.addf %14, %20 : vector<256x128xf32>
    %c0_24 = arith.constant 0 : index
    %c1_25 = arith.constant 1 : index
    %c0_26 = arith.constant 0 : index
    %c0_27 = arith.constant 0 : index
    %22 = vector.load %arg1[%c0_24, %c1_25, %c0_26, %c0_27] : memref<1x18x18x8xbf16, #tpu.memory_space<vmem>>, vector<1x16x16x8xbf16>
    %23 = vector.shape_cast %22 : vector<1x16x16x8xbf16> to vector<16x16x8xbf16>
    %24 = vector.shape_cast %23 : vector<16x16x8xbf16> to vector<256x8xbf16>
    %c1_28 = arith.constant 1 : index
    %c0_29 = arith.constant 0 : index
    %c0_30 = arith.constant 0 : index
    %c0_31 = arith.constant 0 : index
    %25 = vector.load %arg2[%c1_28, %c0_29, %c0_30, %c0_31] : memref<3x3x8x128xbf16, #tpu.memory_space<vmem>>, vector<1x1x8x128xbf16>
    %26 = vector.shape_cast %25 : vector<1x1x8x128xbf16> to vector<8x128xbf16>
    %cst_32 = arith.constant dense<0.000000e+00> : vector<256x128xf32>
    %27 = tpu.matmul %24, %26, %cst_32 {dimension_numbers = #tpu.dot_dimension_numbers<[1], [0], [0], [1], [0, 0, 1, 1], [], []>} : vector<256x8xbf16>, vector<8x128xbf16>, vector<256x128xf32> -> vector<256x128xf32>
    %28 = arith.addf %21, %27 : vector<256x128xf32>
    %c0_33 = arith.constant 0 : index
    %c1_34 = arith.constant 1 : index
    %c1_35 = arith.constant 1 : index
    %c0_36 = arith.constant 0 : index
    %29 = vector.load %arg1[%c0_33, %c1_34, %c1_35, %c0_36] : memref<1x18x18x8xbf16, #tpu.memory_space<vmem>>, vector<1x16x16x8xbf16>
    %30 = vector.shape_cast %29 : vector<1x16x16x8xbf16> to vector<16x16x8xbf16>
    %31 = vector.shape_cast %30 : vector<16x16x8xbf16> to vector<256x8xbf16>
    %c1_37 = arith.constant 1 : index
    %c1_38 = arith.constant 1 : index
    %c0_39 = arith.constant 0 : index
    %c0_40 = arith.constant 0 : index
    %32 = vector.load %arg2[%c1_37, %c1_38, %c0_39, %c0_40] : memref<3x3x8x128xbf16, #tpu.memory_space<vmem>>, vector<1x1x8x128xbf16>
    %33 = vector.shape_cast %32 : vector<1x1x8x128xbf16> to vector<8x128xbf16>
    %cst_41 = arith.constant dense<0.000000e+00> : vector<256x128xf32>
    %34 = tpu.matmul %31, %33, %cst_41 {dimension_numbers = #tpu.dot_dimension_numbers<[1], [0], [0], [1], [0, 0, 1, 1], [], []>} : vector<256x8xbf16>, vector<8x128xbf16>, vector<256x128xf32> -> vector<256x128xf32>
    %35 = arith.addf %28, %34 : vector<256x128xf32>
    %c0_42 = arith.constant 0 : index
    %c1_43 = arith.constant 1 : index
    %c2_44 = arith.constant 2 : index
    %c0_45 = arith.constant 0 : index
    %36 = vector.load %arg1[%c0_42, %c1_43, %c2_44, %c0_45] : memref<1x18x18x8xbf16, #tpu.memory_space<vmem>>, vector<1x16x16x8xbf16>
    %37 = vector.shape_cast %36 : vector<1x16x16x8xbf16> to vector<16x16x8xbf16>
    %38 = vector.shape_cast %37 : vector<16x16x8xbf16> to vector<256x8xbf16>
    %c1_46 = arith.constant 1 : index
    %c2_47 = arith.constant 2 : index
    %c0_48 = arith.constant 0 : index
    %c0_49 = arith.constant 0 : index
    %39 = vector.load %arg2[%c1_46, %c2_47, %c0_48, %c0_49] : memref<3x3x8x128xbf16, #tpu.memory_space<vmem>>, vector<1x1x8x128xbf16>
    %40 = vector.shape_cast %39 : vector<1x1x8x128xbf16> to vector<8x128xbf16>
    %cst_50 = arith.constant dense<0.000000e+00> : vector<256x128xf32>
    %41 = tpu.matmul %38, %40, %cst_50 {dimension_numbers = #tpu.dot_dimension_numbers<[1], [0], [0], [1], [0, 0, 1, 1], [], []>} : vector<256x8xbf16>, vector<8x128xbf16>, vector<256x128xf32> -> vector<256x128xf32>
    %42 = arith.addf %35, %41 : vector<256x128xf32>
    %c0_51 = arith.constant 0 : index
    %c2_52 = arith.constant 2 : index
    %c0_53 = arith.constant 0 : index
    %c0_54 = arith.constant 0 : index
    %43 = vector.load %arg1[%c0_51, %c2_52, %c0_53, %c0_54] : memref<1x18x18x8xbf16, #tpu.memory_space<vmem>>, vector<1x16x16x8xbf16>
    %44 = vector.shape_cast %43 : vector<1x16x16x8xbf16> to vector<16x16x8xbf16>
    %45 = vector.shape_cast %44 : vector<16x16x8xbf16> to vector<256x8xbf16>
    %c2_55 = arith.constant 2 : index
    %c0_56 = arith.constant 0 : index
    %c0_57 = arith.constant 0 : index
    %c0_58 = arith.constant 0 : index
    %46 = vector.load %arg2[%c2_55, %c0_56, %c0_57, %c0_58] : memref<3x3x8x128xbf16, #tpu.memory_space<vmem>>, vector<1x1x8x128xbf16>
    %47 = vector.shape_cast %46 : vector<1x1x8x128xbf16> to vector<8x128xbf16>
    %cst_59 = arith.constant dense<0.000000e+00> : vector<256x128xf32>
    %48 = tpu.matmul %45, %47, %cst_59 {dimension_numbers = #tpu.dot_dimension_numbers<[1], [0], [0], [1], [0, 0, 1, 1], [], []>} : vector<256x8xbf16>, vector<8x128xbf16>, vector<256x128xf32> -> vector<256x128xf32>
    %49 = arith.addf %42, %48 : vector<256x128xf32>
    %c0_60 = arith.constant 0 : index
    %c2_61 = arith.constant 2 : index
    %c1_62 = arith.constant 1 : index
    %c0_63 = arith.constant 0 : index
    %50 = vector.load %arg1[%c0_60, %c2_61, %c1_62, %c0_63] : memref<1x18x18x8xbf16, #tpu.memory_space<vmem>>, vector<1x16x16x8xbf16>
    %51 = vector.shape_cast %50 : vector<1x16x16x8xbf16> to vector<16x16x8xbf16>
    %52 = vector.shape_cast %51 : vector<16x16x8xbf16> to vector<256x8xbf16>
    %c2_64 = arith.constant 2 : index
    %c1_65 = arith.constant 1 : index
    %c0_66 = arith.constant 0 : index
    %c0_67 = arith.constant 0 : index
    %53 = vector.load %arg2[%c2_64, %c1_65, %c0_66, %c0_67] : memref<3x3x8x128xbf16, #tpu.memory_space<vmem>>, vector<1x1x8x128xbf16>
    %54 = vector.shape_cast %53 : vector<1x1x8x128xbf16> to vector<8x128xbf16>
    %cst_68 = arith.constant dense<0.000000e+00> : vector<256x128xf32>
    %55 = tpu.matmul %52, %54, %cst_68 {dimension_numbers = #tpu.dot_dimension_numbers<[1], [0], [0], [1], [0, 0, 1, 1], [], []>} : vector<256x8xbf16>, vector<8x128xbf16>, vector<256x128xf32> -> vector<256x128xf32>
    %56 = arith.addf %49, %55 : vector<256x128xf32>
    %c0_69 = arith.constant 0 : index
    %c2_70 = arith.constant 2 : index
    %c2_71 = arith.constant 2 : index
    %c0_72 = arith.constant 0 : index
    %57 = vector.load %arg1[%c0_69, %c2_70, %c2_71, %c0_72] : memref<1x18x18x8xbf16, #tpu.memory_space<vmem>>, vector<1x16x16x8xbf16>
    %58 = vector.shape_cast %57 : vector<1x16x16x8xbf16> to vector<16x16x8xbf16>
    %59 = vector.shape_cast %58 : vector<16x16x8xbf16> to vector<256x8xbf16>
    %c2_73 = arith.constant 2 : index
    %c2_74 = arith.constant 2 : index
    %c0_75 = arith.constant 0 : index
    %c0_76 = arith.constant 0 : index
    %60 = vector.load %arg2[%c2_73, %c2_74, %c0_75, %c0_76] : memref<3x3x8x128xbf16, #tpu.memory_space<vmem>>, vector<1x1x8x128xbf16>
    %61 = vector.shape_cast %60 : vector<1x1x8x128xbf16> to vector<8x128xbf16>
    %cst_77 = arith.constant dense<0.000000e+00> : vector<256x128xf32>
    %62 = tpu.matmul %59, %61, %cst_77 {dimension_numbers = #tpu.dot_dimension_numbers<[1], [0], [0], [1], [0, 0, 1, 1], [], []>} : vector<256x8xbf16>, vector<8x128xbf16>, vector<256x128xf32> -> vector<256x128xf32>
    %63 = arith.addf %56, %62 : vector<256x128xf32>
    %64 = vector.shape_cast %63 : vector<256x128xf32> to vector<1x16x16x128xf32>
    %65 = arith.truncf %64 : vector<1x16x16x128xf32> to vector<1x16x16x128xbf16>
    %c0_78 = arith.constant 0 : index
    %c0_79 = arith.constant 0 : index
    %c0_80 = arith.constant 0 : index
    %c0_81 = arith.constant 0 : index
    %66 = vector.load %arg4[%c0_78, %c0_79, %c0_80, %c0_81] : memref<1x16x16x128xbf16, #tpu.memory_space<vmem>>, vector<1x16x16x128xbf16>
    tpu.vector_store %arg4[%c0_78, %c0_79, %c0_80, %c0_81], %65 {strides = array<i32>} : memref<1x16x16x128xbf16, #tpu.memory_space<vmem>>, vector<1x16x16x128xbf16>,
    %cst_82 = arith.constant dense<0.000000e+00> : vector<128xf32>
    %67 = vector.multi_reduction <add>, %63, %cst_82 [0] : vector<256x128xf32> to vector<128xf32>
    %68 = vector.shape_cast %67 : vector<128xf32> to vector<1x1x128xf32>
    %c0_83 = arith.constant 0 : index
    %c0_84 = arith.constant 0 : index
    %c0_85 = arith.constant 0 : index
    %69 = vector.load %arg6[%c0_83, %c0_84, %c0_85] : memref<1x1x128xf32, #tpu.memory_space<vmem>>, vector<1x1x128xf32>
    tpu.vector_store %arg6[%c0_83, %c0_84, %c0_85], %68 {strides = array<i32>} : memref<1x1x128xf32, #tpu.memory_space<vmem>>, vector<1x1x128xf32>,
    %70 = arith.mulf %63, %63 : vector<256x128xf32>
    %cst_86 = arith.constant dense<0.000000e+00> : vector<128xf32>
    %71 = vector.multi_reduction <add>, %70, %cst_86 [0] : vector<256x128xf32> to vector<128xf32>
    %72 = vector.shape_cast %71 : vector<128xf32> to vector<1x1x128xf32>
    %c0_87 = arith.constant 0 : index
    %c0_88 = arith.constant 0 : index
    %c0_89 = arith.constant 0 : index
    %73 = vector.load %arg7[%c0_87, %c0_88, %c0_89] : memref<1x1x128xf32, #tpu.memory_space<vmem>>, vector<1x1x128xf32>
    tpu.vector_store %arg7[%c0_87, %c0_88, %c0_89], %72 {strides = array<i32>} : memref<1x1x128xf32, #tpu.memory_space<vmem>>, vector<1x1x128xf32>,
    %c0_90 = arith.constant 0 : index
    %c1_91 = arith.constant 1 : index
    %c1_92 = arith.constant 1 : index
    %c0_93 = arith.constant 0 : index
    %74 = vector.load %arg1[%c0_90, %c1_91, %c1_92, %c0_93] : memref<1x18x18x8xbf16, #tpu.memory_space<vmem>>, vector<1x16x16x8xbf16>
    %75 = vector.shape_cast %74 : vector<1x16x16x8xbf16> to vector<16x16x8xbf16>
    %76 = vector.shape_cast %75 : vector<16x16x8xbf16> to vector<256x8xbf16>
    %c0_94 = arith.constant 0 : index
    %c0_95 = arith.constant 0 : index
    %77 = vector.load %arg3[%c0_94, %c0_95] : memref<8x128xbf16, #tpu.memory_space<vmem>>, vector<8x128xbf16>
    %cst_96 = arith.constant dense<0.000000e+00> : vector<256x128xf32>
    %78 = tpu.matmul %76, %77, %cst_96 {dimension_numbers = #tpu.dot_dimension_numbers<[1], [0], [0], [1], [0, 0, 1, 1], [], []>} : vector<256x8xbf16>, vector<8x128xbf16>, vector<256x128xf32> -> vector<256x128xf32>
    %79 = vector.shape_cast %78 : vector<256x128xf32> to vector<1x16x16x128xf32>
    %80 = arith.truncf %79 : vector<1x16x16x128xf32> to vector<1x16x16x128xbf16>
    %c0_97 = arith.constant 0 : index
    %c0_98 = arith.constant 0 : index
    %c0_99 = arith.constant 0 : index
    %c0_100 = arith.constant 0 : index
    %81 = vector.load %arg5[%c0_97, %c0_98, %c0_99, %c0_100] : memref<1x16x16x128xbf16, #tpu.memory_space<vmem>>, vector<1x16x16x128xbf16>
    tpu.vector_store %arg5[%c0_97, %c0_98, %c0_99, %c0_100], %80 {strides = array<i32>} : memref<1x16x16x128xbf16, #tpu.memory_space<vmem>>, vector<1x16x16x128xbf16>,
    %cst_101 = arith.constant dense<0.000000e+00> : vector<128xf32>
    %82 = vector.multi_reduction <add>, %78, %cst_101 [0] : vector<256x128xf32> to vector<128xf32>
    %83 = vector.shape_cast %82 : vector<128xf32> to vector<1x1x128xf32>
    %c0_102 = arith.constant 0 : index
    %c0_103 = arith.constant 0 : index
    %c0_104 = arith.constant 0 : index
    %84 = vector.load %arg8[%c0_102, %c0_103, %c0_104] : memref<1x1x128xf32, #tpu.memory_space<vmem>>, vector<1x1x128xf32>
    tpu.vector_store %arg8[%c0_102, %c0_103, %c0_104], %83 {strides = array<i32>} : memref<1x1x128xf32, #tpu.memory_space<vmem>>, vector<1x1x128xf32>,
    %85 = arith.mulf %78, %78 : vector<256x128xf32>
    %cst_105 = arith.constant dense<0.000000e+00> : vector<128xf32>
    %86 = vector.multi_reduction <add>, %85, %cst_105 [0] : vector<256x128xf32> to vector<128xf32>
    %87 = vector.shape_cast %86 : vector<128xf32> to vector<1x1x128xf32>
    %c0_106 = arith.constant 0 : index
    %c0_107 = arith.constant 0 : index
    %c0_108 = arith.constant 0 : index
    %88 = vector.load %arg9[%c0_106, %c0_107, %c0_108] : memref<1x1x128xf32, #tpu.memory_space<vmem>>, vector<1x1x128xf32>
    tpu.vector_store %arg9[%c0_106, %c0_107, %c0_108], %87 {strides = array<i32>} : memref<1x1x128xf32, #tpu.memory_space<vmem>>, vector<1x1x128xf32>,
    return
  }
  func.func @transform_0(%arg0: i32) -> (i32, i32, i32, i32) {
    %c0_i32 = arith.constant 0 : i32
    %c0_i32_0 = arith.constant 0 : i32
    %c0_i32_1 = arith.constant 0 : i32
    %c0_i32_2 = arith.constant 0 : i32
    return %arg0, %c0_i32, %c0_i32_0, %c0_i32_1 : i32, i32, i32, i32
  }
  func.func @transform_1(%arg0: i32) -> (i32, i32, i32, i32) {
    %c0_i32 = arith.constant 0 : i32
    %c0_i32_0 = arith.constant 0 : i32
    %c0_i32_1 = arith.constant 0 : i32
    %c0_i32_2 = arith.constant 0 : i32
    %c0_i32_3 = arith.constant 0 : i32
    return %c0_i32, %c0_i32_0, %c0_i32_1, %c0_i32_2 : i32, i32, i32, i32
  }
  func.func @transform_2(%arg0: i32) -> (i32, i32) {
    %c0_i32 = arith.constant 0 : i32
    %c0_i32_0 = arith.constant 0 : i32
    %c0_i32_1 = arith.constant 0 : i32
    return %c0_i32, %c0_i32_0 : i32, i32
  }
  func.func @transform_3(%arg0: i32) -> (i32, i32, i32, i32) {
    %c0_i32 = arith.constant 0 : i32
    %c0_i32_0 = arith.constant 0 : i32
    %c0_i32_1 = arith.constant 0 : i32
    %c0_i32_2 = arith.constant 0 : i32
    return %arg0, %c0_i32, %c0_i32_0, %c0_i32_1 : i32, i32, i32, i32
  }
  func.func @transform_4(%arg0: i32) -> (i32, i32, i32, i32) {
    %c0_i32 = arith.constant 0 : i32
    %c0_i32_0 = arith.constant 0 : i32
    %c0_i32_1 = arith.constant 0 : i32
    %c0_i32_2 = arith.constant 0 : i32
    return %arg0, %c0_i32, %c0_i32_0, %c0_i32_1 : i32, i32, i32, i32
  }
  func.func @transform_5(%arg0: i32) -> (i32, i32, i32) {
    %c0_i32 = arith.constant 0 : i32
    %c0_i32_0 = arith.constant 0 : i32
    %c0_i32_1 = arith.constant 0 : i32
    return %arg0, %c0_i32, %c0_i32_0 : i32, i32, i32
  }
  func.func @transform_6(%arg0: i32) -> (i32, i32, i32) {
    %c0_i32 = arith.constant 0 : i32
    %c0_i32_0 = arith.constant 0 : i32
    %c0_i32_1 = arith.constant 0 : i32
    return %arg0, %c0_i32, %c0_i32_0 : i32, i32, i32
  }
  func.func @transform_7(%arg0: i32) -> (i32, i32, i32) {
    %c0_i32 = arith.constant 0 : i32
    %c0_i32_0 = arith.constant 0 : i32
    %c0_i32_1 = arith.constant 0 : i32
    return %arg0, %c0_i32, %c0_i32_0 : i32, i32, i32
  }
  func.func @transform_8(%arg0: i32) -> (i32, i32, i32) {
    %c0_i32 = arith.constant 0 : i32
    %c0_i32_0 = arith.constant 0 : i32
    %c0_i32_1 = arith.constant 0 : i32
    return %arg0, %c0_i32, %c0_i32_0 : i32, i32, i32
  }
}

module attributes {stable_mosaic.version = 11 : i64} {
  func.func @stage2_kernel(%arg0: i32, %arg1: memref<1x16x16x128xbf16, #tpu.memory_space<vmem>>, %arg2: memref<1152x128xbf16, #tpu.memory_space<vmem>>, %arg3: memref<1x128xf32, #tpu.memory_space<vmem>>, %arg4: memref<1x128xf32, #tpu.memory_space<vmem>>, %arg5: memref<1x16x16x128xbf16, #tpu.memory_space<vmem>>, %arg6: memref<1x1x128xf32, #tpu.memory_space<vmem>>, %arg7: memref<1x1x128xf32, #tpu.memory_space<vmem>>, %arg8: memref<18x18x128xf32, #tpu.memory_space<vmem>>, %arg9: memref<256x1152xbf16, #tpu.memory_space<vmem>>) attributes {dimension_semantics = [#tpu.dimension_semantics<parallel>], iteration_bounds = array<i64: 2>, scalar_prefetch = 0 : i64, scratch_operands = 2 : i64, tpu.core_type = #tpu.core_type<tc>, window_params = [{transform_indices = @transform_0, window_bounds = array<i64: 1, 16, 16, 128>}, {pipeline_mode = #tpu.pipeline_mode<synchronous>, transform_indices = @transform_1, window_bounds = array<i64: 1152, 128>}, {pipeline_mode = #tpu.pipeline_mode<synchronous>, transform_indices = @transform_2, window_bounds = array<i64: 1, 128>}, {pipeline_mode = #tpu.pipeline_mode<synchronous>, transform_indices = @transform_3, window_bounds = array<i64: 1, 128>}, {transform_indices = @transform_4, window_bounds = array<i64: 1, 16, 16, 128>}, {transform_indices = @transform_5, window_bounds = array<i64: 1, 1, 128>}, {transform_indices = @transform_6, window_bounds = array<i64: 1, 1, 128>}]} {
    %c0 = arith.constant 0 : index
    %c0_0 = arith.constant 0 : index
    %0 = vector.load %arg3[%c0, %c0_0] : memref<1x128xf32, #tpu.memory_space<vmem>>, vector<1x128xf32>
    %1 = vector.shape_cast %0 : vector<1x128xf32> to vector<1x1x128xf32>
    %c0_1 = arith.constant 0 : index
    %c0_2 = arith.constant 0 : index
    %2 = vector.load %arg4[%c0_1, %c0_2] : memref<1x128xf32, #tpu.memory_space<vmem>>, vector<1x128xf32>
    %3 = vector.shape_cast %2 : vector<1x128xf32> to vector<1x1x128xf32>
    %c0_3 = arith.constant 0 : index
    %c0_4 = arith.constant 0 : index
    %c0_5 = arith.constant 0 : index
    %c0_6 = arith.constant 0 : index
    %4 = vector.load %arg1[%c0_3, %c0_4, %c0_5, %c0_6] : memref<1x16x16x128xbf16, #tpu.memory_space<vmem>>, vector<1x16x16x128xbf16>
    %5 = vector.shape_cast %4 : vector<1x16x16x128xbf16> to vector<16x16x128xbf16>
    %6 = arith.extf %5 : vector<16x16x128xbf16> to vector<16x16x128xf32>
    %7 = vector.broadcast %1 : vector<1x1x128xf32> to vector<16x16x128xf32>
    %8 = arith.mulf %6, %7 : vector<16x16x128xf32>
    %9 = vector.broadcast %3 : vector<1x1x128xf32> to vector<16x16x128xf32>
    %10 = arith.addf %8, %9 : vector<16x16x128xf32>
    %cst = arith.constant 0.000000e+00 : f32
    %11 = vector.broadcast %cst : f32 to vector<16x16x128xf32>
    %12 = arith.maximumf %10, %11 : vector<16x16x128xf32>
    %cst_7 = arith.constant 0.000000e+00 : f32
    %13 = vector.broadcast %cst_7 : f32 to vector<18x18x128xf32>
    %c0_8 = arith.constant 0 : index
    %c0_9 = arith.constant 0 : index
    %c0_10 = arith.constant 0 : index
    %14 = vector.load %arg8[%c0_8, %c0_9, %c0_10] : memref<18x18x128xf32, #tpu.memory_space<vmem>>, vector<18x18x128xf32>
    tpu.vector_store %arg8[%c0_8, %c0_9, %c0_10], %13 {strides = array<i32>} : memref<18x18x128xf32, #tpu.memory_space<vmem>>, vector<18x18x128xf32>,
    %c1 = arith.constant 1 : index
    %c1_11 = arith.constant 1 : index
    %c0_12 = arith.constant 0 : index
    %15 = vector.load %arg8[%c1, %c1_11, %c0_12] : memref<18x18x128xf32, #tpu.memory_space<vmem>>, vector<16x16x128xf32>
    tpu.vector_store %arg8[%c1, %c1_11, %c0_12], %12 {strides = array<i32>} : memref<18x18x128xf32, #tpu.memory_space<vmem>>, vector<16x16x128xf32>,
    %c0_13 = arith.constant 0 : index
    %c0_14 = arith.constant 0 : index
    %c0_15 = arith.constant 0 : index
    %16 = vector.load %arg8[%c0_13, %c0_14, %c0_15] : memref<18x18x128xf32, #tpu.memory_space<vmem>>, vector<16x16x128xf32>
    %17 = vector.shape_cast %16 : vector<16x16x128xf32> to vector<256x128xf32>
    %18 = arith.truncf %17 : vector<256x128xf32> to vector<256x128xbf16>
    %c0_16 = arith.constant 0 : index
    %c0_17 = arith.constant 0 : index
    %19 = vector.load %arg9[%c0_16, %c0_17] : memref<256x1152xbf16, #tpu.memory_space<vmem>>, vector<256x128xbf16>
    tpu.vector_store %arg9[%c0_16, %c0_17], %18 {strides = array<i32>} : memref<256x1152xbf16, #tpu.memory_space<vmem>>, vector<256x128xbf16>,
    %c0_18 = arith.constant 0 : index
    %c1_19 = arith.constant 1 : index
    %c0_20 = arith.constant 0 : index
    %20 = vector.load %arg8[%c0_18, %c1_19, %c0_20] : memref<18x18x128xf32, #tpu.memory_space<vmem>>, vector<16x16x128xf32>
    %21 = vector.shape_cast %20 : vector<16x16x128xf32> to vector<256x128xf32>
    %22 = arith.truncf %21 : vector<256x128xf32> to vector<256x128xbf16>
    %c0_21 = arith.constant 0 : index
    %c128 = arith.constant 128 : index
    %23 = vector.load %arg9[%c0_21, %c128] : memref<256x1152xbf16, #tpu.memory_space<vmem>>, vector<256x128xbf16>
    tpu.vector_store %arg9[%c0_21, %c128], %22 {strides = array<i32>} : memref<256x1152xbf16, #tpu.memory_space<vmem>>, vector<256x128xbf16>,
    %c0_22 = arith.constant 0 : index
    %c2 = arith.constant 2 : index
    %c0_23 = arith.constant 0 : index
    %24 = vector.load %arg8[%c0_22, %c2, %c0_23] : memref<18x18x128xf32, #tpu.memory_space<vmem>>, vector<16x16x128xf32>
    %25 = vector.shape_cast %24 : vector<16x16x128xf32> to vector<256x128xf32>
    %26 = arith.truncf %25 : vector<256x128xf32> to vector<256x128xbf16>
    %c0_24 = arith.constant 0 : index
    %c256 = arith.constant 256 : index
    %27 = vector.load %arg9[%c0_24, %c256] : memref<256x1152xbf16, #tpu.memory_space<vmem>>, vector<256x128xbf16>
    tpu.vector_store %arg9[%c0_24, %c256], %26 {strides = array<i32>} : memref<256x1152xbf16, #tpu.memory_space<vmem>>, vector<256x128xbf16>,
    %c1_25 = arith.constant 1 : index
    %c0_26 = arith.constant 0 : index
    %c0_27 = arith.constant 0 : index
    %28 = vector.load %arg8[%c1_25, %c0_26, %c0_27] : memref<18x18x128xf32, #tpu.memory_space<vmem>>, vector<16x16x128xf32>
    %29 = vector.shape_cast %28 : vector<16x16x128xf32> to vector<256x128xf32>
    %30 = arith.truncf %29 : vector<256x128xf32> to vector<256x128xbf16>
    %c0_28 = arith.constant 0 : index
    %c384 = arith.constant 384 : index
    %31 = vector.load %arg9[%c0_28, %c384] : memref<256x1152xbf16, #tpu.memory_space<vmem>>, vector<256x128xbf16>
    tpu.vector_store %arg9[%c0_28, %c384], %30 {strides = array<i32>} : memref<256x1152xbf16, #tpu.memory_space<vmem>>, vector<256x128xbf16>,
    %c1_29 = arith.constant 1 : index
    %c1_30 = arith.constant 1 : index
    %c0_31 = arith.constant 0 : index
    %32 = vector.load %arg8[%c1_29, %c1_30, %c0_31] : memref<18x18x128xf32, #tpu.memory_space<vmem>>, vector<16x16x128xf32>
    %33 = vector.shape_cast %32 : vector<16x16x128xf32> to vector<256x128xf32>
    %34 = arith.truncf %33 : vector<256x128xf32> to vector<256x128xbf16>
    %c0_32 = arith.constant 0 : index
    %c512 = arith.constant 512 : index
    %35 = vector.load %arg9[%c0_32, %c512] : memref<256x1152xbf16, #tpu.memory_space<vmem>>, vector<256x128xbf16>
    tpu.vector_store %arg9[%c0_32, %c512], %34 {strides = array<i32>} : memref<256x1152xbf16, #tpu.memory_space<vmem>>, vector<256x128xbf16>,
    %c1_33 = arith.constant 1 : index
    %c2_34 = arith.constant 2 : index
    %c0_35 = arith.constant 0 : index
    %36 = vector.load %arg8[%c1_33, %c2_34, %c0_35] : memref<18x18x128xf32, #tpu.memory_space<vmem>>, vector<16x16x128xf32>
    %37 = vector.shape_cast %36 : vector<16x16x128xf32> to vector<256x128xf32>
    %38 = arith.truncf %37 : vector<256x128xf32> to vector<256x128xbf16>
    %c0_36 = arith.constant 0 : index
    %c640 = arith.constant 640 : index
    %39 = vector.load %arg9[%c0_36, %c640] : memref<256x1152xbf16, #tpu.memory_space<vmem>>, vector<256x128xbf16>
    tpu.vector_store %arg9[%c0_36, %c640], %38 {strides = array<i32>} : memref<256x1152xbf16, #tpu.memory_space<vmem>>, vector<256x128xbf16>,
    %c2_37 = arith.constant 2 : index
    %c0_38 = arith.constant 0 : index
    %c0_39 = arith.constant 0 : index
    %40 = vector.load %arg8[%c2_37, %c0_38, %c0_39] : memref<18x18x128xf32, #tpu.memory_space<vmem>>, vector<16x16x128xf32>
    %41 = vector.shape_cast %40 : vector<16x16x128xf32> to vector<256x128xf32>
    %42 = arith.truncf %41 : vector<256x128xf32> to vector<256x128xbf16>
    %c0_40 = arith.constant 0 : index
    %c768 = arith.constant 768 : index
    %43 = vector.load %arg9[%c0_40, %c768] : memref<256x1152xbf16, #tpu.memory_space<vmem>>, vector<256x128xbf16>
    tpu.vector_store %arg9[%c0_40, %c768], %42 {strides = array<i32>} : memref<256x1152xbf16, #tpu.memory_space<vmem>>, vector<256x128xbf16>,
    %c2_41 = arith.constant 2 : index
    %c1_42 = arith.constant 1 : index
    %c0_43 = arith.constant 0 : index
    %44 = vector.load %arg8[%c2_41, %c1_42, %c0_43] : memref<18x18x128xf32, #tpu.memory_space<vmem>>, vector<16x16x128xf32>
    %45 = vector.shape_cast %44 : vector<16x16x128xf32> to vector<256x128xf32>
    %46 = arith.truncf %45 : vector<256x128xf32> to vector<256x128xbf16>
    %c0_44 = arith.constant 0 : index
    %c896 = arith.constant 896 : index
    %47 = vector.load %arg9[%c0_44, %c896] : memref<256x1152xbf16, #tpu.memory_space<vmem>>, vector<256x128xbf16>
    tpu.vector_store %arg9[%c0_44, %c896], %46 {strides = array<i32>} : memref<256x1152xbf16, #tpu.memory_space<vmem>>, vector<256x128xbf16>,
    %c2_45 = arith.constant 2 : index
    %c2_46 = arith.constant 2 : index
    %c0_47 = arith.constant 0 : index
    %48 = vector.load %arg8[%c2_45, %c2_46, %c0_47] : memref<18x18x128xf32, #tpu.memory_space<vmem>>, vector<16x16x128xf32>
    %49 = vector.shape_cast %48 : vector<16x16x128xf32> to vector<256x128xf32>
    %50 = arith.truncf %49 : vector<256x128xf32> to vector<256x128xbf16>
    %c0_48 = arith.constant 0 : index
    %c1024 = arith.constant 1024 : index
    %51 = vector.load %arg9[%c0_48, %c1024] : memref<256x1152xbf16, #tpu.memory_space<vmem>>, vector<256x128xbf16>
    tpu.vector_store %arg9[%c0_48, %c1024], %50 {strides = array<i32>} : memref<256x1152xbf16, #tpu.memory_space<vmem>>, vector<256x128xbf16>,
    %c0_49 = arith.constant 0 : index
    %c0_50 = arith.constant 0 : index
    %52 = vector.load %arg9[%c0_49, %c0_50] : memref<256x1152xbf16, #tpu.memory_space<vmem>>, vector<256x1152xbf16>
    %c0_51 = arith.constant 0 : index
    %c0_52 = arith.constant 0 : index
    %53 = vector.load %arg2[%c0_51, %c0_52] : memref<1152x128xbf16, #tpu.memory_space<vmem>>, vector<1152x128xbf16>
    %cst_53 = arith.constant dense<0.000000e+00> : vector<256x128xf32>
    %54 = tpu.matmul %52, %53, %cst_53 {dimension_numbers = #tpu.dot_dimension_numbers<[1], [0], [0], [1], [0, 0, 1, 1], [], []>} : vector<256x1152xbf16>, vector<1152x128xbf16>, vector<256x128xf32> -> vector<256x128xf32>
    %55 = vector.shape_cast %54 : vector<256x128xf32> to vector<1x16x16x128xf32>
    %56 = arith.truncf %55 : vector<1x16x16x128xf32> to vector<1x16x16x128xbf16>
    %c0_54 = arith.constant 0 : index
    %c0_55 = arith.constant 0 : index
    %c0_56 = arith.constant 0 : index
    %c0_57 = arith.constant 0 : index
    %57 = vector.load %arg5[%c0_54, %c0_55, %c0_56, %c0_57] : memref<1x16x16x128xbf16, #tpu.memory_space<vmem>>, vector<1x16x16x128xbf16>
    tpu.vector_store %arg5[%c0_54, %c0_55, %c0_56, %c0_57], %56 {strides = array<i32>} : memref<1x16x16x128xbf16, #tpu.memory_space<vmem>>, vector<1x16x16x128xbf16>,
    %cst_58 = arith.constant dense<0.000000e+00> : vector<128xf32>
    %58 = vector.multi_reduction <add>, %54, %cst_58 [0] : vector<256x128xf32> to vector<128xf32>
    %59 = vector.shape_cast %58 : vector<128xf32> to vector<1x1x128xf32>
    %c0_59 = arith.constant 0 : index
    %c0_60 = arith.constant 0 : index
    %c0_61 = arith.constant 0 : index
    %60 = vector.load %arg6[%c0_59, %c0_60, %c0_61] : memref<1x1x128xf32, #tpu.memory_space<vmem>>, vector<1x1x128xf32>
    tpu.vector_store %arg6[%c0_59, %c0_60, %c0_61], %59 {strides = array<i32>} : memref<1x1x128xf32, #tpu.memory_space<vmem>>, vector<1x1x128xf32>,
    %61 = arith.mulf %54, %54 : vector<256x128xf32>
    %cst_62 = arith.constant dense<0.000000e+00> : vector<128xf32>
    %62 = vector.multi_reduction <add>, %61, %cst_62 [0] : vector<256x128xf32> to vector<128xf32>
    %63 = vector.shape_cast %62 : vector<128xf32> to vector<1x1x128xf32>
    %c0_63 = arith.constant 0 : index
    %c0_64 = arith.constant 0 : index
    %c0_65 = arith.constant 0 : index
    %64 = vector.load %arg7[%c0_63, %c0_64, %c0_65] : memref<1x1x128xf32, #tpu.memory_space<vmem>>, vector<1x1x128xf32>
    tpu.vector_store %arg7[%c0_63, %c0_64, %c0_65], %63 {strides = array<i32>} : memref<1x1x128xf32, #tpu.memory_space<vmem>>, vector<1x1x128xf32>,
    return
  }
  func.func @transform_0(%arg0: i32) -> (i32, i32, i32, i32) {
    %c0_i32 = arith.constant 0 : i32
    %c0_i32_0 = arith.constant 0 : i32
    %c0_i32_1 = arith.constant 0 : i32
    %c0_i32_2 = arith.constant 0 : i32
    return %arg0, %c0_i32, %c0_i32_0, %c0_i32_1 : i32, i32, i32, i32
  }
  func.func @transform_1(%arg0: i32) -> (i32, i32) {
    %c0_i32 = arith.constant 0 : i32
    %c0_i32_0 = arith.constant 0 : i32
    %c0_i32_1 = arith.constant 0 : i32
    return %c0_i32, %c0_i32_0 : i32, i32
  }
  func.func @transform_2(%arg0: i32) -> (i32, i32) {
    %c0_i32 = arith.constant 0 : i32
    %c0_i32_0 = arith.constant 0 : i32
    %c0_i32_1 = arith.constant 0 : i32
    return %c0_i32, %c0_i32_0 : i32, i32
  }
  func.func @transform_3(%arg0: i32) -> (i32, i32) {
    %c0_i32 = arith.constant 0 : i32
    %c0_i32_0 = arith.constant 0 : i32
    %c0_i32_1 = arith.constant 0 : i32
    return %c0_i32, %c0_i32_0 : i32, i32
  }
  func.func @transform_4(%arg0: i32) -> (i32, i32, i32, i32) {
    %c0_i32 = arith.constant 0 : i32
    %c0_i32_0 = arith.constant 0 : i32
    %c0_i32_1 = arith.constant 0 : i32
    %c0_i32_2 = arith.constant 0 : i32
    return %arg0, %c0_i32, %c0_i32_0, %c0_i32_1 : i32, i32, i32, i32
  }
  func.func @transform_5(%arg0: i32) -> (i32, i32, i32) {
    %c0_i32 = arith.constant 0 : i32
    %c0_i32_0 = arith.constant 0 : i32
    %c0_i32_1 = arith.constant 0 : i32
    return %arg0, %c0_i32, %c0_i32_0 : i32, i32, i32
  }
  func.func @transform_6(%arg0: i32) -> (i32, i32, i32) {
    %c0_i32 = arith.constant 0 : i32
    %c0_i32_0 = arith.constant 0 : i32
    %c0_i32_1 = arith.constant 0 : i32
    return %arg0, %c0_i32, %c0_i32_0 : i32, i32, i32
  }
}

module attributes {stable_mosaic.version = 11 : i64} {
  func.func @finalize_kernel(%arg0: i32, %arg1: memref<512x128xbf16, #tpu.memory_space<vmem>>, %arg2: memref<512x128xbf16, #tpu.memory_space<vmem>>, %arg3: memref<1x128xf32, #tpu.memory_space<vmem>>, %arg4: memref<1x128xf32, #tpu.memory_space<vmem>>, %arg5: memref<1x128xf32, #tpu.memory_space<vmem>>, %arg6: memref<1x128xf32, #tpu.memory_space<vmem>>, %arg7: memref<512x8xf32, #tpu.memory_space<vmem>>) attributes {dimension_semantics = [#tpu.dimension_semantics<parallel>], iteration_bounds = array<i64: 1>, scalar_prefetch = 0 : i64, scratch_operands = 0 : i64, tpu.core_type = #tpu.core_type<tc>, window_params = [{transform_indices = @transform_0, window_bounds = array<i64: 512, 128>}, {transform_indices = @transform_1, window_bounds = array<i64: 512, 128>}, {pipeline_mode = #tpu.pipeline_mode<synchronous>, transform_indices = @transform_2, window_bounds = array<i64: 1, 128>}, {pipeline_mode = #tpu.pipeline_mode<synchronous>, transform_indices = @transform_3, window_bounds = array<i64: 1, 128>}, {pipeline_mode = #tpu.pipeline_mode<synchronous>, transform_indices = @transform_4, window_bounds = array<i64: 1, 128>}, {pipeline_mode = #tpu.pipeline_mode<synchronous>, transform_indices = @transform_5, window_bounds = array<i64: 1, 128>}, {transform_indices = @transform_6, window_bounds = array<i64: 512, 8>}]} {
    %c0 = arith.constant 0 : index
    %c0_0 = arith.constant 0 : index
    %0 = vector.load %arg1[%c0, %c0_0] : memref<512x128xbf16, #tpu.memory_space<vmem>>, vector<512x128xbf16>
    %1 = arith.extf %0 : vector<512x128xbf16> to vector<512x128xf32>
    %c0_1 = arith.constant 0 : index
    %c0_2 = arith.constant 0 : index
    %2 = vector.load %arg3[%c0_1, %c0_2] : memref<1x128xf32, #tpu.memory_space<vmem>>, vector<1x128xf32>
    %3 = vector.broadcast %2 : vector<1x128xf32> to vector<512x128xf32>
    %4 = arith.mulf %1, %3 : vector<512x128xf32>
    %c0_3 = arith.constant 0 : index
    %c0_4 = arith.constant 0 : index
    %5 = vector.load %arg4[%c0_3, %c0_4] : memref<1x128xf32, #tpu.memory_space<vmem>>, vector<1x128xf32>
    %6 = vector.broadcast %5 : vector<1x128xf32> to vector<512x128xf32>
    %7 = arith.addf %4, %6 : vector<512x128xf32>
    %c0_5 = arith.constant 0 : index
    %c0_6 = arith.constant 0 : index
    %8 = vector.load %arg2[%c0_5, %c0_6] : memref<512x128xbf16, #tpu.memory_space<vmem>>, vector<512x128xbf16>
    %9 = arith.extf %8 : vector<512x128xbf16> to vector<512x128xf32>
    %c0_7 = arith.constant 0 : index
    %c0_8 = arith.constant 0 : index
    %10 = vector.load %arg5[%c0_7, %c0_8] : memref<1x128xf32, #tpu.memory_space<vmem>>, vector<1x128xf32>
    %11 = vector.broadcast %10 : vector<1x128xf32> to vector<512x128xf32>
    %12 = arith.mulf %9, %11 : vector<512x128xf32>
    %c0_9 = arith.constant 0 : index
    %c0_10 = arith.constant 0 : index
    %13 = vector.load %arg6[%c0_9, %c0_10] : memref<1x128xf32, #tpu.memory_space<vmem>>, vector<1x128xf32>
    %14 = vector.broadcast %13 : vector<1x128xf32> to vector<512x128xf32>
    %15 = arith.addf %12, %14 : vector<512x128xf32>
    %16 = arith.addf %7, %15 : vector<512x128xf32>
    %cst = arith.constant 0.000000e+00 : f32
    %17 = vector.broadcast %cst : f32 to vector<512x128xf32>
    %18 = arith.maximumf %16, %17 : vector<512x128xf32>
    %19 = vector.extract_strided_slice %18 {offsets = [0, 0], sizes = [512, 8], strides = [1, 1]} : vector<512x128xf32> to vector<512x8xf32>
    %c0_11 = arith.constant 0 : index
    %c0_12 = arith.constant 0 : index
    %20 = vector.load %arg7[%c0_11, %c0_12] : memref<512x8xf32, #tpu.memory_space<vmem>>, vector<512x8xf32>
    tpu.vector_store %arg7[%c0_11, %c0_12], %19 {strides = array<i32>} : memref<512x8xf32, #tpu.memory_space<vmem>>, vector<512x8xf32>,
    return
  }
  func.func @transform_0(%arg0: i32) -> (i32, i32) {
    %c0_i32 = arith.constant 0 : i32
    %c0_i32_0 = arith.constant 0 : i32
    return %arg0, %c0_i32 : i32, i32
  }
  func.func @transform_1(%arg0: i32) -> (i32, i32) {
    %c0_i32 = arith.constant 0 : i32
    %c0_i32_0 = arith.constant 0 : i32
    return %arg0, %c0_i32 : i32, i32
  }
  func.func @transform_2(%arg0: i32) -> (i32, i32) {
    %c0_i32 = arith.constant 0 : i32
    %c0_i32_0 = arith.constant 0 : i32
    %c0_i32_1 = arith.constant 0 : i32
    return %c0_i32, %c0_i32_0 : i32, i32
  }
  func.func @transform_3(%arg0: i32) -> (i32, i32) {
    %c0_i32 = arith.constant 0 : i32
    %c0_i32_0 = arith.constant 0 : i32
    %c0_i32_1 = arith.constant 0 : i32
    return %c0_i32, %c0_i32_0 : i32, i32
  }
  func.func @transform_4(%arg0: i32) -> (i32, i32) {
    %c0_i32 = arith.constant 0 : i32
    %c0_i32_0 = arith.constant 0 : i32
    %c0_i32_1 = arith.constant 0 : i32
    return %c0_i32, %c0_i32_0 : i32, i32
  }
  func.func @transform_5(%arg0: i32) -> (i32, i32) {
    %c0_i32 = arith.constant 0 : i32
    %c0_i32_0 = arith.constant 0 : i32
    %c0_i32_1 = arith.constant 0 : i32
    return %c0_i32, %c0_i32_0 : i32, i32
  }
  func.func @transform_6(%arg0: i32) -> (i32, i32) {
    %c0_i32 = arith.constant 0 : i32
    %c0_i32_0 = arith.constant 0 : i32
    return %arg0, %c0_i32 : i32, i32
  }
}

</mosaic_0001>

<bundles_post_ra>
// kernel: residual_block_forward.5
= control target key start
LH: loop header
LB: loop body
LE: loop exit
PB: predicated region body
PF: predicated region fallthrough
CT: control target
= control target key end

     0   :  { %vm691_vm0 = vcmask 64512   ;;  %s1865_s0 = inlined_call_operand.vmem [shape: bf16[512,128], index: 0, kind: input, shape index: {}]   ;;  %s1866_s1 = inlined_call_operand.vmem [shape: bf16[512,128], index: 1, kind: input, shape index: {}]   ;;  %s1867_s2 = inlined_call_operand.vmem [shape: f32[1,128], index: 2, kind: input, shape index: {}]   ;;  %s1868_s3 = inlined_call_operand.vmem [shape: f32[1,128], index: 3, kind: input, shape index: {}]   ;;  %s1869_s4 = inlined_call_operand.vmem [shape: f32[1,128], index: 4, kind: input, shape index: {}]   ;;  %s1870_s5 = inlined_call_operand.vmem [shape: f32[1,128], index: 5, kind: input, shape index: {}]   ;;  %s1871_s6 = inlined_call_operand.vmem [shape: f32[512,8], index: 6, kind: output, shape index: {}]  }
   0x1   :  { %v765_v0 = vld [vmem:[%s1865_s0] sm:$0xff]   ;;  %v1020_v9 = vld [vmem:[%s1865_s0 + $0x8] sm:$0xff]   ;;  %v1021_v20 = vld [vmem:[%s1865_s0 + $0x10] sm:$0xff]  }
   0x2   :  { %v1127_v1 = vld [vmem:[%s1867_s2] ss:$0 sm:$0xff]  ;;  %v766_v2 = vunpack.c.l.bf16 %v765_v0  ;;  %v767_v5 = vunpack.c.h.bf16 %v765_v0  ;;  %v1051_v10 = vld [vmem:[%s1866_s1 + $0x8] sm:$0xff]   ;;  %v770_v14 = vunpack.c.l.bf16 %v1020_v9  ;;  %v771_v18 = vunpack.c.h.bf16 %v1020_v9  ;;  %v1052_v21 = vld [vmem:[%s1866_s1 + $0x10] sm:$0xff]  }
   0x3   :  { %v893_v3 = vld [vmem:[%s1866_s1] sm:$0xff]   ;;  %v898_v15 = vunpack.c.l.bf16 %v1051_v10  ;;  %v899_v19 = vunpack.c.h.bf16 %v1051_v10  ;;  %v774_v32 = vunpack.c.l.bf16 %v1021_v20  ;;  %v902_v33 = vunpack.c.l.bf16 %v1052_v21  ;;  %v1022_v42 = vld [vmem:[%s1865_s0 + $0x18] sm:$0xff]  }
   0x4   :  { %v1135_v4 = vld [vmem:[%s1869_s4] ss:$0 sm:$0xff]  ;;  %v894_v7 = vunpack.c.l.bf16 %v893_v3  ;;  %v895_v8 = vunpack.c.h.bf16 %v893_v3  ;;  %v158_v11 = vmul.f32 %v766_v2, %v1127_v1  ;;  %v159_v13 = vmul.f32 %v767_v5, %v1127_v1  ;;  %v1053_v43 = vld [vmem:[%s1866_s1 + $0x18] sm:$0xff]  }
   0x5   :  { %v1140_v6 = vld [vmem:[%s1868_s3] ss:$0 sm:$0xff]  ;;  %v160_v24 = vmul.f32 %v770_v14, %v1127_v1  ;;  %v430_v25 = vmul.f32 %v898_v15, %v1135_v4  ;;  %v161_v28 = vmul.f32 %v771_v18, %v1127_v1  ;;  %v431_v29 = vmul.f32 %v899_v19, %v1135_v4  ;;  %v1024_v14 = vld [vmem:[%s1865_s0 + $0x28] sm:$0xff]  }
   0x6   :  { %v1152_v12 = vld [vmem:[%s1870_s5] ss:$0 sm:$0xff]  ;;  %v428_v16 = vmul.f32 %v894_v7, %v1135_v4  ;;  %v429_v17 = vmul.f32 %v895_v8, %v1135_v4  ;;  %v229_v22 = vadd.f32 %v1140_v6, %v158_v11  ;;  %v230_v23 = vadd.f32 %v1140_v6, %v159_v13  ;;  %v1055_v19 = vld [vmem:[%s1866_s1 + $0x28] sm:$0xff]  }
   0x7   :  { %v231_v30 = vadd.f32 %v1140_v6, %v160_v24  ;;  %v501_v31 = vadd.f32 %v1152_v12, %v430_v25  ;;  %v232_v36 = vadd.f32 %v1140_v6, %v161_v28  ;;  %v502_v37 = vadd.f32 %v1152_v12, %v431_v29  ;;  %v1023_v52 = vld [vmem:[%s1865_s0 + $0x20] sm:$0xff]  }
   0x8   :  { %v499_v26 = vadd.f32 %v1152_v12, %v428_v16  ;;  %v500_v27 = vadd.f32 %v1152_v12, %v429_v17  ;;  %v162_v39 = vmul.f32 %v774_v32, %v1127_v1  ;;  %v432_v40 = vmul.f32 %v902_v33, %v1135_v4  ;;  %v1054_v57 = vld [vmem:[%s1866_s1 + $0x20] sm:$0xff]   ;;  %v1025_v32 = vld [vmem:[%s1865_s0 + $0x30] sm:$0xff]  }
   0x9   :  { %v565_v38 = vadd.f32 %v501_v31, %v231_v30  ;;  %v775_v41 = vunpack.c.h.bf16 %v1021_v20  ;;  %v566_v46 = vadd.f32 %v502_v37, %v232_v36  ;;  %v903_v47 = vunpack.c.h.bf16 %v1052_v21  ;;  %v1056_v33 = vld [vmem:[%s1866_s1 + $0x30] sm:$0xff]  }
   0xa   :  { %v563_v34 = vadd.f32 %v499_v26, %v229_v22  ;;  %v564_v35 = vadd.f32 %v500_v27, %v230_v23  ;;  %v233_v49 = vadd.f32 %v1140_v6, %v162_v39  ;;  %v503_v50 = vadd.f32 %v1152_v12, %v432_v40 }
   0xb   :  { %v629_v48 = vmax.f32 %v565_v38, 0.0  ;;  %v163_v51 = vmul.f32 %v775_v41, %v1127_v1  ;;  %v630_v53 = vmax.f32 %v566_v46, 0.0  ;;  %v433_v54 = vmul.f32 %v903_v47, %v1135_v4  ;;  %v1026_v46 = vld [vmem:[%s1865_s0 + $0x38] sm:$0xff]  }
   0xc   :  { %v627_v44 = vmax.f32 %v563_v34, 0.0  ;;  %v628_v45 = vmax.f32 %v564_v35, 0.0  ;;  %v778_v55 = vunpack.c.l.bf16 %v1022_v42  ;;  %v906_v56 = vunpack.c.l.bf16 %v1053_v43 }
   0xd   :  { %694 = vst.msk [vmem:[%s1871_s6 + $0x10] sm:$0xff] %vm691_vm0, %v629_v48  ;;  %v567_v58 = vadd.f32 %v503_v50, %v233_v49  ;;  %v234_v59 = vadd.f32 %v1140_v6, %v163_v51  ;;  %v779_v60 = vunpack.c.h.bf16 %v1022_v42  ;;  %v907_v61 = vunpack.c.h.bf16 %v1053_v43  ;;  %695 = vst.msk [vmem:[%s1871_s6 + $0x18] sm:$0xff] %vm691_vm0, %v630_v53 }
   0xe   :  { %692 = vst.msk [vmem:[%s1871_s6] sm:$0xff] %vm691_vm0, %v627_v44  ;;  %693 = vst.msk [vmem:[%s1871_s6 + $0x8] sm:$0xff] %vm691_vm0, %v628_v45  ;;  %v504_v62 = vadd.f32 %v1152_v12, %v433_v54  ;;  %v164_v63 = vmul.f32 %v778_v55, %v1127_v1  ;;  %v434_v0 = vmul.f32 %v906_v56, %v1135_v4  ;;  %v782_v2 = vunpack.c.l.bf16 %v1023_v52  ;;  %v1057_v55 = vld [vmem:[%s1866_s1 + $0x38] sm:$0xff]  }
   0xf   :  { %v631_v3 = vmax.f32 %v567_v58, 0.0  ;;  %v165_v5 = vmul.f32 %v779_v60, %v1127_v1  ;;  %v435_v7 = vmul.f32 %v907_v61, %v1135_v4  ;;  %v910_v8 = vunpack.c.l.bf16 %v1054_v57 }
  0x10   :  { %v568_v9 = vadd.f32 %v504_v62, %v234_v59  ;;  %v235_v10 = vadd.f32 %v1140_v6, %v164_v63  ;;  %v505_v11 = vadd.f32 %v1152_v12, %v434_v0  ;;  %v166_v13 = vmul.f32 %v782_v2, %v1127_v1 }
  0x11   :  { %696 = vst.msk [vmem:[%s1871_s6 + $0x20] sm:$0xff] %vm691_vm0, %v631_v3  ;;  %v236_v15 = vadd.f32 %v1140_v6, %v165_v5  ;;  %v506_v16 = vadd.f32 %v1152_v12, %v435_v7  ;;  %v436_v17 = vmul.f32 %v910_v8, %v1135_v4  ;;  %v783_v18 = vunpack.c.h.bf16 %v1023_v52  ;;  %v1027_v7 = vld [vmem:[%s1865_s0 + $0x40] sm:$0xff]  }
  0x12   :  { %v632_v20 = vmax.f32 %v568_v9, 0.0  ;;  %v569_v21 = vadd.f32 %v505_v11, %v235_v10  ;;  %v237_v22 = vadd.f32 %v1140_v6, %v166_v13  ;;  %v911_v23 = vunpack.c.h.bf16 %v1054_v57  ;;  %v1058_v13 = vld [vmem:[%s1866_s1 + $0x40] sm:$0xff]  }
  0x13   :  { %v570_v24 = vadd.f32 %v506_v16, %v236_v15  ;;  %v507_v25 = vadd.f32 %v1152_v12, %v436_v17  ;;  %v167_v26 = vmul.f32 %v783_v18, %v1127_v1  ;;  %v786_v27 = vunpack.c.l.bf16 %v1024_v14 }
  0x14   :  { %697 = vst.msk [vmem:[%s1871_s6 + $0x28] sm:$0xff] %vm691_vm0, %v632_v20  ;;  %v633_v28 = vmax.f32 %v569_v21, 0.0  ;;  %v437_v29 = vmul.f32 %v911_v23, %v1135_v4  ;;  %v914_v30 = vunpack.c.l.bf16 %v1055_v19  ;;  %v787_v31 = vunpack.c.h.bf16 %v1024_v14 }
  0x15   :  { %v634_v34 = vmax.f32 %v570_v24, 0.0  ;;  %v571_v35 = vadd.f32 %v507_v25, %v237_v22  ;;  %v238_v36 = vadd.f32 %v1140_v6, %v167_v26  ;;  %v168_v37 = vmul.f32 %v786_v27, %v1127_v1  ;;  %v1028_v26 = vld [vmem:[%s1865_s0 + $0x48] sm:$0xff]  }
  0x16   :  { %698 = vst.msk [vmem:[%s1871_s6 + $0x30] sm:$0xff] %vm691_vm0, %v633_v28  ;;  %v508_v38 = vadd.f32 %v1152_v12, %v437_v29  ;;  %v438_v39 = vmul.f32 %v914_v30, %v1135_v4  ;;  %v169_v40 = vmul.f32 %v787_v31, %v1127_v1  ;;  %v915_v41 = vunpack.c.h.bf16 %v1055_v19  ;;  %v1059_v27 = vld [vmem:[%s1866_s1 + $0x48] sm:$0xff]  }
  0x17   :  { %699 = vst.msk [vmem:[%s1871_s6 + $0x38] sm:$0xff] %vm691_vm0, %v634_v34  ;;  %v635_v42 = vmax.f32 %v571_v35, 0.0  ;;  %v239_v43 = vadd.f32 %v1140_v6, %v168_v37  ;;  %v790_v44 = vunpack.c.l.bf16 %v1025_v32  ;;  %v918_v45 = vunpack.c.l.bf16 %v1056_v33 }
  0x18   :  { %v572_v47 = vadd.f32 %v508_v38, %v238_v36  ;;  %v509_v48 = vadd.f32 %v1152_v12, %v438_v39  ;;  %v240_v49 = vadd.f32 %v1140_v6, %v169_v40  ;;  %v439_v50 = vmul.f32 %v915_v41, %v1135_v4  ;;  %v1029_v40 = vld [vmem:[%s1865_s0 + $0x50] sm:$0xff]  }
  0x19   :  { %700 = vst.msk [vmem:[%s1871_s6 + $0x40] sm:$0xff] %vm691_vm0, %v635_v42  ;;  %v170_v51 = vmul.f32 %v790_v44, %v1127_v1  ;;  %v440_v52 = vmul.f32 %v918_v45, %v1135_v4  ;;  %v791_v53 = vunpack.c.h.bf16 %v1025_v32  ;;  %v919_v54 = vunpack.c.h.bf16 %v1056_v33 }
  0x1a   :  { %v636_v56 = vmax.f32 %v572_v47, 0.0  ;;  %v573_v57 = vadd.f32 %v509_v48, %v239_v43  ;;  %v510_v58 = vadd.f32 %v1152_v12, %v439_v50  ;;  %v794_v59 = vunpack.c.l.bf16 %v1026_v46 }
  0x1b   :  { %v241_v60 = vadd.f32 %v1140_v6, %v170_v51  ;;  %v511_v61 = vadd.f32 %v1152_v12, %v440_v52  ;;  %v171_v62 = vmul.f32 %v791_v53, %v1127_v1  ;;  %v441_v63 = vmul.f32 %v919_v54, %v1135_v4 }
  0x1c   :  { %701 = vst.msk [vmem:[%s1871_s6 + $0x48] sm:$0xff] %vm691_vm0, %v636_v56  ;;  %v637_v0 = vmax.f32 %v573_v57, 0.0  ;;  %v574_v2 = vadd.f32 %v510_v58, %v240_v49  ;;  %v172_v3 = vmul.f32 %v794_v59, %v1127_v1  ;;  %v922_v5 = vunpack.c.l.bf16 %v1057_v55  ;;  %v1060_v49 = vld [vmem:[%s1866_s1 + $0x50] sm:$0xff]  }
  0x1d   :  { %v575_v8 = vadd.f32 %v511_v61, %v241_v60  ;;  %v242_v9 = vadd.f32 %v1140_v6, %v171_v62  ;;  %v512_v10 = vadd.f32 %v1152_v12, %v441_v63  ;;  %v795_v11 = vunpack.c.h.bf16 %v1026_v46  ;;  %v1030_v62 = vld [vmem:[%s1865_s0 + $0x58] sm:$0xff]  }
  0x1e   :  { %702 = vst.msk [vmem:[%s1871_s6 + $0x50] sm:$0xff] %vm691_vm0, %v637_v0  ;;  %v638_v14 = vmax.f32 %v574_v2, 0.0  ;;  %v243_v15 = vadd.f32 %v1140_v6, %v172_v3  ;;  %v442_v16 = vmul.f32 %v922_v5, %v1135_v4  ;;  %v923_v17 = vunpack.c.h.bf16 %v1057_v55  ;;  %v1061_v63 = vld [vmem:[%s1866_s1 + $0x58] sm:$0xff]  }
  0x1f   :  { %v639_v18 = vmax.f32 %v575_v8, 0.0  ;;  %v576_v19 = vadd.f32 %v512_v10, %v242_v9  ;;  %v173_v20 = vmul.f32 %v795_v11, %v1127_v1  ;;  %v798_v21 = vunpack.c.l.bf16 %v1027_v7 }
  0x20   :  { %703 = vst.msk [vmem:[%s1871_s6 + $0x58] sm:$0xff] %vm691_vm0, %v638_v14  ;;  %v513_v22 = vadd.f32 %v1152_v12, %v442_v16  ;;  %v443_v23 = vmul.f32 %v923_v17, %v1135_v4  ;;  %v926_v24 = vunpack.c.l.bf16 %v1058_v13  ;;  %v799_v25 = vunpack.c.h.bf16 %v1027_v7 }
  0x21   :  { %704 = vst.msk [vmem:[%s1871_s6 + $0x60] sm:$0xff] %vm691_vm0, %v639_v18  ;;  %v640_v28 = vmax.f32 %v576_v19, 0.0  ;;  %v244_v29 = vadd.f32 %v1140_v6, %v173_v20  ;;  %v174_v30 = vmul.f32 %v798_v21, %v1127_v1  ;;  %v927_v31 = vunpack.c.h.bf16 %v1058_v13  ;;  %v1031_v20 = vld [vmem:[%s1865_s0 + $0x60] sm:$0xff]  }
  0x22   :  { %v577_v32 = vadd.f32 %v513_v22, %v243_v15  ;;  %v514_v33 = vadd.f32 %v1152_v12, %v443_v23  ;;  %v444_v34 = vmul.f32 %v926_v24, %v1135_v4  ;;  %v175_v35 = vmul.f32 %v799_v25, %v1127_v1  ;;  %v1062_v25 = vld [vmem:[%s1866_s1 + $0x60] sm:$0xff]  }
  0x23   :  { %705 = vst.msk [vmem:[%s1871_s6 + $0x68] sm:$0xff] %vm691_vm0, %v640_v28  ;;  %v245_v36 = vadd.f32 %v1140_v6, %v174_v30  ;;  %v445_v37 = vmul.f32 %v927_v31, %v1135_v4  ;;  %v802_v38 = vunpack.c.l.bf16 %v1028_v26  ;;  %v930_v39 = vunpack.c.l.bf16 %v1059_v27 }
  0x24   :  { %v641_v41 = vmax.f32 %v577_v32, 0.0  ;;  %v578_v42 = vadd.f32 %v514_v33, %v244_v29  ;;  %v515_v43 = vadd.f32 %v1152_v12, %v444_v34  ;;  %v246_v44 = vadd.f32 %v1140_v6, %v175_v35  ;;  %v1032_v34 = vld [vmem:[%s1865_s0 + $0x68] sm:$0xff]  }
  0x25   :  { %v516_v45 = vadd.f32 %v1152_v12, %v445_v37  ;;  %v176_v46 = vmul.f32 %v802_v38, %v1127_v1  ;;  %v446_v47 = vmul.f32 %v930_v39, %v1135_v4  ;;  %v803_v48 = vunpack.c.h.bf16 %v1028_v26 }
  0x26   :  { %706 = vst.msk [vmem:[%s1871_s6 + $0x70] sm:$0xff] %vm691_vm0, %v641_v41  ;;  %v642_v50 = vmax.f32 %v578_v42, 0.0  ;;  %v579_v51 = vadd.f32 %v515_v43, %v245_v36  ;;  %v931_v52 = vunpack.c.h.bf16 %v1059_v27  ;;  %v806_v53 = vunpack.c.l.bf16 %v1029_v40  ;;  %v1063_v43 = vld [vmem:[%s1866_s1 + $0x68] sm:$0xff]  }
  0x27   :  { %v580_v54 = vadd.f32 %v516_v45, %v246_v44  ;;  %v247_v55 = vadd.f32 %v1140_v6, %v176_v46  ;;  %v517_v56 = vadd.f32 %v1152_v12, %v446_v47  ;;  %v177_v57 = vmul.f32 %v803_v48, %v1127_v1 }
  0x28   :  { %707 = vst.msk [vmem:[%s1871_s6 + $0x78] sm:$0xff] %vm691_vm0, %v642_v50  ;;  %v643_v58 = vmax.f32 %v579_v51, 0.0  ;;  %v447_v59 = vmul.f32 %v931_v52, %v1135_v4  ;;  %v178_v60 = vmul.f32 %v806_v53, %v1127_v1  ;;  %v934_v61 = vunpack.c.l.bf16 %v1060_v49 }
  0x29   :  { %v644_v0 = vmax.f32 %v580_v54, 0.0  ;;  %v581_v2 = vadd.f32 %v517_v56, %v247_v55  ;;  %v248_v3 = vadd.f32 %v1140_v6, %v177_v57  ;;  %v807_v5 = vunpack.c.h.bf16 %v1029_v40  ;;  %v1033_v56 = vld [vmem:[%s1865_s0 + $0x70] sm:$0xff]  }
  0x2a   :  { %708 = vst.msk [vmem:[%s1871_s6 + $0x80] sm:$0xff] %vm691_vm0, %v643_v58  ;;  %v518_v7 = vadd.f32 %v1152_v12, %v447_v59  ;;  %v249_v8 = vadd.f32 %v1140_v6, %v178_v60  ;;  %v448_v9 = vmul.f32 %v934_v61, %v1135_v4  ;;  %v935_v10 = vunpack.c.h.bf16 %v1060_v49  ;;  %v1064_v57 = vld [vmem:[%s1866_s1 + $0x70] sm:$0xff]  }
  0x2b   :  { %709 = vst.msk [vmem:[%s1871_s6 + $0x88] sm:$0xff] %vm691_vm0, %v644_v0  ;;  %v645_v11 = vmax.f32 %v581_v2, 0.0  ;;  %v179_v13 = vmul.f32 %v807_v5, %v1127_v1  ;;  %v810_v14 = vunpack.c.l.bf16 %v1030_v62  ;;  %v938_v15 = vunpack.c.l.bf16 %v1061_v63 }
  0x2c   :  { %v582_v16 = vadd.f32 %v518_v7, %v248_v3  ;;  %v519_v17 = vadd.f32 %v1152_v12, %v448_v9  ;;  %v449_v18 = vmul.f32 %v935_v10, %v1135_v4  ;;  %v811_v19 = vunpack.c.h.bf16 %v1030_v62 }
  0x2d   :  { %710 = vst.msk [vmem:[%s1871_s6 + $0x90] sm:$0xff] %vm691_vm0, %v645_v11  ;;  %v250_v21 = vadd.f32 %v1140_v6, %v179_v13  ;;  %v180_v22 = vmul.f32 %v810_v14, %v1127_v1  ;;  %v450_v23 = vmul.f32 %v938_v15, %v1135_v4  ;;  %v939_v24 = vunpack.c.h.bf16 %v1061_v63  ;;  %v1034_v14 = vld [vmem:[%s1865_s0 + $0x78] sm:$0xff]  }
  0x2e   :  { %v646_v26 = vmax.f32 %v582_v16, 0.0  ;;  %v583_v27 = vadd.f32 %v519_v17, %v249_v8  ;;  %v520_v28 = vadd.f32 %v1152_v12, %v449_v18  ;;  %v181_v29 = vmul.f32 %v811_v19, %v1127_v1  ;;  %v1065_v19 = vld [vmem:[%s1866_s1 + $0x78] sm:$0xff]  }
  0x2f   :  { %v251_v30 = vadd.f32 %v1140_v6, %v180_v22  ;;  %v521_v31 = vadd.f32 %v1152_v12, %v450_v23  ;;  %v451_v32 = vmul.f32 %v939_v24, %v1135_v4  ;;  %v814_v33 = vunpack.c.l.bf16 %v1031_v20 }
  0x30   :  { %711 = vst.msk [vmem:[%s1871_s6 + $0x98] sm:$0xff] %vm691_vm0, %v646_v26  ;;  %v647_v35 = vmax.f32 %v583_v27, 0.0  ;;  %v584_v36 = vadd.f32 %v520_v28, %v250_v21  ;;  %v252_v37 = vadd.f32 %v1140_v6, %v181_v29  ;;  %v942_v38 = vunpack.c.l.bf16 %v1062_v25  ;;  %v1035_v28 = vld [vmem:[%s1865_s0 + $0x80] sm:$0xff]  }
  0x31   :  { %v585_v39 = vadd.f32 %v521_v31, %v251_v30  ;;  %v522_v40 = vadd.f32 %v1152_v12, %v451_v32  ;;  %v182_v41 = vmul.f32 %v814_v33, %v1127_v1  ;;  %v815_v42 = vunpack.c.h.bf16 %v1031_v20  ;;  %v1066_v33 = vld [vmem:[%s1866_s1 + $0x80] sm:$0xff]  }
  0x32   :  { %712 = vst.msk [vmem:[%s1871_s6 + $0xa0] sm:$0xff] %vm691_vm0, %v647_v35  ;;  %v648_v44 = vmax.f32 %v584_v36, 0.0  ;;  %v452_v45 = vmul.f32 %v942_v38, %v1135_v4  ;;  %v943_v46 = vunpack.c.h.bf16 %v1062_v25  ;;  %v818_v47 = vunpack.c.l.bf16 %v1032_v34 }
  0x33   :  { %v649_v48 = vmax.f32 %v585_v39, 0.0  ;;  %v586_v49 = vadd.f32 %v522_v40, %v252_v37  ;;  %v253_v50 = vadd.f32 %v1140_v6, %v182_v41  ;;  %v183_v51 = vmul.f32 %v815_v42, %v1127_v1 }
  0x34   :  { %713 = vst.msk [vmem:[%s1871_s6 + $0xa8] sm:$0xff] %vm691_vm0, %v648_v44  ;;  %v523_v52 = vadd.f32 %v1152_v12, %v452_v45  ;;  %v453_v53 = vmul.f32 %v943_v46, %v1135_v4  ;;  %v184_v54 = vmul.f32 %v818_v47, %v1127_v1  ;;  %v946_v55 = vunpack.c.l.bf16 %v1063_v43 }
  0x35   :  { %714 = vst.msk [vmem:[%s1871_s6 + $0xb0] sm:$0xff] %vm691_vm0, %v649_v48  ;;  %v650_v58 = vmax.f32 %v586_v49, 0.0  ;;  %v254_v59 = vadd.f32 %v1140_v6, %v183_v51  ;;  %v819_v60 = vunpack.c.h.bf16 %v1032_v34  ;;  %v947_v61 = vunpack.c.h.bf16 %v1063_v43 }
  0x36   :  { %v587_v62 = vadd.f32 %v523_v52, %v253_v50  ;;  %v524_v63 = vadd.f32 %v1152_v12, %v453_v53  ;;  %v255_v0 = vadd.f32 %v1140_v6, %v184_v54  ;;  %v454_v2 = vmul.f32 %v946_v55, %v1135_v4  ;;  %v1036_v50 = vld [vmem:[%s1865_s0 + $0x88] sm:$0xff]  }
  0x37   :  { %715 = vst.msk [vmem:[%s1871_s6 + $0xb8] sm:$0xff] %vm691_vm0, %v650_v58  ;;  %v185_v3 = vmul.f32 %v819_v60, %v1127_v1  ;;  %v455_v5 = vmul.f32 %v947_v61, %v1135_v4  ;;  %v822_v7 = vunpack.c.l.bf16 %v1033_v56  ;;  %v950_v8 = vunpack.c.l.bf16 %v1064_v57  ;;  %v1067_v55 = vld [vmem:[%s1866_s1 + $0x88] sm:$0xff]  }
  0x38   :  { %v651_v9 = vmax.f32 %v587_v62, 0.0  ;;  %v588_v10 = vadd.f32 %v524_v63, %v254_v59  ;;  %v525_v11 = vadd.f32 %v1152_v12, %v454_v2  ;;  %v823_v13 = vunpack.c.h.bf16 %v1033_v56 }
  0x39   :  { %v256_v15 = vadd.f32 %v1140_v6, %v185_v3  ;;  %v526_v16 = vadd.f32 %v1152_v12, %v455_v5  ;;  %v186_v17 = vmul.f32 %v822_v7, %v1127_v1  ;;  %v456_v18 = vmul.f32 %v950_v8, %v1135_v4  ;;  %v1037_v7 = vld [vmem:[%s1865_s0 + $0x90] sm:$0xff]  }
  0x3a   :  { %716 = vst.msk [vmem:[%s1871_s6 + $0xc0] sm:$0xff] %vm691_vm0, %v651_v9  ;;  %v652_v20 = vmax.f32 %v588_v10, 0.0  ;;  %v589_v21 = vadd.f32 %v525_v11, %v255_v0  ;;  %v187_v22 = vmul.f32 %v823_v13, %v1127_v1  ;;  %v951_v23 = vunpack.c.h.bf16 %v1064_v57  ;;  %v1068_v13 = vld [vmem:[%s1866_s1 + $0x90] sm:$0xff]  }
  0x3b   :  { %v590_v24 = vadd.f32 %v526_v16, %v256_v15  ;;  %v257_v25 = vadd.f32 %v1140_v6, %v186_v17  ;;  %v527_v26 = vadd.f32 %v1152_v12, %v456_v18  ;;  %v826_v27 = vunpack.c.l.bf16 %v1034_v14 }
  0x3c   :  { %717 = vst.msk [vmem:[%s1871_s6 + $0xc8] sm:$0xff] %vm691_vm0, %v652_v20  ;;  %v653_v29 = vmax.f32 %v589_v21, 0.0  ;;  %v258_v30 = vadd.f32 %v1140_v6, %v187_v22  ;;  %v457_v31 = vmul.f32 %v951_v23, %v1135_v4  ;;  %v954_v32 = vunpack.c.l.bf16 %v1065_v19  ;;  %v1038_v22 = vld [vmem:[%s1865_s0 + $0x98] sm:$0xff]  }
  0x3d   :  { %v654_v34 = vmax.f32 %v590_v24, 0.0  ;;  %v591_v35 = vadd.f32 %v527_v26, %v257_v25  ;;  %v188_v36 = vmul.f32 %v826_v27, %v1127_v1  ;;  %v827_v37 = vunpack.c.h.bf16 %v1034_v14  ;;  %v1069_v27 = vld [vmem:[%s1866_s1 + $0x98] sm:$0xff]  }
  0x3e   :  { %718 = vst.msk [vmem:[%s1871_s6 + $0xd0] sm:$0xff] %vm691_vm0, %v653_v29  ;;  %v528_v38 = vadd.f32 %v1152_v12, %v457_v31  ;;  %v458_v39 = vmul.f32 %v954_v32, %v1135_v4  ;;  %v955_v40 = vunpack.c.h.bf16 %v1065_v19  ;;  %v830_v41 = vunpack.c.l.bf16 %v1035_v28 }
  0x3f   :  { %719 = vst.msk [vmem:[%s1871_s6 + $0xd8] sm:$0xff] %vm691_vm0, %v654_v34  ;;  %v655_v42 = vmax.f32 %v591_v35, 0.0  ;;  %v259_v43 = vadd.f32 %v1140_v6, %v188_v36  ;;  %v189_v44 = vmul.f32 %v827_v37, %v1127_v1  ;;  %v958_v45 = vunpack.c.l.bf16 %v1066_v33 }
  0x40   :  { %v592_v46 = vadd.f32 %v528_v38, %v258_v30  ;;  %v529_v47 = vadd.f32 %v1152_v12, %v458_v39  ;;  %v459_v48 = vmul.f32 %v955_v40, %v1135_v4  ;;  %v190_v49 = vmul.f32 %v830_v41, %v1127_v1 }
  0x41   :  { %720 = vst.msk [vmem:[%s1871_s6 + $0xe0] sm:$0xff] %vm691_vm0, %v655_v42  ;;  %v260_v51 = vadd.f32 %v1140_v6, %v189_v44  ;;  %v460_v52 = vmul.f32 %v958_v45, %v1135_v4  ;;  %v831_v53 = vunpack.c.h.bf16 %v1035_v28  ;;  %v959_v54 = vunpack.c.h.bf16 %v1066_v33  ;;  %v1039_v44 = vld [vmem:[%s1865_s0 + $0xa0] sm:$0xff]  }
  0x42   :  { %v656_v56 = vmax.f32 %v592_v46, 0.0  ;;  %v593_v57 = vadd.f32 %v529_v47, %v259_v43  ;;  %v530_v58 = vadd.f32 %v1152_v12, %v459_v48  ;;  %v261_v59 = vadd.f32 %v1140_v6, %v190_v49  ;;  %v1070_v49 = vld [vmem:[%s1866_s1 + $0xa0] sm:$0xff]  }
  0x43   :  { %v531_v60 = vadd.f32 %v1152_v12, %v460_v52  ;;  %v191_v61 = vmul.f32 %v831_v53, %v1127_v1  ;;  %v461_v62 = vmul.f32 %v959_v54, %v1135_v4  ;;  %v834_v63 = vunpack.c.l.bf16 %v1036_v50 }
  0x44   :  { %721 = vst.msk [vmem:[%s1871_s6 + $0xe8] sm:$0xff] %vm691_vm0, %v656_v56  ;;  %v657_v0 = vmax.f32 %v593_v57, 0.0  ;;  %v594_v2 = vadd.f32 %v530_v58, %v260_v51  ;;  %v962_v3 = vunpack.c.l.bf16 %v1067_v55  ;;  %v835_v5 = vunpack.c.h.bf16 %v1036_v50 }
  0x45   :  { %v595_v8 = vadd.f32 %v531_v60, %v261_v59  ;;  %v262_v9 = vadd.f32 %v1140_v6, %v191_v61  ;;  %v532_v10 = vadd.f32 %v1152_v12, %v461_v62  ;;  %v192_v11 = vmul.f32 %v834_v63, %v1127_v1  ;;  %v1040_v62 = vld [vmem:[%s1865_s0 + $0xa8] sm:$0xff]  }
  0x46   :  { %722 = vst.msk [vmem:[%s1871_s6 + $0xf0] sm:$0xff] %vm691_vm0, %v657_v0  ;;  %v658_v14 = vmax.f32 %v594_v2, 0.0  ;;  %v462_v15 = vmul.f32 %v962_v3, %v1135_v4  ;;  %v193_v16 = vmul.f32 %v835_v5, %v1127_v1  ;;  %v963_v17 = vunpack.c.h.bf16 %v1067_v55  ;;  %v1071_v63 = vld [vmem:[%s1866_s1 + $0xa8] sm:$0xff]  }
  0x47   :  { %v659_v18 = vmax.f32 %v595_v8, 0.0  ;;  %v596_v19 = vadd.f32 %v532_v10, %v262_v9  ;;  %v263_v20 = vadd.f32 %v1140_v6, %v192_v11  ;;  %v838_v21 = vunpack.c.l.bf16 %v1037_v7 }
  0x48   :  { %723 = vst.msk [vmem:[%s1871_s6 + $0xf8] sm:$0xff] %vm691_vm0, %v658_v14  ;;  %v533_v23 = vadd.f32 %v1152_v12, %v462_v15  ;;  %v264_v24 = vadd.f32 %v1140_v6, %v193_v16  ;;  %v463_v25 = vmul.f32 %v963_v17, %v1135_v4  ;;  %v966_v26 = vunpack.c.l.bf16 %v1068_v13  ;;  %v1041_v16 = vld [vmem:[%s1865_s0 + $0xb0] sm:$0xff]  }
  0x49   :  { %724 = vst.msk [vmem:[%s1871_s6 + $0x100] sm:$0xff] %vm691_vm0, %v659_v18  ;;  %v660_v28 = vmax.f32 %v596_v19, 0.0  ;;  %v194_v29 = vmul.f32 %v838_v21, %v1127_v1  ;;  %v839_v30 = vunpack.c.h.bf16 %v1037_v7  ;;  %v967_v31 = vunpack.c.h.bf16 %v1068_v13 }
  0x4a   :  { %v597_v32 = vadd.f32 %v533_v23, %v263_v20  ;;  %v534_v33 = vadd.f32 %v1152_v12, %v463_v25  ;;  %v464_v34 = vmul.f32 %v966_v26, %v1135_v4  ;;  %v842_v35 = vunpack.c.l.bf16 %v1038_v22  ;;  %v1072_v25 = vld [vmem:[%s1866_s1 + $0xb0] sm:$0xff]  }
  0x4b   :  { %725 = vst.msk [vmem:[%s1871_s6 + $0x108] sm:$0xff] %vm691_vm0, %v660_v28  ;;  %v265_v36 = vadd.f32 %v1140_v6, %v194_v29  ;;  %v195_v37 = vmul.f32 %v839_v30, %v1127_v1  ;;  %v465_v38 = vmul.f32 %v967_v31, %v1135_v4  ;;  %v970_v39 = vunpack.c.l.bf16 %v1069_v27 }
  0x4c   :  { %v661_v40 = vmax.f32 %v597_v32, 0.0  ;;  %v598_v41 = vadd.f32 %v534_v33, %v264_v24  ;;  %v535_v42 = vadd.f32 %v1152_v12, %v464_v34  ;;  %v196_v43 = vmul.f32 %v842_v35, %v1127_v1 }
  0x4d   :  { %v266_v45 = vadd.f32 %v1140_v6, %v195_v37  ;;  %v536_v46 = vadd.f32 %v1152_v12, %v465_v38  ;;  %v466_v47 = vmul.f32 %v970_v39, %v1135_v4  ;;  %v843_v48 = vunpack.c.h.bf16 %v1038_v22  ;;  %v1042_v38 = vld [vmem:[%s1865_s0 + $0xb8] sm:$0xff]  }
  0x4e   :  { %726 = vst.msk [vmem:[%s1871_s6 + $0x110] sm:$0xff] %vm691_vm0, %v661_v40  ;;  %v662_v50 = vmax.f32 %v598_v41, 0.0  ;;  %v599_v51 = vadd.f32 %v535_v42, %v265_v36  ;;  %v267_v52 = vadd.f32 %v1140_v6, %v196_v43  ;;  %v971_v53 = vunpack.c.h.bf16 %v1069_v27  ;;  %v1073_v43 = vld [vmem:[%s1866_s1 + $0xb8] sm:$0xff]  }
  0x4f   :  { %v600_v54 = vadd.f32 %v536_v46, %v266_v45  ;;  %v537_v55 = vadd.f32 %v1152_v12, %v466_v47  ;;  %v197_v56 = vmul.f32 %v843_v48, %v1127_v1  ;;  %v846_v57 = vunpack.c.l.bf16 %v1039_v44 }
  0x50   :  { %727 = vst.msk [vmem:[%s1871_s6 + $0x118] sm:$0xff] %vm691_vm0, %v662_v50  ;;  %v663_v58 = vmax.f32 %v599_v51, 0.0  ;;  %v467_v59 = vmul.f32 %v971_v53, %v1135_v4  ;;  %v974_v60 = vunpack.c.l.bf16 %v1070_v49  ;;  %v847_v61 = vunpack.c.h.bf16 %v1039_v44 }
  0x51   :  { %v664_v0 = vmax.f32 %v600_v54, 0.0  ;;  %v601_v2 = vadd.f32 %v537_v55, %v267_v52  ;;  %v268_v3 = vadd.f32 %v1140_v6, %v197_v56  ;;  %v198_v5 = vmul.f32 %v846_v57, %v1127_v1  ;;  %v1043_v56 = vld [vmem:[%s1865_s0 + $0xc0] sm:$0xff]  }
  0x52   :  { %728 = vst.msk [vmem:[%s1871_s6 + $0x120] sm:$0xff] %vm691_vm0, %v663_v58  ;;  %v538_v7 = vadd.f32 %v1152_v12, %v467_v59  ;;  %v468_v8 = vmul.f32 %v974_v60, %v1135_v4  ;;  %v199_v9 = vmul.f32 %v847_v61, %v1127_v1  ;;  %v975_v10 = vunpack.c.h.bf16 %v1070_v49  ;;  %v1074_v57 = vld [vmem:[%s1866_s1 + $0xc0] sm:$0xff]  }
  0x53   :  { %729 = vst.msk [vmem:[%s1871_s6 + $0x128] sm:$0xff] %vm691_vm0, %v664_v0  ;;  %v665_v11 = vmax.f32 %v601_v2, 0.0  ;;  %v269_v13 = vadd.f32 %v1140_v6, %v198_v5  ;;  %v850_v14 = vunpack.c.l.bf16 %v1040_v62  ;;  %v978_v15 = vunpack.c.l.bf16 %v1071_v63 }
  0x54   :  { %v602_v17 = vadd.f32 %v538_v7, %v268_v3  ;;  %v539_v18 = vadd.f32 %v1152_v12, %v468_v8  ;;  %v270_v19 = vadd.f32 %v1140_v6, %v199_v9  ;;  %v469_v20 = vmul.f32 %v975_v10, %v1135_v4  ;;  %v1044_v9 = vld [vmem:[%s1865_s0 + $0xc8] sm:$0xff]  }
  0x55   :  { %730 = vst.msk [vmem:[%s1871_s6 + $0x130] sm:$0xff] %vm691_vm0, %v665_v11  ;;  %v200_v21 = vmul.f32 %v850_v14, %v1127_v1  ;;  %v470_v22 = vmul.f32 %v978_v15, %v1135_v4  ;;  %v851_v23 = vunpack.c.h.bf16 %v1040_v62  ;;  %v979_v24 = vunpack.c.h.bf16 %v1071_v63 }
  0x56   :  { %v666_v26 = vmax.f32 %v602_v17, 0.0  ;;  %v603_v27 = vadd.f32 %v539_v18, %v269_v13  ;;  %v540_v28 = vadd.f32 %v1152_v12, %v469_v20  ;;  %v854_v29 = vunpack.c.l.bf16 %v1041_v16 }
  0x57   :  { %v271_v30 = vadd.f32 %v1140_v6, %v200_v21  ;;  %v541_v31 = vadd.f32 %v1152_v12, %v470_v22  ;;  %v201_v32 = vmul.f32 %v851_v23, %v1127_v1  ;;  %v471_v33 = vmul.f32 %v979_v24, %v1135_v4 }
  0x58   :  { %731 = vst.msk [vmem:[%s1871_s6 + $0x138] sm:$0xff] %vm691_vm0, %v666_v26  ;;  %v667_v34 = vmax.f32 %v603_v27, 0.0  ;;  %v604_v35 = vadd.f32 %v540_v28, %v270_v19  ;;  %v202_v36 = vmul.f32 %v854_v29, %v1127_v1  ;;  %v982_v37 = vunpack.c.l.bf16 %v1072_v25  ;;  %v1075_v19 = vld [vmem:[%s1866_s1 + $0xc8] sm:$0xff]  }
  0x59   :  { %v605_v39 = vadd.f32 %v541_v31, %v271_v30  ;;  %v272_v40 = vadd.f32 %v1140_v6, %v201_v32  ;;  %v542_v41 = vadd.f32 %v1152_v12, %v471_v33  ;;  %v855_v42 = vunpack.c.h.bf16 %v1041_v16  ;;  %v1045_v32 = vld [vmem:[%s1865_s0 + $0xd0] sm:$0xff]  }
  0x5a   :  { %732 = vst.msk [vmem:[%s1871_s6 + $0x140] sm:$0xff] %vm691_vm0, %v667_v34  ;;  %v668_v44 = vmax.f32 %v604_v35, 0.0  ;;  %v273_v45 = vadd.f32 %v1140_v6, %v202_v36  ;;  %v472_v46 = vmul.f32 %v982_v37, %v1135_v4  ;;  %v983_v47 = vunpack.c.h.bf16 %v1072_v25  ;;  %v1076_v33 = vld [vmem:[%s1866_s1 + $0xd0] sm:$0xff]  }
  0x5b   :  { %v669_v48 = vmax.f32 %v605_v39, 0.0  ;;  %v606_v49 = vadd.f32 %v542_v41, %v272_v40  ;;  %v203_v50 = vmul.f32 %v855_v42, %v1127_v1  ;;  %v858_v51 = vunpack.c.l.bf16 %v1042_v38  ;;  %v1701_v42 = vld [vmem:[%s1867_s2] ss:$0 sm:$0xff] }
  0x5c   :  { %733 = vst.msk [vmem:[%s1871_s6 + $0x148] sm:$0xff] %vm691_vm0, %v668_v44  ;;  %v543_v52 = vadd.f32 %v1152_v12, %v472_v46  ;;  %v473_v53 = vmul.f32 %v983_v47, %v1135_v4  ;;  %v986_v54 = vunpack.c.l.bf16 %v1073_v43  ;;  %v859_v55 = vunpack.c.h.bf16 %v1042_v38 }
  0x5d   :  { %734 = vst.msk [vmem:[%s1871_s6 + $0x150] sm:$0xff] %vm691_vm0, %v669_v48  ;;  %v670_v58 = vmax.f32 %v606_v49, 0.0  ;;  %v274_v59 = vadd.f32 %v1140_v6, %v203_v50  ;;  %v204_v60 = vmul.f32 %v858_v51, %v1127_v1  ;;  %v987_v61 = vunpack.c.h.bf16 %v1073_v43  ;;  %v1046_v49 = vld [vmem:[%s1865_s0 + $0xd8] sm:$0xff]  }
  0x5e   :  { %v607_v62 = vadd.f32 %v543_v52, %v273_v45  ;;  %v544_v63 = vadd.f32 %v1152_v12, %v473_v53  ;;  %v474_v0 = vmul.f32 %v986_v54, %v1135_v4  ;;  %v205_v2 = vmul.f32 %v859_v55, %v1127_v1  ;;  %v1077_v54 = vld [vmem:[%s1866_s1 + $0xd8] sm:$0xff]  }
  0x5f   :  { %735 = vst.msk [vmem:[%s1871_s6 + $0x158] sm:$0xff] %vm691_vm0, %v670_v58  ;;  %v275_v3 = vadd.f32 %v1140_v6, %v204_v60  ;;  %v475_v5 = vmul.f32 %v987_v61, %v1135_v4  ;;  %v862_v7 = vunpack.c.l.bf16 %v1043_v56  ;;  %v990_v8 = vunpack.c.l.bf16 %v1074_v57 }
  0x60   :  { %v671_v10 = vmax.f32 %v607_v62, 0.0  ;;  %v608_v11 = vadd.f32 %v544_v63, %v274_v59  ;;  %v545_v13 = vadd.f32 %v1152_v12, %v474_v0  ;;  %v276_v14 = vadd.f32 %v1140_v6, %v205_v2  ;;  %v1047_v0 = vld [vmem:[%s1865_s0 + $0xe0] sm:$0xff]  }
  0x61   :  { %v546_v15 = vadd.f32 %v1152_v12, %v475_v5  ;;  %v206_v16 = vmul.f32 %v862_v7, %v1127_v1  ;;  %v476_v17 = vmul.f32 %v990_v8, %v1135_v4  ;;  %v863_v18 = vunpack.c.h.bf16 %v1043_v56 }
  0x62   :  { %736 = vst.msk [vmem:[%s1871_s6 + $0x160] sm:$0xff] %vm691_vm0, %v671_v10  ;;  %v672_v20 = vmax.f32 %v608_v11, 0.0  ;;  %v609_v21 = vadd.f32 %v545_v13, %v275_v3  ;;  %v991_v22 = vunpack.c.h.bf16 %v1074_v57  ;;  %v866_v23 = vunpack.c.l.bf16 %v1044_v9  ;;  %v1732_v57 = vld [vmem:[%s1870_s5] ss:$0 sm:$0xff] }
  0x63   :  { %v610_v24 = vadd.f32 %v546_v15, %v276_v14  ;;  %v277_v25 = vadd.f32 %v1140_v6, %v206_v16  ;;  %v547_v26 = vadd.f32 %v1152_v12, %v476_v17  ;;  %v207_v27 = vmul.f32 %v863_v18, %v1127_v1  ;;  %v1078_v13 = vld [vmem:[%s1866_s1 + $0xe0] sm:$0xff]  }
  0x64   :  { %737 = vst.msk [vmem:[%s1871_s6 + $0x168] sm:$0xff] %vm691_vm0, %v672_v20  ;;  %v673_v28 = vmax.f32 %v609_v21, 0.0  ;;  %v477_v29 = vmul.f32 %v991_v22, %v1135_v4  ;;  %v208_v30 = vmul.f32 %v866_v23, %v1127_v1  ;;  %v994_v31 = vunpack.c.l.bf16 %v1075_v19 }
  0x65   :  { %v674_v34 = vmax.f32 %v610_v24, 0.0  ;;  %v611_v35 = vadd.f32 %v547_v26, %v277_v25  ;;  %v278_v36 = vadd.f32 %v1140_v6, %v207_v27  ;;  %v867_v37 = vunpack.c.h.bf16 %v1044_v9  ;;  %v1048_v26 = vld [vmem:[%s1865_s0 + $0xe8] sm:$0xff]  }
  0x66   :  { %738 = vst.msk [vmem:[%s1871_s6 + $0x170] sm:$0xff] %vm691_vm0, %v673_v28  ;;  %v548_v1 = vadd.f32 %v1152_v12, %v477_v29  ;;  %v279_v38 = vadd.f32 %v1140_v6, %v208_v30  ;;  %v478_v39 = vmul.f32 %v994_v31, %v1135_v4  ;;  %v995_v40 = vunpack.c.h.bf16 %v1075_v19  ;;  %v1708_v4 = vld [vmem:[%s1869_s4] ss:$0 sm:$0xff]  ;;  %v1079_v27 = vld [vmem:[%s1866_s1 + $0xe8] sm:$0xff]  }
  0x67   :  { %739 = vst.msk [vmem:[%s1871_s6 + $0x178] sm:$0xff] %vm691_vm0, %v674_v34  ;;  %v675_v41 = vmax.f32 %v611_v35, 0.0  ;;  %v209_v43 = vmul.f32 %v1701_v42, %v867_v37  ;;  %v870_v44 = vunpack.c.l.bf16 %v1045_v32  ;;  %v998_v45 = vunpack.c.l.bf16 %v1076_v33 }
  0x68   :  { %v612_v46 = vadd.f32 %v548_v1, %v278_v36  ;;  %v549_v6 = vadd.f32 %v1152_v12, %v478_v39  ;;  %v479_v47 = vmul.f32 %v1708_v4, %v995_v40  ;;  %v871_v48 = vunpack.c.h.bf16 %v1045_v32  ;;  %v1721_v12 = vld [vmem:[%s1868_s3] ss:$0 sm:$0xff] }
  0x69   :  { %740 = vst.msk [vmem:[%s1871_s6 + $0x180] sm:$0xff] %vm691_vm0, %v675_v41  ;;  %v280_v50 = vadd.f32 %v1721_v12, %v209_v43  ;;  %v210_v51 = vmul.f32 %v1701_v42, %v870_v44  ;;  %v480_v52 = vmul.f32 %v1708_v4, %v998_v45  ;;  %v999_v53 = vunpack.c.h.bf16 %v1076_v33  ;;  %v1049_v44 = vld [vmem:[%s1865_s0 + $0xf0] sm:$0xff]  }
  0x6a   :  { %v676_v55 = vmax.f32 %v612_v46, 0.0  ;;  %v613_v56 = vadd.f32 %v549_v6, %v279_v38  ;;  %v550_v58 = vadd.f32 %v1732_v57, %v479_v47  ;;  %v211_v59 = vmul.f32 %v1701_v42, %v871_v48  ;;  %v1080_v48 = vld [vmem:[%s1866_s1 + $0xf0] sm:$0xff]  }
  0x6b   :  { %v281_v60 = vadd.f32 %v1721_v12, %v210_v51  ;;  %v551_v61 = vadd.f32 %v1732_v57, %v480_v52  ;;  %v481_v62 = vmul.f32 %v1708_v4, %v999_v53  ;;  %v874_v63 = vunpack.c.l.bf16 %v1046_v49 }
  0x6c   :  { %741 = vst.msk [vmem:[%s1871_s6 + $0x188] sm:$0xff] %vm691_vm0, %v676_v55  ;;  %v677_v2 = vmax.f32 %v613_v56, 0.0  ;;  %v614_v3 = vadd.f32 %v550_v58, %v280_v50  ;;  %v282_v5 = vadd.f32 %v1721_v12, %v211_v59  ;;  %v1002_v7 = vunpack.c.l.bf16 %v1077_v54  ;;  %v1050_v58 = vld [vmem:[%s1865_s0 + $0xf8] sm:$0xff]  }
  0x6d   :  { %v615_v8 = vadd.f32 %v551_v61, %v281_v60  ;;  %v552_v9 = vadd.f32 %v1732_v57, %v481_v62  ;;  %v212_v10 = vmul.f32 %v1701_v42, %v874_v63  ;;  %v875_v11 = vunpack.c.h.bf16 %v1046_v49  ;;  %v1081_v63 = vld [vmem:[%s1866_s1 + $0xf8] sm:$0xff]  }
  0x6e   :  { %742 = vst.msk [vmem:[%s1871_s6 + $0x190] sm:$0xff] %vm691_vm0, %v677_v2  ;;  %v678_v14 = vmax.f32 %v614_v3, 0.0  ;;  %v482_v15 = vmul.f32 %v1708_v4, %v1002_v7  ;;  %v1003_v16 = vunpack.c.h.bf16 %v1077_v54  ;;  %v878_v17 = vunpack.c.l.bf16 %v1047_v0 }
  0x6f   :  { %v679_v18 = vmax.f32 %v615_v8, 0.0  ;;  %v616_v19 = vadd.f32 %v552_v9, %v282_v5  ;;  %v283_v20 = vadd.f32 %v1721_v12, %v212_v10  ;;  %v213_v21 = vmul.f32 %v1701_v42, %v875_v11 }
  0x70   :  { %743 = vst.msk [vmem:[%s1871_s6 + $0x198] sm:$0xff] %vm691_vm0, %v678_v14  ;;  %v553_v22 = vadd.f32 %v1732_v57, %v482_v15  ;;  %v483_v23 = vmul.f32 %v1708_v4, %v1003_v16  ;;  %v214_v24 = vmul.f32 %v1701_v42, %v878_v17  ;;  %v1006_v25 = vunpack.c.l.bf16 %v1078_v13 }
  0x71   :  { %744 = vst.msk [vmem:[%s1871_s6 + $0x1a0] sm:$0xff] %vm691_vm0, %v679_v18  ;;  %v680_v28 = vmax.f32 %v616_v19, 0.0  ;;  %v284_v29 = vadd.f32 %v1721_v12, %v213_v21  ;;  %v879_v30 = vunpack.c.h.bf16 %v1047_v0  ;;  %v1007_v31 = vunpack.c.h.bf16 %v1078_v13 }
  0x72   :  { %v617_v32 = vadd.f32 %v553_v22, %v283_v20  ;;  %v554_v33 = vadd.f32 %v1732_v57, %v483_v23  ;;  %v285_v34 = vadd.f32 %v1721_v12, %v214_v24  ;;  %v484_v35 = vmul.f32 %v1708_v4, %v1006_v25 }
  0x73   :  { %745 = vst.msk [vmem:[%s1871_s6 + $0x1a8] sm:$0xff] %vm691_vm0, %v680_v28  ;;  %v215_v36 = vmul.f32 %v1701_v42, %v879_v30  ;;  %v485_v37 = vmul.f32 %v1708_v4, %v1007_v31  ;;  %v882_v1 = vunpack.c.l.bf16 %v1048_v26  ;;  %v1010_v38 = vunpack.c.l.bf16 %v1079_v27 }
  0x74   :  { %v681_v39 = vmax.f32 %v617_v32, 0.0  ;;  %v618_v40 = vadd.f32 %v554_v33, %v284_v29  ;;  %v555_v41 = vadd.f32 %v1732_v57, %v484_v35  ;;  %v883_v43 = vunpack.c.h.bf16 %v1048_v26 }
  0x75   :  { %v286_v45 = vadd.f32 %v1721_v12, %v215_v36  ;;  %v556_v46 = vadd.f32 %v1732_v57, %v485_v37  ;;  %v216_v6 = vmul.f32 %v1701_v42, %v882_v1  ;;  %v486_v47 = vmul.f32 %v1708_v4, %v1010_v38 }
  0x76   :  { %746 = vst.msk [vmem:[%s1871_s6 + $0x1b0] sm:$0xff] %vm691_vm0, %v681_v39  ;;  %v682_v49 = vmax.f32 %v618_v40, 0.0  ;;  %v619_v50 = vadd.f32 %v555_v41, %v285_v34  ;;  %v217_v51 = vmul.f32 %v1701_v42, %v883_v43  ;;  %v1011_v52 = vunpack.c.h.bf16 %v1079_v27 }
  0x77   :  { %v620_v53 = vadd.f32 %v556_v46, %v286_v45  ;;  %v287_v54 = vadd.f32 %v1721_v12, %v216_v6  ;;  %v557_v55 = vadd.f32 %v1732_v57, %v486_v47  ;;  %v886_v56 = vunpack.c.l.bf16 %v1049_v44 }
  0x78   :  { %747 = vst.msk [vmem:[%s1871_s6 + $0x1b8] sm:$0xff] %vm691_vm0, %v682_v49  ;;  %v683_v59 = vmax.f32 %v619_v50, 0.0  ;;  %v288_v60 = vadd.f32 %v1721_v12, %v217_v51  ;;  %v487_v61 = vmul.f32 %v1708_v4, %v1011_v52  ;;  %v1014_v62 = vunpack.c.l.bf16 %v1080_v48 }
  0x79   :  { %v684_v0 = vmax.f32 %v620_v53, 0.0  ;;  %v621_v2 = vadd.f32 %v557_v55, %v287_v54  ;;  %v218_v3 = vmul.f32 %v1701_v42, %v886_v56  ;;  %v887_v5 = vunpack.c.h.bf16 %v1049_v44 }
  0x7a   :  { %748 = vst.msk [vmem:[%s1871_s6 + $0x1c0] sm:$0xff] %vm691_vm0, %v683_v59  ;;  %v558_v7 = vadd.f32 %v1732_v57, %v487_v61  ;;  %v488_v8 = vmul.f32 %v1708_v4, %v1014_v62  ;;  %v1015_v9 = vunpack.c.h.bf16 %v1080_v48  ;;  %v890_v10 = vunpack.c.l.bf16 %v1050_v58 }
  0x7b   :  { %749 = vst.msk [vmem:[%s1871_s6 + $0x1c8] sm:$0xff] %vm691_vm0, %v684_v0  ;;  %v685_v11 = vmax.f32 %v621_v2, 0.0  ;;  %v289_v13 = vadd.f32 %v1721_v12, %v218_v3  ;;  %v219_v14 = vmul.f32 %v1701_v42, %v887_v5  ;;  %v1018_v15 = vunpack.c.l.bf16 %v1081_v63 }
  0x7c   :  { %v622_v16 = vadd.f32 %v558_v7, %v288_v60  ;;  %v559_v17 = vadd.f32 %v1732_v57, %v488_v8  ;;  %v489_v18 = vmul.f32 %v1708_v4, %v1015_v9  ;;  %v220_v19 = vmul.f32 %v1701_v42, %v890_v10 }
  0x7d   :  { %750 = vst.msk [vmem:[%s1871_s6 + $0x1d0] sm:$0xff] %vm691_vm0, %v685_v11  ;;  %v290_v20 = vadd.f32 %v1721_v12, %v219_v14  ;;  %v490_v21 = vmul.f32 %v1708_v4, %v1018_v15  ;;  %v891_v22 = vunpack.c.h.bf16 %v1050_v58  ;;  %v1019_v23 = vunpack.c.h.bf16 %v1081_v63 }
  0x7e   :  { %v686_v24 = vmax.f32 %v622_v16, 0.0  ;;  %v623_v25 = vadd.f32 %v559_v17, %v289_v13  ;;  %v560_v26 = vadd.f32 %v1732_v57, %v489_v18  ;;  %v291_v27 = vadd.f32 %v1721_v12, %v220_v19 }
  0x7f   :  { %v561_v28 = vadd.f32 %v1732_v57, %v490_v21  ;;  %v221_v29 = vmul.f32 %v1701_v42, %v891_v22  ;;  %v491_v30 = vmul.f32 %v1708_v4, %v1019_v23 }
  0x80   :  { %751 = vst.msk [vmem:[%s1871_s6 + $0x1d8] sm:$0xff] %vm691_vm0, %v686_v24  ;;  %v687_v31 = vmax.f32 %v623_v25, 0.0  ;;  %v624_v32 = vadd.f32 %v560_v26, %v290_v20 }
  0x81   :  { %v625_v33 = vadd.f32 %v561_v28, %v291_v27  ;;  %v292_v34 = vadd.f32 %v1721_v12, %v221_v29  ;;  %v562_v35 = vadd.f32 %v1732_v57, %v491_v30 }
  0x82   :  { %752 = vst.msk [vmem:[%s1871_s6 + $0x1e0] sm:$0xff] %vm691_vm0, %v687_v31  ;;  %v688_v42 = vmax.f32 %v624_v32, 0.0 }
  0x83   :  { %v689_v36 = vmax.f32 %v625_v33, 0.0  ;;  %v626_v4 = vadd.f32 %v562_v35, %v292_v34 }
  0x84   :  { %753 = vst.msk [vmem:[%s1871_s6 + $0x1e8] sm:$0xff] %vm691_vm0, %v688_v42 }
  0x85   :  { %754 = vst.msk [vmem:[%s1871_s6 + $0x1f0] sm:$0xff] %vm691_vm0, %v689_v36  ;;  %v690_v12 = vmax.f32 %v626_v4, 0.0 }
  0x87   :  { %755 = vst.msk [vmem:[%s1871_s6 + $0x1f8] sm:$0xff] %vm691_vm0, %v690_v12 }

// kernel: residual_block_forward.3
= control target key start
LH: loop header
LB: loop body
LE: loop exit
PB: predicated region body
PF: predicated region fallthrough
CT: control target
= control target key end

     0   :  { %s7933_s27 = smov 0   ;;  %s10466_s0 = inlined_call_operand.vmem [shape: bf16[2,18,18,8], index: 0, kind: input, shape index: {}]   ;;  %s10467_s1 = inlined_call_operand.vmem [shape: bf16[3,3,8,128], index: 1, kind: input, shape index: {}]   ;;  %s10468_s2 = inlined_call_operand.vmem [shape: bf16[8,128], index: 2, kind: input, shape index: {}]   ;;  %s10469_s3 = inlined_call_operand.vmem [shape: bf16[2,16,16,128], index: 3, kind: output, shape index: {0}]   ;;  %s10470_s4 = inlined_call_operand.vmem [shape: bf16[2,16,16,128], index: 4, kind: output, shape index: {1}]   ;;  %s10471_s5 = inlined_call_operand.vmem [shape: f32[2,1,128], index: 5, kind: output, shape index: {2}]   ;;  %s10472_s6 = inlined_call_operand.vmem [shape: f32[2,1,128], index: 6, kind: output, shape index: {3}]   ;;  %s10473_s7 = inlined_call_operand.vmem [shape: f32[2,1,128], index: 7, kind: output, shape index: {4}]   ;;  %s10474_s8 = inlined_call_operand.vmem [shape: f32[2,1,128], index: 8, kind: output, shape index: {5}]  }
   0x1 LB: > { %s6328_s28 = sadd.s32 4294967295, %s7886_s27   ;;  %p6332_p0 = scmp.ge.s32.totalorder %s7886_s27, 1  ;;  %s7886_s27 = sphi %s7933_s27, %s19_s27  }
   0x2   : > { %p273_p1 = scmp.lt.s32.totalorder %s7886_s27, 3 }
   0x4   : > { %p274_p2 = pnand %p6332_p0, %p273_p1 }
   0x6   : > { %277 = sbr.rel (%p274_p2) target bundleno = 626 (0x272), region = 32 }
   0xb   : > { %v384_v0 = vld [vmem:[%s10467_s1] sm:$0xf]  ;;  %vm887_vm0 = vcmask 1043456   ;;  %p324_p3 = scmp.lt.s32.totalorder %s6328_s28, 1  ;;  %v6338_v2 = vld [vmem:[%s10467_s1 + $0x4] sm:$0xf] }
   0xc   : > { %7787 = vmatprep.subr.msk.bf16.mxu1 %vm887_vm0, %v384_v0  ;;  %v1181_v1 = vsel %vm887_vm0, %v384_v0, 0  ;;  %7786 = vmatprep.subr.msk.bf16.mxu0 %vm887_vm0, %v6338_v2  ;;  %v889_v3 = vsel %vm887_vm0, %v6338_v2, 0  ;;  %v6419_v4 = vld [vmem:[%s10467_s1 + $0x8] sm:$0xf]  ;;  %v6484_v5 = vld [vmem:[%s10467_s1 + $0xc] sm:$0xf] }
   0xd   : > { %7481 = vmatpush3.bf16.msra.mxu1 %v1181_v1  ;;  %s10633_s28 = smov (!%p324_p3, %s6328_s28), 1  ;;  %7447 = vmatpush3.bf16.msra.mxu0 %v889_v3  ;;  %v7962_v6 = vld [vmem:[%s10467_s1 + $0x10] sm:$0xf]  ;;  %v6630_v7 = vld [vmem:[%s10467_s1 + $0x14] sm:$0xf]  ;;  %vm838_vm1 = vcmask 64512  }
   0xe   : > { %s7796_s17 = smul.u32 216, %s10633_s28  ;;  %7788 = vmatprep.subr.msk.bf16.mxu0 %vm887_vm0, %v6419_v4  ;;  %7789 = vmatprep.subr.msk.bf16.mxu1 %vm887_vm0, %v6484_v5  ;;  %vm401_vm2 = vsmask.f32 3328  ;;  %vm402_vm3 = vsmask.f32 7440  ;;  %v7976_v8 = vsel %vm887_vm0, %v6419_v4, 0  ;;  %s347_s20 = scalar_lea.vmem %s10473_s7, %s10633_s28 }
   0xf   : > { %v1965_v9 = vsel %vm887_vm0, %v6484_v5, 0  ;;  %v7981_v10 = vsel %vm887_vm0, %v7962_v6, 0  ;;  %v7984_v11 = vsel %vm887_vm0, %v6630_v7, 0  ;;  %vm8027_vm4 = vmor %vm401_vm2, %vm402_vm3  ;;  %vm1392_vm5 = vcmask 1042432   ;;  %s7020_s11 = sshll.u32 %s10633_s28, 7  ;;  %s350_s23 = scalar_lea.vmem %s10474_s8, %s10633_s28 }
  0x10   : > { %s7973_s22 = scalar_lea.vmem %s10466_s0, %s7796_s17  ;;  %vm1393_vm6 = vcmask 1046532   ;;  %s10374_s14 = scalar_lea.vmem %s10470_s4, %s7020_s11 }
  0x11   : > { %v352_v12 = vld [vmem:[%s7973_s22] sm:$0xf]  ;;  %v7988_v13 = vld [vmem:[%s7973_s22 + $0x4] sm:$0xf]  ;;  %v354_v14 = vld [vmem:[%s7973_s22 + $0xc] sm:$0xf]  ;;  %s10386_s17 = scalar_lea.vmem %s10469_s3, %s7020_s11  ;;  %s341_s26 = scalar_lea.vmem %s10471_s5, %s10633_s28 }
  0x12   : > { %v405_v15 = vshrl.u32 %v352_v12, 16  ;;  %v408_v16 = vshll.u32 %v352_v12, 16  ;;  %v418_v17 = vshrl.u32 %v7988_v13, 16  ;;  %v6371_v18 = vcombine.low %v352_v12, %v7988_v13  ;;  %v7994_v19 = vld [vmem:[%s7973_s22 + $0x10] sm:$0xf]  ;;  %vm8287_vm7 = vmor %vm1392_vm5, %vm1393_vm6  ;;  %s344_s9 = scalar_lea.vmem %s10472_s6, %s10633_s28 }
  0x13   : > { %v10476_v20 = vrot.slane %v7988_v13, 5  ;;  %v429_v21 = vshrl.u32 %v354_v14, 16  ;;  %v432_v22 = vshll.u32 %v354_v14, 16  ;;  %v442_v23 = vshrl.u32 %v7994_v19, 16  ;;  %v356_v24 = vld [vmem:[%s7973_s22 + $0x18] sm:$0xf] }
  0x14   : > { %v407_v25 = vrot.slane %v405_v15, 4  ;;  %v410_v26 = vrot.slane %v408_v16, 5  ;;  %7482 = vmatprep.mubr.msk.bf16.mxu1 %vm838_vm1, %v6371_v18  ;;  %v6372_v27 = vcombine.low %v354_v14, %v7994_v19  ;;  %v10475_v28 = vrot.slane %v7994_v19, 5  ;;  %v8003_v29 = vld [vmem:[%s7973_s22 + $0x1c] sm:$0xf] }
  0x15   : > { %v8007_v30 = vrot.slane %v10476_v20, 4  ;;  %v431_v31 = vrot.slane %v429_v21, 4  ;;  %v434_v32 = vrot.slane %v432_v22, 5  ;;  %v453_v33 = vshrl.u32 %v356_v24, 16  ;;  %v8010_v34 = vld [vmem:[%s7973_s22 + $0x8] sm:$0x1] }
  0x16   : > { %7483 = vmatmul.mubr.msk.bf16.vlgmr.msra.gmra.mxu1 %vm838_vm1, %v6372_v27  ;;  %v8015_v35 = vrot.slane %v10475_v28, 4  ;;  %v456_v36 = vshll.u32 %v356_v24, 16  ;;  %v466_v37 = vshrl.u32 %v8003_v29, 16  ;;  %v6373_v38 = vcombine.low %v356_v24, %v8003_v29  ;;  %v358_v39 = vld [vmem:[%s7973_s22 + $0x24] sm:$0xf] }
  0x17   : > { %v455_v40 = vrot.slane %v453_v33, 4  ;;  %v411_v41 = vor.u32 %v410_v26, %v407_v25  ;;  %v414_v42 = vshll.u32 %v7988_v13, 16  ;;  %v420_v43 = vrot.slane %v418_v17, 4  ;;  %v8022_v44 = vld [vmem:[%s7973_s22 + $0x28] sm:$0xf]  ;;  %7549 = vmatpush3.bf16.msra.mxu1 %v1965_v9 }
  0x18   : > { %v458_v45 = vrot.slane %v456_v36, 5  ;;  %7486 = vmatprep.mubr.msk.bf16.mxu1 %vm838_vm1, %v6373_v38  ;;  %v424_v47 = vshll.u32 %v8010_v34, 16  ;;  %v477_v49 = vshrl.u32 %v358_v39, 16  ;;  %7791 = vmatprep.subr.msk.bf16.mxu1 %vm887_vm0, %v6630_v7  ;;  %v480_v52 = vshll.u32 %v358_v39, 16  ;;  %v8036_v54 = vld [vmem:[%s7973_s22 + $0x14] sm:$0x1] }
  0x19   : > { %v412_v50 = vrot.slane %v411_v41, 4  ;;  %v416_v51 = vrot.slane %v414_v42, 5  ;;  %v490_v53 = vshrl.u32 %v8022_v44, 16  ;;  %v6374_v57 = vcombine.low %v358_v39, %v8022_v44  ;;  %v360_v59 = vld [vmem:[%s7973_s22 + $0x30] sm:$0xf] }
  0x1a   : > { %v426_v55 = vrot.slane %v424_v47, 5  ;;  %v479_v56 = vrot.slane %v477_v49, 4  ;;  %v435_v58 = vor.u32 %v434_v32, %v431_v31  ;;  %v482_v62 = vrot.slane %v480_v52, 5  ;;  %v8044_v0 = vld [vmem:[%s7973_s22 + $0x34] sm:$0xf] }
  0x1b   : > { %v417_v60 = vsel %vm8027_vm4, %v412_v50, %v416_v51  ;;  %v421_v61 = vor.u32 %v420_v43, %v416_v51  ;;  %v438_v63 = vshll.u32 %v7994_v19, 16  ;;  %v444_v2 = vrot.slane %v442_v23, 4  ;;  %v8052_v17 = vld [vmem:[%s7973_s22 + $0x20] sm:$0x1]  ;;  %v362_v21 = vld [vmem:[%s7973_s22 + $0x3c] sm:$0xf] }
  0x1c   : > { %v436_v1 = vrot.slane %v435_v58, 4  ;;  %v448_v3 = vshll.u32 %v8036_v54, 16  ;;  %v501_v9 = vshrl.u32 %v360_v59, 16  ;;  %v504_v12 = vshll.u32 %v360_v59, 16  ;;  %v8060_v26 = vld [vmem:[%s7973_s22 + $0x40] sm:$0xf] }
  0x1d   : > { %v422_v5 = vrot.slane %v421_v61, 4  ;;  %v440_v7 = vrot.slane %v438_v63, 5  ;;  %v514_v15 = vshrl.u32 %v8044_v0, 16  ;;  %v6375_v16 = vcombine.low %v360_v59, %v8044_v0  ;;  %v8069_v47 = vld [vmem:[%s7973_s22 + $0x2c] sm:$0x1] }
  0x1e   : > { %7487 = vmatmul.mubr.msk.bf16.gmra.mxu1 %vm838_vm1, %v6374_v57  ;;  %v450_v14 = vrot.slane %v448_v3, 5  ;;  %v459_v18 = vor.u32 %v458_v45, %v455_v40  ;;  %v503_v25 = vrot.slane %v501_v9, 4  ;;  %v506_v31 = vrot.slane %v504_v12, 5  ;;  %v8237_v48 = vld [vmem:[%s7973_s22 + $0x98] sm:$0x1] }
  0x1f   : > { %v427_v22 = vsel %vm8027_vm4, %v422_v5, %v426_v55  ;;  %v441_v23 = vsel %vm8027_vm4, %v436_v1, %v440_v7  ;;  %v445_v24 = vor.u32 %v444_v2, %v440_v7  ;;  %7490 = vmatprep.mubr.msk.bf16.mxu1 %vm838_vm1, %v6375_v16  ;;  %v462_v33 = vshll.u32 %v8003_v29, 16  ;;  %v8075_v55 = vld [vmem:[%s7973_s22 + $0x4c] sm:$0xf]  ;;  %v366_v16 = vld [vmem:[%s7973_s22 + $0x54] sm:$0xf]  ;;  %10480 = vst [vmem:[#allocation2_spill] sm:$0xff] %v8237_v48 }
  0x20   : > { %v6339_v27 = vcombine.low %v417_v60, %v427_v22  ;;  %v460_v32 = vrot.slane %v459_v18, 4  ;;  %v468_v38 = vrot.slane %v466_v37, 4  ;;  %v472_v39 = vshll.u32 %v8052_v17, 16  ;;  %v364_v37 = vld [vmem:[%s7973_s22 + $0x48] sm:$0xf] }
  0x21   : > { %v446_v36 = vrot.slane %v445_v24, 4  ;;  %v525_v40 = vshrl.u32 %v362_v21, 16  ;;  %v464_v41 = vrot.slane %v462_v33, 5  ;;  %v528_v42 = vshll.u32 %v362_v21, 16  ;;  %v8098_v24 = vld [vmem:[%s7973_s22 + $0x58] sm:$0xf] }
  0x22   : > { %7448 = vmatprep.mubr.msk.bf16.mxu0 %vm838_vm1, %v6339_v27  ;;  %v538_v43 = vshrl.u32 %v8060_v26, 16  ;;  %v6376_v45 = vcombine.low %v362_v21, %v8060_v26  ;;  %v474_v50 = vrot.slane %v472_v39, 5  ;;  %v483_v52 = vor.u32 %v482_v62, %v479_v56 }
  0x23   : > { %v451_v49 = vsel %vm8027_vm4, %v446_v36, %v450_v14  ;;  %v527_v51 = vrot.slane %v525_v40, 4  ;;  %v465_v58 = vsel %vm8027_vm4, %v460_v32, %v464_v41  ;;  %v469_v59 = vor.u32 %v468_v38, %v464_v41  ;;  %v8087_v14 = vld [vmem:[%s7973_s22 + $0x38] sm:$0x1] }
  0x24   : > { %v6340_v57 = vcombine.low %v441_v23, %v451_v49  ;;  %v530_v60 = vrot.slane %v528_v42, 5  ;;  %v484_v61 = vrot.slane %v483_v52, 4  ;;  %v486_v63 = vshll.u32 %v8022_v44, 16  ;;  %v8112_v42 = vld [vmem:[%s7973_s22 + $0x44] sm:$0x1] }
  0x25   : > { %v492_v1 = vrot.slane %v490_v53, 4  ;;  %v496_v2 = vshll.u32 %v8069_v47, 16  ;;  %v470_v56 = vrot.slane %v469_v59, 4  ;;  %v549_v62 = vshrl.u32 %v364_v37, 16  ;;  %v368_v52 = vld [vmem:[%s7973_s22 + $0x60] sm:$0xf] }
  0x26   : > { %7449 = vmatmul.mubr.msk.bf16.vlgmr.msra.gmra.mxu0 %vm838_vm1, %v6340_v57  ;;  %7491 = vmatmul.mubr.msk.bf16.gmra.mxu1 %vm838_vm1, %v6376_v45  ;;  %v552_v3 = vshll.u32 %v364_v37, 16  ;;  %v562_v5 = vshrl.u32 %v8075_v55, 16  ;;  %v488_v7 = vrot.slane %v486_v63, 5  ;;  %v6377_v12 = vcombine.low %v364_v37, %v8075_v55 }
  0x27   : > { %7515 = vmatpush3.bf16.msra.mxu0 %v7976_v8  ;;  %v498_v9 = vrot.slane %v496_v2, 5  ;;  %v507_v53 = vor.u32 %v506_v31, %v503_v25  ;;  %v475_v18 = vsel %vm8027_vm4, %v470_v56, %v474_v50  ;;  %v8092_v21 = vrot.slane %v549_v62, 4 }
  0x28   : > { %v8094_v22 = vrot.slane %v552_v3, 5  ;;  %v510_v23 = vshll.u32 %v8044_v0, 16  ;;  %7790 = vmatprep.subr.msk.bf16.mxu0 %vm887_vm0, %v7962_v6  ;;  %v6341_v8 = vcombine.low %v465_v58, %v475_v18  ;;  %v489_v25 = vsel %vm8027_vm4, %v484_v61, %v488_v7  ;;  %7494 = vmatprep.mubr.msk.bf16.mxu1 %vm838_vm1, %v6377_v12  ;;  %v8121_v61 = vld [vmem:[%s7973_s22 + $0x64] sm:$0xf] }
  0x29   : > { %v493_v27 = vor.u32 %v492_v1, %v488_v7  ;;  %v508_v31 = vrot.slane %v507_v53, 4  ;;  %v516_v33 = vrot.slane %v514_v15, 4  ;;  %v520_v36 = vshll.u32 %v8087_v14, 16 }
  0x2a   : > { %v512_v32 = vrot.slane %v510_v23, 5  ;;  %v573_v38 = vshrl.u32 %v366_v16, 16  ;;  %7452 = vmatprep.mubr.msk.bf16.mxu0 %vm838_vm1, %v6341_v8  ;;  %v576_v39 = vshll.u32 %v366_v16, 16  ;;  %v586_v40 = vshrl.u32 %v8098_v24, 16 }
  0x2b   : > { %v494_v6 = vrot.slane %v493_v27, 4  ;;  %v6378_v41 = vcombine.low %v366_v16, %v8098_v24  ;;  %v522_v50 = vrot.slane %v520_v36, 5  ;;  %v531_v58 = vor.u32 %v530_v60, %v527_v51  ;;  %v370_v16 = vld [vmem:[%s7973_s22 + $0x6c] sm:$0xf]  ;;  %v8139_v27 = vld [vmem:[%s7973_s22 + $0x70] sm:$0xf] }
  0x2c   : > { %v513_v45 = vsel %vm8027_vm4, %v508_v31, %v512_v32  ;;  %v517_v49 = vor.u32 %v516_v33, %v512_v32  ;;  %v575_v15 = vrot.slane %v573_v38, 4  ;;  %v578_v57 = vrot.slane %v576_v39, 5  ;;  %v8148_v38 = vld [vmem:[%s7973_s22 + $0x5c] sm:$0x1] }
  0x2d   : > { %v499_v37 = vsel %vm8027_vm4, %v494_v6, %v498_v9  ;;  %v534_v59 = vshll.u32 %v8060_v26, 16  ;;  %v540_v2 = vrot.slane %v538_v43, 4  ;;  %v544_v56 = vshll.u32 %v8112_v42, 16  ;;  %v8133_v43 = vld [vmem:[%s7973_s22 + $0x50] sm:$0x1] }
  0x2e   : > { %v6342_v63 = vcombine.low %v489_v25, %v499_v37  ;;  %v518_v1 = vrot.slane %v517_v49, 4  ;;  %7495 = vmatmul.mubr.msk.bf16.gmra.mxu1 %vm838_vm1, %v6378_v41  ;;  %v532_v62 = vrot.slane %v531_v58, 4  ;;  %v597_v7 = vshrl.u32 %v368_v52, 16  ;;  %v372_v6 = vld [vmem:[%s7973_s22 + $0x78] sm:$0xf] }
  0x2f   : > { %v536_v3 = vrot.slane %v534_v59, 5  ;;  %v600_v51 = vshll.u32 %v368_v52, 16  ;;  %v546_v9 = vrot.slane %v544_v56, 5  ;;  %v610_v12 = vshrl.u32 %v8121_v61, 16 }
  0x30   : > { %7453 = vmatmul.mubr.msk.bf16.gmra.mxu0 %vm838_vm1, %v6342_v63  ;;  %v523_v60 = vsel %vm8027_vm4, %v518_v1, %v522_v50  ;;  %v6379_v53 = vcombine.low %v368_v52, %v8121_v61  ;;  %v599_v25 = vrot.slane %v597_v7, 4  ;;  %v555_v32 = vor.u32 %v8094_v22, %v8092_v21  ;;  %v8154_v50 = vld [vmem:[%s7973_s22 + $0x7c] sm:$0xf] }
  0x31   : > { %v6343_v18 = vcombine.low %v513_v45, %v523_v60  ;;  %v537_v23 = vsel %vm8027_vm4, %v532_v62, %v536_v3  ;;  %v541_v8 = vor.u32 %v540_v2, %v536_v3  ;;  %v602_v31 = vrot.slane %v600_v51, 5 }
  0x32   : > { %7498 = vmatprep.mubr.msk.bf16.mxu1 %vm838_vm1, %v6379_v53  ;;  %v558_v33 = vshll.u32 %v8075_v55, 16  ;;  %v564_v36 = vrot.slane %v562_v5, 4  ;;  %v568_v41 = vshll.u32 %v8133_v43, 16  ;;  %v621_v45 = vshrl.u32 %v370_v16, 16  ;;  %v8166_v53 = vld [vmem:[%s7973_s22 + $0x68] sm:$0x1] }
  0x33   : > { %7456 = vmatprep.mubr.msk.bf16.mxu0 %vm838_vm1, %v6343_v18  ;;  %v542_v39 = vrot.slane %v541_v8, 4  ;;  %v624_v49 = vshll.u32 %v370_v16, 16  ;;  %v556_v52 = vrot.slane %v555_v32, 4  ;;  %v634_v21 = vshrl.u32 %v8139_v27, 16 }
  0x34   : > { %v560_v37 = vrot.slane %v558_v33, 5  ;;  %v6380_v5 = vcombine.low %v370_v16, %v8139_v27  ;;  %v570_v58 = vrot.slane %v568_v41, 5  ;;  %v623_v59 = vrot.slane %v621_v45, 4  ;;  %v8178_v45 = vld [vmem:[%s7973_s22 + $0x88] sm:$0xf] }
  0x35   : > { %v547_v22 = vsel %vm8027_vm4, %v542_v39, %v546_v9  ;;  %v626_v63 = vrot.slane %v624_v49, 5  ;;  %v579_v62 = vor.u32 %v578_v57, %v575_v15  ;;  %v582_v3 = vshll.u32 %v8098_v24, 16  ;;  %v374_v9 = vld [vmem:[%s7973_s22 + $0x84] sm:$0xf] }
  0x36   : > { %v6344_v1 = vcombine.low %v537_v23, %v547_v22  ;;  %v561_v2 = vsel %vm8027_vm4, %v556_v52, %v560_v37  ;;  %v565_v56 = vor.u32 %v564_v36, %v560_v37  ;;  %7499 = vmatmul.mubr.msk.bf16.gmra.mxu1 %vm838_vm1, %v6380_v5  ;;  %v588_v7 = vrot.slane %v586_v40, 4  ;;  %v8184_v22 = vld [vmem:[%s7973_s22 + $0x74] sm:$0x1] }
  0x37   : > { %v592_v51 = vshll.u32 %v8148_v38, 16  ;;  %v645_v60 = vshrl.u32 %v372_v6, 16  ;;  %v580_v18 = vrot.slane %v579_v62, 4  ;;  %v648_v23 = vshll.u32 %v372_v6, 16 }
  0x38   : > { %7457 = vmatmul.mubr.msk.bf16.gmra.mxu0 %vm838_vm1, %v6344_v1  ;;  %v566_v16 = vrot.slane %v565_v56, 4  ;;  %v658_v8 = vshrl.u32 %v8154_v50, 16  ;;  %v584_v32 = vrot.slane %v582_v3, 5  ;;  %v6381_v40 = vcombine.low %v372_v6, %v8154_v50 }
  0x39   : > { %v594_v15 = vrot.slane %v592_v51, 5  ;;  %v8171_v57 = vrot.slane %v645_v60, 4  ;;  %v650_v36 = vrot.slane %v648_v23, 5  ;;  %v603_v39 = vor.u32 %v602_v31, %v599_v25  ;;  %v376_v60 = vld [vmem:[%s7973_s22 + $0x90] sm:$0xf] }
  0x3a   : > { %v571_v33 = vsel %vm8027_vm4, %v566_v16, %v570_v58  ;;  %v606_v41 = vshll.u32 %v8121_v61, 16  ;;  %v585_v52 = vsel %vm8027_vm4, %v580_v18, %v584_v32  ;;  %v589_v37 = vor.u32 %v588_v7, %v584_v32  ;;  %7502 = vmatprep.mubr.msk.bf16.mxu1 %vm838_vm1, %v6381_v40  ;;  %v8198_v40 = vld [vmem:[%s7973_s22 + $0x94] sm:$0xf] }
  0x3b   : > { %v6345_v49 = vcombine.low %v561_v2, %v571_v33  ;;  %v612_v5 = vrot.slane %v610_v12, 4  ;;  %v604_v6 = vrot.slane %v603_v39, 4  ;;  %v616_v58 = vshll.u32 %v8166_v53, 16 }
  0x3c   : > { %v608_v1 = vrot.slane %v606_v41, 5  ;;  %v669_v25 = vshrl.u32 %v374_v9, 16  ;;  %v590_v31 = vrot.slane %v589_v37, 4  ;;  %v672_v2 = vshll.u32 %v374_v9, 16 }
  0x3d   : > { %7460 = vmatprep.mubr.msk.bf16.mxu0 %vm838_vm1, %v6345_v49  ;;  %v682_v56 = vshrl.u32 %v8178_v45, 16  ;;  %v6382_v62 = vcombine.low %v374_v9, %v8178_v45  ;;  %v618_v7 = vrot.slane %v616_v58, 5  ;;  %v627_v23 = vor.u32 %v626_v63, %v623_v59  ;;  %v8202_v49 = vld [vmem:[%s7973_s22 + $0x80] sm:$0x1] }
  0x3e   : > { %v609_v12 = vsel %vm8027_vm4, %v604_v6, %v608_v1  ;;  %v613_v3 = vor.u32 %v612_v5, %v608_v1  ;;  %v671_v51 = vrot.slane %v669_v25, 4  ;;  %v595_v16 = vsel %vm8027_vm4, %v590_v31, %v594_v15  ;;  %v378_v1 = vld [vmem:[%s7973_s22 + $0x9c] sm:$0xf] }
  0x3f   : > { %v674_v18 = vrot.slane %v672_v2, 5  ;;  %7503 = vmatmul.mubr.msk.bf16.gmra.mxu1 %vm838_vm1, %v6382_v62  ;;  %v630_v32 = vshll.u32 %v8139_v27, 16  ;;  %v6346_v9 = vcombine.low %v585_v52, %v595_v16  ;;  %v636_v39 = vrot.slane %v634_v21, 4  ;;  %v8213_v62 = vld [vmem:[%s7973_s22 + $0xa0] sm:$0xf] }
  0x40   : > { %v614_v33 = vrot.slane %v613_v3, 4  ;;  %v640_v41 = vshll.u32 %v8184_v22, 16  ;;  %v628_v37 = vrot.slane %v627_v23, 4  ;;  %v693_v15 = vshrl.u32 %v376_v60, 16 }
  0x41   : > { %v632_v5 = vrot.slane %v630_v32, 5  ;;  %v696_v6 = vshll.u32 %v376_v60, 16  ;;  %7461 = vmatmul.mubr.msk.bf16.gmra.mxu0 %vm838_vm1, %v6346_v9  ;;  %v706_v52 = vshrl.u32 %v8198_v40, 16  ;;  %v6383_v21 = vcombine.low %v376_v60, %v8198_v40  ;;  %v8219_v32 = vld [vmem:[%s7973_s22 + $0x8c] sm:$0x1] }
  0x42   : > { %v619_v59 = vsel %vm8027_vm4, %v614_v33, %v618_v7  ;;  %v642_v63 = vrot.slane %v640_v41, 5  ;;  %v695_v2 = vrot.slane %v693_v15, 4  ;;  %v651_v7 = vor.u32 %v650_v36, %v8171_v57  ;;  %v380_v60 = vld [vmem:[%s7973_s22 + $0xa8] sm:$0xf]  ;;  %v8227_v36 = vld [vmem:[%s7973_s22 + $0xac] sm:$0xf] }
  0x43   : > { %v6347_v58 = vcombine.low %v609_v12, %v619_v59  ;;  %v633_v25 = vsel %vm8027_vm4, %v628_v37, %v632_v5  ;;  %v637_v31 = vor.u32 %v636_v39, %v632_v5  ;;  %v698_v3 = vrot.slane %v696_v6, 5  ;;  %7506 = vmatprep.mubr.msk.bf16.mxu1 %vm838_vm1, %v6383_v21 }
  0x44   : > { %v654_v16 = vshll.u32 %v8154_v50, 16  ;;  %v660_v23 = vrot.slane %v658_v8, 4  ;;  %v664_v9 = vshll.u32 %v8202_v49, 16  ;;  %v717_v33 = vshrl.u32 %v378_v1, 16 }
  0x45   : > { %7464 = vmatprep.mubr.msk.bf16.mxu0 %vm838_vm1, %v6347_v58  ;;  %v638_v12 = vrot.slane %v637_v31, 4  ;;  %v720_v39 = vshll.u32 %v378_v1, 16  ;;  %v652_v41 = vrot.slane %v651_v7, 4  ;;  %v730_v5 = vshrl.u32 %v8213_v62, 16 }
  0x46   : > { %v656_v37 = vrot.slane %v654_v16, 5  ;;  %v6384_v57 = vcombine.low %v378_v1, %v8213_v62  ;;  %v666_v15 = vrot.slane %v664_v9, 5  ;;  %v719_v6 = vrot.slane %v717_v33, 4 }
  0x47   : > { %v643_v8 = vsel %vm8027_vm4, %v638_v12, %v642_v63  ;;  %v722_v59 = vrot.slane %v720_v39, 5  ;;  %v675_v7 = vor.u32 %v674_v18, %v671_v51  ;;  %v678_v16 = vshll.u32 %v8178_v45, 16 }
  0x48   : > { %v6348_v21 = vcombine.low %v633_v25, %v643_v8  ;;  %v657_v58 = vsel %vm8027_vm4, %v652_v41, %v656_v37  ;;  %v661_v31 = vor.u32 %v660_v23, %v656_v37  ;;  %7507 = vmatmul.mubr.msk.bf16.gmra.mxu1 %vm838_vm1, %v6384_v57  ;;  %v684_v1 = vrot.slane %v682_v56, 4  ;;  %v382_v23 = vld [vmem:[%s7973_s22 + $0xb4] sm:$0xf]  ;;  %v8247_v8 = vld [vmem:[%s7973_s22 + $0xb8] sm:$0xf] }
  0x49   : > { %v688_v28 = vshll.u32 %v8219_v32, 16  ;;  %v741_v4 = vshrl.u32 %v380_v60, 16  ;;  %v676_v25 = vrot.slane %v675_v7, 4  ;;  %v744_v12 = vshll.u32 %v380_v60, 16 }
  0x4a   : > { %7465 = vmatmul.mubr.msk.bf16.gmra.mxu0 %vm838_vm1, %v6348_v21  ;;  %v662_v63 = vrot.slane %v661_v31, 4  ;;  %v754_v9 = vshrl.u32 %v8227_v36, 16  ;;  %v680_v33 = vrot.slane %v678_v16, 5  ;;  %v6385_v56 = vcombine.low %v380_v60, %v8227_v36  ;;  %v7821_v60 = vld [vmem:[%s7973_s22 + $0xc] sm:$0xff]  }
  0x4b   : > { %v690_v51 = vrot.slane %v688_v28, 5  ;;  %v743_v18 = vrot.slane %v741_v4, 4  ;;  %v746_v41 = vrot.slane %v744_v12, 5  ;;  %v699_v37 = vor.u32 %v698_v3, %v695_v2  ;;  %v8255_v2 = vld [vmem:[%s7973_s22 + $0xa4] sm:$0x1] }
  0x4c   : > { %v667_v39 = vsel %vm8027_vm4, %v662_v63, %v666_v15  ;;  %v702_v57 = vshll.u32 %v8198_v40, 16  ;;  %v681_v31 = vsel %vm8027_vm4, %v676_v25, %v680_v33  ;;  %v685_v28 = vor.u32 %v684_v1, %v680_v33  ;;  %7510 = vmatprep.mubr.msk.bf16.mxu1 %vm838_vm1, %v6385_v56 }
  0x4d   : > { %v6349_v21 = vcombine.low %v657_v58, %v667_v39  ;;  %v708_v4 = vrot.slane %v706_v52, 4  ;;  %v700_v7 = vrot.slane %v699_v37, 4  ;;  %v712_v15 = vshll.u32 %v8237_v48, 16  ;;  %v8263_v39 = vld [vmem:[%s7973_s22 + $0xb0] sm:$0x1] }
  0x4e   : > { %v704_v16 = vrot.slane %v702_v57, 5  ;;  %v765_v63 = vshrl.u32 %v382_v23, 16  ;;  %v686_v3 = vrot.slane %v685_v28, 4  ;;  %v768_v58 = vshll.u32 %v382_v23, 16 }
  0x4f   : > { %7468 = vmatprep.mubr.msk.bf16.mxu0 %vm838_vm1, %v6349_v21  ;;  %v778_v12 = vshrl.u32 %v8247_v8, 16  ;;  %v6386_v1 = vcombine.low %v382_v23, %v8247_v8  ;;  %v714_v33 = vrot.slane %v712_v15, 5  ;;  %v723_v21 = vor.u32 %v722_v59, %v719_v6 }
  0x50   : > { %v705_v52 = vsel %vm8027_vm4, %v700_v7, %v704_v16  ;;  %v709_v25 = vor.u32 %v708_v4, %v704_v16  ;;  %v767_v56 = vrot.slane %v765_v63, 4  ;;  %v691_v37 = vsel %vm8027_vm4, %v686_v3, %v690_v51  ;;  %v8273_v63 = vld [vmem:[%s7973_s22 + $0xbc] sm:$0x1]  ;;  %v1344_v3 = vld [vmem:[%s7973_s22] sm:$0xe] }
  0x51   : > { %v770_v57 = vrot.slane %v768_v58, 5  ;;  %7511 = vmatmul.mubr.msk.bf16.gmra.mxu1 %vm838_vm1, %v6386_v1  ;;  %v726_v28 = vshll.u32 %v8213_v62, 16  ;;  %v6350_v23 = vcombine.low %v681_v31, %v691_v37  ;;  %v732_v48 = vrot.slane %v730_v5, 4  ;;  %v7822_v1 = vld [vmem:[%s7973_s22 + $0x18] sm:$0xff]  }
  0x52   : > { %v710_v20 = vrot.slane %v709_v25, 4  ;;  %v736_v4 = vshll.u32 %v8255_v2, 16  ;;  %7550 = vmatprep.mubr.msk.bf16.mxu1 %vm838_vm1, %v7821_v60  ;;  %v724_v7 = vrot.slane %v723_v21, 4  ;;  %v747_v15 = vor.u32 %v746_v41, %v743_v18 }
  0x53   : > { %v728_v16 = vrot.slane %v726_v28, 5  ;;  %v750_v51 = vshll.u32 %v8227_v36, 16  ;;  %7469 = vmatmul.mubr.msk.bf16.gmra.mxu0 %vm838_vm1, %v6350_v23  ;;  %v756_v5 = vrot.slane %v754_v9, 4  ;;  %v760_v31 = vshll.u32 %v8263_v39, 16 }
  0x54   : > { %v715_v6 = vsel %vm8027_vm4, %v710_v20, %v714_v33  ;;  %v738_v59 = vrot.slane %v736_v4, 5  ;;  %v748_v41 = vrot.slane %v747_v15, 4  ;;  %v771_v21 = vor.u32 %v770_v57, %v767_v56  ;;  %v7823_v20 = vld [vmem:[%s7973_s22 + $0x24] sm:$0xff]   ;;  %v1346_v15 = vld [vmem:[%s7973_s22 + $0x18] sm:$0xe] }
  0x55   : > { %v6351_v60 = vcombine.low %v705_v52, %v715_v6  ;;  %v729_v58 = vsel %vm8027_vm4, %v724_v7, %v728_v16  ;;  %v733_v18 = vor.u32 %v732_v48, %v728_v16  ;;  %v752_v25 = vrot.slane %v750_v51, 5  ;;  %v1345_v16 = vld [vmem:[%s7973_s22 + $0xc] sm:$0xe] }
  0x56   : > { %v762_v37 = vrot.slane %v760_v31, 5  ;;  %v774_v28 = vshll.u32 %v8247_v8, 16  ;;  %v780_v48 = vrot.slane %v778_v12, 4  ;;  %v784_v33 = vshll.u32 %v8273_v63, 16 }
  0x57   : > { %7472 = vmatprep.mubr.msk.bf16.mxu0 %vm838_vm1, %v6351_v60  ;;  %v734_v52 = vrot.slane %v733_v18, 4  ;;  %v6403_v23 = vrot.slane %v1344_v3, 9  ;;  %v753_v4 = vsel %vm8027_vm4, %v748_v41, %v752_v25  ;;  %v757_v56 = vor.u32 %v756_v5, %v752_v25 }
  0x58   : > { %v772_v57 = vrot.slane %v771_v21, 4  ;;  %v776_v7 = vrot.slane %v774_v28, 5  ;;  %v786_v6 = vrot.slane %v784_v33, 5  ;;  %v10483_v12 = vrot.slane %v7988_v13, 5  ;;  %v1347_v13 = vld [vmem:[%s7973_s22 + $0x24] sm:$0xe] }
  0x59   : > { %v739_v51 = vsel %vm8027_vm4, %v734_v52, %v738_v59  ;;  %7551 = vmatmul.mubr.msk.bf16.vlgmr.msra.gmra.mxu1 %vm838_vm1, %v7822_v1  ;;  %v10484_v3 = vrot.slane %v8010_v34, 5  ;;  %v758_v18 = vrot.slane %v757_v56, 4  ;;  %v6404_v1 = vrot.slane %v1345_v16, 9  ;;  %v1348_v56 = vld [vmem:[%s7973_s22 + $0x30] sm:$0xe] }
  0x5a   : > { %v8304_v31 = vsel %vm8287_vm7, %v6403_v23, %v10483_v12  ;;  %v6352_v60 = vcombine.low %v729_v58, %v739_v51  ;;  %v777_v59 = vsel %vm8027_vm4, %v772_v57, %v776_v7  ;;  %v781_v41 = vor.u32 %v780_v48, %v776_v7  ;;  %7554 = vmatprep.mubr.msk.bf16.mxu1 %vm838_vm1, %v7823_v20  ;;  %v1349_v57 = vld [vmem:[%s7973_s22 + $0x3c] sm:$0xe] }
  0x5b   : > { %v8311_v5 = vsel %vm8287_vm7, %v8007_v30, %v10484_v3  ;;  %7617 = vmatpush3.bf16.msra.mxu1 %v7984_v11  ;;  %v10485_v30 = vrot.slane %v8036_v54, 5  ;;  %v6405_v25 = vrot.slane %v1346_v15, 9  ;;  %v763_v11 = vsel %vm8027_vm4, %v758_v18, %v762_v37  ;;  %v7824_v54 = vld [vmem:[%s7973_s22 + $0x30] sm:$0xff]   ;;  %v8354_v7 = vld [vmem:[%s10467_s1 + $0x1c] sm:$0xf] }
  0x5c   : > { %v6420_v34 = vcombine.low %v8304_v31, %v8311_v5  ;;  %7473 = vmatmul.mubr.msk.bf16.gmra.mxu0 %vm838_vm1, %v6352_v60  ;;  %v782_v21 = vrot.slane %v781_v41, 4  ;;  %v1411_v28 = vrot.slane %v8003_v29, 5  ;;  %v1414_v20 = vrot.slane %v8052_v17, 5  ;;  %v7825_v17 = vld [vmem:[%s7973_s22 + $0x3c] sm:$0xff]   ;;  %7793 = vmatprep.subr.msk.bf16.mxu1 %vm887_vm0, %v8354_v7  ;;  %v1350_v5 = vld [vmem:[%s7973_s22 + $0x48] sm:$0xe] }
  0x5d   : > { %v8325_v58 = vsel %vm8287_vm7, %v8015_v35, %v10485_v30  ;;  %v6353_v52 = vcombine.low %v753_v4, %v763_v11  ;;  %v10486_v48 = vrot.slane %v7994_v19, 5  ;;  %v6406_v33 = vrot.slane %v1347_v13, 9  ;;  %v1351_v41 = vld [vmem:[%s7973_s22 + $0x54] sm:$0xe] }
  0x5e   : > { %v1418_v23 = vrot.slane %v8022_v44, 5  ;;  %v787_v37 = vsel %vm8027_vm4, %v782_v21, %v786_v6  ;;  %v8348_v4 = vsel %vm8287_vm7, %v6405_v25, %v1411_v28  ;;  %v1413_v19 = vrot.slane %v1411_v28, 4 }
  0x5f   : > { %v8337_v35 = vsel %vm8287_vm7, %v6404_v1, %v10486_v48  ;;  %7476 = vmatprep.mubr.msk.bf16.mxu0 %vm838_vm1, %v6353_v52  ;;  %v6354_v44 = vcombine.low %v777_v59, %v787_v37  ;;  %v1421_v51 = vrot.slane %v8069_v47, 5  ;;  %v6407_v12 = vrot.slane %v1348_v56, 9  ;;  %v1352_v52 = vld [vmem:[%s7973_s22 + $0x60] sm:$0xe] }
  0x60   : > { %v6421_v29 = vcombine.low %v8337_v35, %v8325_v58  ;;  %v8359_v16 = vsel %vm8287_vm7, %v6406_v33, %v1418_v23  ;;  %v1420_v15 = vrot.slane %v1418_v23, 4  ;;  %v8366_v6 = vsel %vm8287_vm7, %v1413_v19, %v1414_v20  ;;  %v1353_v23 = vld [vmem:[%s7973_s22 + $0x6c] sm:$0xe]  ;;  %v7828_v58 = vld [vmem:[%s7973_s22 + $0x60] sm:$0xff]  }
  0x61   : > { %v1425_v31 = vrot.slane %v8044_v0, 5  ;;  %v1428_v3 = vrot.slane %v8087_v14, 5  ;;  %7555 = vmatmul.mubr.msk.bf16.gmra.mxu1 %vm838_vm1, %v7824_v54  ;;  %v6422_v60 = vcombine.low %v8348_v4, %v8366_v6  ;;  %v6408_v18 = vrot.slane %v1349_v57, 9  ;;  %v7826_v54 = vld [vmem:[%s7973_s22 + $0x48] sm:$0xff]  }
  0x62   : > { %v8376_v47 = vsel %vm8287_vm7, %v1420_v15, %v1421_v51  ;;  %v1432_v59 = vrot.slane %v8060_v26, 5  ;;  %7558 = vmatprep.mubr.msk.bf16.mxu1 %vm838_vm1, %v7825_v17  ;;  %v1435_v1 = vrot.slane %v8112_v42, 5  ;;  %v6409_v25 = vrot.slane %v1350_v5, 9  ;;  %v1354_v51 = vld [vmem:[%s7973_s22 + $0x78] sm:$0xe] }
  0x63   : > { %v6423_v0 = vcombine.low %v8359_v16, %v8376_v47  ;;  %v8385_v14 = vsel %vm8287_vm7, %v6407_v12, %v1425_v31  ;;  %v1427_v13 = vrot.slane %v1425_v31, 4  ;;  %v1439_v11 = vrot.slane %v8075_v55, 5  ;;  %v1355_v5 = vld [vmem:[%s7973_s22 + $0x84] sm:$0xe] }
  0x64   : > { %v8390_v30 = vsel %vm8287_vm7, %v6408_v18, %v1432_v59  ;;  %v1434_v26 = vrot.slane %v1432_v59, 4  ;;  %7477 = vmatmul.mubr.msk.bf16.gmra.mxu0 %vm838_vm1, %v6354_v44  ;;  %v1442_v28 = vrot.slane %v8133_v43, 5  ;;  %v6410_v20 = vrot.slane %v1351_v41, 9  ;;  %v7831_v16 = vld [vmem:[%s7973_s22 + $0x84] sm:$0xff]  }
  0x65   : > { %v8396_v21 = vsel %vm8287_vm7, %v1427_v13, %v1428_v3  ;;  %v1446_v42 = vrot.slane %v8098_v24, 5  ;;  %7516 = vmatprep.mubr.msk.bf16.mxu0 %vm838_vm1, %v6420_v34  ;;  %v8411_v33 = vsel %vm8287_vm7, %v6409_v25, %v1439_v11  ;;  %v1441_v43 = vrot.slane %v1439_v11, 4  ;;  %v7827_v24 = vld [vmem:[%s7973_s22 + $0x54] sm:$0xff]  }
  0x66   : > { %v6424_v48 = vcombine.low %v8385_v14, %v8396_v21  ;;  %v8407_v55 = vsel %vm8287_vm7, %v1434_v26, %v1435_v1  ;;  %v1449_v17 = vrot.slane %v8148_v38, 5  ;;  %v6411_v57 = vrot.slane %v1352_v52, 9  ;;  %v1356_v26 = vld [vmem:[%s7973_s22 + $0x90] sm:$0xe]  ;;  %v1357_v52 = vld [vmem:[%s7973_s22 + $0x9c] sm:$0xe] }
  0x67   : > { %v6425_v34 = vcombine.low %v8390_v30, %v8407_v55  ;;  %v8419_v56 = vsel %vm8287_vm7, %v6410_v20, %v1446_v42  ;;  %v1448_v37 = vrot.slane %v1446_v42, 4  ;;  %v8424_v19 = vsel %vm8287_vm7, %v1441_v43, %v1442_v28  ;;  %v8461_v20 = vld [vmem:[%s10467_s1 + $0x18] sm:$0xf] }
  0x68   : > { %v1453_v44 = vrot.slane %v8121_v61, 5  ;;  %v1456_v15 = vrot.slane %v8166_v53, 5  ;;  %v6426_v12 = vcombine.low %v8411_v33, %v8424_v19  ;;  %v6412_v3 = vrot.slane %v1353_v23, 9  ;;  %v8492_v23 = vld [vmem:[%s7973_s22 + $0x10] sm:$0xf] }
  0x69   : > { %v8433_v31 = vsel %vm8287_vm7, %v1448_v37, %v1449_v17  ;;  %v1460_v38 = vrot.slane %v8139_v27, 5  ;;  %7559 = vmatmul.mubr.msk.bf16.gmra.mxu1 %vm838_vm1, %v7826_v54  ;;  %v1463_v59 = vrot.slane %v8184_v22, 5  ;;  %v6413_v13 = vrot.slane %v1354_v51, 9  ;;  %v6598_v17 = vld [vmem:[%s7973_s22 + $0xc] sm:$0xe] }
  0x6a   : > { %v6427_v61 = vcombine.low %v8419_v56, %v8433_v31  ;;  %v8442_v53 = vsel %vm8287_vm7, %v6411_v57, %v1453_v44  ;;  %v1455_v18 = vrot.slane %v1453_v44, 4  ;;  %7562 = vmatprep.mubr.msk.bf16.mxu1 %vm838_vm1, %v7827_v24  ;;  %v1467_v1 = vrot.slane %v8154_v50, 5  ;;  %v10487_v24 = vld [vmem:[#allocation2_spill] sm:$0xff]  ;;  %v8512_v51 = vld [vmem:[%s7973_s22 + $0x14] sm:$0x1] }
  0x6b   : > { %v8448_v41 = vsel %vm8287_vm7, %v6412_v3, %v1460_v38  ;;  %v1462_v27 = vrot.slane %v1460_v38, 4  ;;  %v1470_v11 = vrot.slane %v8202_v49, 5  ;;  %v6414_v22 = vrot.slane %v1355_v5, 9 }
  0x6c   : > { %v8454_v25 = vsel %vm8287_vm7, %v1455_v18, %v1456_v15  ;;  %v1474_v28 = vrot.slane %v8178_v45, 5  ;;  %7517 = vmatmul.mubr.msk.bf16.vlgmr.msra.gmra.mxu0 %vm838_vm1, %v6421_v29  ;;  %v8475_v45 = vsel %vm8287_vm7, %v6413_v13, %v1467_v1  ;;  %v1469_v42 = vrot.slane %v1467_v1, 4 }
  0x6d   : > { %v6428_v50 = vcombine.low %v8442_v53, %v8454_v25  ;;  %v8471_v49 = vsel %vm8287_vm7, %v1462_v27, %v1463_v59  ;;  %7583 = vmatpush3.bf16.msra.mxu0 %v7981_v10  ;;  %7520 = vmatprep.mubr.msk.bf16.mxu0 %vm838_vm1, %v6422_v60  ;;  %v1477_v43 = vrot.slane %v8219_v32, 5  ;;  %v7829_v10 = vld [vmem:[%s7973_s22 + $0x6c] sm:$0xff]   ;;  %v6415_v6 = vrot.slane %v1356_v26, 9  ;;  %v8523_v59 = vld [vmem:[%s7973_s22 + $0x1c] sm:$0xf] }
  0x6e   : > { %v6429_v35 = vcombine.low %v8448_v41, %v8471_v49  ;;  %v8488_v29 = vsel %vm8287_vm7, %v6414_v22, %v1474_v28  ;;  %v1476_v54 = vrot.slane %v1474_v28, 4  ;;  %v8497_v4 = vsel %vm8287_vm7, %v1469_v42, %v1470_v11  ;;  %7792 = vmatprep.subr.msk.bf16.mxu0 %vm887_vm0, %v8461_v20  ;;  %v8532_v26 = vld [vmem:[%s7973_s22 + $0x20] sm:$0x1]  ;;  %v6599_v42 = vld [vmem:[%s7973_s22 + $0x18] sm:$0xe] }
  0x6f   : > { %v1481_v60 = vrot.slane %v8198_v40, 5  ;;  %v1484_v37 = vrot.slane %v10487_v24, 5  ;;  %v6430_v32 = vcombine.low %v8475_v45, %v8497_v4  ;;  %v6416_v44 = vrot.slane %v1357_v52, 9  ;;  %v1358_v40 = vld [vmem:[%s7973_s22 + $0xa8] sm:$0xe] }
  0x70   : > { %v8508_v57 = vsel %vm8287_vm7, %v1476_v54, %v1477_v43  ;;  %v1488_v15 = vrot.slane %v8213_v62, 5  ;;  %v1491_v18 = vrot.slane %v8255_v2, 5  ;;  %v6614_v13 = vrot.slane %v6598_v17, 9  ;;  %v8566_v17 = vld [vmem:[%s7973_s22 + $0x28] sm:$0xf] }
  0x71   : > { %v6431_v3 = vcombine.low %v8488_v29, %v8508_v57  ;;  %v8519_v38 = vsel %vm8287_vm7, %v6415_v6, %v1481_v60  ;;  %v1483_v5 = vrot.slane %v1481_v60, 4  ;;  %7563 = vmatmul.mubr.msk.bf16.gmra.mxu1 %vm838_vm1, %v7828_v58  ;;  %v2952_v1 = vrot.slane %v8492_v23, 5  ;;  %v8758_v45 = vld [vmem:[%s7973_s22 + $0x5c] sm:$0x1] }
  0x72   : > { %v8528_v62 = vsel %vm8287_vm7, %v6416_v44, %v1488_v15  ;;  %v1490_v27 = vrot.slane %v1488_v15, 4  ;;  %7566 = vmatprep.mubr.msk.bf16.mxu1 %vm838_vm1, %v7829_v10  ;;  %v2955_v11 = vrot.slane %v8512_v51, 5  ;;  %v6417_v22 = vrot.slane %v1358_v40, 9  ;;  %v1359_v10 = vld [vmem:[%s7973_s22 + $0xb4] sm:$0xe] }
  0x73   : > { %v8537_v2 = vsel %vm8287_vm7, %v1483_v5, %v1484_v37  ;;  %v1495_v28 = vrot.slane %v8227_v36, 5  ;;  %v8550_v54 = vsel %vm8287_vm7, %v6614_v13, %v2952_v1  ;;  %v2954_v43 = vrot.slane %v2952_v1, 4  ;;  %v7830_v36 = vld [vmem:[%s7973_s22 + $0x78] sm:$0xff]   ;;  %v6600_v40 = vld [vmem:[%s7973_s22 + $0x24] sm:$0xe] }
  0x74   : > { %v6432_v52 = vcombine.low %v8519_v38, %v8537_v2  ;;  %v8546_v58 = vsel %vm8287_vm7, %v1490_v27, %v1491_v18  ;;  %7521 = vmatmul.mubr.msk.bf16.gmra.mxu0 %vm838_vm1, %v6423_v0  ;;  %v1498_v37 = vrot.slane %v8263_v39, 5  ;;  %v6615_v0 = vrot.slane %v6599_v42, 9  ;;  %v6517_v18 = vld [vmem:[%s7973_s22 + $0xc] sm:$0xf]  ;;  %v6529_v4 = vld [vmem:[%s7973_s22 + $0x3c] sm:$0xf] }
  0x75   : > { %v8562_v60 = vsel %vm8287_vm7, %v6417_v22, %v1495_v28  ;;  %v1497_v24 = vrot.slane %v1495_v28, 4  ;;  %7524 = vmatprep.mubr.msk.bf16.mxu0 %vm838_vm1, %v6424_v48  ;;  %v8575_v47 = vsel %vm8287_vm7, %v2954_v43, %v2955_v11  ;;  %v2959_v44 = vrot.slane %v8523_v59, 5  ;;  %v8588_v48 = vld [vmem:[%s7973_s22 + $0x2c] sm:$0x1] }
  0x76   : > { %v2962_v15 = vrot.slane %v8532_v26, 5  ;;  %v6631_v39 = vcombine.low %v8550_v54, %v8575_v47  ;;  %v6418_v14 = vrot.slane %v1359_v10, 9  ;;  %v1502_v21 = vrot.slane %v8247_v8, 5 }
  0x77   : > { %v8584_v5 = vsel %vm8287_vm7, %v1497_v24, %v1498_v37  ;;  %v8595_v13 = vsel %vm8287_vm7, %v6615_v0, %v2959_v44  ;;  %v2961_v1 = vrot.slane %v2959_v44, 4  ;;  %v1505_v11 = vrot.slane %v8273_v63, 5  ;;  %v6601_v37 = vld [vmem:[%s7973_s22 + $0x30] sm:$0xe] }
  0x78   : > { %v8600_v22 = vsel %vm8287_vm7, %v6418_v14, %v1502_v21  ;;  %v1504_v8 = vrot.slane %v1502_v21, 4  ;;  %v6616_v28 = vrot.slane %v6600_v40, 9  ;;  %v2966_v42 = vrot.slane %v8566_v17, 5  ;;  %v8622_v40 = vld [vmem:[%s7973_s22 + $0x34] sm:$0xf] }
  0x79   : > { %7567 = vmatmul.mubr.msk.bf16.gmra.mxu1 %vm838_vm1, %v7830_v36  ;;  %v8606_v43 = vsel %vm8287_vm7, %v2961_v1, %v2962_v15  ;;  %v2969_v10 = vrot.slane %v8588_v48, 5  ;;  %v2209_v63 = vshrl.u32 %v6517_v18, 16  ;;  %v2212_v24 = vshll.u32 %v6517_v18, 16  ;;  %v8625_v14 = vld [vmem:[%s7973_s22 + $0x38] sm:$0x1] }
  0x7a   : > { %7570 = vmatprep.mubr.msk.bf16.mxu1 %vm838_vm1, %v7831_v16  ;;  %v6632_v0 = vcombine.low %v8595_v13, %v8606_v43  ;;  %v8615_v44 = vsel %vm8287_vm7, %v1504_v8, %v1505_v11  ;;  %v8619_v36 = vsel %vm8287_vm7, %v6616_v28, %v2966_v42  ;;  %v2968_v15 = vrot.slane %v2966_v42, 4  ;;  %v6520_v11 = vld [vmem:[%s7973_s22 + $0x18] sm:$0xf] }
  0x7b   : > { %v2211_v21 = vrot.slane %v2209_v63, 4  ;;  %v2214_v18 = vrot.slane %v2212_v24, 5  ;;  %v2218_v1 = vshll.u32 %v8492_v23, 16  ;;  %v2222_v28 = vshrl.u32 %v8492_v23, 16  ;;  %v7832_v63 = vld [vmem:[%s7973_s22 + $0x90] sm:$0xff]   ;;  %v7833_v24 = vld [vmem:[%s7973_s22 + $0x9c] sm:$0xff]  }
  0x7c   : > { %7525 = vmatmul.mubr.msk.bf16.gmra.mxu0 %vm838_vm1, %v6425_v34  ;;  %v8637_v8 = vsel %vm8287_vm7, %v2968_v15, %v2969_v10  ;;  %v2228_v42 = vshll.u32 %v8512_v51, 16  ;;  %v6617_v16 = vrot.slane %v6601_v37, 9  ;;  %v2973_v10 = vrot.slane %v8622_v40, 5 }
  0x7d   : > { %7528 = vmatprep.mubr.msk.bf16.mxu0 %vm838_vm1, %v6426_v12  ;;  %v2215_v55 = vor.u32 %v2214_v18, %v2211_v21  ;;  %v2220_v34 = vrot.slane %v2218_v1, 5  ;;  %v2224_v15 = vrot.slane %v2222_v28, 4  ;;  %v2976_v51 = vrot.slane %v8625_v14, 5 }
  0x7e   : > { %v2230_v23 = vrot.slane %v2228_v42, 5  ;;  %v2233_v37 = vshrl.u32 %v6520_v11, 16  ;;  %v8653_v19 = vsel %vm8287_vm7, %v6617_v16, %v2973_v10  ;;  %v2975_v12 = vrot.slane %v2973_v10, 4  ;;  %v8658_v42 = vld [vmem:[%s7973_s22 + $0x40] sm:$0xf] }
  0x7f   : > { %v2216_v33 = vrot.slane %v2215_v55, 4  ;;  %v2236_v27 = vshll.u32 %v6520_v11, 16  ;;  %v2225_v21 = vor.u32 %v2224_v15, %v2220_v34  ;;  %v2242_v1 = vshll.u32 %v8523_v59, 16  ;;  %v8669_v15 = vld [vmem:[%s7973_s22 + $0x44] sm:$0x1] }
  0x80   : > { %v2235_v18 = vrot.slane %v2233_v37, 4  ;;  %v2246_v28 = vshrl.u32 %v8523_v59, 16  ;;  %v8665_v16 = vsel %vm8287_vm7, %v2975_v12, %v2976_v51  ;;  %v2252_v11 = vshll.u32 %v8532_v26, 16  ;;  %v6602_v37 = vld [vmem:[%s7973_s22 + $0x3c] sm:$0xe] }
  0x81   : > { %7571 = vmatmul.mubr.msk.bf16.gmra.mxu1 %vm838_vm1, %v7832_v63  ;;  %v2221_v55 = vsel %vm8027_vm4, %v2216_v33, %v2220_v34  ;;  %v2238_v10 = vrot.slane %v2236_v27, 5  ;;  %v2226_v59 = vrot.slane %v2225_v21, 4  ;;  %v6634_v63 = vcombine.low %v8653_v19, %v8665_v16  ;;  %v6523_v34 = vld [vmem:[%s7973_s22 + $0x24] sm:$0xf] }
  0x82   : > { %7574 = vmatprep.mubr.msk.bf16.mxu1 %vm838_vm1, %v7833_v24  ;;  %v2244_v6 = vrot.slane %v2242_v1, 5  ;;  %v2248_v30 = vrot.slane %v2246_v28, 4  ;;  %v2254_v51 = vrot.slane %v2252_v11, 5  ;;  %v8678_v26 = vsel %vm887_vm0, %v8461_v20, 0  ;;  %v7834_v20 = vld [vmem:[%s7973_s22 + $0xa8] sm:$0xff]  }
  0x83   : > { %v2239_v33 = vor.u32 %v2238_v10, %v2235_v18  ;;  %v8682_v27 = vsel %vm887_vm0, %v8354_v7, 0  ;;  %v2231_v24 = vsel %vm8027_vm4, %v2226_v59, %v2230_v23  ;;  %v6618_v21 = vrot.slane %v6602_v37, 9  ;;  %v7835_v23 = vld [vmem:[%s7973_s22 + $0xb4] sm:$0xff]  }
  0x84   : > { %7529 = vmatmul.mubr.msk.bf16.gmra.mxu0 %vm838_vm1, %v6427_v61  ;;  %v2249_v12 = vor.u32 %v2248_v30, %v2244_v6  ;;  %v2980_v18 = vrot.slane %v8658_v42, 5  ;;  %v8696_v7 = vcombine.low %v2221_v55, %v2231_v24  ;;  %v2983_v56 = vrot.slane %v8669_v15, 5  ;;  %v8700_v61 = vld [vmem:[%s7973_s22 + $0x4c] sm:$0xf]  ;;  %v6603_v30 = vld [vmem:[%s7973_s22 + $0x48] sm:$0xe] }
  0x85   : > { %7532 = vmatprep.mubr.msk.bf16.mxu0 %vm838_vm1, %v6428_v50  ;;  %v2240_v1 = vrot.slane %v2239_v33, 4  ;;  %v2257_v31 = vshrl.u32 %v6523_v34, 16  ;;  %v2260_v25 = vshll.u32 %v6523_v34, 16  ;;  %v2266_v11 = vshll.u32 %v8566_v17, 16  ;;  %v6526_v34 = vld [vmem:[%s7973_s22 + $0x30] sm:$0xf] }
  0x86   : > { %v2250_v28 = vrot.slane %v2249_v12, 4  ;;  %v8706_v10 = vsel %vm8287_vm7, %v6618_v21, %v2980_v18  ;;  %v2982_v53 = vrot.slane %v2980_v18, 4  ;;  %v2270_v37 = vshrl.u32 %v8566_v17, 16  ;;  %v8720_v21 = vld [vmem:[%s7973_s22 + $0x50] sm:$0x1] }
  0x87   : > { %v2245_v50 = vsel %vm8027_vm4, %v2240_v1, %v2244_v6  ;;  %v2259_v55 = vrot.slane %v2257_v31, 4  ;;  %v2262_v24 = vrot.slane %v2260_v25, 5  ;;  %v2276_v12 = vshll.u32 %v8588_v48, 16 }
  0x88   : > { %v2255_v59 = vsel %vm8027_vm4, %v2250_v28, %v2254_v51  ;;  %v8716_v33 = vsel %vm8287_vm7, %v2982_v53, %v2983_v56  ;;  %v2268_v18 = vrot.slane %v2266_v11, 5  ;;  %v2272_v51 = vrot.slane %v2270_v37, 4  ;;  %v8742_v37 = vld [vmem:[%s7973_s22 + $0x58] sm:$0xf] }
  0x89   : > { %7575 = vmatmul.mubr.msk.bf16.gmra.mxu1 %vm838_vm1, %v7834_v20  ;;  %v8724_v6 = vcombine.low %v2245_v50, %v2255_v59  ;;  %v6635_v17 = vcombine.low %v8706_v10, %v8716_v33  ;;  %v2263_v1 = vor.u32 %v2262_v24, %v2259_v55  ;;  %v2278_v56 = vrot.slane %v2276_v12, 5  ;;  %v7836_v50 = vld [vmem:[%s7973_s22 + $0xc0] sm:$0xff]   ;;  %v6604_v24 = vld [vmem:[%s7973_s22 + $0x54] sm:$0xe] }
  0x8a   : > { %7578 = vmatprep.mubr.msk.bf16.mxu1 %vm838_vm1, %v7835_v23  ;;  %v6619_v31 = vrot.slane %v6603_v30, 9  ;;  %v2987_v48 = vrot.slane %v8700_v61, 5  ;;  %v2273_v28 = vor.u32 %v2272_v51, %v2268_v18  ;;  %v2990_v53 = vrot.slane %v8720_v21, 5 }
  0x8b   : > { %v2281_v20 = vshrl.u32 %v6526_v34, 16  ;;  %v2284_v25 = vshll.u32 %v6526_v34, 16  ;;  %v2264_v11 = vrot.slane %v2263_v1, 4  ;;  %v2290_v55 = vshll.u32 %v8622_v40, 16 }
  0x8c   : > { %7533 = vmatmul.mubr.msk.bf16.gmra.mxu0 %vm838_vm1, %v6429_v35  ;;  %v8738_v30 = vsel %vm8287_vm7, %v6619_v31, %v2987_v48  ;;  %v2989_v23 = vrot.slane %v2987_v48, 4  ;;  %v2274_v41 = vrot.slane %v2273_v28, 4  ;;  %v2294_v59 = vshrl.u32 %v8622_v40, 16 }
  0x8d   : > { %7536 = vmatprep.mubr.msk.bf16.mxu0 %vm838_vm1, %v6430_v32  ;;  %v2283_v49 = vrot.slane %v2281_v20, 4  ;;  %v2286_v35 = vrot.slane %v2284_v25, 5  ;;  %v2269_v12 = vsel %vm8027_vm4, %v2264_v11, %v2268_v18  ;;  %v2292_v51 = vrot.slane %v2290_v55, 5  ;;  %v6605_v55 = vld [vmem:[%s7973_s22 + $0x60] sm:$0xe] }
  0x8e   : > { %v8754_v34 = vsel %vm8287_vm7, %v2989_v23, %v2990_v53  ;;  %v2300_v1 = vshll.u32 %v8625_v14, 16  ;;  %v2279_v32 = vsel %vm8027_vm4, %v2274_v41, %v2278_v56  ;;  %v2296_v18 = vrot.slane %v2294_v59, 4  ;;  %v8771_v23 = vld [vmem:[%s7973_s22 + $0x64] sm:$0xf]  ;;  %v8784_v59 = vld [vmem:[%s7973_s22 + $0x68] sm:$0x1] }
  0x8f   : > { %v6636_v40 = vcombine.low %v8738_v30, %v8754_v34  ;;  %v2287_v31 = vor.u32 %v2286_v35, %v2283_v49  ;;  %v8765_v48 = vcombine.low %v2269_v12, %v2279_v32  ;;  %v6620_v53 = vrot.slane %v6604_v24, 9  ;;  %v6532_v24 = vld [vmem:[%s7973_s22 + $0x48] sm:$0xf] }
  0x90   : > { %v2302_v28 = vrot.slane %v2300_v1, 5  ;;  %v2994_v14 = vrot.slane %v8742_v37, 5  ;;  %v2297_v25 = vor.u32 %v2296_v18, %v2292_v51  ;;  %v2997_v11 = vrot.slane %v8758_v45, 5 }
  0x91   : > { %7579 = vmatmul.mubr.msk.bf16.gmra.mxu1 %vm838_vm1, %v7836_v50  ;;  %v2288_v20 = vrot.slane %v2287_v31, 4  ;;  %v2305_v56 = vshrl.u32 %v6529_v4, 16  ;;  %v2308_v35 = vshll.u32 %v6529_v4, 16  ;;  %v2314_v50 = vshll.u32 %v8658_v42, 16 }
  0x92   : > { %7618 = vmatprep.mubr.msk.bf16.mxu1 %vm838_vm1, %v6631_v39  ;;  %v8780_v41 = vsel %vm8287_vm7, %v6620_v53, %v2994_v14  ;;  %v2996_v49 = vrot.slane %v2994_v14, 4  ;;  %v2298_v1 = vrot.slane %v2297_v25, 4  ;;  %v2318_v54 = vshrl.u32 %v8658_v42, 16 }
  0x93   : > { %v2293_v12 = vsel %vm8027_vm4, %v2288_v20, %v2292_v51  ;;  %v2307_v32 = vrot.slane %v2305_v56, 4  ;;  %v2310_v39 = vrot.slane %v2308_v35, 5  ;;  %v2316_v4 = vrot.slane %v2314_v50, 5  ;;  %v8812_v20 = vld [vmem:[%s7973_s22 + $0x70] sm:$0xf] }
  0x94   : > { %7537 = vmatmul.mubr.msk.bf16.gmra.mxu0 %vm838_vm1, %v6431_v3  ;;  %v8796_v47 = vsel %vm8287_vm7, %v2996_v49, %v2997_v11  ;;  %v2324_v31 = vshll.u32 %v8669_v15, 16  ;;  %v2303_v42 = vsel %vm8027_vm4, %v2298_v1, %v2302_v28  ;;  %v2320_v57 = vrot.slane %v2318_v54, 4  ;;  %v8825_v49 = vld [vmem:[%s10468_s2] sm:$0xf]  ;;  %v6606_v1 = vld [vmem:[%s7973_s22 + $0x6c] sm:$0xe] }
  0x95   : > { %7540 = vmatprep.mubr.msk.bf16.mxu0 %vm838_vm1, %v6432_v52  ;;  %v6637_v29 = vcombine.low %v8780_v41, %v8796_v47  ;;  %v6621_v3 = vrot.slane %v6605_v55, 9  ;;  %v8807_v51 = vcombine.low %v2293_v12, %v2303_v42  ;;  %v2311_v18 = vor.u32 %v2310_v39, %v2307_v32  ;;  %v8820_v55 = vld [vmem:[%s7973_s22 + $0x74] sm:$0x1]  ;;  %v8962_v47 = vld [vmem:[%s10467_s1 + $0x20] sm:$0xf] }
  0x96   : > { %v2326_v53 = vrot.slane %v2324_v31, 5  ;;  %v3001_v15 = vrot.slane %v8771_v23, 5  ;;  %v2321_v14 = vor.u32 %v2320_v57, %v2316_v4  ;;  %v3004_v38 = vrot.slane %v8784_v59, 5  ;;  %v6535_v39 = vld [vmem:[%s7973_s22 + $0x54] sm:$0xf] }
  0x97   : > { %v2329_v2 = vshrl.u32 %v6532_v24, 16  ;;  %v2332_v52 = vshll.u32 %v6532_v24, 16  ;;  %v2312_v28 = vrot.slane %v2311_v18, 4  ;;  %v2338_v56 = vshll.u32 %v8700_v61, 16 }
  0x98   : > { %v8816_v25 = vsel %vm8287_vm7, %v6621_v3, %v3001_v15  ;;  %v3003_v11 = vrot.slane %v3001_v15, 4  ;;  %v2322_v35 = vrot.slane %v2321_v14, 4  ;;  %v2342_v12 = vshrl.u32 %v8700_v61, 16 }
  0x99   : > { %7619 = vmatmul.mubr.msk.bf16.vlgmr.msra.gmra.mxu1 %vm838_vm1, %v6632_v0  ;;  %v2331_v50 = vrot.slane %v2329_v2, 4  ;;  %v2334_v24 = vrot.slane %v2332_v52, 5  ;;  %v10488_v32 = vcombine.low %v8619_v36, %v8637_v8  ;;  %v2317_v54 = vsel %vm8027_vm4, %v2312_v28, %v2316_v4 }
  0x9a   : > { %7685 = vmatpush3.bf16.msra.mxu1 %v8682_v27  ;;  %v8842_v13 = vsel %vm8287_vm7, %v3003_v11, %v3004_v38  ;;  %v2340_v43 = vrot.slane %v2338_v56, 5  ;;  %v2348_v0 = vshll.u32 %v8720_v21, 16  ;;  %v2327_v61 = vsel %vm8027_vm4, %v2322_v35, %v2326_v53 }
  0x9b   : > { %7622 = vmatprep.mubr.msk.bf16.mxu1 %vm838_vm1, %v10488_v32  ;;  %v6638_v36 = vcombine.low %v8816_v25, %v8842_v13  ;;  %v2335_v8 = vor.u32 %v2334_v24, %v2331_v50  ;;  %v2344_v27 = vrot.slane %v2342_v12, 4  ;;  %7795 = vmatprep.subr.msk.bf16.mxu1 %vm887_vm0, %v8825_v49  ;;  %v10489_v4 = vcombine.low %v8528_v62, %v8546_v58  ;;  %v8865_v62 = vld [vmem:[%s7973_s22 + $0x7c] sm:$0xf]  ;;  %v6607_v58 = vld [vmem:[%s7973_s22 + $0x78] sm:$0xe] }
  0x9c   : > { %v8856_v21 = vcombine.low %v2317_v54, %v2327_v61  ;;  %v2350_v31 = vrot.slane %v2348_v0, 5  ;;  %v6622_v42 = vrot.slane %v6606_v1, 9  ;;  %v3008_v57 = vrot.slane %v8812_v20, 5  ;;  %v6538_v32 = vld [vmem:[%s7973_s22 + $0x60] sm:$0xf] }
  0x9d   : > { %7541 = vmatmul.mubr.msk.bf16.gmra.mxu0 %vm838_vm1, %v10489_v4  ;;  %v10490_v3 = vcombine.low %v8562_v60, %v8584_v5  ;;  %v2336_v18 = vrot.slane %v2335_v8, 4  ;;  %v2345_v53 = vor.u32 %v2344_v27, %v2340_v43  ;;  %v3011_v15 = vrot.slane %v8820_v55, 5  ;;  %v8874_v60 = vld [vmem:[%s7973_s22 + $0x80] sm:$0x1]  ;;  %v8902_v4 = vld [vmem:[%s7973_s22 + $0x88] sm:$0xf] }
  0x9e   : > { %v2353_v14 = vshrl.u32 %v6535_v39, 16  ;;  %v8870_v38 = vsel %vm8287_vm7, %v6622_v42, %v3008_v57  ;;  %v3010_v2 = vrot.slane %v3008_v57, 4  ;;  %v2356_v52 = vshll.u32 %v6535_v39, 16  ;;  %v8914_v57 = vld [vmem:[%s7973_s22 + $0x8c] sm:$0x1] }
  0x9f   : > { %7544 = vmatprep.mubr.msk.bf16.mxu0 %vm838_vm1, %v10490_v3  ;;  %v2362_v28 = vshll.u32 %v8742_v37, 16  ;;  %v2341_v5 = vsel %vm8027_vm4, %v2336_v18, %v2340_v43  ;;  %v2346_v11 = vrot.slane %v2345_v53, 4  ;;  %v2366_v35 = vshrl.u32 %v8742_v37, 16  ;;  %v6608_v3 = vld [vmem:[%s7973_s22 + $0x84] sm:$0xe] }
  0xa0   : > { %v2355_v56 = vrot.slane %v2353_v14, 4  ;;  %v8881_v50 = vsel %vm8287_vm7, %v3010_v2, %v3011_v15  ;;  %v2358_v24 = vrot.slane %v2356_v52, 5  ;;  %v2372_v1 = vshll.u32 %v8758_v45, 16  ;;  %v6541_v15 = vld [vmem:[%s7973_s22 + $0x6c] sm:$0xf] }
  0xa1   : > { %v2364_v12 = vrot.slane %v2362_v28, 5  ;;  %7623 = vmatmul.mubr.msk.bf16.gmra.mxu1 %vm838_vm1, %v6634_v63  ;;  %v2351_v54 = vsel %vm8027_vm4, %v2346_v11, %v2350_v31  ;;  %v6639_v37 = vcombine.low %v8870_v38, %v8881_v50  ;;  %v2368_v43 = vrot.slane %v2366_v35, 4 }
  0xa2   : > { %v6623_v0 = vrot.slane %v6607_v58, 9  ;;  %7626 = vmatprep.mubr.msk.bf16.mxu1 %vm838_vm1, %v6635_v17  ;;  %v8897_v45 = vcombine.low %v2341_v5, %v2351_v54  ;;  %v2359_v19 = vor.u32 %v2358_v24, %v2355_v56  ;;  %v2374_v16 = vrot.slane %v2372_v1, 5 }
  0xa3   : > { %v3015_v63 = vrot.slane %v8865_v62, 5  ;;  %v2369_v39 = vor.u32 %v2368_v43, %v2364_v12  ;;  %v3018_v61 = vrot.slane %v8874_v60, 5  ;;  %v2377_v8 = vshrl.u32 %v6538_v32, 16  ;;  %v8942_v43 = vld [vmem:[%s7973_s22 + $0x94] sm:$0xf] }
  0xa4   : > { %v2380_v27 = vshll.u32 %v6538_v32, 16  ;;  %v10491_v10 = vcombine.low %v8600_v22, %v8615_v44  ;;  %v2360_v33 = vrot.slane %v2359_v19, 4  ;;  %v2386_v42 = vshll.u32 %v8771_v23, 16  ;;  %v8954_v19 = vld [vmem:[%s7973_s22 + $0x98] sm:$0x1] }
  0xa5   : > { %v8910_v17 = vsel %vm8287_vm7, %v6623_v0, %v3015_v63  ;;  %v3017_v31 = vrot.slane %v3015_v63, 4  ;;  %v2370_v18 = vrot.slane %v2369_v39, 4  ;;  %v2379_v53 = vrot.slane %v2377_v8, 4 }
  0xa6   : > { %7545 = vmatmul.mubr.msk.bf16.gmra.mxu0 %vm838_vm1, %v10491_v10  ;;  %v2382_v22 = vrot.slane %v2380_v27, 5  ;;  %v2390_v44 = vshrl.u32 %v8771_v23, 16  ;;  %v2365_v14 = vsel %vm8027_vm4, %v2360_v33, %v2364_v12  ;;  %v2388_v2 = vrot.slane %v2386_v42, 5  ;;  %v6609_v12 = vld [vmem:[%s7973_s22 + $0x90] sm:$0xe] }
  0xa7   : > { %7584 = vmatprep.mubr.msk.bf16.mxu0 %vm838_vm1, %v8696_v7  ;;  %v8925_v58 = vsel %vm8287_vm7, %v3017_v31, %v3018_v61  ;;  %v2396_v52 = vshll.u32 %v8784_v59, 16  ;;  %v2375_v7 = vsel %vm8027_vm4, %v2370_v18, %v2374_v16  ;;  %v6624_v35 = vrot.slane %v6608_v3, 9  ;;  %v6544_v10 = vld [vmem:[%s7973_s22 + $0x78] sm:$0xf] }
  0xa8   : > { %v6640_v28 = vcombine.low %v8910_v17, %v8925_v58  ;;  %v2383_v5 = vor.u32 %v2382_v22, %v2379_v53  ;;  %v2392_v23 = vrot.slane %v2390_v44, 4  ;;  %v8932_v11 = vcombine.low %v2365_v14, %v2375_v7  ;;  %v8986_v44 = vld [vmem:[%s7973_s22 + $0xa0] sm:$0xf]  ;;  %v8994_v7 = vld [vmem:[%s7973_s22 + $0xa4] sm:$0x1] }
  0xa9   : > { %v2398_v56 = vrot.slane %v2396_v52, 5  ;;  %v3022_v24 = vrot.slane %v8902_v4, 5  ;;  %7627 = vmatmul.mubr.msk.bf16.gmra.mxu1 %vm838_vm1, %v6636_v40  ;;  %v3025_v32 = vrot.slane %v8914_v57, 5  ;;  %v2401_v54 = vshrl.u32 %v6541_v15, 16 }
  0xaa   : > { %v2384_v59 = vrot.slane %v2383_v5, 4  ;;  %v2393_v1 = vor.u32 %v2392_v23, %v2388_v2  ;;  %7630 = vmatprep.mubr.msk.bf16.mxu1 %vm838_vm1, %v6637_v29  ;;  %v2404_v34 = vshll.u32 %v6541_v15, 16  ;;  %v2410_v40 = vshll.u32 %v8812_v20, 16  ;;  %v6610_v5 = vld [vmem:[%s7973_s22 + $0x9c] sm:$0xe] }
  0xab   : > { %v8950_v0 = vsel %vm8287_vm7, %v6624_v35, %v3022_v24  ;;  %v3024_v30 = vrot.slane %v3022_v24, 4  ;;  %v2403_v39 = vrot.slane %v2401_v54, 4  ;;  %v2414_v41 = vshrl.u32 %v8812_v20, 16 }
  0xac   : > { %v2389_v16 = vsel %vm8027_vm4, %v2384_v59, %v2388_v2  ;;  %v2394_v63 = vrot.slane %v2393_v1, 4  ;;  %v2406_v61 = vrot.slane %v2404_v34, 5  ;;  %v2412_v8 = vrot.slane %v2410_v40, 5 }
  0xad   : > { %v8968_v29 = vsel %vm8287_vm7, %v3024_v30, %v3025_v32  ;;  %v2420_v27 = vshll.u32 %v8820_v55, 16  ;;  %v2416_v33 = vrot.slane %v2414_v41, 4  ;;  %v6625_v31 = vrot.slane %v6609_v12, 9 }
  0xae   : > { %7585 = vmatmul.mubr.msk.bf16.vlgmr.msra.gmra.mxu0 %vm838_vm1, %v8724_v6  ;;  %v2399_v20 = vsel %vm8027_vm4, %v2394_v63, %v2398_v56  ;;  %v6641_v6 = vcombine.low %v8950_v0, %v8968_v29  ;;  %v2407_v55 = vor.u32 %v2406_v61, %v2403_v39  ;;  %v3029_v18 = vrot.slane %v8942_v43, 5  ;;  %v9027_v63 = vld [vmem:[%s7973_s22 + $0xac] sm:$0xf] }
  0xaf   : > { %7651 = vmatpush3.bf16.msra.mxu0 %v8678_v26  ;;  %7588 = vmatprep.mubr.msk.bf16.mxu0 %vm838_vm1, %v8765_v48  ;;  %v8979_v42 = vcombine.low %v2389_v16, %v2399_v20  ;;  %v2422_v3 = vrot.slane %v2420_v27, 5  ;;  %v2417_v26 = vor.u32 %v2416_v33, %v2412_v8  ;;  %v3032_v48 = vrot.slane %v8954_v19, 5  ;;  %v9037_v33 = vld [vmem:[%s7973_s22 + $0xb0] sm:$0x1] }
  0xb0   : > { %7794 = vmatprep.subr.msk.bf16.mxu0 %vm887_vm0, %v8962_v47  ;;  %v2425_v53 = vshrl.u32 %v6544_v10, 16  ;;  %v2428_v22 = vshll.u32 %v6544_v10, 16  ;;  %v2408_v15 = vrot.slane %v2407_v55, 4  ;;  %v8990_v14 = vsel %vm8287_vm7, %v6625_v31, %v3029_v18 }
  0xb1   : > { %v3031_v2 = vrot.slane %v3029_v18, 4  ;;  %v2434_v52 = vshll.u32 %v8865_v62, 16  ;;  %7631 = vmatmul.mubr.msk.bf16.gmra.mxu1 %vm838_vm1, %v6638_v36  ;;  %v2418_v23 = vrot.slane %v2417_v26, 4  ;;  %v2438_v24 = vshrl.u32 %v8865_v62, 16  ;;  %v6547_v36 = vld [vmem:[%s7973_s22 + $0x84] sm:$0xf] }
  0xb2   : > { %v2427_v56 = vrot.slane %v2425_v53, 4  ;;  %v2430_v35 = vrot.slane %v2428_v22, 5  ;;  %7634 = vmatprep.mubr.msk.bf16.mxu1 %vm838_vm1, %v6639_v37  ;;  %v2413_v12 = vsel %vm8027_vm4, %v2408_v15, %v2412_v8  ;;  %v2444_v13 = vshll.u32 %v8874_v60, 16  ;;  %v6611_v8 = vld [vmem:[%s7973_s22 + $0xa8] sm:$0xe] }
  0xb3   : > { %v9010_v59 = vsel %vm8287_vm7, %v3031_v2, %v3032_v48  ;;  %v2436_v25 = vrot.slane %v2434_v52, 5  ;;  %v2423_v62 = vsel %vm8027_vm4, %v2418_v23, %v2422_v3  ;;  %v2440_v37 = vrot.slane %v2438_v24, 4  ;;  %v6550_v26 = vld [vmem:[%s7973_s22 + $0x90] sm:$0xf]  ;;  %v9058_v23 = vld [vmem:[%s7973_s22 + $0xb8] sm:$0xf] }
  0xb4   : > { %v6642_v38 = vcombine.low %v8990_v14, %v9010_v59  ;;  %v2431_v50 = vor.u32 %v2430_v35, %v2427_v56  ;;  %v9020_v1 = vcombine.low %v2413_v12, %v2423_v62  ;;  %v2446_v32 = vrot.slane %v2444_v13, 5  ;;  %v6612_v56 = vld [vmem:[%s7973_s22 + $0xb4] sm:$0xe]  ;;  %v6613_v59 = vld [vmem:[%s7973_s22 + $0xc0] sm:$0xe] }
  0xb5   : > { %v6626_v54 = vrot.slane %v6610_v5, 9  ;;  %v3036_v60 = vrot.slane %v8986_v44, 5  ;;  %v2441_v34 = vor.u32 %v2440_v37, %v2436_v25  ;;  %v3039_v40 = vrot.slane %v8994_v7, 5  ;;  %v9077_v37 = vld [vmem:[%s7973_s22 + $0xbc] sm:$0x1] }
  0xb6   : > { %7589 = vmatmul.mubr.msk.bf16.gmra.mxu0 %vm838_vm1, %v8807_v51  ;;  %v2432_v30 = vrot.slane %v2431_v50, 4  ;;  %v2449_v16 = vshrl.u32 %v6547_v36, 16  ;;  %v2452_v41 = vshll.u32 %v6547_v36, 16  ;;  %v2458_v61 = vshll.u32 %v8902_v4, 16 }
  0xb7   : > { %7592 = vmatprep.mubr.msk.bf16.mxu0 %vm838_vm1, %v8856_v21  ;;  %v3037_v51 = vsel %vm8287_vm7, %v6626_v54, %v3036_v60  ;;  %v3038_v39 = vrot.slane %v3036_v60, 4  ;;  %v2442_v21 = vrot.slane %v2441_v34, 4  ;;  %v2462_v20 = vshrl.u32 %v8902_v4, 16 }
  0xb8   : > { %v2437_v27 = vsel %vm8027_vm4, %v2432_v30, %v2436_v25  ;;  %v2451_v10 = vrot.slane %v2449_v16, 4  ;;  %v2454_v55 = vrot.slane %v2452_v41, 5  ;;  %v2460_v3 = vrot.slane %v2458_v61, 5  ;;  %v9092_v61 = vld [vmem:[%s7973_s22 + $0xc4] sm:$0xf] }
  0xb9   : > { %v3040_v31 = vsel %vm8287_vm7, %v3038_v39, %v3039_v40  ;;  %v2468_v18 = vshll.u32 %v8914_v57, 16  ;;  %7635 = vmatmul.mubr.msk.bf16.gmra.mxu1 %vm838_vm1, %v6640_v28  ;;  %v2447_v4 = vsel %vm8027_vm4, %v2442_v21, %v2446_v32  ;;  %v2464_v53 = vrot.slane %v2462_v20, 4  ;;  %v6553_v32 = vld [vmem:[%s7973_s22 + $0x9c] sm:$0xf] }
  0xba   : > { %v6643_v48 = vcombine.low %v3037_v51, %v3040_v31  ;;  %v6627_v22 = vrot.slane %v6611_v8, 9  ;;  %7638 = vmatprep.mubr.msk.bf16.mxu1 %vm838_vm1, %v6641_v6  ;;  %v9053_v57 = vcombine.low %v2437_v27, %v2447_v4  ;;  %v2455_v15 = vor.u32 %v2454_v55, %v2451_v10  ;;  %v9103_v55 = vld [vmem:[%s7973_s22 + $0xc8] sm:$0x1] }
  0xbb   : > { %v2470_v2 = vrot.slane %v2468_v18, 5  ;;  %v3043_v17 = vrot.slane %v9027_v63, 5  ;;  %v2465_v58 = vor.u32 %v2464_v53, %v2460_v3  ;;  %v3046_v28 = vrot.slane %v9037_v33, 5 }
  0xbc   : > { %v2473_v52 = vshrl.u32 %v6550_v26, 16  ;;  %v2476_v5 = vshll.u32 %v6550_v26, 16  ;;  %v2456_v0 = vrot.slane %v2455_v15, 4  ;;  %v2482_v35 = vshll.u32 %v8942_v43, 16 }
  0xbd   : > { %v9065_v29 = vsel %vm8287_vm7, %v6627_v22, %v3043_v17  ;;  %v3045_v6 = vrot.slane %v3043_v17, 4  ;;  %v2466_v24 = vrot.slane %v2465_v58, 4  ;;  %v2486_v13 = vshrl.u32 %v8942_v43, 16 }
  0xbe   : > { %7593 = vmatmul.mubr.msk.bf16.gmra.mxu0 %vm838_vm1, %v8897_v45  ;;  %v2475_v12 = vrot.slane %v2473_v52, 4  ;;  %v2478_v25 = vrot.slane %v2476_v5, 5  ;;  %v2461_v36 = vsel %vm8027_vm4, %v2456_v0, %v2460_v3  ;;  %v2484_v62 = vrot.slane %v2482_v35, 5 }
  0xbf   : > { %7596 = vmatprep.mubr.msk.bf16.mxu0 %vm838_vm1, %v8932_v11  ;;  %v3047_v45 = vsel %vm8287_vm7, %v3045_v6, %v3046_v28  ;;  %v2492_v50 = vshll.u32 %v8954_v19, 16  ;;  %v2471_v11 = vsel %vm8027_vm4, %v2466_v24, %v2470_v2  ;;  %v2488_v43 = vrot.slane %v2486_v13, 4 }
  0xc0   : > { %v6644_v54 = vcombine.low %v9065_v29, %v3047_v45  ;;  %v2479_v60 = vor.u32 %v2478_v25, %v2475_v12  ;;  %v9083_v30 = vcombine.low %v2461_v36, %v2471_v11  ;;  %v6628_v40 = vrot.slane %v6612_v56, 9  ;;  %v6728_v25 = vld [vmem:[%s7973_s22 + $0x18] sm:$0xf] }
  0xc1   : > { %v2494_v34 = vrot.slane %v2492_v50, 5  ;;  %v3050_v16 = vrot.slane %v9058_v23, 5  ;;  %7639 = vmatmul.mubr.msk.bf16.gmra.mxu1 %vm838_vm1, %v6642_v38  ;;  %v2489_v51 = vor.u32 %v2488_v43, %v2484_v62  ;;  %v3053_v39 = vrot.slane %v9077_v37, 5  ;;  %v6729_v50 = vld [vmem:[%s7973_s22 + $0x1c] sm:$0xf] }
  0xc2   : > { %v2480_v19 = vrot.slane %v2479_v60, 4  ;;  %v2497_v41 = vshrl.u32 %v6553_v32, 16  ;;  %7642 = vmatprep.mubr.msk.bf16.mxu1 %vm838_vm1, %v6643_v48  ;;  %v2500_v21 = vshll.u32 %v6553_v32, 16  ;;  %v2506_v14 = vshll.u32 %v8986_v44, 16  ;;  %v6556_v48 = vld [vmem:[%s7973_s22 + $0xa8] sm:$0xf] }
  0xc3   : > { %v3051_v8 = vsel %vm8287_vm7, %v6628_v40, %v3050_v16  ;;  %v3052_v27 = vrot.slane %v3050_v16, 4  ;;  %v2490_v10 = vrot.slane %v2489_v51, 4  ;;  %v2510_v31 = vshrl.u32 %v8986_v44, 16  ;;  %v6559_v43 = vld [vmem:[%s7973_s22 + $0xb4] sm:$0xf] }
  0xc4   : > { %v2485_v38 = vsel %vm8027_vm4, %v2480_v19, %v2484_v62  ;;  %v2499_v20 = vrot.slane %v2497_v41, 4  ;;  %v2502_v18 = vrot.slane %v2500_v21, 5  ;;  %v2508_v26 = vrot.slane %v2506_v14, 5 }
  0xc5   : > { %v3054_v3 = vsel %vm8287_vm7, %v3052_v27, %v3053_v39  ;;  %v2516_v4 = vshll.u32 %v8994_v7, 16  ;;  %v2495_v53 = vsel %vm8027_vm4, %v2490_v10, %v2494_v34  ;;  %v2512_v22 = vrot.slane %v2510_v31, 4 }
  0xc6   : > { %7597 = vmatmul.mubr.msk.bf16.gmra.mxu0 %vm838_vm1, %v8979_v42  ;;  %v6645_v44 = vcombine.low %v3051_v8, %v3054_v3  ;;  %v6629_v15 = vrot.slane %v6613_v59, 9  ;;  %v9115_v2 = vcombine.low %v2485_v38, %v2495_v53  ;;  %v2503_v42 = vor.u32 %v2502_v18, %v2499_v20  ;;  %v6731_v18 = vld [vmem:[%s7973_s22 + $0x24] sm:$0xf] }
  0xc7   : > { %7600 = vmatprep.mubr.msk.bf16.mxu0 %vm838_vm1, %v9020_v1  ;;  %v2518_v17 = vrot.slane %v2516_v4, 5  ;;  %v3057_v58 = vrot.slane %v9092_v61, 5  ;;  %v2513_v28 = vor.u32 %v2512_v22, %v2508_v26  ;;  %v3060_v7 = vrot.slane %v9103_v55, 5 }
  0xc8   : > { %v2521_v52 = vshrl.u32 %v6556_v48, 16  ;;  %v2524_v5 = vshll.u32 %v6556_v48, 16  ;;  %v2504_v1 = vrot.slane %v2503_v42, 4  ;;  %v2530_v29 = vshll.u32 %v9027_v63, 16 }
  0xc9   : > { %v3058_v56 = vsel %vm8287_vm7, %v6629_v15, %v3057_v58  ;;  %v3059_v0 = vrot.slane %v3057_v58, 4  ;;  %7643 = vmatmul.mubr.msk.bf16.gmra.mxu1 %vm838_vm1, %v6644_v54  ;;  %v2514_v6 = vrot.slane %v2513_v28, 4  ;;  %v2534_v12 = vshrl.u32 %v9027_v63, 16  ;;  %v6730_v63 = vld [vmem:[%s7973_s22 + $0x20] sm:$0x1] }
  0xca   : > { %v2523_v35 = vrot.slane %v2521_v52, 4  ;;  %v2526_v24 = vrot.slane %v2524_v5, 5  ;;  %7646 = vmatprep.mubr.msk.bf16.mxu1 %vm838_vm1, %v6645_v44  ;;  %v2509_v13 = vsel %vm8027_vm4, %v2504_v1, %v2508_v26  ;;  %v2532_v45 = vrot.slane %v2530_v29, 5 }
  0xcb   : > { %v3061_v36 = vsel %vm8287_vm7, %v3059_v0, %v3060_v7  ;;  %v2540_v62 = vshll.u32 %v9037_v33, 16  ;;  %v2519_v32 = vsel %vm8027_vm4, %v2514_v6, %v2518_v17  ;;  %v2536_v60 = vrot.slane %v2534_v12, 4  ;;  %v9150_v17 = vld [vmem:[%s7973_s22 + $0x28] sm:$0xf] }
  0xcc   : > { %v6646_v11 = vcombine.low %v3058_v56, %v3061_v36  ;;  %v2527_v54 = vor.u32 %v2526_v24, %v2523_v35  ;;  %v6578_v34 = vcombine.low %v2509_v13, %v2519_v32  ;;  %v3764_v16 = vshrl.u32 %v6728_v25, 16  ;;  %v9157_v56 = vld [vmem:[%s7973_s22 + $0x2c] sm:$0x1]  ;;  %v6562_v36 = vld [vmem:[%s7973_s22 + $0xc0] sm:$0xf] }
  0xcd   : > { %v2542_v40 = vrot.slane %v2540_v62, 5  ;;  %v3767_v19 = vshll.u32 %v6728_v25, 16  ;;  %v2537_v51 = vor.u32 %v2536_v60, %v2532_v45  ;;  %v3773_v39 = vshll.u32 %v6729_v50, 16 }
  0xce   : > { %7601 = vmatmul.mubr.msk.bf16.gmra.mxu0 %vm838_vm1, %v9053_v57  ;;  %v2528_v33 = vrot.slane %v2527_v54, 4  ;;  %v3777_v41 = vshrl.u32 %v6729_v50, 16  ;;  %v3766_v8 = vrot.slane %v3764_v16, 4  ;;  %v3783_v21 = vshll.u32 %v6730_v63, 16 }
  0xcf   : > { %7604 = vmatprep.mubr.msk.bf16.mxu0 %vm838_vm1, %v9083_v30  ;;  %v3769_v27 = vrot.slane %v3767_v19, 5  ;;  %v2545_v14 = vshrl.u32 %v6559_v43, 16  ;;  %v2538_v57 = vrot.slane %v2537_v51, 4  ;;  %v3775_v38 = vrot.slane %v3773_v39, 5 }
  0xd0   : > { %v2533_v59 = vsel %vm8027_vm4, %v2528_v33, %v2532_v45  ;;  %v3779_v10 = vrot.slane %v3777_v41, 4  ;;  %v3785_v31 = vrot.slane %v3783_v21, 5  ;;  %v2548_v30 = vshll.u32 %v6559_v43, 16  ;;  %v6734_v33 = vld [vmem:[%s7973_s22 + $0x30] sm:$0xf] }
  0xd1   : > { %v3770_v20 = vor.u32 %v3769_v27, %v3766_v8  ;;  %v2547_v3 = vrot.slane %v2545_v14, 4  ;;  %7647 = vmatmul.mubr.msk.bf16.gmra.mxu1 %vm838_vm1, %v6646_v11  ;;  %v2543_v26 = vsel %vm8027_vm4, %v2538_v57, %v2542_v40  ;;  %v2554_v48 = vshll.u32 %v9058_v23, 16 }
  0xd2   : > { %v3780_v4 = vor.u32 %v3779_v10, %v3775_v38  ;;  %v2558_v53 = vshrl.u32 %v9058_v23, 16  ;;  %v6579_v44 = vcombine.low %v2533_v59, %v2543_v26  ;;  %v2550_v15 = vrot.slane %v2548_v30, 5  ;;  %v6736_v30 = vld [vmem:[%s7973_s22 + $0x38] sm:$0x1] }
  0xd3   : > { %v3771_v22 = vrot.slane %v3770_v20, 4  ;;  %v2564_v42 = vshll.u32 %v9077_v37, 16  ;;  %v2556_v28 = vrot.slane %v2554_v48, 5  ;;  %v3788_v52 = vshrl.u32 %v6731_v18, 16 }
  0xd4   : > { %v3781_v58 = vrot.slane %v3780_v4, 4  ;;  %v2560_v7 = vrot.slane %v2558_v53, 4  ;;  %v2551_v1 = vor.u32 %v2550_v15, %v2547_v3  ;;  %v3791_v0 = vshll.u32 %v6731_v18, 16 }
  0xd5   : > { %v3776_v5 = vsel %vm8027_vm4, %v3771_v22, %v3775_v38  ;;  %v2566_v23 = vrot.slane %v2564_v42, 5  ;;  %v3790_v6 = vrot.slane %v3788_v52, 4  ;;  %v3797_v35 = vshll.u32 %v9150_v17, 16  ;;  %v6735_v38 = vld [vmem:[%s7973_s22 + $0x34] sm:$0xf] }
  0xd6   : > { %7605 = vmatmul.mubr.msk.bf16.gmra.mxu0 %vm838_vm1, %v9115_v2  ;;  %v3786_v37 = vsel %vm8027_vm4, %v3781_v58, %v3785_v31  ;;  %v2561_v29 = vor.u32 %v2560_v7, %v2556_v28  ;;  %v9163_v2 = vpop.f32.mrf.mxu1  ;;  %v2552_v12 = vrot.slane %v2551_v1, 4  ;;  %v3793_v25 = vrot.slane %v3791_v0, 5 }
  0xd7   : > { %7608 = vmatprep.mubr.msk.bf16.mxu0 %vm838_vm1, %v6578_v34  ;;  %v6777_v24 = vcombine.low %v3776_v5, %v3786_v37  ;;  %v3801_v13 = vshrl.u32 %v9150_v17, 16  ;;  %v3799_v62 = vrot.slane %v3797_v35, 5  ;;  %v3807_v50 = vshll.u32 %v9157_v56, 16  ;;  %v6738_v5 = vld [vmem:[%s7973_s22 + $0x40] sm:$0xf] }
  0xd8   : > { %v2562_v45 = vrot.slane %v2561_v29, 4  ;;  %v2557_v11 = vsel %vm8027_vm4, %v2552_v12, %v2556_v28  ;;  %v3794_v54 = vor.u32 %v3793_v25, %v3790_v6  ;;  %v9173_v43 = vpop.f32.mrf.mxu1  ;;  %v2569_v16 = vshrl.u32 %v6562_v36, 16  ;;  %v9203_v12 = vld [vmem:[%s7973_s22 + $0x44] sm:$0x1] }
  0xd9   : > { %7686 = vmatprep.mubr.msk.bf16.mxu1 %vm838_vm1, %v6777_v24  ;;  %v3803_v60 = vrot.slane %v3801_v13, 4  ;;  %v3809_v40 = vrot.slane %v3807_v50, 5  ;;  %v2572_v19 = vshll.u32 %v6562_v36, 16  ;;  %v2578_v8 = vshll.u32 %v9092_v61, 16 }
  0xda   : > { %v2567_v34 = vsel %vm8027_vm4, %v2562_v45, %v2566_v23  ;;  %v3795_v39 = vrot.slane %v3794_v54, 4  ;;  %v9179_v27 = vpop.f32.mrf.mxu1  ;;  %v2571_v21 = vrot.slane %v2569_v16, 4  ;;  %v2582_v59 = vshrl.u32 %v9092_v61, 16 }
  0xdb   : > { %v6580_v51 = vcombine.low %v2557_v11, %v2567_v34  ;;  %v3804_v41 = vor.u32 %v3803_v60, %v3799_v62  ;;  %v2574_v14 = vrot.slane %v2572_v19, 5  ;;  %v2588_v57 = vshll.u32 %v9103_v55, 16  ;;  %v6737_v55 = vld [vmem:[%s7973_s22 + $0x3c] sm:$0xf] }
  0xdc   : > { %v3800_v10 = vsel %vm8027_vm4, %v3795_v39, %v3799_v62  ;;  %v2580_v31 = vrot.slane %v2578_v8, 5  ;;  %v9187_v3 = vpop.f32.mrf.mxu1  ;;  %v3812_v18 = vshrl.u32 %v6734_v33, 16  ;;  %v2584_v4 = vrot.slane %v2582_v59, 4  ;;  %v7837_v60 = vld [vmem:[%s7973_s22 + $0x18] sm:$0xff]   ;;  %v6740_v59 = vld [vmem:[%s7973_s22 + $0x48] sm:$0xf] }
  0xdd   : > { %v3805_v20 = vrot.slane %v3804_v41, 4  ;;  %v2575_v26 = vor.u32 %v2574_v14, %v2571_v21  ;;  %v2590_v61 = vrot.slane %v2588_v57, 5  ;;  %v3815_v48 = vshll.u32 %v6734_v33, 16  ;;  %v6741_v57 = vld [vmem:[%s7973_s22 + $0x4c] sm:$0xf] }
  0xde   : > { %7609 = vmatmul.mubr.msk.bf16.gmra.mxu0 %vm838_vm1, %v6579_v44  ;;  %v3814_v44 = vrot.slane %v3812_v18, 4  ;;  %v3821_v22 = vshll.u32 %v6735_v38, 16  ;;  %v3825_v15 = vshrl.u32 %v6735_v38, 16  ;;  %v9194_v42 = vpop.f32.mrf.mxu1  ;;  %v2585_v7 = vor.u32 %v2584_v4, %v2580_v31  ;;  %v6742_v18 = vld [vmem:[%s7973_s22 + $0x50] sm:$0x1] }
  0xdf   : > { %7612 = vmatprep.mubr.msk.bf16.mxu0 %vm838_vm1, %v6580_v51  ;;  %v3810_v53 = vsel %vm8027_vm4, %v3805_v20, %v3809_v40  ;;  %v2576_v28 = vrot.slane %v2575_v26, 4  ;;  %v3817_v52 = vrot.slane %v3815_v48, 5  ;;  %v3831_v0 = vshll.u32 %v6736_v30, 16 }
  0xe0   : > { %v6778_v58 = vcombine.low %v3800_v10, %v3810_v53  ;;  %v3823_v1 = vrot.slane %v3821_v22, 5  ;;  %v3827_v23 = vrot.slane %v3825_v15, 4  ;;  %v3836_v37 = vshrl.u32 %v6737_v55, 16  ;;  %v9197_v29 = vpop.f32.mrf.mxu1 }
  0xe1   : > { %v2581_v6 = vsel %vm8027_vm4, %v2576_v28, %v2580_v31  ;;  %v2586_v35 = vrot.slane %v2585_v7, 4  ;;  %v3818_v24 = vor.u32 %v3817_v52, %v3814_v44  ;;  %v3839_v25 = vshll.u32 %v6737_v55, 16 }
  0xe2   : > { %7687 = vmatmul.mubr.msk.bf16.vlgmr.msra.gmra.mxu1 %vm838_vm1, %v6778_v58  ;;  %v3828_v13 = vor.u32 %v3827_v23, %v3823_v1  ;;  %v3833_v36 = vrot.slane %v3831_v0, 5  ;;  %v3838_v45 = vrot.slane %v3836_v37, 4  ;;  %v3845_v62 = vshll.u32 %v6738_v5, 16  ;;  %v9205_v50 = vpop.f32.mrf.mxu1 }
  0xe3   : > { %v2591_v11 = vsel %vm8027_vm4, %v2586_v35, %v2590_v61  ;;  %v3819_v54 = vrot.slane %v3818_v24, 4  ;;  %v3841_v34 = vrot.slane %v3839_v25, 5  ;;  %v3849_v40 = vshrl.u32 %v6738_v5, 16  ;;  %v6744_v35 = vld [vmem:[%s7973_s22 + $0x58] sm:$0xf] }
  0xe4   : > { %v6581_v16 = vcombine.low %v2581_v6, %v2591_v11  ;;  %v3829_v19 = vrot.slane %v3828_v13, 4  ;;  %v3847_v33 = vrot.slane %v3845_v62, 5  ;;  %v3855_v51 = vshll.u32 %v9203_v12, 16  ;;  %v9211_v39 = vpop.f32.mrf.mxu1 }
  0xe5   : > { %v3824_v41 = vsel %vm8027_vm4, %v3819_v54, %v3823_v1  ;;  %v3842_v8 = vor.u32 %v3841_v34, %v3838_v45  ;;  %v3851_v21 = vrot.slane %v3849_v40, 4  ;;  %v4716_v31 = vsel %vm887_vm0, %v8962_v47, 0  ;;  %v7839_v45 = vld [vmem:[%s7973_s22 + $0x30] sm:$0xff]  }
  0xe6   : > { %7613 = vmatmul.mubr.msk.bf16.gmra.mxu0 %vm838_vm1, %v6581_v16  ;;  %v3834_v38 = vsel %vm8027_vm4, %v3829_v19, %v3833_v36  ;;  %v3857_v10 = vrot.slane %v3855_v51, 5  ;;  %v7450_v20 = vpop.f32.mrf.mxu0  ;;  %v5709_v30 = vsel %vm887_vm0, %v8825_v49, 0  ;;  %v9226_v26 = vpop.f32.mrf.mxu1  ;;  %v3860_v44 = vshrl.u32 %v6740_v59, 16  ;;  %v6743_v49 = vld [vmem:[%s7973_s22 + $0x54] sm:$0xf] }
  0xe7   : > { %v6779_v4 = vcombine.low %v3824_v41, %v3834_v38  ;;  %7652 = vmatprep.mubr.msk.bf16.mxu0 %vm838_vm1, %v7837_v60  ;;  %v3843_v61 = vrot.slane %v3842_v8, 4  ;;  %v3852_v48 = vor.u32 %v3851_v21, %v3847_v33  ;;  %v9230_v55 = vadd.f32 %v9163_v2, %v7450_v20  ;;  %7753 = vmatpush3.bf16.msra.mxu1 %v5709_v30  ;;  %v7838_v2 = vld [vmem:[%s7973_s22 + $0x24] sm:$0xff]   ;;  %v6746_v19 = vld [vmem:[%s7973_s22 + $0x60] sm:$0xf] }
  0xe8   : > { %v925_v53 = vpop.f32.mrf.mxu0  ;;  %v3863_v22 = vshll.u32 %v6740_v59, 16  ;;  %v3869_v47 = vshll.u32 %v6741_v57, 16  ;;  %v3873_v15 = vshrl.u32 %v6741_v57, 16  ;;  %v9233_v58 = vpop.f32.mrf.mxu1  ;;  %v3879_v5 = vshll.u32 %v6742_v18, 16  ;;  %v6747_v30 = vld [vmem:[%s7973_s22 + $0x64] sm:$0xf] }
  0xe9   : > { %7690 = vmatprep.mubr.msk.bf16.mxu1 %vm838_vm1, %v6779_v4  ;;  %v3848_v28 = vsel %vm8027_vm4, %v3843_v61, %v3847_v33  ;;  %v3853_v7 = vrot.slane %v3852_v48, 4  ;;  %v9240_v52 = vadd.f32 %v9173_v43, %v925_v53  ;;  %v3862_v23 = vrot.slane %v3860_v44, 4  ;;  %v9252_v43 = vld [vmem:[%s7973_s22 + $0x5c] sm:$0x1] }
  0xea   : > { %v7451_v1 = vpop.f32.mrf.mxu0  ;;  %v3865_v0 = vrot.slane %v3863_v22, 5  ;;  %v3871_v37 = vrot.slane %v3869_v47, 5  ;;  %v3875_v6 = vrot.slane %v3873_v15, 4  ;;  %v9243_v24 = vpop.f32.mrf.mxu1  ;;  %v3881_v36 = vrot.slane %v3879_v5, 5  ;;  %v6748_v22 = vld [vmem:[%s7973_s22 + $0x68] sm:$0x1] }
  0xeb   : > { %v3858_v25 = vsel %vm8027_vm4, %v3853_v7, %v3857_v10  ;;  %v9248_v13 = vadd.f32 %v9179_v27, %v7451_v1  ;;  %v3884_v62 = vshrl.u32 %v6743_v49, 16  ;;  %v3887_v40 = vshll.u32 %v6743_v49, 16  ;;  %v7840_v5 = vld [vmem:[%s7973_s22 + $0x3c] sm:$0xff]  }
  0xec   : > { %v6780_v11 = vcombine.low %v3848_v28, %v3858_v25  ;;  %v928_v54 = vpop.f32.mrf.mxu0  ;;  %v3866_v60 = vor.u32 %v3865_v0, %v3862_v23  ;;  %v3876_v34 = vor.u32 %v3875_v6, %v3871_v37  ;;  %v9254_v16 = vpop.f32.mrf.mxu1  ;;  %v3893_v27 = vshll.u32 %v6744_v35, 16 }
  0xed   : > { %v9258_v33 = vadd.f32 %v9187_v3, %v928_v54  ;;  %v3886_v51 = vrot.slane %v3884_v62, 4  ;;  %v3897_v41 = vshrl.u32 %v6744_v35, 16  ;;  %v3889_v59 = vrot.slane %v3887_v40, 5 }
  0xee   : > { %7691 = vmatmul.mubr.msk.bf16.gmra.mxu1 %vm838_vm1, %v6780_v11  ;;  %7653 = vmatmul.mubr.msk.bf16.vlgmr.msra.gmra.mxu0 %vm838_vm1, %v7838_v2  ;;  %v3867_v8 = vrot.slane %v3866_v60, 4  ;;  %v3877_v21 = vrot.slane %v3876_v34, 4  ;;  %v3903_v57 = vshll.u32 %v9252_v43, 16  ;;  %v9263_v38 = vpop.f32.mrf.mxu1  ;;  %v3895_v3 = vrot.slane %v3893_v27, 5 }
  0xef   : > { %7719 = vmatpush3.bf16.msra.mxu0 %v4716_v31  ;;  %7656 = vmatprep.mubr.msk.bf16.mxu0 %vm838_vm1, %v7839_v45  ;;  %v3899_v10 = vrot.slane %v3897_v41, 4  ;;  %v3908_v18 = vshrl.u32 %v6746_v19, 16  ;;  %v3890_v48 = vor.u32 %v3889_v59, %v3886_v51  ;;  %v6749_v31 = vld [vmem:[%s7973_s22 + $0x6c] sm:$0xf]  ;;  %v3911_v23 = vshll.u32 %v6746_v19, 16 }
  0xf0   : > { %v3872_v4 = vsel %vm8027_vm4, %v3867_v8, %v3871_v37  ;;  %v3882_v61 = vsel %vm8027_vm4, %v3877_v21, %v3881_v36  ;;  %v3905_v53 = vrot.slane %v3903_v57, 5  ;;  %v7454_v44 = vpop.f32.mrf.mxu0  ;;  %v9274_v47 = vpop.f32.mrf.mxu1  ;;  %v3917_v0 = vshll.u32 %v6747_v30, 16  ;;  %v7841_v45 = vld [vmem:[%s7973_s22 + $0x48] sm:$0xff]   ;;  %v9291_v19 = vld [vmem:[%s7973_s22 + $0x74] sm:$0x1] }
  0xf1   : > { %v6781_v15 = vcombine.low %v3872_v4, %v3882_v61  ;;  %v3900_v49 = vor.u32 %v3899_v10, %v3895_v3  ;;  %v9277_v28 = vadd.f32 %v9194_v42, %v7454_v44  ;;  %v3910_v7 = vrot.slane %v3908_v18, 4  ;;  %v6750_v42 = vld [vmem:[%s7973_s22 + $0x70] sm:$0xf] }
  0xf2   : > { %v3891_v2 = vrot.slane %v3890_v48, 4  ;;  %v941_v1 = vpop.f32.mrf.mxu0  ;;  %v3921_v37 = vshrl.u32 %v6747_v30, 16  ;;  %v9280_v6 = vpop.f32.mrf.mxu1  ;;  %v3927_v36 = vshll.u32 %v6748_v22, 16  ;;  %v3932_v62 = vshrl.u32 %v6749_v31, 16  ;;  %v6752_v48 = vld [vmem:[%s7973_s22 + $0x78] sm:$0xf] }
  0xf3   : > { %7694 = vmatprep.mubr.msk.bf16.mxu1 %vm838_vm1, %v6781_v15  ;;  %v3901_v35 = vrot.slane %v3900_v49, 4  ;;  %v9284_v25 = vadd.f32 %v9197_v29, %v941_v1  ;;  %v3913_v60 = vrot.slane %v3911_v23, 5  ;;  %v3919_v34 = vrot.slane %v3917_v0, 5  ;;  %v6753_v1 = vld [vmem:[%s7973_s22 + $0x7c] sm:$0xf] }
  0xf4   : > { %v3896_v11 = vsel %vm8027_vm4, %v3891_v2, %v3895_v3  ;;  %v7455_v54 = vpop.f32.mrf.mxu0  ;;  %v3923_v40 = vrot.slane %v3921_v37, 4  ;;  %v9293_v51 = vpop.f32.mrf.mxu1  ;;  %v3929_v41 = vrot.slane %v3927_v36, 5  ;;  %v3934_v8 = vrot.slane %v3932_v62, 4 }
  0xf5   : > { %v3906_v27 = vsel %vm8027_vm4, %v3901_v35, %v3905_v53  ;;  %v9298_v29 = vadd.f32 %v9205_v50, %v7455_v54  ;;  %v3914_v57 = vor.u32 %v3913_v60, %v3910_v7  ;;  %v3935_v10 = vshll.u32 %v6749_v31, 16  ;;  %v7842_v35 = vld [vmem:[%s7973_s22 + $0x54] sm:$0xff]  }
  0xf6   : > { %v6782_v21 = vcombine.low %v3896_v11, %v3906_v27  ;;  %7657 = vmatmul.mubr.msk.bf16.gmra.mxu0 %vm838_vm1, %v7840_v5  ;;  %v944_v59 = vpop.f32.mrf.mxu0  ;;  %v3924_v3 = vor.u32 %v3923_v40, %v3919_v34  ;;  %v9301_v30 = vpop.f32.mrf.mxu1  ;;  %v3941_v4 = vshll.u32 %v6750_v42, 16  ;;  %v3945_v50 = vshrl.u32 %v6750_v42, 16  ;;  %v7843_v40 = vld [vmem:[%s7973_s22 + $0x60] sm:$0xff]  }
  0xf7   : > { %v9304_v18 = vadd.f32 %v9211_v39, %v944_v59  ;;  %7660 = vmatprep.mubr.msk.bf16.mxu0 %vm838_vm1, %v7841_v45  ;;  %v3951_v61 = vshll.u32 %v9291_v19, 16  ;;  %v3915_v53 = vrot.slane %v3914_v57, 4  ;;  %v3937_v22 = vrot.slane %v3935_v10, 5  ;;  %v6754_v45 = vld [vmem:[%s7973_s22 + $0x80] sm:$0x1] }
  0xf8   : > { %7695 = vmatmul.mubr.msk.bf16.gmra.mxu1 %vm838_vm1, %v6782_v21  ;;  %v3925_v44 = vrot.slane %v3924_v3, 4  ;;  %v7458_v15 = vpop.f32.mrf.mxu0  ;;  %v9311_v39 = vpop.f32.mrf.mxu1  ;;  %v3943_v49 = vrot.slane %v3941_v4, 5  ;;  %v3947_v7 = vrot.slane %v3945_v50, 4  ;;  %v3956_v42 = vshrl.u32 %v6752_v48, 16  ;;  %v6755_v27 = vld [vmem:[%s7973_s22 + $0x84] sm:$0xf] }
  0xf9   : > { %v3953_v2 = vrot.slane %v3951_v61, 5  ;;  %v9314_v5 = vadd.f32 %v9226_v26, %v7458_v15  ;;  %v3920_v23 = vsel %vm8027_vm4, %v3915_v53, %v3919_v34  ;;  %v3938_v37 = vor.u32 %v3937_v22, %v3934_v8  ;;  %v6756_v50 = vld [vmem:[%s7973_s22 + $0x88] sm:$0xf]  ;;  %v6757_v22 = vld [vmem:[%s7973_s22 + $0x8c] sm:$0x1] }
  0xfa   : > { %v3930_v0 = vsel %vm8027_vm4, %v3925_v44, %v3929_v41  ;;  %v957_v36 = vpop.f32.mrf.mxu0  ;;  %v9323_v62 = vpop.f32.mrf.mxu1  ;;  %v3948_v54 = vor.u32 %v3947_v7, %v3943_v49  ;;  %v3959_v60 = vshll.u32 %v6752_v48, 16  ;;  %v3958_v41 = vrot.slane %v3956_v42, 4 }
  0xfb   : > { %v6783_v11 = vcombine.low %v3920_v23, %v3930_v0  ;;  %v9326_v26 = vadd.f32 %v9233_v58, %v957_v36  ;;  %v3939_v34 = vrot.slane %v3938_v37, 4  ;;  %v3965_v8 = vshll.u32 %v6753_v1, 16  ;;  %v6758_v0 = vld [vmem:[%s7973_s22 + $0x90] sm:$0xf] }
  0xfc   : > { %v7459_v21 = vpop.f32.mrf.mxu0  ;;  %v3969_v59 = vshrl.u32 %v6753_v1, 16  ;;  %v9330_v57 = vpop.f32.mrf.mxu1  ;;  %v3949_v3 = vrot.slane %v3948_v54, 4  ;;  %v3961_v58 = vrot.slane %v3959_v60, 5  ;;  %v3975_v4 = vshll.u32 %v6754_v45, 16 }
  0xfd   : > { %7698 = vmatprep.mubr.msk.bf16.mxu1 %vm838_vm1, %v6783_v11  ;;  %v9334_v10 = vadd.f32 %v9243_v24, %v7459_v21  ;;  %v3944_v61 = vsel %vm8027_vm4, %v3939_v34, %v3943_v49  ;;  %v3967_v53 = vrot.slane %v3965_v8, 5  ;;  %v3980_v15 = vshrl.u32 %v6755_v27, 16 }
  0xfe   : > { %7661 = vmatmul.mubr.msk.bf16.gmra.mxu0 %vm838_vm1, %v7842_v35  ;;  %v960_v48 = vpop.f32.mrf.mxu0  ;;  %v3971_v44 = vrot.slane %v3969_v59, 4  ;;  %v3954_v7 = vsel %vm8027_vm4, %v3949_v3, %v3953_v2  ;;  %v3962_v1 = vor.u32 %v3961_v58, %v3958_v41  ;;  %v3977_v23 = vrot.slane %v3975_v4, 5  ;;  %v6759_v41 = vld [vmem:[%s7973_s22 + $0x94] sm:$0xf] }
  0xff   : > { %v9344_v24 = vadd.f32 %v9254_v16, %v960_v48  ;;  %7664 = vmatprep.mubr.msk.bf16.mxu0 %vm838_vm1, %v7843_v40  ;;  %v9348_v49 = vpop.f32.mrf.mxu1  ;;  %v6784_v37 = vcombine.low %v3944_v61, %v3954_v7  ;;  %v3982_v36 = vrot.slane %v3980_v15, 4  ;;  %v3983_v45 = vshll.u32 %v6755_v27, 16  ;;  %v7844_v16 = vld [vmem:[%s7973_s22 + $0x6c] sm:$0xff]   ;;  %v7845_v61 = vld [vmem:[%s7973_s22 + $0x78] sm:$0xff]  }
 0x100   : > { %v3972_v35 = vor.u32 %v3971_v44, %v3967_v53  ;;  %v3963_v42 = vrot.slane %v3962_v1, 4  ;;  %v3989_v11 = vshll.u32 %v6756_v50, 16  ;;  %v3993_v54 = vshrl.u32 %v6756_v50, 16  ;;  %v6760_v50 = vld [vmem:[%s7973_s22 + $0x98] sm:$0x1] }
 0x101   : > { %v3999_v2 = vshll.u32 %v6757_v22, 16  ;;  %v9351_v60 = vpop.f32.mrf.mxu1  ;;  %7699 = vmatmul.mubr.msk.bf16.gmra.mxu1 %vm838_vm1, %v6784_v37  ;;  %v3985_v34 = vrot.slane %v3983_v45, 5  ;;  %v7462_v21 = vpop.f32.mrf.mxu0  ;;  %v4004_v8 = vshrl.u32 %v6758_v0, 16  ;;  %v4007_v59 = vshll.u32 %v6758_v0, 16  ;;  %v6761_v0 = vld [vmem:[%s7973_s22 + $0x9c] sm:$0xf] }
 0x102   : > { %v3973_v40 = vrot.slane %v3972_v35, 4  ;;  %v3968_v27 = vsel %vm8027_vm4, %v3963_v42, %v3967_v53  ;;  %v3991_v3 = vrot.slane %v3989_v11, 5  ;;  %v3995_v58 = vrot.slane %v3993_v54, 4 }
 0x103   : > { %v4001_v4 = vrot.slane %v3999_v2, 5  ;;  %v9359_v48 = vpop.f32.mrf.mxu1  ;;  %v3986_v22 = vor.u32 %v3985_v34, %v3982_v36  ;;  %v9364_v15 = vadd.f32 %v9263_v38, %v7462_v21  ;;  %v973_v7 = vpop.f32.mrf.mxu0  ;;  %v4006_v1 = vrot.slane %v4004_v8, 4  ;;  %v6762_v34 = vld [vmem:[%s7973_s22 + $0xa0] sm:$0xf] }
 0x104   : > { %v3978_v44 = vsel %vm8027_vm4, %v3973_v40, %v3977_v23  ;;  %v3996_v53 = vor.u32 %v3995_v58, %v3991_v3  ;;  %v9368_v35 = vadd.f32 %v9274_v47, %v973_v7  ;;  %v4009_v45 = vrot.slane %v4007_v59, 5  ;;  %v6763_v58 = vld [vmem:[%s7973_s22 + $0xa4] sm:$0x1]  ;;  %v6764_v7 = vld [vmem:[%s7973_s22 + $0xa8] sm:$0xf] }
 0x105   : > { %v6785_v37 = vcombine.low %v3968_v27, %v3978_v44  ;;  %v9370_v42 = vpop.f32.mrf.mxu1  ;;  %v3987_v11 = vrot.slane %v3986_v22, 4  ;;  %v7463_v23 = vpop.f32.mrf.mxu0  ;;  %v4013_v36 = vshll.u32 %v6759_v41, 16  ;;  %v4017_v38 = vshrl.u32 %v6759_v41, 16 }
 0x106   : > { %7665 = vmatmul.mubr.msk.bf16.gmra.mxu0 %vm838_vm1, %v7844_v16  ;;  %v4023_v54 = vshll.u32 %v6760_v50, 16  ;;  %v3997_v2 = vrot.slane %v3996_v53, 4  ;;  %v9375_v40 = vadd.f32 %v9280_v6, %v7463_v23  ;;  %v4010_v47 = vor.u32 %v4009_v45, %v4006_v1 }
 0x107   : > { %7702 = vmatprep.mubr.msk.bf16.mxu1 %vm838_vm1, %v6785_v37  ;;  %7668 = vmatprep.mubr.msk.bf16.mxu0 %vm838_vm1, %v7845_v61  ;;  %v4028_v21 = vshrl.u32 %v6761_v0, 16  ;;  %v3992_v16 = vsel %vm8027_vm4, %v3987_v11, %v3991_v3  ;;  %v976_v8 = vpop.f32.mrf.mxu0  ;;  %v4015_v59 = vrot.slane %v4013_v36, 5  ;;  %v4019_v41 = vrot.slane %v4017_v38, 4  ;;  %v7846_v11 = vld [vmem:[%s7973_s22 + $0x84] sm:$0xff]  }
 0x108   : > { %v4025_v27 = vrot.slane %v4023_v54, 5  ;;  %v9382_v50 = vpop.f32.mrf.mxu1  ;;  %v4002_v6 = vsel %vm8027_vm4, %v3997_v2, %v4001_v4  ;;  %v9387_v44 = vadd.f32 %v9293_v51, %v976_v8  ;;  %v4011_v61 = vrot.slane %v4010_v47, 4  ;;  %v6765_v54 = vld [vmem:[%s7973_s22 + $0xac] sm:$0xf]  ;;  %v7847_v2 = vld [vmem:[%s7973_s22 + $0x90] sm:$0xff]  }
 0x109   : > { %v4030_v22 = vrot.slane %v4028_v21, 4  ;;  %v6786_v3 = vcombine.low %v3992_v16, %v4002_v6  ;;  %v4020_v1 = vor.u32 %v4019_v41, %v4015_v59  ;;  %v4031_v37 = vshll.u32 %v6761_v0, 16 }
 0x10a   : > { %v4037_v53 = vshll.u32 %v6762_v34, 16  ;;  %v7466_v45 = vpop.f32.mrf.mxu0  ;;  %v9391_v23 = vpop.f32.mrf.mxu1  ;;  %v4016_v36 = vsel %vm8027_vm4, %v4011_v61, %v4015_v59  ;;  %v4041_v4 = vshrl.u32 %v6762_v34, 16  ;;  %v4047_v38 = vshll.u32 %v6763_v58, 16  ;;  %v6766_v58 = vld [vmem:[%s7973_s22 + $0xb0] sm:$0x1] }
 0x10b   : > { %v9396_v51 = vadd.f32 %v9301_v30, %v7466_v45  ;;  %7703 = vmatmul.mubr.msk.bf16.gmra.mxu1 %vm838_vm1, %v6786_v3  ;;  %v4021_v47 = vrot.slane %v4020_v1, 4  ;;  %v4033_v0 = vrot.slane %v4031_v37, 5  ;;  %v4052_v8 = vshrl.u32 %v6764_v7, 16 }
 0x10c   : > { %v4039_v21 = vrot.slane %v4037_v53, 5  ;;  %v989_v16 = vpop.f32.mrf.mxu0  ;;  %v9401_v41 = vpop.f32.mrf.mxu1  ;;  %v4043_v6 = vrot.slane %v4041_v4, 4  ;;  %v4049_v59 = vrot.slane %v4047_v38, 5  ;;  %v4055_v30 = vshll.u32 %v6764_v7, 16  ;;  %v6767_v53 = vld [vmem:[%s7973_s22 + $0xb4] sm:$0xf] }
 0x10d   : > { %v9404_v34 = vadd.f32 %v9311_v39, %v989_v16  ;;  %v4026_v61 = vsel %vm8027_vm4, %v4021_v47, %v4025_v27  ;;  %v4034_v45 = vor.u32 %v4033_v0, %v4030_v22  ;;  %v4054_v1 = vrot.slane %v4052_v8, 4  ;;  %v6768_v0 = vld [vmem:[%s7973_s22 + $0xb8] sm:$0xf] }
 0x10e   : > { %7669 = vmatmul.mubr.msk.bf16.gmra.mxu0 %vm838_vm1, %v7846_v11  ;;  %v7467_v3 = vpop.f32.mrf.mxu0  ;;  %v4061_v37 = vshll.u32 %v6765_v54, 16  ;;  %v9411_v31 = vpop.f32.mrf.mxu1  ;;  %v6787_v4 = vcombine.low %v4016_v36, %v4026_v61  ;;  %v4044_v38 = vor.u32 %v4043_v6, %v4039_v21  ;;  %v4057_v16 = vrot.slane %v4055_v30, 5 }
 0x10f   : > { %v9414_v39 = vadd.f32 %v9323_v62, %v7467_v3  ;;  %7672 = vmatprep.mubr.msk.bf16.mxu0 %vm838_vm1, %v7847_v2  ;;  %v4035_v27 = vrot.slane %v4034_v45, 4  ;;  %v4065_v11 = vshrl.u32 %v6765_v54, 16  ;;  %v4071_v47 = vshll.u32 %v6766_v58, 16  ;;  %v6769_v54 = vld [vmem:[%s7973_s22 + $0xbc] sm:$0x1] }
 0x110   : > { %v992_v22 = vpop.f32.mrf.mxu0  ;;  %v4063_v7 = vrot.slane %v4061_v37, 5  ;;  %7706 = vmatprep.mubr.msk.bf16.mxu1 %vm838_vm1, %v6787_v4  ;;  %v4045_v8 = vrot.slane %v4044_v38, 4  ;;  %v4058_v62 = vor.u32 %v4057_v16, %v4054_v1  ;;  %v4076_v6 = vshrl.u32 %v6767_v53, 16  ;;  %v7848_v3 = vld [vmem:[%s7973_s22 + $0x9c] sm:$0xff]   ;;  %v7849_v1 = vld [vmem:[%s7973_s22 + $0xa8] sm:$0xff]  }
 0x111   : > { %v9420_v36 = vadd.f32 %v9330_v57, %v992_v22  ;;  %v9422_v30 = vpop.f32.mrf.mxu1  ;;  %v4040_v2 = vsel %vm8027_vm4, %v4035_v27, %v4039_v21  ;;  %v4067_v61 = vrot.slane %v4065_v11, 4  ;;  %v4073_v45 = vrot.slane %v4071_v47, 5  ;;  %v6770_v22 = vld [vmem:[%s7973_s22 + $0xc0] sm:$0xf]  ;;  %v6771_v11 = vld [vmem:[%s7973_s22 + $0xc4] sm:$0xf] }
 0x112   : > { %v4079_v58 = vshll.u32 %v6767_v53, 16  ;;  %v4050_v37 = vsel %vm8027_vm4, %v4045_v8, %v4049_v59  ;;  %v4059_v4 = vrot.slane %v4058_v62, 4  ;;  %v4078_v38 = vrot.slane %v4076_v6, 4 }
 0x113   : > { %v4085_v57 = vshll.u32 %v6768_v0, 16  ;;  %v9432_v16 = vpop.f32.mrf.mxu1  ;;  %v6788_v20 = vcombine.low %v4040_v2, %v4050_v37  ;;  %v4068_v14 = vor.u32 %v4067_v61, %v4063_v7  ;;  %v4089_v21 = vshrl.u32 %v6768_v0, 16  ;;  %v7470_v27 = vpop.f32.mrf.mxu0 }
 0x114   : > { %v4081_v63 = vrot.slane %v4079_v58, 5  ;;  %v4064_v53 = vsel %vm8027_vm4, %v4059_v4, %v4063_v7  ;;  %v4095_v32 = vshll.u32 %v6769_v54, 16  ;;  %v9438_v59 = vadd.f32 %v9348_v49, %v7470_v27  ;;  %v6772_v54 = vld [vmem:[%s7973_s22 + $0xc8] sm:$0x1]  ;;  %v6774_v27 = vld [vmem:[%s7973_s22 + $0xd0] sm:$0xf] }
 0x115   : > { %v4087_v47 = vrot.slane %v4085_v57, 5  ;;  %v9440_v8 = vpop.f32.mrf.mxu1  ;;  %7707 = vmatmul.mubr.msk.bf16.gmra.mxu1 %vm838_vm1, %v6788_v20  ;;  %v4069_v62 = vrot.slane %v4068_v14, 4  ;;  %v4091_v2 = vrot.slane %v4089_v21, 4  ;;  %v1005_v0 = vpop.f32.mrf.mxu0  ;;  %v4100_v61 = vshrl.u32 %v6770_v22, 16 }
 0x116   : > { %v4082_v6 = vor.u32 %v4081_v63, %v4078_v38  ;;  %7673 = vmatmul.mubr.msk.bf16.gmra.mxu0 %vm838_vm1, %v7848_v3  ;;  %v4097_v58 = vrot.slane %v4095_v32, 5  ;;  %v9445_v7 = vadd.f32 %v9351_v60, %v1005_v0  ;;  %v4103_v49 = vshll.u32 %v6770_v22, 16  ;;  %v6773_v32 = vld [vmem:[%s7973_s22 + $0xcc] sm:$0xf] }
 0x117   : > { %v4109_v37 = vshll.u32 %v6771_v11, 16  ;;  %7676 = vmatprep.mubr.msk.bf16.mxu0 %vm838_vm1, %v7849_v1  ;;  %v9449_v4 = vpop.f32.mrf.mxu1  ;;  %v4074_v63 = vsel %vm8027_vm4, %v4069_v62, %v4073_v45  ;;  %v4092_v20 = vor.u32 %v4091_v2, %v4087_v47  ;;  %v7471_v3 = vpop.f32.mrf.mxu0  ;;  %v4102_v38 = vrot.slane %v4100_v61, 4  ;;  %v7850_v61 = vld [vmem:[%s7973_s22 + $0xb4] sm:$0xff]  }
 0x118   : > { %10492 = vst [vmem:[#allocation2_spill] sm:$0xff] %v9445_v7  ;;  %v4083_v14 = vrot.slane %v4082_v6, 4  ;;  %v6789_v60 = vcombine.low %v4064_v53, %v4074_v63  ;;  %v9455_v57 = vadd.f32 %v9359_v48, %v7471_v3  ;;  %v4105_v22 = vrot.slane %v4103_v49, 5  ;;  %v6775_v49 = vld [vmem:[%s7973_s22 + $0xd4] sm:$0x1] }
 0x119   : > { %v4111_v21 = vrot.slane %v4109_v37, 5  ;;  %v9458_v1 = vpop.f32.mrf.mxu1  ;;  %v4093_v45 = vrot.slane %v4092_v20, 4  ;;  %v1008_v62 = vpop.f32.mrf.mxu0  ;;  %v4113_v6 = vshrl.u32 %v6771_v11, 16  ;;  %v4119_v2 = vshll.u32 %v6772_v54, 16 }
 0x11a   : > { %10493 = vst [vmem:[#allocation3_spill] sm:$0xff] %v9455_v57  ;;  %10494 = vst [vmem:[#allocation4_spill] sm:$0xff] %v9458_v1  ;;  %v4088_v0 = vsel %vm8027_vm4, %v4083_v14, %v4087_v47  ;;  %7710 = vmatprep.mubr.msk.bf16.mxu1 %vm838_vm1, %v6789_v60  ;;  %v9465_v53 = vadd.f32 %v9370_v42, %v1008_v62  ;;  %v4106_v48 = vor.u32 %v4105_v22, %v4102_v38  ;;  %v7851_v1 = vld [vmem:[%s7973_s22 + $0xc0] sm:$0xff]  }
 0x11b   : > { %v4124_v37 = vshrl.u32 %v6773_v32, 16  ;;  %v4127_v63 = vshll.u32 %v6773_v32, 16  ;;  %v9468_v3 = vpop.f32.mrf.mxu1  ;;  %v4098_v47 = vsel %vm8027_vm4, %v4093_v45, %v4097_v58  ;;  %v4115_v14 = vrot.slane %v4113_v6, 4  ;;  %v6907_v45 = vld [vmem:[%s7973_s22 + $0x10] sm:$0xf] }
 0x11c   : > { %10495 = vst [vmem:[#allocation5_spill] sm:$0xff] %v9465_v53  ;;  %10496 = vst [vmem:[#allocation6_spill] sm:$0xff] %v9468_v3  ;;  %v4121_v20 = vrot.slane %v4119_v2, 5  ;;  %v4133_v11 = vshll.u32 %v6774_v27, 16  ;;  %v7474_v54 = vpop.f32.mrf.mxu0  ;;  %v6790_v60 = vcombine.low %v4088_v0, %v4098_v47  ;;  %v4107_v57 = vrot.slane %v4106_v48, 4 }
 0x11d   : > { %v4126_v42 = vrot.slane %v4124_v37, 4  ;;  %v4129_v62 = vrot.slane %v4127_v63, 5  ;;  %v6906_v53 = vld [vmem:[%s7973_s22 + $0xc] sm:$0xf]  ;;  %v9474_v38 = vpop.f32.mrf.mxu1  ;;  %v4116_v22 = vor.u32 %v4115_v14, %v4111_v21  ;;  %v4137_v7 = vshrl.u32 %v6774_v27, 16 }
 0x11e   : > { %10497 = vst [vmem:[#allocation7_spill] sm:$0xff] %v9474_v38  ;;  %v4135_v32 = vrot.slane %v4133_v11, 5  ;;  %v4143_v3 = vshll.u32 %v6775_v49, 16  ;;  %7677 = vmatmul.mubr.msk.bf16.gmra.mxu0 %vm838_vm1, %v7850_v61  ;;  %v1021_v58 = vpop.f32.mrf.mxu0  ;;  %7711 = vmatmul.mubr.msk.bf16.gmra.mxu1 %vm838_vm1, %v6790_v60  ;;  %v4112_v0 = vsel %vm8027_vm4, %v4107_v57, %v4111_v21  ;;  %v9482_v2 = vadd.f32 %v9382_v50, %v7474_v54  ;;  %v6908_v50 = vld [vmem:[%s7973_s22 + $0x14] sm:$0x1] }
 0x11f   : > { %v4130_v6 = vor.u32 %v4129_v62, %v4126_v42  ;;  %v9485_v48 = vadd.f32 %v9391_v23, %v1021_v58  ;;  %v9487_v27 = vpop.f32.mrf.mxu1  ;;  %v4117_v49 = vrot.slane %v4116_v22, 4  ;;  %v4139_v61 = vrot.slane %v4137_v7, 4  ;;  %7680 = vmatprep.mubr.msk.bf16.mxu0 %vm838_vm1, %v7851_v1  ;;  %v7852_v23 = vld [vmem:[%s7973_s22 + $0xcc] sm:$0xff]   ;;  %v6909_v22 = vld [vmem:[%s7973_s22 + $0x18] sm:$0xf] }
 0x120   : > { %10498 = vst [vmem:[#allocation8_spill] sm:$0xff] %v9487_v27  ;;  %v4145_v37 = vrot.slane %v4143_v3, 5  ;;  %v7475_v63 = vpop.f32.mrf.mxu0  ;;  %v5228_v47 = vshrl.u32 %v6906_v53, 16  ;;  %v5231_v14 = vshll.u32 %v6906_v53, 16  ;;  %v5237_v11 = vshll.u32 %v6907_v45, 16 }
 0x121   : > { %v4131_v57 = vrot.slane %v4130_v6, 4  ;;  %v9491_v21 = vadd.f32 %v9401_v41, %v7475_v63  ;;  %v9495_v54 = vpop.f32.mrf.mxu1  ;;  %v4122_v7 = vsel %vm8027_vm4, %v4117_v49, %v4121_v20  ;;  %v4140_v3 = vor.u32 %v4139_v61, %v4135_v32  ;;  %v6910_v1 = vld [vmem:[%s7973_s22 + $0x1c] sm:$0xf] }
 0x122   : > { %10500 = vst [vmem:[#allocation10_spill] sm:$0xff] %v9495_v54  ;;  %v1024_v60 = vpop.f32.mrf.mxu0  ;;  %v5230_v42 = vrot.slane %v5228_v47, 4  ;;  %v5241_v62 = vshrl.u32 %v6907_v45, 16  ;;  %v6791_v58 = vcombine.low %v4112_v0, %v4122_v7  ;;  %v5233_v6 = vrot.slane %v5231_v14, 5  ;;  %v6911_v47 = vld [vmem:[%s7973_s22 + $0x20] sm:$0x1] }
 0x123   : > { %10499 = vst [vmem:[#allocation9_spill] sm:$0xff] %v9491_v21  ;;  %v4136_v41 = vsel %vm8027_vm4, %v4131_v57, %v4135_v32  ;;  %v9504_v53 = vadd.f32 %v9411_v31, %v1024_v60  ;;  %v9506_v63 = vpop.f32.mrf.mxu1  ;;  %v4141_v54 = vrot.slane %v4140_v3, 4  ;;  %v5239_v27 = vrot.slane %v5237_v11, 5 }
 0x124   : > { %10501 = vst [vmem:[#allocation11_spill] sm:$0xff] %v9506_v63  ;;  %v5243_v20 = vrot.slane %v5241_v62, 4  ;;  %v5247_v49 = vshll.u32 %v6908_v50, 16  ;;  %v7478_v61 = vpop.f32.mrf.mxu0  ;;  %7714 = vmatprep.mubr.msk.bf16.mxu1 %vm838_vm1, %v6791_v58  ;;  %v5234_v45 = vor.u32 %v5233_v6, %v5230_v42  ;;  %v5252_v38 = vshrl.u32 %v6909_v22, 16 }
 0x125   : > { %v5255_v0 = vshll.u32 %v6909_v22, 16  ;;  %v5261_v7 = vshll.u32 %v6910_v1, 16  ;;  %v9510_v21 = vpop.f32.mrf.mxu1  ;;  %v4146_v31 = vsel %vm8027_vm4, %v4141_v54, %v4145_v37  ;;  %v5265_v14 = vshrl.u32 %v6910_v1, 16  ;;  %v6912_v54 = vld [vmem:[%s7973_s22 + $0x24] sm:$0xf] }
 0x126   : > { %10502 = vst [vmem:[#allocation12_spill] sm:$0xff] %v9510_v21  ;;  %v5244_v32 = vor.u32 %v5243_v20, %v5239_v27  ;;  %v5249_v57 = vrot.slane %v5247_v49, 5  ;;  %7681 = vmatmul.mubr.msk.bf16.gmra.mxu0 %vm838_vm1, %v7852_v23  ;;  %v1037_v50 = vpop.f32.mrf.mxu0  ;;  %v6792_v11 = vcombine.low %v4136_v41, %v4146_v31  ;;  %v5235_v3 = vrot.slane %v5234_v45, 4  ;;  %v6913_v20 = vld [vmem:[%s7973_s22 + $0x28] sm:$0xf] }
 0x127   : > { %v5254_v60 = vrot.slane %v5252_v38, 4  ;;  %v5257_v42 = vrot.slane %v5255_v0, 5  ;;  %v9515_v62 = vpop.f32.mrf.mxu1  ;;  %v5263_v58 = vrot.slane %v5261_v7, 5  ;;  %v5267_v6 = vrot.slane %v5265_v14, 4 }
 0x128   : > { %10503 = vst [vmem:[#allocation13_spill] sm:$0xff] %v9515_v62  ;;  %v5245_v22 = vrot.slane %v5244_v32, 4  ;;  %v5271_v21 = vshll.u32 %v6911_v47, 16  ;;  %v7479_v37 = vpop.f32.mrf.mxu0  ;;  %7715 = vmatmul.mubr.msk.bf16.gmra.mxu1 %vm838_vm1, %v6792_v11  ;;  %v5240_v23 = vsel %vm8027_vm4, %v5235_v3, %v5239_v27  ;;  %v9522_v41 = vadd.f32 %v9422_v30, %v7478_v61  ;;  %v6914_v27 = vld [vmem:[%s7973_s22 + $0x2c] sm:$0x1] }
 0x129   : > { %v5258_v1 = vor.u32 %v5257_v42, %v5254_v60  ;;  %v9525_v38 = vadd.f32 %v9432_v16, %v1037_v50  ;;  %v9528_v49 = vpop.f32.mrf.mxu1  ;;  %v5268_v47 = vor.u32 %v5267_v6, %v5263_v58  ;;  %v9533_v7 = vadd.f32 %v9440_v8, %v7479_v37  ;;  %v6809_v32 = vld [vmem:[%s7973_s22 + $0x18] sm:$0xe]  ;;  %v6915_v6 = vld [vmem:[%s7973_s22 + $0x30] sm:$0xf] }
 0x12a   : > { %10504 = vst [vmem:[#allocation14_spill] sm:$0xff] %v9528_v49  ;;  %v5250_v45 = vsel %vm8027_vm4, %v5245_v22, %v5249_v57  ;;  %v5273_v0 = vrot.slane %v5271_v21, 5  ;;  %v1040_v31 = vpop.f32.mrf.mxu0  ;;  %v5276_v14 = vshrl.u32 %v6912_v54, 16  ;;  %v5279_v57 = vshll.u32 %v6912_v54, 16 }
 0x12b   : > { %v6954_v30 = vcombine.low %v5240_v23, %v5250_v45  ;;  %v5259_v61 = vrot.slane %v5258_v1, 4  ;;  %v9538_v16 = vadd.f32 %v9449_v4, %v1040_v31  ;;  %v9540_v50 = vpop.f32.mrf.mxu1  ;;  %v5269_v11 = vrot.slane %v5268_v47, 4  ;;  %v6916_v45 = vld [vmem:[%s7973_s22 + $0x34] sm:$0xf] }
 0x12c   : > { %10506 = vst [vmem:[#allocation16_spill] sm:$0xff] %v9540_v50  ;;  %v5285_v3 = vshll.u32 %v6913_v20, 16  ;;  %v5289_v21 = vshrl.u32 %v6913_v20, 16  ;;  %v7518_v60 = vpop.f32.mrf.mxu0  ;;  %v5278_v42 = vrot.slane %v5276_v14, 4  ;;  %v5295_v22 = vshll.u32 %v6914_v27, 16 }
 0x12d   : > { %10505 = vst [vmem:[#allocation15_spill] sm:$0xff] %v9538_v16  ;;  %7754 = vmatprep.mubr.msk.bf16.mxu1 %vm838_vm1, %v6954_v30  ;;  %v5264_v8 = vsel %vm8027_vm4, %v5259_v61, %v5263_v58  ;;  %v6825_v4 = vrot.slane %v6809_v32, 9  ;;  %v9546_v37 = vpop.f32.mrf.mxu1  ;;  %v5274_v54 = vsel %vm8027_vm4, %v5269_v11, %v5273_v0  ;;  %v5281_v23 = vrot.slane %v5279_v57, 5  ;;  %v7853_v50 = vld [vmem:[%s7973_s22 + $0x1c] sm:$0xf] }
 0x12e   : > { %10507 = vst [vmem:[#allocation17_spill] sm:$0xff] %v9546_v37  ;;  %v5287_v1 = vrot.slane %v5285_v3, 5  ;;  %v5291_v20 = vrot.slane %v5289_v21, 4  ;;  %v1642_v47 = vpop.f32.mrf.mxu0  ;;  %v6955_v31 = vcombine.low %v5264_v8, %v5274_v54  ;;  %v5297_v30 = vrot.slane %v5295_v22, 5  ;;  %v7854_v61 = vld [vmem:[%s7973_s22 + $0x20] sm:$0x1] }
 0x12f   : > { %v4507_v58 = vrot.slane %v7853_v50, 5  ;;  %v4510_v14 = vrot.slane %v7854_v61, 5  ;;  %v9553_v27 = vpop.f32.mrf.mxu1  ;;  %v5282_v32 = vor.u32 %v5281_v23, %v5278_v42  ;;  %v6917_v37 = vld [vmem:[%s7973_s22 + $0x38] sm:$0x1]  ;;  %v5300_v62 = vshrl.u32 %v6915_v6, 16 }
 0x130   : > { %10508 = vst [vmem:[#allocation18_spill] sm:$0xff] %v9553_v27  ;;  %v5292_v49 = vor.u32 %v5291_v20, %v5287_v1  ;;  %v5303_v63 = vshll.u32 %v6915_v6, 16  ;;  %v7519_v16 = vpop.f32.mrf.mxu0  ;;  %7755 = vmatmul.mubr.msk.bf16.vlgmr.msra.gmra.mxu1 %vm838_vm1, %v6955_v31  ;;  %v5309_v57 = vshll.u32 %v6916_v45, 16  ;;  %v5313_v3 = vshrl.u32 %v6916_v45, 16  ;;  %v6810_v61 = vld [vmem:[%s7973_s22 + $0x24] sm:$0xe] }
 0x131   : > { %v4508_v0 = vsel %vm8287_vm7, %v6825_v4, %v4507_v58  ;;  %v4509_v11 = vrot.slane %v4507_v58, 4  ;;  %v9559_v50 = vpop.f32.mrf.mxu1  ;;  %v5283_v21 = vrot.slane %v5282_v32, 4  ;;  %v5302_v42 = vrot.slane %v5300_v62, 4 }
 0x132   : > { %10509 = vst [vmem:[#allocation19_spill] sm:$0xff] %v9559_v50  ;;  %v5293_v8 = vrot.slane %v5292_v49, 4  ;;  %v5305_v22 = vrot.slane %v5303_v63, 5  ;;  %v1645_v54 = vpop.f32.mrf.mxu0  ;;  %v5311_v23 = vrot.slane %v5309_v57, 5  ;;  %v5315_v20 = vrot.slane %v5313_v3, 4 }
 0x133   : > { %v4511_v6 = vsel %vm8287_vm7, %v4509_v11, %v4510_v14  ;;  %v5319_v31 = vshll.u32 %v6917_v37, 16  ;;  %v9564_v27 = vpop.f32.mrf.mxu1  ;;  %v5288_v4 = vsel %vm8027_vm4, %v5283_v21, %v5287_v1  ;;  %v6918_v63 = vld [vmem:[%s7973_s22 + $0x3c] sm:$0xf]  ;;  %v9574_v37 = vadd.f32 %v7518_v60, %v9230_v55 }
 0x134   : > { %10510 = vst [vmem:[#allocation20_spill] sm:$0xff] %v9564_v27  ;;  %v5298_v45 = vsel %vm8027_vm4, %v5293_v8, %v5297_v30  ;;  %v6842_v49 = vcombine.low %v4508_v0, %v4511_v6  ;;  %v5306_v62 = vor.u32 %v5305_v22, %v5302_v42  ;;  %v9571_v58 = vpop.f32.mrf.mxu0  ;;  %v5316_v14 = vor.u32 %v5315_v20, %v5311_v23  ;;  %v6919_v8 = vld [vmem:[%s7973_s22 + $0x40] sm:$0xf]  ;;  %v6920_v6 = vld [vmem:[%s7973_s22 + $0x44] sm:$0x1] }
 0x135   : > { %v6956_v32 = vcombine.low %v5288_v4, %v5298_v45  ;;  %v5321_v11 = vrot.slane %v5319_v31, 5  ;;  %v9576_v57 = vpop.f32.mrf.mxu1  ;;  %v6826_v3 = vrot.slane %v6810_v61, 9  ;;  %v10512_v30 = vrot.slane %v9150_v17, 5 }
 0x136   : > { %10511 = vst [vmem:[#allocation21_spill] sm:$0xff] %v9576_v57  ;;  %7720 = vmatprep.mubr.msk.bf16.mxu0 %vm838_vm1, %v6842_v49  ;;  %v5307_v1 = vrot.slane %v5306_v62, 4  ;;  %v9582_v21 = vadd.f32 %v1642_v47, %v9240_v52  ;;  %v9585_v42 = vpop.f32.mrf.mxu0  ;;  %v5317_v55 = vrot.slane %v5316_v14, 4  ;;  %v9589_v60 = vadd.f32 %v7519_v16, %v9248_v13  ;;  %v6811_v16 = vld [vmem:[%s7973_s22 + $0x30] sm:$0xe] }
 0x137   : > { %v4516_v0 = vrot.slane %v10512_v30, 4  ;;  %7758 = vmatprep.mubr.msk.bf16.mxu1 %vm838_vm1, %v6956_v32  ;;  %v9592_v22 = vadd.f32 %v1645_v54, %v9258_v33  ;;  %v5324_v20 = vshrl.u32 %v6918_v63, 16  ;;  %v9595_v31 = vpop.f32.mrf.mxu1  ;;  %v10514_v47 = vmov %v10512_v30  ;;  %v6921_v62 = vld [vmem:[%s7973_s22 + $0x48] sm:$0xf]  ;;  %v6812_v57 = vld [vmem:[%s7973_s22 + $0x3c] sm:$0xe] }
 0x138   : > { %10513 = vst [vmem:[#allocation22_spill] sm:$0xff] %v9595_v31  ;;  %v5312_v52 = vsel %vm8027_vm4, %v5307_v1, %v5311_v23  ;;  %v4515_v61 = vsel %vm8287_vm7, %v6826_v3, %v10514_v47  ;;  %v10515_v4 = vrot.slane %v9157_v56, 5  ;;  %v5327_v33 = vshll.u32 %v6918_v63, 16  ;;  %v9608_v54 = vpop.f32.mrf.mxu0  ;;  %v6922_v63 = vld [vmem:[%s7973_s22 + $0x4c] sm:$0xf] }
 0x139   : > { %v5322_v45 = vsel %vm8027_vm4, %v5317_v55, %v5321_v11  ;;  %v5326_v17 = vrot.slane %v5324_v20, 4  ;;  %v5333_v49 = vshll.u32 %v6919_v8, 16  ;;  %v9613_v32 = vpop.f32.mrf.mxu1  ;;  %v5337_v1 = vshrl.u32 %v6919_v8, 16  ;;  %v7856_v55 = vld [vmem:[%s7973_s22 + $0x38] sm:$0x1] }
 0x13a   : > { %v4518_v13 = vsel %vm8287_vm7, %v4516_v0, %v10515_v4  ;;  %10516 = vst [vmem:[#allocation23_spill] sm:$0xff] %v9613_v32  ;;  %v6957_v14 = vcombine.low %v5312_v52, %v5322_v45  ;;  %v5329_v56 = vrot.slane %v5327_v33, 5  ;;  %v5343_v3 = vshll.u32 %v6920_v6, 16  ;;  %v1661_v30 = vpop.f32.mrf.mxu0  ;;  %v7855_v4 = vld [vmem:[%s7973_s22 + $0x34] sm:$0xf] }
 0x13b   : > { %v6843_v23 = vcombine.low %v4515_v61, %v4518_v13  ;;  %v5335_v0 = vrot.slane %v5333_v49, 5  ;;  %v6827_v47 = vrot.slane %v6811_v16, 9  ;;  %v4521_v11 = vrot.slane %v7855_v4, 5  ;;  %v9619_v20 = vpop.f32.mrf.mxu1  ;;  %v6923_v33 = vld [vmem:[%s7973_s22 + $0x50] sm:$0x1] }
 0x13c   : > { %v4524_v61 = vrot.slane %v7856_v55, 5  ;;  %10517 = vst [vmem:[#allocation24_spill] sm:$0xff] %v9619_v20  ;;  %7759 = vmatmul.mubr.msk.bf16.gmra.mxu1 %vm838_vm1, %v6957_v14  ;;  %v5330_v52 = vor.u32 %v5329_v56, %v5326_v17  ;;  %v5339_v13 = vrot.slane %v5337_v1, 4  ;;  %v5345_v8 = vrot.slane %v5343_v3, 5  ;;  %v9623_v45 = vpop.f32.mrf.mxu0 }
 0x13d   : > { %7721 = vmatmul.mubr.msk.bf16.vlgmr.msra.gmra.mxu0 %vm838_vm1, %v6843_v23  ;;  %v5348_v6 = vshrl.u32 %v6921_v62, 16  ;;  %v4522_v23 = vsel %vm8287_vm7, %v6827_v47, %v4521_v11  ;;  %v4523_v16 = vrot.slane %v4521_v11, 4  ;;  %v5351_v49 = vshll.u32 %v6921_v62, 16  ;;  %v9627_v32 = vpop.f32.mrf.mxu1 }
 0x13e   : > { %v5357_v4 = vshll.u32 %v6922_v63, 16  ;;  %10518 = vst [vmem:[#allocation25_spill] sm:$0xff] %v9627_v32  ;;  %v5331_v55 = vrot.slane %v5330_v52, 4  ;;  %v5340_v20 = vor.u32 %v5339_v13, %v5335_v0  ;;  %v5361_v14 = vshrl.u32 %v6922_v63, 16  ;;  %v9630_v17 = vpop.f32.mrf.mxu0 }
 0x13f   : > { %v5350_v31 = vrot.slane %v5348_v6, 4  ;;  %v4525_v56 = vsel %vm8287_vm7, %v4523_v16, %v4524_v61  ;;  %v5353_v1 = vrot.slane %v5351_v49, 5  ;;  %v5367_v27 = vshll.u32 %v6923_v33, 16  ;;  %v9634_v47 = vpop.f32.mrf.mxu1  ;;  %v6924_v16 = vld [vmem:[%s7973_s22 + $0x54] sm:$0xf] }
 0x140   : > { %v5359_v3 = vrot.slane %v5357_v4, 5  ;;  %10519 = vst [vmem:[#allocation26_spill] sm:$0xff] %v9634_v47  ;;  %v5336_v62 = vsel %vm8027_vm4, %v5331_v55, %v5335_v0  ;;  %v5341_v11 = vrot.slane %v5340_v20, 4  ;;  %v6844_v52 = vcombine.low %v4522_v23, %v4525_v56  ;;  %v9638_v13 = vpop.f32.mrf.mxu0  ;;  %v7857_v23 = vld [vmem:[%s7973_s22 + $0x40] sm:$0xf] }
 0x141   : > { %v5363_v63 = vrot.slane %v5361_v14, 4  ;;  %v5354_v6 = vor.u32 %v5353_v1, %v5350_v31  ;;  %v5369_v32 = vrot.slane %v5367_v27, 5  ;;  %v9642_v61 = vadd.f32 %v9571_v58, %v9277_v28  ;;  %v9645_v49 = vpop.f32.mrf.mxu1  ;;  %v6925_v31 = vld [vmem:[%s7973_s22 + $0x58] sm:$0xf]  ;;  %v6926_v14 = vld [vmem:[%s7973_s22 + $0x5c] sm:$0x1] }
 0x142   : > { %v6828_v33 = vrot.slane %v6812_v57, 9  ;;  %10520 = vst [vmem:[#allocation27_spill] sm:$0xff] %v9645_v49  ;;  %v5346_v0 = vsel %vm8027_vm4, %v5341_v11, %v5345_v8  ;;  %7724 = vmatprep.mubr.msk.bf16.mxu0 %vm838_vm1, %v6844_v52  ;;  %v4528_v4 = vrot.slane %v7857_v23, 5  ;;  %v9653_v27 = vadd.f32 %v9585_v42, %v9284_v25  ;;  %v9656_v28 = vpop.f32.mrf.mxu0  ;;  %v6813_v52 = vld [vmem:[%s7973_s22 + $0x48] sm:$0xe] }
 0x143   : > { %v5364_v20 = vor.u32 %v5363_v63, %v5359_v3  ;;  %v6958_v58 = vcombine.low %v5336_v62, %v5346_v0  ;;  %v5355_v57 = vrot.slane %v5354_v6, 4  ;;  %v9660_v55 = vadd.f32 %v9608_v54, %v9298_v29  ;;  %v9666_v56 = vpop.f32.mrf.mxu1  ;;  %v7858_v49 = vld [vmem:[%s7973_s22 + $0x4c] sm:$0xf] }
 0x144   : > { %v9663_v8 = vadd.f32 %v1661_v30, %v9304_v18  ;;  %10521 = vst [vmem:[#allocation28_spill] sm:$0xff] %v9666_v56  ;;  %v4529_v25 = vsel %vm8287_vm7, %v6828_v33, %v4528_v4  ;;  %v4530_v42 = vrot.slane %v4528_v4, 4  ;;  %v5372_v11 = vshrl.u32 %v6924_v16, 16  ;;  %v9670_v62 = vpop.f32.mrf.mxu0  ;;  %v6927_v4 = vld [vmem:[%s7973_s22 + $0x60] sm:$0xf] }
 0x145   : > { %v5365_v1 = vrot.slane %v5364_v20, 4  ;;  %7762 = vmatprep.mubr.msk.bf16.mxu1 %vm838_vm1, %v6958_v58  ;;  %v5360_v29 = vsel %vm8027_vm4, %v5355_v57, %v5359_v3  ;;  %v5375_v18 = vshll.u32 %v6924_v16, 16  ;;  %v5381_v54 = vshll.u32 %v6925_v31, 16  ;;  %v9676_v63 = vpop.f32.mrf.mxu1 }
 0x146   : > { %v5385_v30 = vshrl.u32 %v6925_v31, 16  ;;  %10522 = vst [vmem:[#allocation29_spill] sm:$0xff] %v9676_v63  ;;  %v10523_v33 = vrot.slane %v9203_v12, 5  ;;  %v5374_v20 = vrot.slane %v5372_v11, 4  ;;  %v5391_v23 = vshll.u32 %v6926_v14, 16  ;;  %v9685_v3 = vpop.f32.mrf.mxu0 }
 0x147   : > { %v5370_v6 = vsel %vm8027_vm4, %v5365_v1, %v5369_v32  ;;  %v5377_v58 = vrot.slane %v5375_v18, 5  ;;  %v5383_v57 = vrot.slane %v5381_v54, 5  ;;  %v6928_v63 = vld [vmem:[%s7973_s22 + $0x64] sm:$0xf]  ;;  %v9688_v56 = vpop.f32.mrf.mxu1  ;;  %v6829_v12 = vrot.slane %v6813_v52, 9 }
 0x148   : > { %v4532_v0 = vsel %vm8287_vm7, %v4530_v42, %v10523_v33  ;;  %v6959_v16 = vcombine.low %v5360_v29, %v5370_v6  ;;  %10524 = vst [vmem:[#allocation30_spill] sm:$0xff] %v9688_v56  ;;  %v5387_v32 = vrot.slane %v5385_v30, 4  ;;  %v5393_v1 = vrot.slane %v5391_v23, 5  ;;  %v9691_v42 = vpop.f32.mrf.mxu0  ;;  %v6929_v29 = vld [vmem:[%s7973_s22 + $0x68] sm:$0x1] }
 0x149   : > { %v6845_v31 = vcombine.low %v4529_v25, %v4532_v0  ;;  %v4535_v47 = vrot.slane %v7858_v49, 5  ;;  %v5378_v14 = vor.u32 %v5377_v58, %v5374_v20  ;;  %v7859_v25 = vld [vmem:[%s7973_s22 + $0x50] sm:$0x1]  ;;  %v5396_v18 = vshrl.u32 %v6927_v4, 16  ;;  %v9697_v6 = vpop.f32.mrf.mxu1  ;;  %v6814_v58 = vld [vmem:[%s7973_s22 + $0x54] sm:$0xe] }
 0x14a   : > { %7763 = vmatmul.mubr.msk.bf16.gmra.mxu1 %vm838_vm1, %v6959_v16  ;;  %v4538_v11 = vrot.slane %v7859_v25, 5  ;;  %v5399_v54 = vshll.u32 %v6927_v4, 16  ;;  %10525 = vst [vmem:[#allocation31_spill] sm:$0xff] %v9697_v6  ;;  %v5388_v30 = vor.u32 %v5387_v32, %v5383_v57  ;;  %v5405_v33 = vshll.u32 %v6928_v63, 16  ;;  %v9701_v0 = vpop.f32.mrf.mxu0 }
 0x14b   : > { %7725 = vmatmul.mubr.msk.bf16.gmra.mxu0 %vm838_vm1, %v6845_v31  ;;  %v4536_v52 = vsel %vm8287_vm7, %v6829_v12, %v4535_v47  ;;  %v4537_v49 = vrot.slane %v4535_v47, 4  ;;  %v5379_v23 = vrot.slane %v5378_v14, 4  ;;  %v5398_v16 = vrot.slane %v5396_v18, 4  ;;  %v9704_v25 = vpop.f32.mrf.mxu1 }
 0x14c   : > { %v5401_v20 = vrot.slane %v5399_v54, 5  ;;  %v5409_v31 = vshrl.u32 %v6928_v63, 16  ;;  %10526 = vst [vmem:[#allocation32_spill] sm:$0xff] %v9704_v25  ;;  %v5389_v56 = vrot.slane %v5388_v30, 4  ;;  %v5407_v32 = vrot.slane %v5405_v33, 5  ;;  %v9708_v50 = vpop.f32.mrf.mxu0 }
 0x14d   : > { %v4539_v4 = vsel %vm8287_vm7, %v4537_v49, %v4538_v11  ;;  %v5415_v6 = vshll.u32 %v6929_v29, 16  ;;  %v5384_v47 = vsel %vm8027_vm4, %v5379_v23, %v5383_v57  ;;  %v6930_v63 = vld [vmem:[%s7973_s22 + $0x6c] sm:$0xf]  ;;  %v9713_v54 = vpop.f32.mrf.mxu1  ;;  %v9719_v29 = vadd.f32 %v9623_v45, %v9314_v5 }
 0x14e   : > { %v6846_v12 = vcombine.low %v4536_v52, %v4539_v4  ;;  %v5402_v14 = vor.u32 %v5401_v20, %v5398_v16  ;;  %v5411_v18 = vrot.slane %v5409_v31, 4  ;;  %10527 = vst [vmem:[#allocation33_spill] sm:$0xff] %v9713_v54  ;;  %v5394_v30 = vsel %vm8027_vm4, %v5389_v56, %v5393_v1  ;;  %v9721_v33 = vpop.f32.mrf.mxu0  ;;  %v7860_v16 = vld [vmem:[%s7973_s22 + $0x58] sm:$0xf]  ;;  %v6931_v31 = vld [vmem:[%s7973_s22 + $0x70] sm:$0xf] }
 0x14f   : > { %v5417_v11 = vrot.slane %v5415_v6, 5  ;;  %v6830_v49 = vrot.slane %v6814_v58, 9  ;;  %v6960_v57 = vcombine.low %v5384_v47, %v5394_v30  ;;  %v4542_v20 = vrot.slane %v7860_v16, 5  ;;  %v9726_v4 = vpop.f32.mrf.mxu1  ;;  %v6932_v1 = vld [vmem:[%s7973_s22 + $0x74] sm:$0x1] }
 0x150   : > { %7728 = vmatprep.mubr.msk.bf16.mxu0 %vm838_vm1, %v6846_v12  ;;  %v5403_v52 = vrot.slane %v5402_v14, 4  ;;  %v5412_v23 = vor.u32 %v5411_v18, %v5407_v32  ;;  %10528 = vst [vmem:[#allocation34_spill] sm:$0xff] %v9726_v4  ;;  %v9730_v56 = vadd.f32 %v9630_v17, %v9326_v26  ;;  %v9734_v5 = vadd.f32 %v9638_v13, %v9334_v10  ;;  %v6815_v58 = vld [vmem:[%s7973_s22 + $0x60] sm:$0xe]  ;;  %v9742_v47 = vpop.f32.mrf.mxu0 }
 0x151   : > { %v9738_v45 = vadd.f32 %v9656_v28, %v9344_v24  ;;  %v5420_v6 = vshrl.u32 %v6930_v63, 16  ;;  %7766 = vmatprep.mubr.msk.bf16.mxu1 %vm838_vm1, %v6960_v57  ;;  %v4543_v10 = vsel %vm8287_vm7, %v6830_v49, %v4542_v20  ;;  %v4544_v13 = vrot.slane %v4542_v20, 4  ;;  %v9749_v12 = vpop.f32.mrf.mxu1  ;;  %v6934_v20 = vld [vmem:[%s7973_s22 + $0x7c] sm:$0xf] }
 0x152   : > { %10529 = vst [vmem:[#allocation35_spill] sm:$0xff] %v9734_v5  ;;  %v5408_v26 = vsel %vm8027_vm4, %v5403_v52, %v5407_v32  ;;  %v5413_v17 = vrot.slane %v5412_v23, 4  ;;  %10531 = vst [vmem:[#allocation37_spill] sm:$0xff] %v9749_v12  ;;  %v5423_v28 = vshll.u32 %v6930_v63, 16  ;;  %v5429_v14 = vshll.u32 %v6931_v31, 16  ;;  %v9751_v30 = vpop.f32.mrf.mxu0 }
 0x153   : > { %10530 = vst [vmem:[#allocation36_spill] sm:$0xff] %v9738_v45  ;;  %v5422_v24 = vrot.slane %v5420_v6, 4  ;;  %v5433_v18 = vshrl.u32 %v6931_v31, 16  ;;  %v10532_v16 = vrot.slane %v9252_v43, 5  ;;  %v5439_v49 = vshll.u32 %v6932_v1, 16  ;;  %v9761_v6 = vpop.f32.mrf.mxu1 }
 0x154   : > { %v5418_v57 = vsel %vm8027_vm4, %v5413_v17, %v5417_v11  ;;  %v6831_v52 = vrot.slane %v6815_v58, 9  ;;  %v6933_v23 = vld [vmem:[%s7973_s22 + $0x78] sm:$0xf]  ;;  %10533 = vst [vmem:[#allocation38_spill] sm:$0xff] %v9761_v6  ;;  %v5425_v12 = vrot.slane %v5423_v28, 5  ;;  %v5431_v4 = vrot.slane %v5429_v14, 5  ;;  %v9763_v54 = vpop.f32.mrf.mxu0 }
 0x155   : > { %v4546_v32 = vsel %vm8287_vm7, %v4544_v13, %v10532_v16  ;;  %v6961_v63 = vcombine.low %v5408_v26, %v5418_v57  ;;  %v5435_v11 = vrot.slane %v5433_v18, 4  ;;  %v5441_v17 = vrot.slane %v5439_v49, 5  ;;  %v7861_v43 = vld [vmem:[%s7973_s22 + $0x64] sm:$0xf]  ;;  %v7862_v45 = vld [vmem:[%s7973_s22 + $0x68] sm:$0x1]  ;;  %v9767_v13 = vpop.f32.mrf.mxu1 }
 0x156   : > { %v6847_v31 = vcombine.low %v4543_v10, %v4546_v32  ;;  %v4549_v25 = vrot.slane %v7861_v43, 5  ;;  %v4552_v5 = vrot.slane %v7862_v45, 5  ;;  %10534 = vst [vmem:[#allocation39_spill] sm:$0xff] %v9767_v13  ;;  %v5426_v1 = vor.u32 %v5425_v12, %v5422_v24  ;;  %v6935_v58 = vld [vmem:[%s7973_s22 + $0x80] sm:$0x1]  ;;  %v9772_v14 = vpop.f32.mrf.mxu0 }
 0x157   : > { %7767 = vmatmul.mubr.msk.bf16.gmra.mxu1 %vm838_vm1, %v6961_v63  ;;  %v5444_v26 = vshrl.u32 %v6933_v23, 16  ;;  %v5447_v10 = vshll.u32 %v6933_v23, 16  ;;  %v5453_v28 = vshll.u32 %v6934_v20, 16  ;;  %v5436_v18 = vor.u32 %v5435_v11, %v5431_v4  ;;  %v9776_v32 = vpop.f32.mrf.mxu1  ;;  %v6816_v12 = vld [vmem:[%s7973_s22 + $0x6c] sm:$0xe] }
 0x158   : > { %7729 = vmatmul.mubr.msk.bf16.gmra.mxu0 %vm838_vm1, %v6847_v31  ;;  %v4550_v57 = vsel %vm8287_vm7, %v6831_v52, %v4549_v25  ;;  %v4551_v16 = vrot.slane %v4549_v25, 4  ;;  %v5457_v45 = vshrl.u32 %v6934_v20, 16  ;;  %10535 = vst [vmem:[#allocation40_spill] sm:$0xff] %v9776_v32  ;;  %v5427_v49 = vrot.slane %v5426_v1, 4  ;;  %v9779_v24 = vpop.f32.mrf.mxu0 }
 0x159   : > { %v5446_v63 = vrot.slane %v5444_v26, 4  ;;  %v5449_v31 = vrot.slane %v5447_v10, 5  ;;  %v5455_v43 = vrot.slane %v5453_v28, 5  ;;  %v5437_v23 = vrot.slane %v5436_v18, 4  ;;  %v9783_v52 = vpop.f32.mrf.mxu1  ;;  %v6936_v10 = vld [vmem:[%s7973_s22 + $0x84] sm:$0xf] }
 0x15a   : > { %v4553_v13 = vsel %vm8287_vm7, %v4551_v16, %v4552_v5  ;;  %v5459_v11 = vrot.slane %v5457_v45, 4  ;;  %v5463_v6 = vshll.u32 %v6935_v58, 16  ;;  %10536 = vst [vmem:[#allocation41_spill] sm:$0xff] %v9783_v52  ;;  %v5432_v25 = vsel %vm8027_vm4, %v5427_v49, %v5431_v4  ;;  %v9792_v28 = vpop.f32.mrf.mxu0  ;;  %v6937_v49 = vld [vmem:[%s7973_s22 + $0x88] sm:$0xf] }
 0x15b   : > { %v6848_v20 = vcombine.low %v4550_v57, %v4553_v13  ;;  %v5450_v1 = vor.u32 %v5449_v31, %v5446_v63  ;;  %v9789_v26 = vadd.f32 %v9670_v62, %v9364_v15  ;;  %v5442_v5 = vsel %vm8027_vm4, %v5437_v23, %v5441_v17  ;;  %v9796_v45 = vpop.f32.mrf.mxu1  ;;  %v7863_v57 = vld [vmem:[%s7973_s22 + $0x70] sm:$0xf] }
 0x15c   : > { %v5460_v58 = vor.u32 %v5459_v11, %v5455_v43  ;;  %v5465_v18 = vrot.slane %v5463_v6, 5  ;;  %v6832_v16 = vrot.slane %v6816_v12, 9  ;;  %10537 = vst [vmem:[#allocation42_spill] sm:$0xff] %v9796_v45  ;;  %v6962_v4 = vcombine.low %v5432_v25, %v5442_v5  ;;  %v6938_v12 = vld [vmem:[%s7973_s22 + $0x8c] sm:$0x1] }
 0x15d   : > { %7732 = vmatprep.mubr.msk.bf16.mxu0 %vm838_vm1, %v6848_v20  ;;  %v5451_v13 = vrot.slane %v5450_v1, 4  ;;  %v4556_v15 = vrot.slane %v7863_v57, 5  ;;  %v9802_v62 = vadd.f32 %v9685_v3, %v9368_v35  ;;  %v9805_v63 = vpop.f32.mrf.mxu0  ;;  %v9809_v6 = vadd.f32 %v9691_v42, %v9375_v40  ;;  %v9816_v11 = vpop.f32.mrf.mxu1  ;;  %v6817_v25 = vld [vmem:[%s7973_s22 + $0x78] sm:$0xe]  ;;  %v6939_v57 = vld [vmem:[%s7973_s22 + $0x90] sm:$0xf] }
 0x15e   : > { %v5461_v17 = vrot.slane %v5460_v58, 4  ;;  %v9813_v31 = vadd.f32 %v9701_v0, %v9387_v44  ;;  %v5468_v23 = vshrl.u32 %v6936_v10, 16  ;;  %10538 = vst [vmem:[#allocation43_spill] sm:$0xff] %v9816_v11  ;;  %7770 = vmatprep.mubr.msk.bf16.mxu1 %vm838_vm1, %v6962_v4  ;;  %v5471_v42 = vshll.u32 %v6936_v10, 16 }
 0x15f   : > { %v5456_v35 = vsel %vm8027_vm4, %v5451_v13, %v5455_v43  ;;  %v4557_v3 = vsel %vm8287_vm7, %v6832_v16, %v4556_v15  ;;  %v4558_v40 = vrot.slane %v4556_v15, 4  ;;  %v9824_v20 = vpop.f32.mrf.mxu0  ;;  %v5477_v1 = vshll.u32 %v6937_v49, 16  ;;  %v9828_v58 = vpop.f32.mrf.mxu1  ;;  %v6940_v15 = vld [vmem:[%s7973_s22 + $0x94] sm:$0xf] }
 0x160   : > { %v5466_v44 = vsel %vm8027_vm4, %v5461_v17, %v5465_v18  ;;  %v5470_v0 = vrot.slane %v5468_v23, 4  ;;  %v5481_v5 = vshrl.u32 %v6937_v49, 16  ;;  %10539 = vst [vmem:[#allocation44_spill] sm:$0xff] %v9828_v58  ;;  %v10540_v43 = vrot.slane %v9291_v19, 5 }
 0x161   : > { %v6963_v4 = vcombine.low %v5456_v35, %v5466_v44  ;;  %v5473_v10 = vrot.slane %v5471_v42, 5  ;;  %v5487_v13 = vshll.u32 %v6938_v12, 16  ;;  %v9836_v11 = vpop.f32.mrf.mxu0  ;;  %v5479_v17 = vrot.slane %v5477_v1, 5  ;;  %v9838_v58 = vpop.f32.mrf.mxu1  ;;  %v7864_v44 = vld [vmem:[%s7973_s22 + $0x7c] sm:$0xf] }
 0x162   : > { %v4560_v16 = vsel %vm8287_vm7, %v4558_v40, %v10540_v43  ;;  %v5483_v49 = vrot.slane %v5481_v5, 4  ;;  %v6833_v23 = vrot.slane %v6817_v25, 9  ;;  %10541 = vst [vmem:[#allocation45_spill] sm:$0xff] %v9838_v58  ;;  %v4563_v40 = vrot.slane %v7864_v44, 5  ;;  %v7865_v43 = vld [vmem:[%s7973_s22 + $0x80] sm:$0x1] }
 0x163   : > { %v6849_v18 = vcombine.low %v4557_v3, %v4560_v16  ;;  %7771 = vmatmul.mubr.msk.bf16.gmra.mxu1 %vm838_vm1, %v6963_v4  ;;  %v5474_v19 = vor.u32 %v5473_v10, %v5470_v0  ;;  %v5489_v35 = vrot.slane %v5487_v13, 5  ;;  %v4566_v42 = vrot.slane %v7865_v43, 5  ;;  %v9843_v12 = vpop.f32.mrf.mxu0  ;;  %v6941_v3 = vld [vmem:[%s7973_s22 + $0x98] sm:$0x1]  ;;  %v9847_v16 = vpop.f32.mrf.mxu1 }
 0x164   : > { %v5484_v45 = vor.u32 %v5483_v49, %v5479_v17  ;;  %v5492_v1 = vshrl.u32 %v6939_v57, 16  ;;  %v5495_v5 = vshll.u32 %v6939_v57, 16  ;;  %v5501_v25 = vshll.u32 %v6940_v15, 16  ;;  %10542 = vst [vmem:[#allocation46_spill] sm:$0xff] %v9847_v16  ;;  %v6818_v49 = vld [vmem:[%s7973_s22 + $0x84] sm:$0xe] }
 0x165   : > { %7733 = vmatmul.mubr.msk.bf16.gmra.mxu0 %vm838_vm1, %v6849_v18  ;;  %v5475_v58 = vrot.slane %v5474_v19, 4  ;;  %v4564_v0 = vsel %vm8287_vm7, %v6833_v23, %v4563_v40  ;;  %v4565_v4 = vrot.slane %v4563_v40, 4  ;;  %v5505_v10 = vshrl.u32 %v6940_v15, 16  ;;  %v9854_v32 = vpop.f32.mrf.mxu1 }
 0x166   : > { %v9851_v13 = vpop.f32.mrf.mxu0  ;;  %v5485_v44 = vrot.slane %v5484_v45, 4  ;;  %v5494_v43 = vrot.slane %v5492_v1, 4  ;;  %v5497_v18 = vrot.slane %v5495_v5, 5  ;;  %v5503_v52 = vrot.slane %v5501_v25, 5  ;;  %10543 = vst [vmem:[#allocation47_spill] sm:$0xff] %v9854_v32 }
 0x167   : > { %v5480_v57 = vsel %vm8027_vm4, %v5475_v58, %v5479_v17  ;;  %v4567_v19 = vsel %vm8287_vm7, %v4565_v4, %v4566_v42  ;;  %v5507_v16 = vrot.slane %v5505_v10, 4  ;;  %v5511_v23 = vshll.u32 %v6941_v3, 16  ;;  %v6942_v58 = vld [vmem:[%s7973_s22 + $0x9c] sm:$0xf]  ;;  %v9869_v17 = vpop.f32.mrf.mxu1  ;;  %v7868_v32 = vld [vmem:[%s7973_s22 + $0x94] sm:$0xf] }
 0x168   : > { %v9860_v15 = vpop.f32.mrf.mxu0  ;;  %v5490_v45 = vsel %vm8027_vm4, %v5485_v44, %v5489_v35  ;;  %v6850_v40 = vcombine.low %v4564_v0, %v4567_v19  ;;  %v5498_v1 = vor.u32 %v5497_v18, %v5494_v43  ;;  %v9866_v5 = vadd.f32 %v9708_v50, %v9396_v51  ;;  %10545 = vst [vmem:[#allocation49_spill] sm:$0xff] %v9869_v17  ;;  %v7866_v0 = vld [vmem:[%s7973_s22 + $0x88] sm:$0xf]  ;;  %v7867_v43 = vld [vmem:[%s7973_s22 + $0x8c] sm:$0x1] }
 0x169   : > { %v6964_v42 = vcombine.low %v5480_v57, %v5490_v45  ;;  %v5508_v25 = vor.u32 %v5507_v16, %v5503_v52  ;;  %v5513_v4 = vrot.slane %v5511_v23, 5  ;;  %v6834_v3 = vrot.slane %v6818_v49, 9  ;;  %v6943_v50 = vld [vmem:[%s7973_s22 + $0xa0] sm:$0xf]  ;;  %v9881_v57 = vpop.f32.mrf.mxu1  ;;  %v6944_v23 = vld [vmem:[%s7973_s22 + $0xa4] sm:$0x1] }
 0x16a   : > { %10544 = vst [vmem:[#allocation48_spill] sm:$0xff] %v9866_v5  ;;  %v9871_v10 = vpop.f32.mrf.mxu0  ;;  %7736 = vmatprep.mubr.msk.bf16.mxu0 %vm838_vm1, %v6850_v40  ;;  %v5499_v35 = vrot.slane %v5498_v1, 4  ;;  %v4570_v44 = vrot.slane %v7866_v0, 5  ;;  %v4573_v18 = vrot.slane %v7867_v43, 5  ;;  %v9878_v51 = vadd.f32 %v9721_v33, %v9404_v34  ;;  %10547 = vst [vmem:[#allocation51_spill] sm:$0xff] %v9881_v57 }
 0x16b   : > { %7774 = vmatprep.mubr.msk.bf16.mxu1 %vm838_vm1, %v6964_v42  ;;  %v5509_v16 = vrot.slane %v5508_v25, 4  ;;  %v9886_v49 = vadd.f32 %v9742_v47, %v9414_v39  ;;  %v9890_v19 = vadd.f32 %v9751_v30, %v9420_v36  ;;  %v5516_v45 = vshrl.u32 %v6942_v58, 16  ;;  %v6819_v39 = vld [vmem:[%s7973_s22 + $0x90] sm:$0xe]  ;;  %v9900_v47 = vpop.f32.mrf.mxu1 }
 0x16c   : > { %10546 = vst [vmem:[#allocation50_spill] sm:$0xff] %v9878_v51  ;;  %v9893_v40 = vpop.f32.mrf.mxu0  ;;  %v5504_v34 = vsel %vm8027_vm4, %v5499_v35, %v5503_v52  ;;  %v4571_v33 = vsel %vm8287_vm7, %v6834_v3, %v4570_v44  ;;  %v4572_v1 = vrot.slane %v4570_v44, 4  ;;  %v5519_v42 = vshll.u32 %v6942_v58, 16  ;;  %10550 = vst [vmem:[#allocation54_spill] sm:$0xff] %v9900_v47  ;;  %v6945_v58 = vld [vmem:[%s7973_s22 + $0xa8] sm:$0xf] }
 0x16d   : > { %10548 = vst [vmem:[#allocation52_spill] sm:$0xff] %v9886_v49  ;;  %10549 = vst [vmem:[#allocation53_spill] sm:$0xff] %v9890_v19  ;;  %v5514_v36 = vsel %vm8027_vm4, %v5509_v16, %v5513_v4  ;;  %v5518_v30 = vrot.slane %v5516_v45, 4  ;;  %v5525_v25 = vshll.u32 %v6943_v50, 16  ;;  %v5529_v0 = vshrl.u32 %v6943_v50, 16  ;;  %v9910_v17 = vpop.f32.mrf.mxu1 }
 0x16e   : > { %v9904_v43 = vpop.f32.mrf.mxu0  ;;  %v6965_v57 = vcombine.low %v5504_v34, %v5514_v36  ;;  %v4574_v52 = vsel %vm8287_vm7, %v4572_v1, %v4573_v18  ;;  %v5521_v3 = vrot.slane %v5519_v42, 5  ;;  %v5535_v35 = vshll.u32 %v6944_v23, 16  ;;  %v6946_v44 = vld [vmem:[%s7973_s22 + $0xac] sm:$0xf]  ;;  %10551 = vst [vmem:[#allocation55_spill] sm:$0xff] %v9910_v17 }
 0x16f   : > { %v6851_v47 = vcombine.low %v4571_v33, %v4574_v52  ;;  %v5527_v4 = vrot.slane %v5525_v25, 5  ;;  %v5531_v16 = vrot.slane %v5529_v0, 4  ;;  %v6835_v45 = vrot.slane %v6819_v39, 9  ;;  %v7869_v1 = vld [vmem:[%s7973_s22 + $0x98] sm:$0x1]  ;;  %v9917_v23 = vpop.f32.mrf.mxu1 }
 0x170   : > { %v9912_v50 = vpop.f32.mrf.mxu0  ;;  %7775 = vmatmul.mubr.msk.bf16.gmra.mxu1 %vm838_vm1, %v6965_v57  ;;  %v5522_v34 = vor.u32 %v5521_v3, %v5518_v30  ;;  %v5537_v36 = vrot.slane %v5535_v35, 5  ;;  %v4577_v18 = vrot.slane %v7868_v32, 5  ;;  %v4580_v42 = vrot.slane %v7869_v1, 5  ;;  %10552 = vst [vmem:[#allocation56_spill] sm:$0xff] %v9917_v23  ;;  %v6947_v33 = vld [vmem:[%s7973_s22 + $0xb0] sm:$0x1] }
 0x171   : > { %7737 = vmatmul.mubr.msk.bf16.gmra.mxu0 %vm838_vm1, %v6851_v47  ;;  %v5532_v17 = vor.u32 %v5531_v16, %v5527_v4  ;;  %v5540_v25 = vshrl.u32 %v6945_v58, 16  ;;  %v5543_v0 = vshll.u32 %v6945_v58, 16  ;;  %v5549_v39 = vshll.u32 %v6946_v44, 16  ;;  %v9925_v3 = vpop.f32.mrf.mxu1  ;;  %v6820_v16 = vld [vmem:[%s7973_s22 + $0x9c] sm:$0xe] }
 0x172   : > { %v9921_v52 = vpop.f32.mrf.mxu0  ;;  %v5523_v19 = vrot.slane %v5522_v34, 4  ;;  %v4578_v57 = vsel %vm8287_vm7, %v6835_v45, %v4577_v18  ;;  %v4579_v30 = vrot.slane %v4577_v18, 4  ;;  %v5553_v32 = vshrl.u32 %v6946_v44, 16  ;;  %10553 = vst [vmem:[#allocation57_spill] sm:$0xff] %v9925_v3 }
 0x173   : > { %v5533_v35 = vrot.slane %v5532_v17, 4  ;;  %v5542_v1 = vrot.slane %v5540_v25, 4  ;;  %v5545_v47 = vrot.slane %v5543_v0, 5  ;;  %v5551_v23 = vrot.slane %v5549_v39, 5  ;;  %v9934_v44 = vpop.f32.mrf.mxu1 }
 0x174   : > { %v9928_v49 = vpop.f32.mrf.mxu0  ;;  %v5528_v58 = vsel %vm8027_vm4, %v5523_v19, %v5527_v4  ;;  %v4581_v34 = vsel %vm8287_vm7, %v4579_v30, %v4580_v42  ;;  %v5555_v51 = vrot.slane %v5553_v32, 4  ;;  %v5559_v45 = vshll.u32 %v6947_v33, 16  ;;  %10554 = vst [vmem:[#allocation58_spill] sm:$0xff] %v9934_v44  ;;  %v6948_v19 = vld [vmem:[%s7973_s22 + $0xb4] sm:$0xf] }
 0x175   : > { %v5538_v17 = vsel %vm8027_vm4, %v5533_v35, %v5537_v36  ;;  %v6852_v18 = vcombine.low %v4578_v57, %v4581_v34  ;;  %v5546_v25 = vor.u32 %v5545_v47, %v5542_v1  ;;  %v9940_v0 = vadd.f32 %v9763_v54, %v9438_v59  ;;  %v9945_v32 = vpop.f32.mrf.mxu1  ;;  %v7870_v57 = vld [vmem:[%s7973_s22 + $0xa0] sm:$0xf]  ;;  %v7871_v1 = vld [vmem:[%s7973_s22 + $0xa4] sm:$0x1]  ;;  %v6949_v34 = vld [vmem:[%s7973_s22 + $0xb8] sm:$0xf] }
 0x176   : > { %v9943_v4 = vpop.f32.mrf.mxu0  ;;  %v6966_v42 = vcombine.low %v5528_v58, %v5538_v17  ;;  %v5556_v39 = vor.u32 %v5555_v51, %v5551_v23  ;;  %v5561_v30 = vrot.slane %v5559_v45, 5  ;;  %v6836_v33 = vrot.slane %v6820_v16, 9  ;;  %10556 = vst [vmem:[#allocation60_spill] sm:$0xff] %v9945_v32  ;;  %v10557_v59 = vld [vmem:[#allocation2_spill] sm:$0xff]  ;;  %v10559_v16 = vld [vmem:[#allocation3_spill] sm:$0xff]  ;;  %v10561_v17 = vld [vmem:[#allocation5_spill] sm:$0xff] }
 0x177   : > { %10555 = vst [vmem:[#allocation59_spill] sm:$0xff] %v9940_v0  ;;  %7740 = vmatprep.mubr.msk.bf16.mxu0 %vm838_vm1, %v6852_v18  ;;  %v5547_v36 = vrot.slane %v5546_v25, 4  ;;  %v4584_v35 = vrot.slane %v7870_v57, 5  ;;  %v4587_v47 = vrot.slane %v7871_v1, 5  ;;  %v9952_v54 = vadd.f32 %v9772_v14, %v10557_v59  ;;  %v6950_v25 = vld [vmem:[%s7973_s22 + $0xbc] sm:$0x1]  ;;  %v9967_v1 = vpop.f32.mrf.mxu1 }
 0x178   : > { %v9955_v58 = vpop.f32.mrf.mxu0  ;;  %7778 = vmatprep.mubr.msk.bf16.mxu1 %vm838_vm1, %v6966_v42  ;;  %v5557_v51 = vrot.slane %v5556_v39, 4  ;;  %v9960_v45 = vadd.f32 %v9779_v24, %v10559_v16  ;;  %v9964_v18 = vadd.f32 %v9792_v28, %v10561_v17  ;;  %v5564_v57 = vshrl.u32 %v6948_v19, 16  ;;  %10563 = vst [vmem:[#allocation61_spill] sm:$0xff] %v9967_v1  ;;  %v6821_v24 = vld [vmem:[%s7973_s22 + $0xa8] sm:$0xe] }
 0x179   : > { %10558 = vst [vmem:[#allocation2_spill] sm:$0xff] %v9952_v54  ;;  %v5552_v14 = vsel %vm8027_vm4, %v5547_v36, %v5551_v23  ;;  %v4585_v42 = vsel %vm8287_vm7, %v6836_v33, %v4584_v35  ;;  %v4586_v39 = vrot.slane %v4584_v35, 4  ;;  %v5567_v59 = vshll.u32 %v6948_v19, 16  ;;  %v9978_v1 = vpop.f32.mrf.mxu1  ;;  %v6951_v19 = vld [vmem:[%s7973_s22 + $0xc0] sm:$0xf] }
 0x17a   : > { %10560 = vst [vmem:[#allocation3_spill] sm:$0xff] %v9960_v45  ;;  %10562 = vst [vmem:[#allocation5_spill] sm:$0xff] %v9964_v18  ;;  %v9974_v16 = vpop.f32.mrf.mxu0  ;;  %v5562_v28 = vsel %vm8027_vm4, %v5557_v51, %v5561_v30  ;;  %v5566_v17 = vrot.slane %v5564_v57, 4  ;;  %v5573_v32 = vshll.u32 %v6949_v34, 16  ;;  %v5577_v44 = vshrl.u32 %v6949_v34, 16 }
 0x17b   : > { %10564 = vst [vmem:[#allocation62_spill] sm:$0xff] %v9978_v1  ;;  %v6967_v3 = vcombine.low %v5552_v14, %v5562_v28  ;;  %v4588_v23 = vsel %vm8287_vm7, %v4586_v39, %v4587_v47  ;;  %v5569_v33 = vrot.slane %v5567_v59, 5  ;;  %v5583_v36 = vshll.u32 %v6950_v25, 16  ;;  %v6952_v35 = vld [vmem:[%s7973_s22 + $0xc4] sm:$0xf]  ;;  %v9986_v34 = vpop.f32.mrf.mxu1 }
 0x17c   : > { %v9984_v18 = vpop.f32.mrf.mxu0  ;;  %v6853_v45 = vcombine.low %v4585_v42, %v4588_v23  ;;  %v5575_v30 = vrot.slane %v5573_v32, 5  ;;  %v5579_v51 = vrot.slane %v5577_v44, 4  ;;  %v6837_v57 = vrot.slane %v6821_v24, 9  ;;  %10565 = vst [vmem:[#allocation63_spill] sm:$0xff] %v9986_v34  ;;  %v7872_v1 = vld [vmem:[%s7973_s22 + $0xac] sm:$0xf] }
 0x17d   : > { %7779 = vmatmul.mubr.msk.bf16.gmra.mxu1 %vm838_vm1, %v6967_v3  ;;  %v5570_v14 = vor.u32 %v5569_v33, %v5566_v17  ;;  %v5585_v28 = vrot.slane %v5583_v36, 5  ;;  %v4591_v47 = vrot.slane %v7872_v1, 5  ;;  %v7873_v39 = vld [vmem:[%s7973_s22 + $0xb0] sm:$0x1]  ;;  %v6953_v42 = vld [vmem:[%s7973_s22 + $0xc8] sm:$0x1]  ;;  %v9995_v23 = vpop.f32.mrf.mxu1 }
 0x17e   : > { %v4594_v59 = vrot.slane %v7873_v39, 5  ;;  %v9991_v25 = vpop.f32.mrf.mxu0  ;;  %7741 = vmatmul.mubr.msk.bf16.gmra.mxu0 %vm838_vm1, %v6853_v45  ;;  %v5580_v54 = vor.u32 %v5579_v51, %v5575_v30  ;;  %v5588_v32 = vshrl.u32 %v6951_v19, 16  ;;  %v5591_v44 = vshll.u32 %v6951_v19, 16  ;;  %10566 = vst [vmem:[#allocation64_spill] sm:$0xff] %v9995_v23  ;;  %v6822_v51 = vld [vmem:[%s7973_s22 + $0xb4] sm:$0xe] }
 0x17f   : > { %v5597_v24 = vshll.u32 %v6952_v35, 16  ;;  %v5571_v34 = vrot.slane %v5570_v14, 4  ;;  %v4592_v3 = vsel %vm8287_vm7, %v6837_v57, %v4591_v47  ;;  %v4593_v17 = vrot.slane %v4591_v47, 4  ;;  %v10002_v5 = vpop.f32.mrf.mxu1 }
 0x180   : > { %v5601_v1 = vshrl.u32 %v6952_v35, 16  ;;  %v9999_v33 = vpop.f32.mrf.mxu0  ;;  %v5581_v36 = vrot.slane %v5580_v54, 4  ;;  %v5590_v39 = vrot.slane %v5588_v32, 4  ;;  %v5593_v45 = vrot.slane %v5591_v44, 5  ;;  %10567 = vst [vmem:[#allocation65_spill] sm:$0xff] %v10002_v5 }
 0x181   : > { %v5599_v0 = vrot.slane %v5597_v24, 5  ;;  %v5576_v19 = vsel %vm8027_vm4, %v5571_v34, %v5575_v30  ;;  %v4595_v14 = vsel %vm8287_vm7, %v4593_v17, %v4594_v59  ;;  %v5607_v57 = vshll.u32 %v6953_v42, 16  ;;  %v6823_v30 = vld [vmem:[%s7973_s22 + $0xc0] sm:$0xe]  ;;  %v10017_v34 = vpop.f32.mrf.mxu1 }
 0x182   : > { %v5603_v23 = vrot.slane %v5601_v1, 4  ;;  %v10008_v35 = vpop.f32.mrf.mxu0  ;;  %v5586_v54 = vsel %vm8027_vm4, %v5581_v36, %v5585_v28  ;;  %v6854_v47 = vcombine.low %v4592_v3, %v4595_v14  ;;  %v5594_v32 = vor.u32 %v5593_v45, %v5590_v39  ;;  %v7874_v28 = vld [vmem:[%s7973_s22 + $0xb8] sm:$0xf]  ;;  %v7875_v36 = vld [vmem:[%s7973_s22 + $0xbc] sm:$0x1] }
 0x183   : > { %v10014_v44 = vadd.f32 %v9805_v63, %v9482_v2  ;;  %v6968_v59 = vcombine.low %v5576_v19, %v5586_v54  ;;  %v5609_v17 = vrot.slane %v5607_v57, 5  ;;  %v6838_v42 = vrot.slane %v6822_v51, 9  ;;  %v6824_v63 = vld [vmem:[%s7973_s22 + $0xcc] sm:$0xe]  ;;  %v10029_v45 = vpop.f32.mrf.mxu1  ;;  %v10568_v51 = vld [vmem:[#allocation9_spill] sm:$0xff] }
 0x184   : > { %v5604_v24 = vor.u32 %v5603_v23, %v5599_v0  ;;  %v10019_v1 = vpop.f32.mrf.mxu0  ;;  %7744 = vmatprep.mubr.msk.bf16.mxu0 %vm838_vm1, %v6854_v47  ;;  %v5595_v5 = vrot.slane %v5594_v32, 4  ;;  %v4598_v3 = vrot.slane %v7874_v28, 5  ;;  %v4601_v39 = vrot.slane %v7875_v36, 5  ;;  %v7876_v32 = vld [vmem:[%s7973_s22 + $0xc4] sm:$0xf] }
 0x185   : > { %v10026_v2 = vadd.f32 %v9824_v20, %v9485_v48  ;;  %7782 = vmatprep.mubr.msk.bf16.mxu1 %vm838_vm1, %v6968_v59  ;;  %v10034_v19 = vadd.f32 %v9836_v11, %v10568_v51  ;;  %v10038_v14 = vadd.f32 %v9843_v12, %v9504_v53  ;;  %v6839_v57 = vrot.slane %v6823_v30, 9  ;;  %v10047_v11 = vpop.f32.mrf.mxu1  ;;  %v7877_v12 = vld [vmem:[%s7973_s22 + $0xc8] sm:$0x1] }
 0x186   : > { %v5605_v23 = vrot.slane %v5604_v24, 4  ;;  %v10040_v54 = vpop.f32.mrf.mxu0  ;;  %v5600_v48 = vsel %vm8027_vm4, %v5595_v5, %v5599_v0  ;;  %v4599_v20 = vsel %vm8287_vm7, %v6838_v42, %v4598_v3  ;;  %v4600_v47 = vrot.slane %v4598_v3, 4 }
 0x187   : > { %v4605_v59 = vrot.slane %v7876_v32, 5  ;;  %v4608_v30 = vrot.slane %v7877_v12, 5  ;;  %v10054_v24 = vadd.f32 %v9851_v13, %v9522_v41  ;;  %v6840_v5 = vrot.slane %v6824_v63, 9  ;;  %v10060_v51 = vpop.f32.mrf.mxu1  ;;  %v7879_v32 = vld [vmem:[%s7973_s22 + $0xd4] sm:$0x1] }
 0x188   : > { %v5610_v53 = vsel %vm8027_vm4, %v5605_v23, %v5609_v17  ;;  %v2775_v0 = vpop.f32.mrf.mxu0  ;;  %v4602_v42 = vsel %vm8287_vm7, %v4600_v47, %v4601_v39  ;;  %v7878_v17 = vld [vmem:[%s7973_s22 + $0xd0] sm:$0xf]  ;;  %v4615_v12 = vrot.slane %v7879_v32, 5  ;;  %v10066_v41 = vadd.f32 %v9860_v15, %v9525_v38 }
 0x189   : > { %v6969_v28 = vcombine.low %v5600_v48, %v5610_v53  ;;  %v4606_v3 = vsel %vm8287_vm7, %v6839_v57, %v4605_v59  ;;  %v4607_v36 = vrot.slane %v4605_v59, 4  ;;  %v6855_v46 = vcombine.low %v4599_v20, %v4602_v42  ;;  %v10569_v57 = vld [vmem:[#allocation15_spill] sm:$0xff]  ;;  %v10570_v20 = vld [vmem:[#allocation4_spill] sm:$0xff]  ;;  %v10081_v59 = vpop.f32.mrf.mxu1 }
 0x18a   : > { %v4612_v23 = vrot.slane %v7878_v17, 5  ;;  %v7599_v13 = vpop.f32.mrf.mxu0  ;;  %v10073_v63 = vadd.f32 %v9871_v10, %v9533_v7  ;;  %v10077_v48 = vadd.f32 %v9893_v40, %v10569_v57  ;;  %v2130_v47 = vadd.f32 %v10570_v20, %v9574_v37  ;;  %v10572_v40 = vld [vmem:[#allocation7_spill] sm:$0xff]  ;;  %v10573_v37 = vld [vmem:[#allocation8_spill] sm:$0xff] }
 0x18b   : > { %7783 = vmatmul.mubr.msk.bf16.gmra.mxu1 %vm838_vm1, %v6969_v28  ;;  %v4609_v39 = vsel %vm8287_vm7, %v4607_v36, %v4608_v30  ;;  %7745 = vmatmul.mubr.msk.bf16.gmra.mxu0 %vm838_vm1, %v6855_v46  ;;  %v10571_v30 = vld [vmem:[#allocation6_spill] sm:$0xff]  ;;  %v2131_v42 = vadd.f32 %v10572_v40, %v9589_v60  ;;  %v2129_v36 = vadd.f32 %v10573_v37, %v9592_v22  ;;  %v10097_v17 = vpop.f32.mrf.mxu1  ;;  %v10576_v60 = vld [vmem:[#allocation12_spill] sm:$0xff] }
 0x18c   : > { %v6856_v38 = vcombine.low %v4606_v3, %v4609_v39  ;;  %v4613_v15 = vsel %vm8287_vm7, %v6840_v5, %v4612_v23  ;;  %v4614_v53 = vrot.slane %v4612_v23, 4  ;;  %v2128_v7 = vadd.f32 %v10571_v30, %v9582_v21  ;;  %v2778_v10 = vpop.f32.mrf.mxu0  ;;  %v10574_v46 = vld [vmem:[#allocation10_spill] sm:$0xff]  ;;  %v10580_v30 = vld [vmem:[#allocation35_spill] sm:$0xff] }
 0x18d   : > { %v10089_v28 = vadd.f32 %v9904_v43, %v2130_v47  ;;  %v2134_v3 = vadd.f32 %v10574_v46, %v9642_v61  ;;  %v10575_v43 = vld [vmem:[#allocation11_spill] sm:$0xff]  ;;  %v2135_v32 = vadd.f32 %v10576_v60, %v9660_v55  ;;  %v2857_v57 = vadd.f32 %v9921_v52, %v2131_v42  ;;  %v10110_v47 = vpop.f32.mrf.mxu1  ;;  %v10583_v40 = vld [vmem:[#allocation18_spill] sm:$0xff] }
 0x18e   : > { %7748 = vmatprep.mubr.msk.bf16.mxu0 %vm838_vm1, %v6856_v38  ;;  %v4616_v21 = vsel %vm8287_vm7, %v4614_v53, %v4615_v12  ;;  %v2854_v5 = vadd.f32 %v9912_v50, %v2128_v7  ;;  %v2132_v23 = vadd.f32 %v10575_v43, %v9653_v27  ;;  %v7602_v39 = vpop.f32.mrf.mxu0  ;;  %v2855_v61 = vadd.f32 %v9928_v49, %v2129_v36  ;;  %v10577_v12 = vld [vmem:[#allocation13_spill] sm:$0xff]  ;;  %v10578_v38 = vld [vmem:[#allocation14_spill] sm:$0xff] }
 0x18f   : > { %v6857_v22 = vcombine.low %v4613_v15, %v4616_v21  ;;  %v2860_v20 = vadd.f32 %v9943_v4, %v2134_v3  ;;  %v2861_v50 = vadd.f32 %v9974_v16, %v2135_v32  ;;  %v2133_v27 = vadd.f32 %v10577_v12, %v9663_v8  ;;  %v10579_v15 = vld [vmem:[#allocation16_spill] sm:$0xff]  ;;  %v10581_v49 = vld [vmem:[#allocation17_spill] sm:$0xff]  ;;  %v10126_v16 = vpop.f32.mrf.mxu1 }
 0x190   : > { %v2858_v9 = vadd.f32 %v9955_v58, %v2132_v23  ;;  %v2138_v55 = vadd.f32 %v10578_v38, %v9719_v29  ;;  %v2791_v53 = vpop.f32.mrf.mxu0  ;;  %v2136_v52 = vadd.f32 %v10579_v15, %v9730_v56  ;;  %v2139_v7 = vadd.f32 %v10581_v49, %v10580_v30  ;;  %v10582_v4 = vld [vmem:[#allocation36_spill] sm:$0xff]  ;;  %v10584_v58 = vld [vmem:[#allocation19_spill] sm:$0xff]  ;;  %v10586_v56 = vld [vmem:[#allocation21_spill] sm:$0xff] }
 0x191   : > { %v2137_v42 = vadd.f32 %v10583_v40, %v10582_v4  ;;  %v2142_v37 = vadd.f32 %v10584_v58, %v9789_v26  ;;  %v2859_v8 = vadd.f32 %v9984_v18, %v2133_v27  ;;  %v10585_v29 = vld [vmem:[#allocation20_spill] sm:$0xff]  ;;  %v2143_v3 = vadd.f32 %v10586_v56, %v9809_v6  ;;  %v10138_v32 = vpop.f32.mrf.mxu1  ;;  %v10589_v6 = vld [vmem:[#allocation23_spill] sm:$0xff]  ;;  %v10595_v49 = vld [vmem:[#allocation26_spill] sm:$0xff] }
 0x192   : > { %v2864_v36 = vadd.f32 %v9991_v25, %v2138_v55  ;;  %v2140_v46 = vadd.f32 %v10585_v29, %v9802_v62  ;;  %v7603_v21 = vpop.f32.mrf.mxu0  ;;  %v2862_v43 = vadd.f32 %v9999_v33, %v2136_v52  ;;  %v2865_v23 = vadd.f32 %v10008_v35, %v2139_v7  ;;  %v10587_v62 = vld [vmem:[#allocation22_spill] sm:$0xff]  ;;  %v10588_v27 = vld [vmem:[#allocation48_spill] sm:$0xff]  ;;  %v10596_v4 = vld [vmem:[#allocation59_spill] sm:$0xff] }
 0x193   : > { %v2863_v60 = vadd.f32 %v10019_v1, %v2137_v42  ;;  %v2868_v26 = vadd.f32 %v10040_v54, %v2142_v37  ;;  %7749 = vmatmul.mubr.msk.bf16.gmra.mxu0 %vm838_vm1, %v6857_v22  ;;  %v2869_v25 = vadd.f32 %v7599_v13, %v2143_v3  ;;  %v2141_v12 = vadd.f32 %v10587_v62, %v9813_v31  ;;  %v10590_v33 = vld [vmem:[#allocation50_spill] sm:$0xff]  ;;  %v10591_v15 = vld [vmem:[#allocation24_spill] sm:$0xff]  ;;  %v10593_v1 = vld [vmem:[#allocation25_spill] sm:$0xff]  ;;  %v10155_v62 = vpop.f32.mrf.mxu1 }
 0x194   : > { %v2866_v18 = vadd.f32 %v2775_v0, %v2140_v46  ;;  %v2146_v38 = vadd.f32 %v10589_v6, %v10588_v27  ;;  %v2794_v55 = vpop.f32.mrf.mxu0  ;;  %v2144_v35 = vadd.f32 %v10591_v15, %v10590_v33  ;;  %v10592_v52 = vld [vmem:[#allocation52_spill] sm:$0xff]  ;;  %v10594_v54 = vld [vmem:[#allocation53_spill] sm:$0xff]  ;;  %v10597_v22 = vld [vmem:[#allocation27_spill] sm:$0xff] }
 0x195   : > { %v2147_v30 = vadd.f32 %v10593_v1, %v10592_v52  ;;  %v2145_v7 = vadd.f32 %v10595_v49, %v10594_v54  ;;  %v2150_v0 = vadd.f32 %v10597_v22, %v10596_v4  ;;  %v2867_v13 = vadd.f32 %v2778_v10, %v2141_v12  ;;  %v10598_v31 = vld [vmem:[#allocation2_spill] sm:$0xff]  ;;  %v10599_v58 = vld [vmem:[#allocation28_spill] sm:$0xff]  ;;  %v10600_v33 = vld [vmem:[#allocation3_spill] sm:$0xff] }
 0x196   : > { %v2872_v40 = vadd.f32 %v7602_v39, %v2146_v38  ;;  %v7606_v42 = vpop.f32.mrf.mxu0  ;;  %v2148_v37 = vadd.f32 %v10599_v58, %v10598_v31  ;;  %v2870_v29 = vadd.f32 %v2791_v53, %v2144_v35  ;;  %v10601_v15 = vld [vmem:[#allocation29_spill] sm:$0xff]  ;;  %v10603_v54 = vld [vmem:[#allocation30_spill] sm:$0xff]  ;;  %v10604_v10 = vld [vmem:[#allocation31_spill] sm:$0xff] }
 0x197   : > { %v2873_v46 = vadd.f32 %v7603_v21, %v2147_v30  ;;  %v2871_v56 = vadd.f32 %v2794_v55, %v2145_v7  ;;  %v2876_v3 = vadd.f32 %v7606_v42, %v2150_v0  ;;  %v2151_v52 = vadd.f32 %v10601_v15, %v10600_v33  ;;  %v10602_v1 = vld [vmem:[#allocation5_spill] sm:$0xff]  ;;  %v10605_v38 = vld [vmem:[#allocation32_spill] sm:$0xff]  ;;  %v10608_v7 = vld [vmem:[#allocation42_spill] sm:$0xff]  ;;  %v7649_v0 = vpop.f32.mrf.mxu1 }
 0x198   : > { %v2807_v27 = vpop.f32.mrf.mxu0  ;;  %v2149_v49 = vadd.f32 %v10603_v54, %v10602_v1  ;;  %v2154_v39 = vadd.f32 %v10604_v10, %v10014_v44  ;;  %v2152_v53 = vadd.f32 %v10605_v38, %v10026_v2  ;;  %v10606_v21 = vld [vmem:[#allocation40_spill] sm:$0xff]  ;;  %v10607_v35 = vld [vmem:[#allocation41_spill] sm:$0xff]  ;;  %v10172_v4 = vadd.f32 %v10608_v7, %v2854_v5  ;;  %v10609_v42 = vld [vmem:[#allocation43_spill] sm:$0xff] }
 0x199   : > { %v2874_v6 = vadd.f32 %v2807_v27, %v2148_v37  ;;  %v2157_v55 = vadd.f32 %v10606_v21, %v10077_v48  ;;  %v10169_v30 = vadd.f32 %v10607_v35, %v10089_v28  ;;  %v10175_v31 = vadd.f32 %v10609_v42, %v2857_v57  ;;  %v10610_v44 = vld [vmem:[#allocation44_spill] sm:$0xff]  ;;  %v10611_v37 = vld [vmem:[#allocation45_spill] sm:$0xff]  ;;  %v10612_v48 = vld [vmem:[#allocation46_spill] sm:$0xff] }
 0x19a   : > { %v7607_v12 = vpop.f32.mrf.mxu0  ;;  %v10178_v58 = vadd.f32 %v10610_v44, %v2855_v61  ;;  %v10181_v2 = vadd.f32 %v10611_v37, %v2860_v20  ;;  %v10184_v33 = vadd.f32 %v10612_v48, %v2858_v9  ;;  %v10613_v28 = vld [vmem:[#allocation47_spill] sm:$0xff]  ;;  %v10614_v5 = vld [vmem:[#allocation49_spill] sm:$0xff]  ;;  %v10616_v10 = vld [vmem:[#allocation54_spill] sm:$0xff]  ;;  %v3312_v37 = vpop.f32.mrf.mxu1 }
 0x19b   : > { %v2877_v22 = vadd.f32 %v7607_v12, %v2151_v52  ;;  %v10187_v15 = vadd.f32 %v10613_v28, %v2861_v50  ;;  %v10190_v1 = vadd.f32 %v10614_v5, %v2859_v8  ;;  %v10615_v52 = vld [vmem:[#allocation51_spill] sm:$0xff]  ;;  %v10196_v61 = vadd.f32 %v10616_v10, %v2862_v43  ;;  %v10618_v38 = vld [vmem:[#allocation56_spill] sm:$0xff]  ;;  %v10619_v35 = vld [vmem:[#allocation57_spill] sm:$0xff] }
 0x19c   : > { %v2810_v27 = vpop.f32.mrf.mxu0  ;;  %v10193_v54 = vadd.f32 %v10615_v52, %v2864_v36  ;;  %v10617_v12 = vld [vmem:[#allocation55_spill] sm:$0xff]  ;;  %v10202_v21 = vadd.f32 %v10618_v38, %v2863_v60  ;;  %v10205_v50 = vadd.f32 %v10619_v35, %v2868_v26  ;;  %v10620_v7 = vld [vmem:[#allocation58_spill] sm:$0xff]  ;;  %v10621_v42 = vld [vmem:[#allocation60_spill] sm:$0xff] }
 0x19d   : > { %v2875_v57 = vadd.f32 %v2810_v27, %v2149_v49  ;;  %v10199_v20 = vadd.f32 %v10617_v12, %v2865_v23  ;;  %v10208_v8 = vadd.f32 %v10620_v7, %v2866_v18  ;;  %v10211_v36 = vadd.f32 %v10621_v42, %v2869_v25  ;;  %v10622_v49 = vld [vmem:[#allocation61_spill] sm:$0xff]  ;;  %v10623_v23 = vld [vmem:[#allocation62_spill] sm:$0xff]  ;;  %v10624_v60 = vld [vmem:[#allocation63_spill] sm:$0xff] }
 0x19e   : > { %v7610_v9 = vpop.f32.mrf.mxu0  ;;  %v10214_v44 = vadd.f32 %v10622_v49, %v2867_v13  ;;  %v10217_v27 = vadd.f32 %v10623_v23, %v2872_v40  ;;  %v10220_v48 = vadd.f32 %v10624_v60, %v2870_v29  ;;  %v10625_v28 = vld [vmem:[#allocation64_spill] sm:$0xff]  ;;  %v10626_v18 = vld [vmem:[#allocation65_spill] sm:$0xff]  ;;  %v10229_v25 = vadd.f32 %v10017_v34, %v2876_v3  ;;  %v10628_v34 = vld [vmem:[#allocation34_spill] sm:$0xff] }
 0x19f   : > { %v2880_v43 = vadd.f32 %v7610_v9, %v2154_v39  ;;  %v10223_v26 = vadd.f32 %v10625_v28, %v2873_v46  ;;  %v10226_v52 = vadd.f32 %v10626_v18, %v2871_v56  ;;  %v10232_v13 = vadd.f32 %v10029_v45, %v2874_v6  ;;  %v10627_v29 = vld [vmem:[#allocation33_spill] sm:$0xff] }
 0x1a0   : > { %v2823_v5 = vpop.f32.mrf.mxu0  ;;  %v10235_v39 = vadd.f32 %v10047_v11, %v2877_v22  ;;  %v2155_v10 = vadd.f32 %v10627_v29, %v10034_v19  ;;  %v10240_v46 = vadd.f32 %v10060_v51, %v2875_v57  ;;  %v2153_v3 = vadd.f32 %v10628_v34, %v10038_v14  ;;  %v10629_v51 = vld [vmem:[#allocation37_spill] sm:$0xff]  ;;  %v10630_v14 = vld [vmem:[#allocation38_spill] sm:$0xff] }
 0x1a1   : > { %v2878_v40 = vadd.f32 %v2823_v5, %v2152_v53  ;;  %v10243_v12 = vadd.f32 %v10081_v59, %v2880_v43  ;;  %v2158_v57 = vadd.f32 %v10629_v51, %v10054_v24  ;;  %v2156_v42 = vadd.f32 %v10630_v14, %v10066_v41  ;;  %v10631_v43 = vld [vmem:[#allocation39_spill] sm:$0xff] }
 0x1a2   : > { %v7611_v56 = vpop.f32.mrf.mxu0  ;;  %v7688_v45 = vpop.f32.mrf.mxu1  ;;  %v2159_v23 = vadd.f32 %v10631_v43, %v10073_v63 }
 0x1a3   : > { %v2881_v38 = vadd.f32 %v7611_v56, %v2155_v10  ;;  %v10248_v6 = vadd.f32 %v10097_v17, %v2878_v40 }
 0x1a4   : > { %v2826_v11 = vpop.f32.mrf.mxu0  ;;  %v4282_v22 = vpop.f32.mrf.mxu1 }
 0x1a5   : > { %v2879_v53 = vadd.f32 %v2826_v11, %v2153_v3  ;;  %v10251_v19 = vadd.f32 %v10110_v47, %v2881_v38 }
 0x1a6   : > { %v7614_v9 = vpop.f32.mrf.mxu0  ;;  %v7689_v35 = vpop.f32.mrf.mxu1 }
 0x1a7   : > { %v10256_v59 = vadd.f32 %v10126_v16, %v2879_v53  ;;  %v2884_v7 = vadd.f32 %v7614_v9, %v2158_v57 }
 0x1a8   : > { %v2839_v17 = vpop.f32.mrf.mxu0  ;;  %v4285_v28 = vpop.f32.mrf.mxu1 }
 0x1a9   : > { %v2882_v49 = vadd.f32 %v2839_v17, %v2156_v42  ;;  %v10263_v47 = vadd.f32 %v10138_v32, %v2884_v7 }
 0x1aa   : > { %v7615_v60 = vpop.f32.mrf.mxu0 }
 0x1ab   : > { %v2885_v24 = vadd.f32 %v7615_v60, %v2159_v23  ;;  %v10266_v16 = vadd.f32 %v10155_v62, %v2882_v49 }
 0x1ac   : > { %v2842_v5 = vpop.f32.mrf.mxu0 }
 0x1ad   : > { %v2883_v18 = vadd.f32 %v2842_v5, %v2157_v55  ;;  %v10268_v40 = vadd.f32 %v7649_v0, %v2885_v24 }
 0x1ae   : > { %v7692_v29 = vpop.f32.mrf.mxu1  ;;  %v7654_v41 = vpop.f32.mrf.mxu0 }
 0x1af   : > { %v3685_v10 = vadd.f32 %v7654_v41, %v10169_v30  ;;  %v10271_v56 = vadd.f32 %v3312_v37, %v2883_v18 }
 0x1b0   : > { %v4298_v63 = vpop.f32.mrf.mxu1  ;;  %v3556_v38 = vpop.f32.mrf.mxu0 }
 0x1b1   : > { %v3683_v32 = vadd.f32 %v3556_v38, %v10172_v4  ;;  %v10274_v34 = vadd.f32 %v7688_v45, %v3685_v10 }
 0x1b2   : > { %v7693_v3 = vpop.f32.mrf.mxu1  ;;  %v7655_v11 = vpop.f32.mrf.mxu0 }
 0x1b3   : > { %v3686_v62 = vadd.f32 %v7655_v11, %v10175_v31  ;;  %v10277_v53 = vadd.f32 %v4282_v22, %v3683_v32 }
 0x1b4   : > { %v4301_v55 = vpop.f32.mrf.mxu1  ;;  %v3559_v0 = vpop.f32.mrf.mxu0 }
 0x1b5   : > { %v3684_v51 = vadd.f32 %v3559_v0, %v10178_v58  ;;  %v10280_v57 = vadd.f32 %v7689_v35, %v3686_v62 }
 0x1b6   : > { %v7658_v30 = vpop.f32.mrf.mxu0 }
 0x1b7   : > { %v3689_v37 = vadd.f32 %v7658_v30, %v10181_v2  ;;  %v10283_v9 = vadd.f32 %v4285_v28, %v3684_v51 }
 0x1b8   : > { %v7696_v4 = vpop.f32.mrf.mxu1  ;;  %v3572_v45 = vpop.f32.mrf.mxu0 }
 0x1b9   : > { %v3687_v7 = vadd.f32 %v3572_v45, %v10184_v33  ;;  %v10286_v14 = vadd.f32 %v7692_v29, %v3689_v37 }
 0x1ba   : > { %v4314_v31 = vpop.f32.mrf.mxu1  ;;  %v7659_v22 = vpop.f32.mrf.mxu0 }
 0x1bb   : > { %v3690_v42 = vadd.f32 %v7659_v22, %v10187_v15  ;;  %v10289_v17 = vadd.f32 %v4298_v63, %v3687_v7 }
 0x1bc   : > { %v7697_v58 = vpop.f32.mrf.mxu1  ;;  %v3575_v35 = vpop.f32.mrf.mxu0 }
 0x1bd   : > { %v3688_v49 = vadd.f32 %v3575_v35, %v10190_v1  ;;  %v10292_v43 = vadd.f32 %v7693_v3, %v3690_v42 }
 0x1be   : > { %v4317_v2 = vpop.f32.mrf.mxu1  ;;  %v7662_v23 = vpop.f32.mrf.mxu0 }
 0x1bf   : > { %v3693_v60 = vadd.f32 %v7662_v23, %v10193_v54  ;;  %v10295_v28 = vadd.f32 %v4301_v55, %v3688_v49 }
 0x1c0   : > { %v3588_v33 = vpop.f32.mrf.mxu0 }
 0x1c1   : > { %v3691_v24 = vadd.f32 %v3588_v33, %v10196_v61  ;;  %v10298_v5 = vadd.f32 %v7696_v4, %v3693_v60  ;;  %v7700_v15 = vpop.f32.mrf.mxu1 }
 0x1c2   : > { %v7663_v18 = vpop.f32.mrf.mxu0 }
 0x1c3   : > { %v3694_v29 = vadd.f32 %v7663_v18, %v10199_v20  ;;  %v10301_v41 = vadd.f32 %v4314_v31, %v3691_v24  ;;  %v4330_v1 = vpop.f32.mrf.mxu1 }
 0x1c4   : > { %v3591_v10 = vpop.f32.mrf.mxu0 }
 0x1c5   : > { %v3692_v63 = vadd.f32 %v3591_v10, %v10202_v21  ;;  %v10304_v38 = vadd.f32 %v7697_v58, %v3694_v29  ;;  %v7701_v54 = vpop.f32.mrf.mxu1 }
 0x1c6   : > { %v7666_v32 = vpop.f32.mrf.mxu0 }
 0x1c7   : > { %v3697_v3 = vadd.f32 %v7666_v32, %v10205_v50  ;;  %v10307_v11 = vadd.f32 %v4317_v2, %v3692_v63  ;;  %v4333_v61 = vpop.f32.mrf.mxu1 }
 0x1c8   : > { %v3604_v62 = vpop.f32.mrf.mxu0 }
 0x1c9   : > { %v3695_v55 = vadd.f32 %v3604_v62, %v10208_v8  ;;  %v10310_v0 = vadd.f32 %v7700_v15, %v3697_v3 }
 0x1ca   : > { %v7667_v20 = vpop.f32.mrf.mxu0 }
 0x1cb   : > { %v3698_v51 = vadd.f32 %v7667_v20, %v10211_v36  ;;  %v10313_v30 = vadd.f32 %v4330_v1, %v3695_v55  ;;  %v7704_v21 = vpop.f32.mrf.mxu1 }
 0x1cc   : > { %v3607_v37 = vpop.f32.mrf.mxu0 }
 0x1cd   : > { %v3696_v4 = vadd.f32 %v3607_v37, %v10214_v44  ;;  %v10316_v45 = vadd.f32 %v7701_v54, %v3698_v51  ;;  %v4346_v50 = vpop.f32.mrf.mxu1 }
 0x1ce   : > { %v7670_v7 = vpop.f32.mrf.mxu0 }
 0x1cf   : > { %v3701_v31 = vadd.f32 %v7670_v7, %v10217_v27  ;;  %v10319_v22 = vadd.f32 %v4333_v61, %v3696_v4  ;;  %v7705_v8 = vpop.f32.mrf.mxu1 }
 0x1d0   : > { %v3620_v42 = vpop.f32.mrf.mxu0 }
 0x1d1   : > { %v3699_v58 = vadd.f32 %v3620_v42, %v10220_v48  ;;  %v10322_v35 = vadd.f32 %v7704_v21, %v3701_v31  ;;  %v4349_v36 = vpop.f32.mrf.mxu1 }
 0x1d2   : > { %v7671_v49 = vpop.f32.mrf.mxu0 }
 0x1d3   : > { %v3702_v2 = vadd.f32 %v7671_v49, %v10223_v26  ;;  %v10325_v23 = vadd.f32 %v4346_v50, %v3699_v58 }
 0x1d4   : > { %v3623_v44 = vpop.f32.mrf.mxu0 }
 0x1d5   : > { %v3700_v60 = vadd.f32 %v3623_v44, %v10226_v52  ;;  %v10328_v33 = vadd.f32 %v7705_v8, %v3702_v2  ;;  %v7708_v27 = vpop.f32.mrf.mxu1 }
 0x1d6   : > { %v7674_v24 = vpop.f32.mrf.mxu0 }
 0x1d7   : > { %v3705_v15 = vadd.f32 %v7674_v24, %v10229_v25  ;;  %v10331_v18 = vadd.f32 %v4349_v36, %v3700_v60  ;;  %v4362_v48 = vpop.f32.mrf.mxu1 }
 0x1d8   : > { %v3636_v29 = vpop.f32.mrf.mxu0 }
 0x1d9   : > { %v3703_v1 = vadd.f32 %v3636_v29, %v10232_v13  ;;  %v10334_v10 = vadd.f32 %v7708_v27, %v3705_v15  ;;  %v7709_v26 = vpop.f32.mrf.mxu1 }
 0x1da   : > { %v7675_v63 = vpop.f32.mrf.mxu0 }
 0x1db   : > { %v3706_v54 = vadd.f32 %v7675_v63, %v10235_v39  ;;  %v10337_v32 = vadd.f32 %v4362_v48, %v3703_v1  ;;  %v4365_v52 = vpop.f32.mrf.mxu1 }
 0x1dc   : > { %v3639_v3 = vpop.f32.mrf.mxu0 }
 0x1dd   : > { %v3704_v61 = vadd.f32 %v3639_v3, %v10240_v46  ;;  %v10340_v62 = vadd.f32 %v7709_v26, %v3706_v54 }
 0x1de   : > { %v7678_v25 = vpop.f32.mrf.mxu0  ;;  %v7712_v55 = vpop.f32.mrf.mxu1 }
 0x1df   : > { %v3709_v20 = vadd.f32 %v7678_v25, %v10243_v12  ;;  %v10343_v51 = vadd.f32 %v4365_v52, %v3704_v61 }
 0x1e0   : > { %v3652_v13 = vpop.f32.mrf.mxu0  ;;  %v4378_v21 = vpop.f32.mrf.mxu1 }
 0x1e1   : > { %v3707_v37 = vadd.f32 %v3652_v13, %v10248_v6  ;;  %v10346_v4 = vadd.f32 %v7712_v55, %v3709_v20 }
 0x1e2   : > { %v7679_v39 = vpop.f32.mrf.mxu0  ;;  %v7713_v50 = vpop.f32.mrf.mxu1 }
 0x1e3   : > { %v3710_v7 = vadd.f32 %v7679_v39, %v10251_v19  ;;  %v10349_v31 = vadd.f32 %v4378_v21, %v3707_v37 }
 0x1e4   : > { %v3655_v46 = vpop.f32.mrf.mxu0  ;;  %v4381_v8 = vpop.f32.mrf.mxu1 }
 0x1e5   : > { %v3708_v42 = vadd.f32 %v3655_v46, %v10256_v59  ;;  %v10352_v58 = vadd.f32 %v7713_v50, %v3710_v7 }
 0x1e6   : > { %v7682_v12 = vpop.f32.mrf.mxu0 }
 0x1e7   : > { %v3713_v36 = vadd.f32 %v7682_v12, %v10263_v47  ;;  %v10355_v49 = vadd.f32 %v4381_v8, %v3708_v42 }
 0x1e8   : > { %v3668_v6 = vpop.f32.mrf.mxu0  ;;  %v7716_v2 = vpop.f32.mrf.mxu1 }
 0x1e9   : > { %v3711_v44 = vadd.f32 %v3668_v6, %v10266_v16  ;;  %v10358_v60 = vadd.f32 %v7716_v2, %v3713_v36 }
 0x1ea   : > { %v7683_v19 = vpop.f32.mrf.mxu0  ;;  %v4394_v27 = vpop.f32.mrf.mxu1 }
 0x1eb   : > { %v3714_v24 = vadd.f32 %v7683_v19, %v10268_v40  ;;  %v10361_v15 = vadd.f32 %v4394_v27, %v3711_v44 }
 0x1ec   : > { %v3671_v59 = vpop.f32.mrf.mxu0  ;;  %v7717_v48 = vpop.f32.mrf.mxu1 }
 0x1ed   : > { %v3712_v47 = vadd.f32 %v3671_v59, %v10271_v56  ;;  %v10364_v29 = vadd.f32 %v7717_v48, %v3714_v24 }
 0x1ee   : > { %v4397_v1 = vpop.f32.mrf.mxu1 }
 0x1ef   : > { %v10366_v26 = vadd.f32 %v4397_v1, %v3712_v47 }
 0x1f0   : > { %v7756_v63 = vpop.f32.mrf.mxu1 }
 0x1f1   : > { %v6072_v3 = vmul.f32 %v7756_v63, %v7756_v63 }
 0x1f2   : > { %v5745_v16 = vpop.f32.mrf.mxu1 }
 0x1f3   : > { %v6070_v54 = vmul.f32 %v5745_v16, %v5745_v16 }
 0x1f4   : > { %v7757_v40 = vpop.f32.mrf.mxu1 }
 0x1f5   : > { %v7174_v52 = vpack.c.bf16 %v7757_v40, %v7756_v63  ;;  %v6073_v20 = vmul.f32 %v7757_v40, %v7757_v40 }
 0x1f6   : > { %v5748_v56 = vpop.f32.mrf.mxu1 }
 0x1f7   : > { %7261 = vst [vmem:[%s10374_s14 + $0x8] sm:$0xff] %v7174_v52   ;;  %v7169_v61 = vpack.c.bf16 %v5748_v56, %v5745_v16  ;;  %v6032_v25 = vadd.f32 %v5748_v56, %v5745_v16  ;;  %v6071_v55 = vmul.f32 %v5748_v56, %v5748_v56 }
 0x1f9   : > { %7170 = vst [vmem:[%s10374_s14] sm:$0xff] %v7169_v61   ;;  %v6033_v13 = vadd.f32 %v7756_v63, %v6032_v25  ;;  %v6102_v21 = vadd.f32 %v6071_v55, %v6070_v54 }
 0x1fb   : > { %v6103_v39 = vadd.f32 %v6102_v21, %v6072_v3  ;;  %v6034_v7 = vadd.f32 %v7757_v40, %v6033_v13 }
 0x1fc   : > { %v7760_v50 = vpop.f32.mrf.mxu1 }
 0x1fd   : > { %v7722_v37 = vpop.f32.mrf.mxu0  ;;  %v6104_v42 = vadd.f32 %v6103_v39, %v6073_v20 }
 0x1fe   : > { %v5761_v8 = vpop.f32.mrf.mxu1  ;;  %v4881_v2 = vadd.f32 %v7722_v37, %v10274_v34 }
 0x1ff   : > { %v4752_v46 = vpop.f32.mrf.mxu0  ;;  %v6035_v12 = vadd.f32 %v6034_v7, %v5761_v8  ;;  %v6074_v36 = vmul.f32 %v5761_v8, %v5761_v8 }
 0x200   : > { %v4879_v44 = vadd.f32 %v4752_v46, %v10277_v53  ;;  %v7761_v19 = vpop.f32.mrf.mxu1  ;;  %v6076_v53 = vmul.f32 %v7760_v50, %v7760_v50  ;;  %v5111_v25 = vmul.f32 %v4881_v2, %v4881_v2 }
 0x201   : > { %v7723_v6 = vpop.f32.mrf.mxu0  ;;  %v6105_v24 = vadd.f32 %v6104_v42, %v6074_v36  ;;  %v7184_v59 = vpack.c.bf16 %v7761_v19, %v7760_v50  ;;  %v6077_v55 = vmul.f32 %v7761_v19, %v7761_v19 }
 0x202   : > { %v4882_v27 = vadd.f32 %v7723_v6, %v10280_v57  ;;  %v5764_v1 = vpop.f32.mrf.mxu1  ;;  %v5109_v40 = vmul.f32 %v4879_v44, %v4879_v44 }
 0x203   : > { %v4755_v48 = vpop.f32.mrf.mxu0  ;;  %7263 = vst [vmem:[%s10374_s14 + $0x18] sm:$0xff] %v7184_v59   ;;  %v7179_v63 = vpack.c.bf16 %v5764_v1, %v5761_v8  ;;  %v6036_v57 = vadd.f32 %v6035_v12, %v5764_v1  ;;  %v6075_v16 = vmul.f32 %v5764_v1, %v5764_v1 }
 0x204   : > { %v7094_v47 = vpack.c.bf16 %v4882_v27, %v4881_v2  ;;  %v4880_v34 = vadd.f32 %v4755_v48, %v10283_v9  ;;  %v5112_v21 = vmul.f32 %v4882_v27, %v4882_v27 }
 0x205   : > { %7262 = vst [vmem:[%s10374_s14 + $0x10] sm:$0xff] %v7179_v63   ;;  %v6037_v3 = vadd.f32 %v7760_v50, %v6036_v57  ;;  %v6106_v61 = vadd.f32 %v6105_v24, %v6075_v16 }
 0x206   : > { %7246 = vst [vmem:[%s10386_s17 + $0x8] sm:$0xff] %v7094_v47   ;;  %v7089_v54 = vpack.c.bf16 %v4880_v34, %v4879_v44  ;;  %v5071_v52 = vadd.f32 %v4880_v34, %v4879_v44  ;;  %v5110_v56 = vmul.f32 %v4880_v34, %v4880_v34 }
 0x207   : > { %v6107_v9 = vadd.f32 %v6106_v61, %v6076_v53  ;;  %v6038_v39 = vadd.f32 %v7761_v19, %v6037_v3 }
 0x208   : > { %7090 = vst [vmem:[%s10386_s17] sm:$0xff] %v7089_v54   ;;  %v5072_v20 = vadd.f32 %v5071_v52, %v4881_v2  ;;  %v5141_v13 = vadd.f32 %v5110_v56, %v5109_v40 }
 0x209   : > { %v6108_v42 = vadd.f32 %v6107_v9, %v6077_v55 }
 0x20a   : > { %v5142_v37 = vadd.f32 %v5141_v13, %v5111_v25  ;;  %v5073_v7 = vadd.f32 %v5072_v20, %v4882_v27  ;;  %v7764_v46 = vpop.f32.mrf.mxu1 }
 0x20b   : > { %v7726_v8 = vpop.f32.mrf.mxu0  ;;  %v6080_v19 = vmul.f32 %v7764_v46, %v7764_v46 }
 0x20c   : > { %v5143_v12 = vadd.f32 %v5142_v37, %v5112_v21  ;;  %v5777_v36 = vpop.f32.mrf.mxu1  ;;  %v4885_v27 = vadd.f32 %v7726_v8, %v10286_v14 }
 0x20d   : > { %v4768_v6 = vpop.f32.mrf.mxu0  ;;  %v6039_v44 = vadd.f32 %v6038_v39, %v5777_v36  ;;  %v6078_v50 = vmul.f32 %v5777_v36, %v5777_v36 }
 0x20e   : > { %v4883_v24 = vadd.f32 %v4768_v6, %v10289_v17  ;;  %v7765_v59 = vpop.f32.mrf.mxu1  ;;  %v5115_v13 = vmul.f32 %v4885_v27, %v4885_v27 }
 0x20f   : > { %v7727_v48 = vpop.f32.mrf.mxu0  ;;  %v6109_v2 = vadd.f32 %v6108_v42, %v6078_v50  ;;  %v7194_v34 = vpack.c.bf16 %v7765_v59, %v7764_v46  ;;  %v6081_v25 = vmul.f32 %v7765_v59, %v7765_v59 }
 0x210   : > { %v5074_v47 = vadd.f32 %v5073_v7, %v4883_v24  ;;  %v5113_v1 = vmul.f32 %v4883_v24, %v4883_v24  ;;  %v4886_v53 = vadd.f32 %v7727_v48, %v10292_v43  ;;  %v5780_v63 = vpop.f32.mrf.mxu1 }
 0x211   : > { %v4771_v57 = vpop.f32.mrf.mxu0  ;;  %7265 = vst [vmem:[%s10374_s14 + $0x28] sm:$0xff] %v7194_v34   ;;  %v7189_v40 = vpack.c.bf16 %v5780_v63, %v5777_v36  ;;  %v6040_v17 = vadd.f32 %v6039_v44, %v5780_v63  ;;  %v6079_v54 = vmul.f32 %v5780_v63, %v5780_v63 }
 0x212   : > { %v5144_v16 = vadd.f32 %v5143_v12, %v5113_v1  ;;  %v7104_v52 = vpack.c.bf16 %v4886_v53, %v4885_v27  ;;  %v4884_v56 = vadd.f32 %v4771_v57, %v10295_v28  ;;  %v5116_v28 = vmul.f32 %v4886_v53, %v4886_v53 }
 0x213   : > { %7264 = vst [vmem:[%s10374_s14 + $0x20] sm:$0xff] %v7189_v40   ;;  %v6041_v3 = vadd.f32 %v7764_v46, %v6040_v17  ;;  %v6110_v61 = vadd.f32 %v6109_v2, %v6079_v54 }
 0x214   : > { %7248 = vst [vmem:[%s10386_s17 + $0x18] sm:$0xff] %v7104_v52   ;;  %v7099_v55 = vpack.c.bf16 %v4884_v56, %v4883_v24  ;;  %v5075_v14 = vadd.f32 %v5074_v47, %v4884_v56  ;;  %v5114_v20 = vmul.f32 %v4884_v56, %v4884_v56 }
 0x215   : > { %v6111_v43 = vadd.f32 %v6110_v61, %v6080_v19  ;;  %v6042_v37 = vadd.f32 %v7765_v59, %v6041_v3 }
 0x216   : > { %7247 = vst [vmem:[%s10386_s17 + $0x10] sm:$0xff] %v7099_v55   ;;  %v5076_v9 = vadd.f32 %v5075_v14, %v4885_v27  ;;  %v5145_v21 = vadd.f32 %v5144_v16, %v5114_v20 }
 0x217   : > { %v7768_v39 = vpop.f32.mrf.mxu1  ;;  %v6112_v42 = vadd.f32 %v6111_v43, %v6081_v25 }
 0x218   : > { %v7730_v7 = vpop.f32.mrf.mxu0  ;;  %v5146_v8 = vadd.f32 %v5145_v21, %v5115_v13  ;;  %v5077_v12 = vadd.f32 %v5076_v9, %v4886_v53  ;;  %v6084_v19 = vmul.f32 %v7768_v39, %v7768_v39 }
 0x219   : > { %v5793_v36 = vpop.f32.mrf.mxu1  ;;  %v4889_v27 = vadd.f32 %v7730_v7, %v10298_v5 }
 0x21a   : > { %v4784_v46 = vpop.f32.mrf.mxu0  ;;  %v6043_v6 = vadd.f32 %v6042_v37, %v5793_v36  ;;  %v6082_v44 = vmul.f32 %v5793_v36, %v5793_v36  ;;  %v5147_v24 = vadd.f32 %v5146_v8, %v5116_v28 }
 0x21b   : > { %v4887_v50 = vadd.f32 %v4784_v46, %v10301_v41  ;;  %v7769_v48 = vpop.f32.mrf.mxu1  ;;  %v5119_v20 = vmul.f32 %v4889_v27, %v4889_v27 }
 0x21c   : > { %v7731_v2 = vpop.f32.mrf.mxu0  ;;  %v6113_v47 = vadd.f32 %v6112_v42, %v6082_v44  ;;  %v7204_v34 = vpack.c.bf16 %v7769_v48, %v7768_v39  ;;  %v6085_v56 = vmul.f32 %v7769_v48, %v7769_v48 }
 0x21d   : > { %v5078_v1 = vadd.f32 %v5077_v12, %v4887_v50  ;;  %v5117_v59 = vmul.f32 %v4887_v50, %v4887_v50  ;;  %v4890_v53 = vadd.f32 %v7731_v2, %v10304_v38  ;;  %v5796_v63 = vpop.f32.mrf.mxu1 }
 0x21e   : > { %v4787_v57 = vpop.f32.mrf.mxu0  ;;  %7267 = vst [vmem:[%s10374_s14 + $0x38] sm:$0xff] %v7204_v34   ;;  %v7199_v40 = vpack.c.bf16 %v5796_v63, %v5793_v36  ;;  %v6044_v41 = vadd.f32 %v6043_v6, %v5796_v63  ;;  %v6083_v17 = vmul.f32 %v5796_v63, %v5796_v63 }
 0x21f   : > { %v5148_v16 = vadd.f32 %v5147_v24, %v5117_v59  ;;  %v7114_v54 = vpack.c.bf16 %v4890_v53, %v4889_v27  ;;  %v4888_v52 = vadd.f32 %v4787_v57, %v10307_v11  ;;  %v5120_v7 = vmul.f32 %v4890_v53, %v4890_v53 }
 0x220   : > { %7266 = vst [vmem:[%s10374_s14 + $0x30] sm:$0xff] %v7199_v40   ;;  %v6045_v3 = vadd.f32 %v7768_v39, %v6044_v41  ;;  %v6114_v61 = vadd.f32 %v6113_v47, %v6083_v17 }
 0x221   : > { %7250 = vst [vmem:[%s10386_s17 + $0x28] sm:$0xff] %v7114_v54   ;;  %v7109_v25 = vpack.c.bf16 %v4888_v52, %v4887_v50  ;;  %v5079_v5 = vadd.f32 %v5078_v1, %v4888_v52  ;;  %v5118_v55 = vmul.f32 %v4888_v52, %v4888_v52 }
 0x222   : > { %v6115_v38 = vadd.f32 %v6114_v61, %v6084_v19  ;;  %v6046_v14 = vadd.f32 %v7769_v48, %v6045_v3 }
 0x223   : > { %7249 = vst [vmem:[%s10386_s17 + $0x20] sm:$0xff] %v7109_v25   ;;  %v5080_v43 = vadd.f32 %v5079_v5, %v4889_v27  ;;  %v5149_v13 = vadd.f32 %v5148_v16, %v5118_v55  ;;  %v7772_v9 = vpop.f32.mrf.mxu1 }
 0x224   : > { %v6116_v37 = vadd.f32 %v6115_v38, %v6085_v56  ;;  %v6088_v34 = vmul.f32 %v7772_v9, %v7772_v9 }
 0x225   : > { %v7734_v21 = vpop.f32.mrf.mxu0  ;;  %v5150_v8 = vadd.f32 %v5149_v13, %v5119_v20  ;;  %v5809_v11 = vpop.f32.mrf.mxu1  ;;  %v5081_v42 = vadd.f32 %v5080_v43, %v4890_v53 }
 0x226   : > { %v6047_v39 = vadd.f32 %v6046_v14, %v5809_v11  ;;  %v6086_v12 = vmul.f32 %v5809_v11, %v5809_v11  ;;  %v4893_v48 = vadd.f32 %v7734_v21, %v10310_v0 }
 0x227   : > { %v4800_v28 = vpop.f32.mrf.mxu0  ;;  %v5151_v46 = vadd.f32 %v5150_v8, %v5120_v7  ;;  %v7773_v6 = vpop.f32.mrf.mxu1 }
 0x228   : > { %v4891_v36 = vadd.f32 %v4800_v28, %v10313_v30  ;;  %v6117_v44 = vadd.f32 %v6116_v37, %v6086_v12  ;;  %v7214_v50 = vpack.c.bf16 %v7773_v6, %v7772_v9  ;;  %v6089_v41 = vmul.f32 %v7773_v6, %v7773_v6 }
 0x229   : > { %v7735_v24 = vpop.f32.mrf.mxu0  ;;  %v5812_v59 = vpop.f32.mrf.mxu1  ;;  %v5123_v56 = vmul.f32 %v4893_v48, %v4893_v48 }
 0x22a   : > { %v5082_v2 = vadd.f32 %v5081_v42, %v4891_v36  ;;  %v5121_v47 = vmul.f32 %v4891_v36, %v4891_v36  ;;  %v4894_v1 = vadd.f32 %v7735_v24, %v10316_v45  ;;  %7269 = vst [vmem:[%s10374_s14 + $0x48] sm:$0xff] %v7214_v50   ;;  %v7209_v19 = vpack.c.bf16 %v5812_v59, %v5809_v11 }
 0x22b   : > { %v6048_v27 = vadd.f32 %v6047_v39, %v5812_v59  ;;  %v6087_v30 = vmul.f32 %v5812_v59, %v5812_v59  ;;  %v4803_v53 = vpop.f32.mrf.mxu0 }
 0x22c   : > { %v5152_v63 = vadd.f32 %v5151_v46, %v5121_v47  ;;  %v7124_v57 = vpack.c.bf16 %v4894_v1, %v4893_v48  ;;  %v4892_v16 = vadd.f32 %v4803_v53, %v10319_v22  ;;  %7268 = vst [vmem:[%s10374_s14 + $0x40] sm:$0xff] %v7209_v19   ;;  %v5124_v55 = vmul.f32 %v4894_v1, %v4894_v1 }
 0x22d   : > { %v6049_v40 = vadd.f32 %v7772_v9, %v6048_v27  ;;  %v6118_v0 = vadd.f32 %v6117_v44, %v6087_v30 }
 0x22e   : > { %7252 = vst [vmem:[%s10386_s17 + $0x38] sm:$0xff] %v7124_v57   ;;  %v7119_v17 = vpack.c.bf16 %v4892_v16, %v4891_v36  ;;  %v5083_v54 = vadd.f32 %v5082_v2, %v4892_v16  ;;  %v5122_v45 = vmul.f32 %v4892_v16, %v4892_v16 }
 0x22f   : > { %v6119_v52 = vadd.f32 %v6118_v0, %v6088_v34  ;;  %v6050_v25 = vadd.f32 %v7773_v6, %v6049_v40 }
 0x230   : > { %7251 = vst [vmem:[%s10386_s17 + $0x30] sm:$0xff] %v7119_v17   ;;  %v5084_v3 = vadd.f32 %v5083_v54, %v4893_v48  ;;  %v5153_v61 = vadd.f32 %v5152_v63, %v5122_v45  ;;  %v7776_v5 = vpop.f32.mrf.mxu1 }
 0x231   : > { %v7738_v14 = vpop.f32.mrf.mxu0  ;;  %v6120_v20 = vadd.f32 %v6119_v52, %v6089_v41  ;;  %v6092_v44 = vmul.f32 %v7776_v5, %v7776_v5 }
 0x232   : > { %v5154_v38 = vadd.f32 %v5153_v61, %v5123_v56  ;;  %v5085_v22 = vadd.f32 %v5084_v3, %v4894_v1  ;;  %v5825_v43 = vpop.f32.mrf.mxu1  ;;  %v4897_v12 = vadd.f32 %v7738_v14, %v10322_v35 }
 0x233   : > { %v6051_v13 = vadd.f32 %v6050_v25, %v5825_v43  ;;  %v6090_v9 = vmul.f32 %v5825_v43, %v5825_v43  ;;  %v4816_v21 = vpop.f32.mrf.mxu0 }
 0x234   : > { %v5155_v37 = vadd.f32 %v5154_v38, %v5124_v55  ;;  %v4895_v7 = vadd.f32 %v4816_v21, %v10325_v23  ;;  %v7777_v8 = vpop.f32.mrf.mxu1  ;;  %v5127_v53 = vmul.f32 %v4897_v12, %v4897_v12 }
 0x235   : > { %v6121_v11 = vadd.f32 %v6120_v20, %v6090_v9  ;;  %v7224_v42 = vpack.c.bf16 %v7777_v8, %v7776_v5  ;;  %v7739_v39 = vpop.f32.mrf.mxu0  ;;  %v6093_v34 = vmul.f32 %v7777_v8, %v7777_v8 }
 0x236   : > { %v5086_v28 = vadd.f32 %v5085_v22, %v4895_v7  ;;  %v5125_v36 = vmul.f32 %v4895_v7, %v4895_v7  ;;  %v4898_v46 = vadd.f32 %v7739_v39, %v10328_v33  ;;  %v5828_v6 = vpop.f32.mrf.mxu1 }
 0x237   : > { %7271 = vst [vmem:[%s10374_s14 + $0x58] sm:$0xff] %v7224_v42   ;;  %v7219_v50 = vpack.c.bf16 %v5828_v6, %v5825_v43  ;;  %v6052_v24 = vadd.f32 %v6051_v13, %v5828_v6  ;;  %v6091_v48 = vmul.f32 %v5828_v6, %v5828_v6  ;;  %v4819_v23 = vpop.f32.mrf.mxu0 }
 0x238   : > { %v5156_v2 = vadd.f32 %v5155_v37, %v5125_v36  ;;  %v7134_v47 = vpack.c.bf16 %v4898_v46, %v4897_v12  ;;  %v4896_v1 = vadd.f32 %v4819_v23, %v10331_v18  ;;  %v5128_v0 = vmul.f32 %v4898_v46, %v4898_v46 }
 0x239   : > { %7270 = vst [vmem:[%s10374_s14 + $0x50] sm:$0xff] %v7219_v50   ;;  %v6053_v59 = vadd.f32 %v7776_v5, %v6052_v24  ;;  %v6122_v35 = vadd.f32 %v6121_v11, %v6091_v48 }
 0x23a   : > { %7254 = vst [vmem:[%s10386_s17 + $0x48] sm:$0xff] %v7134_v47   ;;  %v7129_v19 = vpack.c.bf16 %v4896_v1, %v4895_v7  ;;  %v5087_v27 = vadd.f32 %v5086_v28, %v4896_v1  ;;  %v5126_v33 = vmul.f32 %v4896_v1, %v4896_v1 }
 0x23b   : > { %v6123_v30 = vadd.f32 %v6122_v35, %v6092_v44  ;;  %v6054_v16 = vadd.f32 %v7777_v8, %v6053_v59 }
 0x23c   : > { %7253 = vst [vmem:[%s10386_s17 + $0x40] sm:$0xff] %v7129_v19   ;;  %v5088_v63 = vadd.f32 %v5087_v27, %v4897_v12  ;;  %v5157_v57 = vadd.f32 %v5156_v2, %v5126_v33 }
 0x23d   : > { %v7780_v40 = vpop.f32.mrf.mxu1  ;;  %v6124_v54 = vadd.f32 %v6123_v30, %v6093_v34 }
 0x23e   : > { %v5158_v41 = vadd.f32 %v5157_v57, %v5127_v53  ;;  %v7742_v17 = vpop.f32.mrf.mxu0  ;;  %v5089_v18 = vadd.f32 %v5088_v63, %v4898_v46  ;;  %v6096_v21 = vmul.f32 %v7780_v40, %v7780_v40 }
 0x23f   : > { %v5841_v45 = vpop.f32.mrf.mxu1  ;;  %v4901_v20 = vadd.f32 %v7742_v17, %v10334_v10 }
 0x240   : > { %v6055_v52 = vadd.f32 %v6054_v16, %v5841_v45  ;;  %v6094_v56 = vmul.f32 %v5841_v45, %v5841_v45  ;;  %v4832_v3 = vpop.f32.mrf.mxu0  ;;  %v5159_v61 = vadd.f32 %v5158_v41, %v5128_v0 }
 0x241   : > { %v4899_v25 = vadd.f32 %v4832_v3, %v10337_v32  ;;  %v7781_v5 = vpop.f32.mrf.mxu1  ;;  %v5131_v44 = vmul.f32 %v4901_v20, %v4901_v20 }
 0x242   : > { %v6125_v55 = vadd.f32 %v6124_v54, %v6094_v56  ;;  %v7234_v38 = vpack.c.bf16 %v7781_v5, %v7780_v40  ;;  %v7743_v14 = vpop.f32.mrf.mxu0  ;;  %v6097_v28 = vmul.f32 %v7781_v5, %v7781_v5 }
 0x243   : > { %v5090_v22 = vadd.f32 %v5089_v18, %v4899_v25  ;;  %v5129_v43 = vmul.f32 %v4899_v25, %v4899_v25  ;;  %v4902_v13 = vadd.f32 %v7743_v14, %v10340_v62  ;;  %v5844_v9 = vpop.f32.mrf.mxu1 }
 0x244   : > { %7273 = vst [vmem:[%s10374_s14 + $0x68] sm:$0xff] %v7234_v38   ;;  %v7229_v37 = vpack.c.bf16 %v5844_v9, %v5841_v45  ;;  %v6056_v7 = vadd.f32 %v6055_v52, %v5844_v9  ;;  %v6095_v8 = vmul.f32 %v5844_v9, %v5844_v9  ;;  %v4835_v32 = vpop.f32.mrf.mxu0 }
 0x245   : > { %v5160_v11 = vadd.f32 %v5159_v61, %v5129_v43  ;;  %v7144_v42 = vpack.c.bf16 %v4902_v13, %v4901_v20  ;;  %v4900_v39 = vadd.f32 %v4835_v32, %v10343_v51  ;;  %v5132_v2 = vmul.f32 %v4902_v13, %v4902_v13 }
 0x246   : > { %7272 = vst [vmem:[%s10374_s14 + $0x60] sm:$0xff] %v7229_v37   ;;  %v6057_v12 = vadd.f32 %v7780_v40, %v6056_v7  ;;  %v6126_v10 = vadd.f32 %v6125_v55, %v6095_v8 }
 0x247   : > { %7256 = vst [vmem:[%s10386_s17 + $0x58] sm:$0xff] %v7144_v42   ;;  %v7139_v36 = vpack.c.bf16 %v4900_v39, %v4899_v25  ;;  %v5091_v46 = vadd.f32 %v5090_v22, %v4900_v39  ;;  %v5130_v62 = vmul.f32 %v4900_v39, %v4900_v39 }
 0x248   : > { %v6127_v6 = vadd.f32 %v6126_v10, %v6096_v21  ;;  %v6058_v48 = vadd.f32 %v7781_v5, %v6057_v12 }
 0x249   : > { %7255 = vst [vmem:[%s10386_s17 + $0x50] sm:$0xff] %v7139_v36   ;;  %v5092_v50 = vadd.f32 %v5091_v46, %v4901_v20  ;;  %v5161_v24 = vadd.f32 %v5160_v11, %v5130_v62 }
 0x24a   : > { %v6128_v59 = vadd.f32 %v6127_v6, %v6097_v28 }
 0x24b   : > { %v7784_v23 = vpop.f32.mrf.mxu1  ;;  %v5162_v47 = vadd.f32 %v5161_v24, %v5131_v44  ;;  %v7746_v1 = vpop.f32.mrf.mxu0  ;;  %v5093_v51 = vadd.f32 %v5092_v50, %v4902_v13 }
 0x24c   : > { %v4905_v40 = vadd.f32 %v7746_v1, %v10346_v4  ;;  %v6100_v18 = vmul.f32 %v7784_v23, %v7784_v23 }
 0x24d   : > { %v5857_v35 = vpop.f32.mrf.mxu1  ;;  %v4848_v27 = vpop.f32.mrf.mxu0  ;;  %v5163_v33 = vadd.f32 %v5162_v47, %v5132_v2 }
 0x24e   : > { %v6059_v34 = vadd.f32 %v6058_v48, %v5857_v35  ;;  %v6098_v19 = vmul.f32 %v5857_v35, %v5857_v35  ;;  %v4903_v30 = vadd.f32 %v4848_v27, %v10349_v31  ;;  %v5135_v9 = vmul.f32 %v4905_v40, %v4905_v40 }
 0x24f   : > { %v7785_v53 = vpop.f32.mrf.mxu1  ;;  %v7747_v16 = vpop.f32.mrf.mxu0 }
 0x250   : > { %v6129_v63 = vadd.f32 %v6128_v59, %v6098_v19  ;;  %v7244_v57 = vpack.c.bf16 %v7785_v53, %v7784_v23  ;;  %v5094_v0 = vadd.f32 %v5093_v51, %v4903_v30  ;;  %v5133_v41 = vmul.f32 %v4903_v30, %v4903_v30 }
 0x251   : > { %v4906_v17 = vadd.f32 %v7747_v16, %v10352_v58  ;;  %v5860_v54 = vpop.f32.mrf.mxu1  ;;  %v4851_v3 = vpop.f32.mrf.mxu0  ;;  %v6101_v5 = vmul.f32 %v7785_v53, %v7785_v53 }
 0x252   : > { %7275 = vst [vmem:[%s10374_s14 + $0x78] sm:$0xff] %v7244_v57   ;;  %v7239_v45 = vpack.c.bf16 %v5860_v54, %v5857_v35  ;;  %v6060_v52 = vadd.f32 %v6059_v34, %v5860_v54  ;;  %v6099_v56 = vmul.f32 %v5860_v54, %v5860_v54  ;;  %v5164_v31 = vadd.f32 %v5163_v33, %v5133_v41 }
 0x253   : > { %v7154_v61 = vpack.c.bf16 %v4906_v17, %v4905_v40  ;;  %v4904_v25 = vadd.f32 %v4851_v3, %v10355_v49  ;;  %v7750_v38 = vpop.f32.mrf.mxu0  ;;  %v5136_v8 = vmul.f32 %v4906_v17, %v4906_v17 }
 0x254   : > { %7274 = vst [vmem:[%s10374_s14 + $0x70] sm:$0xff] %v7239_v45   ;;  %v6061_v4 = vadd.f32 %v7784_v23, %v6060_v52  ;;  %v6130_v55 = vadd.f32 %v6129_v63, %v6099_v56  ;;  %v4909_v39 = vadd.f32 %v7750_v38, %v10358_v60 }
 0x255   : > { %7258 = vst [vmem:[%s10386_s17 + $0x68] sm:$0xff] %v7154_v61   ;;  %v7149_v58 = vpack.c.bf16 %v4904_v25, %v4903_v30  ;;  %v5095_v14 = vadd.f32 %v5094_v0, %v4904_v25  ;;  %v5134_v20 = vmul.f32 %v4904_v25, %v4904_v25  ;;  %v4864_v13 = vpop.f32.mrf.mxu0 }
 0x256   : > { %v6062_v22 = vadd.f32 %v7785_v53, %v6061_v4  ;;  %v6131_v43 = vadd.f32 %v6130_v55, %v6100_v18  ;;  %v4907_v7 = vadd.f32 %v4864_v13, %v10361_v15  ;;  %v5139_v34 = vmul.f32 %v4909_v39, %v4909_v39 }
 0x257   : > { %7257 = vst [vmem:[%s10386_s17 + $0x60] sm:$0xff] %v7149_v58   ;;  %v5096_v21 = vadd.f32 %v5095_v14, %v4905_v40  ;;  %v5165_v37 = vadd.f32 %v5164_v31, %v5134_v20  ;;  %v7751_v11 = vpop.f32.mrf.mxu0 }
 0x258   : > { %v6063_v49 = vrot.slane %v6062_v22, 4  ;;  %v6132_v32 = vadd.f32 %v6131_v43, %v6101_v5  ;;  %v4910_v10 = vadd.f32 %v7751_v11, %v10364_v29  ;;  %v5137_v6 = vmul.f32 %v4907_v7, %v4907_v7 }
 0x259   : > { %v5166_v42 = vadd.f32 %v5165_v37, %v5135_v9  ;;  %v5097_v12 = vadd.f32 %v5096_v21, %v4906_v17  ;;  %v4867_v46 = vpop.f32.mrf.mxu0 }
 0x25a   : > { %v6064_v28 = vadd.f32 %v6063_v49, %v6062_v22  ;;  %v6133_v36 = vrot.slane %v6132_v32, 4  ;;  %v7164_v15 = vpack.c.bf16 %v4910_v10, %v4909_v39  ;;  %v4908_v48 = vadd.f32 %v4867_v46, %v10366_v26 }
 0x25b   : > { %v5098_v62 = vadd.f32 %v5097_v12, %v4907_v7  ;;  %v5167_v44 = vadd.f32 %v5166_v42, %v5136_v8  ;;  %v5140_v30 = vmul.f32 %v4910_v10, %v4910_v10 }
 0x25c   : > { %v6065_v50 = vrot.slane %v6064_v28, 2  ;;  %v6134_v24 = vadd.f32 %v6133_v36, %v6132_v32  ;;  %7260 = vst [vmem:[%s10386_s17 + $0x78] sm:$0xff] %v7164_v15   ;;  %v7159_v47 = vpack.c.bf16 %v4908_v48, %v4907_v7  ;;  %v5138_v1 = vmul.f32 %v4908_v48, %v4908_v48 }
 0x25d   : > { %v5168_v23 = vadd.f32 %v5167_v44, %v5137_v6  ;;  %v5099_v29 = vadd.f32 %v5098_v62, %v4908_v48 }
 0x25e   : > { %v6066_v60 = vadd.f32 %v6065_v50, %v6064_v28  ;;  %v6135_v2 = vrot.slane %v6134_v24, 2  ;;  %7259 = vst [vmem:[%s10386_s17 + $0x70] sm:$0xff] %v7159_v47  }
 0x25f   : > { %v5100_v35 = vadd.f32 %v5099_v29, %v4909_v39  ;;  %v5169_v19 = vadd.f32 %v5168_v23, %v5138_v1 }
 0x260   : > { %v6067_v59 = vrot.slane %v6066_v60, 1  ;;  %v6136_v51 = vadd.f32 %v6135_v2, %v6134_v24 }
 0x261   : > { %v5101_v33 = vadd.f32 %v5100_v35, %v4910_v10  ;;  %v5170_v53 = vadd.f32 %v5169_v19, %v5139_v34 }
 0x262   : > { %v6068_v27 = vadd.f32 %v6067_v59, %v6066_v60  ;;  %v6137_v26 = vrot.slane %v6136_v51, 1 }
 0x263   : > { %v5102_v57 = vrot.slane %v5101_v33, 4  ;;  %v5171_v16 = vadd.f32 %v5170_v53, %v5140_v30 }
 0x264   : > { %6069 = vst [vmem:[%s347_s20] sm:$0x1] %v6068_v27  ;;  %v6138_v63 = vadd.f32 %v6137_v26, %v6136_v51 }
 0x265   : > { %v5103_v40 = vadd.f32 %v5102_v57, %v5101_v33  ;;  %v5172_v0 = vrot.slane %v5171_v16, 4 }
 0x266   : > { %6139 = vst [vmem:[%s350_s23] sm:$0x1] %v6138_v63 }
 0x267   : > { %v5104_v41 = vrot.slane %v5103_v40, 2  ;;  %v5173_v17 = vadd.f32 %v5172_v0, %v5171_v16 }
 0x269   : > { %v5105_v54 = vadd.f32 %v5104_v41, %v5103_v40  ;;  %v5174_v18 = vrot.slane %v5173_v17, 2 }
 0x26b   : > { %v5106_v45 = vrot.slane %v5105_v54, 1  ;;  %v5175_v52 = vadd.f32 %v5174_v18, %v5173_v17 }
 0x26d   : > { %v5107_v56 = vadd.f32 %v5106_v45, %v5105_v54  ;;  %v5176_v3 = vrot.slane %v5175_v52, 1 }
 0x26f   : > { %5108 = vst [vmem:[%s341_s26] sm:$0x1] %v5107_v56  ;;  %v5177_v31 = vadd.f32 %v5176_v3, %v5175_v52 }
 0x271   : > { %5178 = vst [vmem:[%s344_s9] sm:$0x1] %v5177_v31 }
 0x272 PF: > { %s19_s27 = sadd.s32 1, %s7886_s27  }
 0x273   : > { %p16_p4 = scmp.ge.s32.totalorder %s19_s27, 4  }
 0x275   :  { %18 = sbr.rel (!%p16_p4) target bundleno = 1 (0x1), region = 132 }

// kernel: residual_block_forward.4
= control target key start
LH: loop header
LB: loop body
LE: loop exit
PB: predicated region body
PF: predicated region fallthrough
CT: control target
= control target key end

     0   :  { %s6828_s21 = smov 0   ;;  %s7624_s0 = inlined_call_operand.vmem [shape: bf16[2,16,16,128], index: 0, kind: input, shape index: {}]   ;;  %s7625_s1 = inlined_call_operand.vmem [shape: bf16[1152,128], index: 1, kind: input, shape index: {}]   ;;  %s7626_s2 = inlined_call_operand.vmem [shape: f32[1,128], index: 2, kind: input, shape index: {}]   ;;  %s7627_s3 = inlined_call_operand.vmem [shape: f32[1,128], index: 3, kind: input, shape index: {}]   ;;  %s7628_s4 = inlined_call_operand.vmem [shape: bf16[2,16,16,128], index: 4, kind: output, shape index: {0}]   ;;  %s7629_s5 = inlined_call_operand.vmem [shape: f32[2,1,128], index: 5, kind: output, shape index: {1}]   ;;  %s7630_s6 = inlined_call_operand.vmem [shape: f32[2,1,128], index: 6, kind: output, shape index: {2}]  }
   0x1 LB: > { %s4910_s22 = sadd.s32 4294967295, %s6789_s21   ;;  %p4914_p0 = scmp.ge.s32.totalorder %s6789_s21, 1  ;;  %s6789_s21 = sphi %s6828_s21, %s17_s21  }
   0x2   : > { %p217_p1 = scmp.lt.s32.totalorder %s6789_s21, 3 }
   0x4   : > { %p218_p2 = pnand %p4914_p0, %p217_p1 }
   0x6   : > { %221 = sbr.rel (%p218_p2) target bundleno = 561 (0x231), region = 36 }
   0xb   : > { %v6500_v0 = vld [vmem:[%s7625_s1 + $0x78] sm:$0xff]   ;;  %v6791_v2 = vmov 0.0   ;;  %v6502_v3 = vld [vmem:[%s7625_s1 + $0x70] sm:$0xff]   ;;  %v6792_v5 = vmov 0.0|0.0   ;;  %p253_p3 = scmp.lt.s32.totalorder %s4910_s22, 1  ;;  %v6504_v6 = vld [vmem:[%s7625_s1 + $0x68] sm:$0xff]  }
   0xc   : > { %v6501_v1 = vld [vmem:[%s7625_s1 + $0x38] sm:$0xff]   ;;  %444 = vst [vmem:[#allocation2] sm:$0xff] %v6791_v2  ;;  %445 = vst [vmem:[#allocation2 + $0x8] sm:$0xff] %v6791_v2  ;;  %5955 = vmatprep.subr.bf16.mxu0 %v6500_v0  ;;  %6475 = vmatprep.subr.bf16.mxu1 %v6500_v0  ;;  %v6503_v4 = vld [vmem:[%s7625_s1 + $0x30] sm:$0xff]  }
   0xd   : > { %446 = vst [vmem:[#allocation2 + $0x10] sm:$0x3] %v6791_v2  ;;  %447 = vst [vmem:[#allocation2 + $0x18] sm:$0xff] %v6791_v2  ;;  %5956 = vmatpush3.bf16.msra.mxu0 %v6501_v1  ;;  %6483 = vmatpush3.bf16.msra.mxu1 %v6501_v1  ;;  %v6505_v7 = vld [vmem:[%s7625_s1 + $0x28] sm:$0xff]   ;;  %s7654_s22 = smov (!%p253_p3, %s4910_s22), 1  ;;  %v6506_v8 = vld [vmem:[%s7625_s1 + $0x60] sm:$0xff]  }
   0xe   : > { %448 = vst [vmem:[#allocation2 + $0x20] sm:$0xff] %v6791_v2  ;;  %449 = vst [vmem:[#allocation2 + $0x28] sm:$0x3] %v6791_v2  ;;  %5957 = vmatprep.subr.bf16.mxu0 %v6502_v3  ;;  %6476 = vmatprep.subr.bf16.mxu1 %v6502_v3  ;;  %v6507_v9 = vld [vmem:[%s7625_s1 + $0x20] sm:$0xff]   ;;  %s5459_s15 = sshll.u32 %s7654_s22, 7  ;;  %v6508_v10 = vld [vmem:[%s7625_s1 + $0x58] sm:$0xff]   ;;  %s265_s17 = scalar_lea.vmem %s7629_s5, %s7654_s22 }
   0xf   : > { %450 = vst [vmem:[#allocation2 + $0x30] sm:$0xff] %v6791_v2  ;;  %451 = vst [vmem:[#allocation2 + $0x38] sm:$0xff] %v6791_v2  ;;  %s6875_s20 = scalar_lea.vmem %s7624_s0, %s5459_s15  ;;  %v6509_v11 = vld [vmem:[%s7625_s1 + $0x18] sm:$0xff]   ;;  %v6510_v12 = vld [vmem:[%s7625_s1 + $0x50] sm:$0xff]   ;;  %s7516_s14 = scalar_lea.vmem %s7628_s4, %s5459_s15 }
  0x10   : > { %452 = vst [vmem:[#allocation2 + $0x40] sm:$0x3] %v6791_v2  ;;  %453 = vst [vmem:[#allocation2 + $0x48] sm:$0xff] %v6791_v2  ;;  %v6886_v17 = vld [vmem:[%s7626_s2] ss:$0 sm:$0xff]  ;;  %v5935_v18 = vld [vmem:[%s6875_s20 + $0x58] sm:$0xff]   ;;  %s268_s23 = scalar_lea.vmem %s7630_s6, %s7654_s22 }
  0x11   : > { %454 = vst [vmem:[#allocation2 + $0x50] sm:$0xff] %v6791_v2  ;;  %455 = vst [vmem:[#allocation2 + $0x58] sm:$0x3] %v6791_v2  ;;  %5958 = vmatpush3.bf16.msra.mxu0 %v6503_v4  ;;  %6484 = vmatpush3.bf16.msra.mxu1 %v6503_v4  ;;  %v6511_v19 = vld [vmem:[%s7625_s1 + $0x10] sm:$0xff]   ;;  %v5827_v20 = vunpack.c.l.bf16 %v5935_v18  ;;  %v5828_v21 = vunpack.c.h.bf16 %v5935_v18  ;;  %v6895_v22 = vld [vmem:[%s7627_s3] ss:$0 sm:$0xff] }
  0x12   : > { %456 = vst [vmem:[#allocation2 + $0x60] sm:$0xff] %v6791_v2  ;;  %457 = vst [vmem:[#allocation2 + $0x68] sm:$0xff] %v6791_v2  ;;  %5959 = vmatprep.subr.bf16.mxu0 %v6504_v6  ;;  %6477 = vmatprep.subr.bf16.mxu1 %v6504_v6  ;;  %v6512_v23 = vld [vmem:[%s7625_s1 + $0x48] sm:$0xff]   ;;  %v5782_v29 = vld [vmem:[%s6875_s20] sm:$0xff]  }
  0x13   : > { %458 = vst [vmem:[#allocation2 + $0x70] sm:$0x3] %v6791_v2  ;;  %459 = vst [vmem:[#allocation2 + $0x78] sm:$0xff] %v6791_v2  ;;  %v723_v13 = vld [vmem:[#allocation2 + $0x1] sm:$0xff]  ;;  %v364_v24 = vmul.f32 %v5827_v20, %v6886_v17  ;;  %v365_v25 = vmul.f32 %v5828_v21, %v6886_v17  ;;  %v5783_v33 = vunpack.c.l.bf16 %v5782_v29  ;;  %v5784_v34 = vunpack.c.h.bf16 %v5782_v29  ;;  %v6522_v44 = vld [vmem:[%s7625_s1 + $0xf8] sm:$0xff]  }
  0x14   : > { %460 = vst [vmem:[#allocation2 + $0x80] sm:$0xff] %v6791_v2  ;;  %461 = vst [vmem:[#allocation2 + $0x88] sm:$0x3] %v6791_v2  ;;  %v724_v14 = vld [vmem:[#allocation2 + $0x9] sm:$0xff]  ;;  %v5493_v15 = vpack.c.bf16 %v723_v13, %v723_v13  ;;  %v6514_v30 = vld [vmem:[%s7625_s1 + $0x40] sm:$0xff]  }
  0x15   : > { %462 = vst [vmem:[#allocation2 + $0x90] sm:$0xff] %v6791_v2  ;;  %463 = vst [vmem:[#allocation2 + $0x98] sm:$0xff] %v6791_v2  ;;  %5960 = vmatpush3.bf16.msra.mxu0 %v6505_v7  ;;  %6485 = vmatpush3.bf16.msra.mxu1 %v6505_v7  ;;  %v5494_v16 = vpack.c.bf16 %v724_v14, %v724_v14  ;;  %v402_v26 = vadd.f32 %v6895_v22, %v364_v24  ;;  %v6513_v28 = vld [vmem:[%s7625_s1 + $0x8] sm:$0xff]   ;;  %v5936_v35 = vld [vmem:[%s6875_s20 + $0x60] sm:$0xff]  }
  0x16   : > { %464 = vst [vmem:[#allocation2 + $0xa0] sm:$0x3] %v6791_v2  ;;  %465 = vst [vmem:[#allocation2 + $0xa8] sm:$0xff] %v6791_v2  ;;  %5961 = vmatprep.subr.bf16.mxu0 %v6506_v8  ;;  %6478 = vmatprep.subr.bf16.mxu1 %v6506_v8  ;;  %v403_v27 = vadd.f32 %v6895_v22, %v365_v25  ;;  %v5831_v36 = vunpack.c.l.bf16 %v5936_v35  ;;  %v5832_v37 = vunpack.c.h.bf16 %v5936_v35  ;;  %v6515_v38 = vld [vmem:[%s7625_s1] sm:$0xff]   ;;  %v6523_v47 = vld [vmem:[%s7625_s1 + $0x178] sm:$0xff]  }
  0x17   : > { %466 = vst [vmem:[#allocation2 + $0xb0] sm:$0xff] %v6791_v2  ;;  %467 = vst [vmem:[#allocation2 + $0xb8] sm:$0x3] %v6791_v2  ;;  %v434_v31 = vmax.f32 %v402_v26, 0.0  ;;  %v342_v41 = vmul.f32 %v5783_v33, %v6886_v17  ;;  %v343_v42 = vmul.f32 %v5784_v34, %v6886_v17  ;;  %v6525_v53 = vld [vmem:[%s7625_s1 + $0x138] sm:$0xff]   ;;  %v6537_v56 = vld [vmem:[%s7625_s1 + $0x170] sm:$0xff]  }
  0x18   : > { %468 = vst [vmem:[#allocation2 + $0xc0] sm:$0xff] %v6791_v2  ;;  %469 = vst [vmem:[#allocation2 + $0xc8] sm:$0xff] %v6791_v2  ;;  %v435_v32 = vmax.f32 %v403_v27, 0.0  ;;  %v366_v45 = vmul.f32 %v5831_v36, %v6886_v17  ;;  %v367_v46 = vmul.f32 %v5832_v37, %v6886_v17  ;;  %v5925_v61 = vld [vmem:[%s6875_s20 + $0x8] sm:$0xff]   ;;  %v5938_v18 = vld [vmem:[%s6875_s20 + $0x70] sm:$0xff]  }
  0x19   : > { %470 = vst [vmem:[#allocation2 + $0xd0] sm:$0x3] %v6791_v2  ;;  %471 = vst [vmem:[#allocation2 + $0xd8] sm:$0xff] %v6791_v2  ;;  %5962 = vmatpush3.bf16.msra.mxu0 %v6507_v9  ;;  %6486 = vmatpush3.bf16.msra.mxu1 %v6507_v9  ;;  %v5517_v39 = vpack.c.bf16 %v434_v31, %v434_v31  ;;  %v380_v48 = vadd.f32 %v6895_v22, %v342_v41  ;;  %v5937_v62 = vld [vmem:[%s6875_s20 + $0x68] sm:$0xff]   ;;  %v5787_v3 = vunpack.c.l.bf16 %v5925_v61  ;;  %v6539_v9 = vld [vmem:[%s7625_s1 + $0x130] sm:$0xff]  }
  0x1a   : > { %472 = vst [vmem:[#allocation2 + $0xe0] sm:$0xff] %v6791_v2  ;;  %473 = vst [vmem:[#allocation2 + $0xe8] sm:$0x3] %v6791_v2  ;;  %5963 = vmatprep.subr.bf16.mxu0 %v6508_v10  ;;  %6479 = vmatprep.subr.bf16.mxu1 %v6508_v10  ;;  %v5518_v40 = vpack.c.bf16 %v435_v32, %v435_v32  ;;  %v381_v49 = vadd.f32 %v6895_v22, %v343_v42  ;;  %v5788_v4 = vunpack.c.h.bf16 %v5925_v61  ;;  %v6524_v41 = vld [vmem:[%s7625_s1 + $0xb8] sm:$0xff]  }
  0x1b   : > { %474 = vst [vmem:[#allocation2 + $0xf0] sm:$0xff] %v6791_v2  ;;  %475 = vst [vmem:[#allocation2 + $0xf8] sm:$0xff] %v6791_v2  ;;  %v404_v51 = vadd.f32 %v6895_v22, %v366_v45  ;;  %v405_v52 = vadd.f32 %v6895_v22, %v367_v46  ;;  %v412_v54 = vmax.f32 %v380_v48, 0.0  ;;  %v5835_v7 = vunpack.c.l.bf16 %v5937_v62 }
  0x1c   : > { %476 = vst [vmem:[#allocation2 + $0x100] sm:$0x3] %v6791_v2  ;;  %477 = vst [vmem:[#allocation2 + $0x108] sm:$0xff] %v6791_v2  ;;  %v413_v55 = vmax.f32 %v381_v49, 0.0  ;;  %v5836_v8 = vunpack.c.h.bf16 %v5937_v62  ;;  %v344_v10 = vmul.f32 %v5787_v3, %v6886_v17  ;;  %v5840_v29 = vunpack.c.h.bf16 %v5938_v18 }
  0x1d   : > { %478 = vst [vmem:[#allocation2 + $0x110] sm:$0xff] %v6791_v2  ;;  %479 = vst [vmem:[#allocation2 + $0x118] sm:$0x3] %v6791_v2  ;;  %5964 = vmatpush3.bf16.msra.mxu0 %v6509_v11  ;;  %6487 = vmatpush3.bf16.msra.mxu1 %v6509_v11  ;;  %v436_v57 = vmax.f32 %v404_v51, 0.0  ;;  %v437_v58 = vmax.f32 %v405_v52, 0.0  ;;  %v5495_v59 = vpack.c.bf16 %v412_v54, %v412_v54  ;;  %v6559_v52 = vld [vmem:[%s7625_s1 + $0x128] sm:$0xff]  }
  0x1e   : > { %480 = vst [vmem:[#allocation2 + $0x120] sm:$0xff] %v6791_v2  ;;  %481 = vst [vmem:[#allocation2 + $0x128] sm:$0xff] %v6791_v2  ;;  %5965 = vmatprep.subr.bf16.mxu0 %v6510_v12  ;;  %6480 = vmatprep.subr.bf16.mxu1 %v6510_v12  ;;  %v5496_v60 = vpack.c.bf16 %v413_v55, %v413_v55  ;;  %v345_v11 = vmul.f32 %v5788_v4, %v6886_v17 }
  0x1f   : > { %482 = vst [vmem:[#allocation2 + $0x130] sm:$0x3] %v6791_v2  ;;  %483 = vst [vmem:[#allocation2 + $0x138] sm:$0xff] %v6791_v2  ;;  %v5519_v1 = vpack.c.bf16 %v436_v57, %v436_v57  ;;  %v368_v12 = vmul.f32 %v5835_v7, %v6886_v17  ;;  %v369_v13 = vmul.f32 %v5836_v8, %v6886_v17 }
  0x20   : > { %484 = vst [vmem:[#allocation2 + $0x140] sm:$0xff] %v6791_v2  ;;  %485 = vst [vmem:[#allocation2 + $0x148] sm:$0x3] %v6791_v2  ;;  %v382_v14 = vadd.f32 %v6895_v22, %v344_v10  ;;  %v371_v48 = vmul.f32 %v5840_v29, %v6886_v17  ;;  %v6538_v29 = vld [vmem:[%s7625_s1 + $0xa0] sm:$0xff]  }
  0x21   : > { %486 = vst [vmem:[#allocation2 + $0x150] sm:$0xff] %v6791_v2  ;;  %487 = vst [vmem:[#allocation2 + $0x158] sm:$0xff] %v6791_v2  ;;  %5966 = vmatpush3.bf16.msra.mxu0 %v6511_v19  ;;  %6488 = vmatpush3.bf16.msra.mxu1 %v6511_v19  ;;  %v406_v19 = vadd.f32 %v6895_v22, %v368_v12  ;;  %v407_v20 = vadd.f32 %v6895_v22, %v369_v13 }
  0x22   : > { %488 = vst [vmem:[#allocation2 + $0x160] sm:$0x3] %v6791_v2  ;;  %489 = vst [vmem:[#allocation2 + $0x168] sm:$0xff] %v6791_v2  ;;  %5967 = vmatprep.subr.bf16.mxu0 %v6512_v23  ;;  %6481 = vmatprep.subr.bf16.mxu1 %v6512_v23  ;;  %v414_v26 = vmax.f32 %v382_v14, 0.0 }
  0x23   : > { %490 = vst [vmem:[#allocation2 + $0x170] sm:$0xff] %v6791_v2  ;;  %491 = vst [vmem:[#allocation2 + $0x178] sm:$0x3] %v6791_v2  ;;  %v438_v34 = vmax.f32 %v406_v19, 0.0  ;;  %v439_v35 = vmax.f32 %v407_v20, 0.0 }
  0x24   : > { %492 = vst [vmem:[#allocation2 + $0x180] sm:$0xff] %v6791_v2  ;;  %493 = vst [vmem:[#allocation2 + $0x188] sm:$0xff] %v6791_v2 }
  0x25   : > { %494 = vst [vmem:[#allocation2 + $0x190] sm:$0x3] %v6791_v2  ;;  %495 = vst [vmem:[#allocation2 + $0x198] sm:$0xff] %v6791_v2  ;;  %5968 = vmatpush3.bf16.msra.mxu0 %v6513_v28  ;;  %6489 = vmatpush3.bf16.msra.mxu1 %v6513_v28  ;;  %v5839_v28 = vunpack.c.l.bf16 %v5938_v18  ;;  %v5521_v42 = vpack.c.bf16 %v438_v34, %v438_v34 }
  0x26   : > { %496 = vst [vmem:[#allocation2 + $0x1a0] sm:$0xff] %v6791_v2  ;;  %497 = vst [vmem:[#allocation2 + $0x1a8] sm:$0x3] %v6791_v2  ;;  %5969 = vmatprep.subr.bf16.mxu0 %v6514_v30  ;;  %6482 = vmatprep.subr.bf16.mxu1 %v6514_v30  ;;  %v5520_v2 = vpack.c.bf16 %v437_v58, %v437_v58 }
  0x27   : > { %691 = vst [vmem:[#allocation3] sm:$0xf] %v6792_v5  ;;  %692 = vst [vmem:[#allocation3 + $0x24] sm:$0xf] %v6792_v5 }
  0x28   : > { %883 = vst [vmem:[#allocation3 + $0x4] sm:$0xf] %v5493_v15  ;;  %884 = vst [vmem:[#allocation3 + $0x28] sm:$0xf] %v5494_v16  ;;  %v383_v15 = vadd.f32 %v6895_v22, %v345_v11  ;;  %v5926_v16 = vld [vmem:[%s6875_s20 + $0x10] sm:$0xff]  }
  0x29   : > { %521 = vst [vmem:[#allocation2 + $0x121] sm:$0xff] %v434_v31  ;;  %522 = vst [vmem:[#allocation2 + $0x129] sm:$0xff] %v435_v32  ;;  %5970 = vmatpush3.bf16.msra.mxu0 %v6515_v38  ;;  %6490 = vmatpush3.bf16.msra.mxu1 %v6515_v38  ;;  %v5791_v21 = vunpack.c.l.bf16 %v5926_v16  ;;  %v5792_v23 = vunpack.c.h.bf16 %v5926_v16  ;;  %v5497_v38 = vpack.c.bf16 %v414_v26, %v414_v26 }
  0x2a   : > { %907 = vst [vmem:[#allocation3 + $0x364] sm:$0xf] %v5517_v39  ;;  %908 = vst [vmem:[#allocation3 + $0x388] sm:$0xf] %v5518_v40  ;;  %6067 = vmatprep.subr.bf16.mxu1 %v6522_v44  ;;  %6179 = vmatprep.subr.bf16.mxu0 %v6523_v47  ;;  %v415_v27 = vmax.f32 %v383_v15, 0.0  ;;  %v6556_v40 = vld [vmem:[%s7625_s1 + $0x168] sm:$0xff]   ;;  %v370_v47 = vmul.f32 %v5839_v28, %v6886_v17 }
  0x2b   : > { %499 = vst [vmem:[#allocation2 + $0x19] sm:$0xff] %v412_v54  ;;  %500 = vst [vmem:[#allocation2 + $0x21] sm:$0xff] %v413_v55  ;;  %v346_v44 = vmul.f32 %v5791_v21, %v6886_v17  ;;  %v347_v45 = vmul.f32 %v5792_v23, %v6886_v17  ;;  %v409_v55 = vadd.f32 %v6895_v22, %v371_v48  ;;  %v6535_v21 = vld [vmem:[%s7625_s1 + $0xa8] sm:$0xff]   ;;  %v6548_v48 = vld [vmem:[%s7625_s1 + $0xd0] sm:$0xff]  }
  0x2c   : > { %523 = vst [vmem:[#allocation2 + $0x139] sm:$0xff] %v436_v57  ;;  %524 = vst [vmem:[#allocation2 + $0x141] sm:$0xff] %v437_v58  ;;  %v5498_v39 = vpack.c.bf16 %v415_v27, %v415_v27  ;;  %v408_v54 = vadd.f32 %v6895_v22, %v370_v47 }
  0x2d   : > { %885 = vst [vmem:[#allocation3 + $0x4c] sm:$0xf] %v5495_v59  ;;  %886 = vst [vmem:[#allocation3 + $0x70] sm:$0xf] %v5496_v60  ;;  %v385_v51 = vadd.f32 %v6895_v22, %v347_v45  ;;  %v5927_v59 = vld [vmem:[%s6875_s20 + $0x18] sm:$0xff]   ;;  %v6533_v60 = vld [vmem:[%s7625_s1 + $0xe8] sm:$0xff]  }
  0x2e   : > { %v6516_v50 = vld [vmem:[#allocation3] ss:$36 sps:$4 sm:$0xff]   ;;  %909 = vst [vmem:[#allocation3 + $0x3ac] sm:$0xf] %v5519_v1  ;;  %910 = vst [vmem:[#allocation3 + $0x3d0] sm:$0xf] %v5520_v2 }
  0x2f   : > { %v6518_v43 = vld [vmem:[#allocation3 + $0x4] ss:$36 sps:$4 sm:$0xff]   ;;  %501 = vst [vmem:[#allocation2 + $0x31] sm:$0xff] %v414_v26  ;;  %502 = vst [vmem:[#allocation2 + $0x39] sm:$0xff] %v415_v27  ;;  %v417_v58 = vmax.f32 %v385_v51, 0.0  ;;  %v440_v61 = vmax.f32 %v408_v54, 0.0 }
  0x30   : > { %3764 = vmatprep.mubr.bf16.mxu0 %v6518_v43  ;;  %v555_v63 = vld [vmem:[#allocation2 + $0x120] sm:$0xff]  ;;  %v556_v0 = vld [vmem:[#allocation2 + $0x128] sm:$0xff]  ;;  %525 = vst [vmem:[#allocation2 + $0x151] sm:$0xff] %v438_v34  ;;  %526 = vst [vmem:[#allocation2 + $0x159] sm:$0xff] %v439_v35  ;;  %v5522_v43 = vpack.c.bf16 %v439_v35, %v439_v35  ;;  %v441_v62 = vmax.f32 %v409_v55, 0.0 }
  0x31   : > { %3765 = vmatmul.mubr.bf16.vlgmr.msra.gmra.mxu0 %v6516_v50  ;;  %v5485_v5 = vpack.c.bf16 %v555_v63, %v555_v63  ;;  %v5486_v6 = vpack.c.bf16 %v556_v0, %v556_v0  ;;  %887 = vst [vmem:[#allocation3 + $0x94] sm:$0xf] %v5497_v38  ;;  %888 = vst [vmem:[#allocation3 + $0xb8] sm:$0xf] %v5498_v39  ;;  %v6521_v49 = vld [vmem:[#allocation3 + $0x364] ss:$36 sps:$4 sm:$0xff]   ;;  %v384_v50 = vadd.f32 %v6895_v22, %v346_v44 }
  0x32   : > { %6180 = vmatpush3.bf16.msra.mxu0 %v6525_v53  ;;  %v533_v24 = vld [vmem:[#allocation2 + $0x18] sm:$0xff]  ;;  %v534_v25 = vld [vmem:[#allocation2 + $0x20] sm:$0xff]  ;;  %911 = vst [vmem:[#allocation3 + $0x3f4] sm:$0xf] %v5521_v42  ;;  %912 = vst [vmem:[#allocation3 + $0x418] sm:$0xf] %v5522_v43  ;;  %3860 = vmatprep.mubr.bf16.mxu1 %v6521_v49  ;;  %v5795_v63 = vunpack.c.l.bf16 %v5927_v59  ;;  %v5796_v0 = vunpack.c.h.bf16 %v5927_v59  ;;  %v5523_v12 = vpack.c.bf16 %v440_v61, %v440_v61 }
  0x33   : > { %715 = vst [vmem:[#allocation3 + $0x360] sm:$0xf] %v5485_v5  ;;  %716 = vst [vmem:[#allocation3 + $0x384] sm:$0xf] %v5486_v6  ;;  %6181 = vmatprep.subr.bf16.mxu0 %v6537_v56  ;;  %v5463_v30 = vpack.c.bf16 %v533_v24, %v533_v24  ;;  %v5464_v31 = vpack.c.bf16 %v534_v25, %v534_v25  ;;  %v557_v32 = vld [vmem:[#allocation2 + $0x138] sm:$0xff]  ;;  %v558_v33 = vld [vmem:[#allocation2 + $0x140] sm:$0xff]  ;;  %v5500_v6 = vpack.c.bf16 %v417_v58, %v417_v58 }
  0x34   : > { %v5487_v36 = vpack.c.bf16 %v557_v32, %v557_v32  ;;  %v5488_v37 = vpack.c.bf16 %v558_v33, %v558_v33  ;;  %v6526_v53 = vld [vmem:[%s7625_s1 + $0xf0] sm:$0xff]   ;;  %v416_v57 = vmax.f32 %v384_v50, 0.0  ;;  %v915_v1 = vld [vmem:[#allocation2 + $0x2] sm:$0xff]  ;;  %504 = vst [vmem:[#allocation2 + $0x51] sm:$0xff] %v417_v58  ;;  %527 = vst [vmem:[#allocation2 + $0x169] sm:$0xff] %v440_v61  ;;  %v5524_v13 = vpack.c.bf16 %v441_v62, %v441_v62 }
  0x35   : > { %693 = vst [vmem:[#allocation3 + $0x48] sm:$0xf] %v5463_v30  ;;  %694 = vst [vmem:[#allocation3 + $0x6c] sm:$0xf] %v5464_v31  ;;  %v6527_v56 = vld [vmem:[%s7625_s1 + $0xb0] sm:$0xff]   ;;  %v5525_v7 = vpack.c.bf16 %v915_v1, %v915_v1  ;;  %v348_v15 = vmul.f32 %v5795_v63, %v6886_v17  ;;  %v349_v16 = vmul.f32 %v5796_v0, %v6886_v17  ;;  %v6536_v27 = vld [vmem:[%s7625_s1 + $0xe0] sm:$0xff]  }
  0x36   : > { %6182 = vmatpush3.bf16.msra.mxu0 %v6539_v9  ;;  %1267 = vst [vmem:[#allocation3 + $0xc] sm:$0xf] %v5463_v30  ;;  %1268 = vst [vmem:[#allocation3 + $0x30] sm:$0xf] %v5464_v31  ;;  %v916_v2 = vld [vmem:[#allocation2 + $0xa] sm:$0xff]  ;;  %v536_v4 = vld [vmem:[#allocation2 + $0x38] sm:$0xff]  ;;  %v5499_v5 = vpack.c.bf16 %v416_v57, %v416_v57 }
  0x37   : > { %717 = vst [vmem:[#allocation3 + $0x3a8] sm:$0xf] %v5487_v36  ;;  %718 = vst [vmem:[#allocation3 + $0x3cc] sm:$0xf] %v5488_v37  ;;  %6183 = vmatprep.subr.bf16.mxu0 %v6556_v40  ;;  %v535_v3 = vld [vmem:[#allocation2 + $0x30] sm:$0xff]  ;;  %v5526_v8 = vpack.c.bf16 %v916_v2, %v916_v2  ;;  %v5466_v11 = vpack.c.bf16 %v536_v4, %v536_v4  ;;  %v560_v23 = vld [vmem:[#allocation2 + $0x158] sm:$0xff]  ;;  %v386_v25 = vadd.f32 %v6895_v22, %v348_v15 }
  0x38   : > { %503 = vst [vmem:[#allocation2 + $0x49] sm:$0xff] %v416_v57  ;;  %v6528_v9 = vld [vmem:[#allocation3 + $0x4c] ss:$36 sps:$4 sm:$0xff]   ;;  %v5465_v10 = vpack.c.bf16 %v535_v3, %v535_v3  ;;  %528 = vst [vmem:[#allocation2 + $0x171] sm:$0xff] %v441_v62  ;;  %v559_v20 = vld [vmem:[#allocation2 + $0x150] sm:$0xff]  ;;  %v387_v26 = vadd.f32 %v6895_v22, %v349_v16  ;;  %v5490_v28 = vpack.c.bf16 %v560_v23, %v560_v23 }
  0x39   : > { %889 = vst [vmem:[#allocation3 + $0xdc] sm:$0xf] %v5499_v5  ;;  %890 = vst [vmem:[#allocation3 + $0x100] sm:$0xf] %v5500_v6  ;;  %3772 = vmatprep.mubr.bf16.mxu0 %v6528_v9  ;;  %v6531_v18 = vld [vmem:[#allocation3 + $0x3ac] ss:$36 sps:$4 sm:$0xff]   ;;  %v5489_v24 = vpack.c.bf16 %v559_v20, %v559_v20 }
  0x3a   : > { %v6519_v46 = vld [vmem:[#allocation3 + $0x360] ss:$36 sps:$4 sm:$0xff]   ;;  %6184 = vmatpush3.bf16.msra.mxu0 %v6559_v52  ;;  %1075 = vst [vmem:[#allocation3 + $0x8] sm:$0xf] %v5525_v7  ;;  %1076 = vst [vmem:[#allocation3 + $0x2c] sm:$0xf] %v5526_v8 }
  0x3b   : > { %3861 = vmatmul.mubr.bf16.vlgmr.msra.gmra.mxu1 %v6519_v46  ;;  %695 = vst [vmem:[#allocation3 + $0x90] sm:$0xf] %v5465_v10  ;;  %696 = vst [vmem:[#allocation3 + $0xb4] sm:$0xf] %v5466_v11  ;;  %v418_v30 = vmax.f32 %v386_v25, 0.0  ;;  %v419_v31 = vmax.f32 %v387_v26, 0.0 }
  0x3c   : > { %6068 = vmatpush3.bf16.msra.mxu1 %v6524_v41  ;;  %v6530_v14 = vld [vmem:[#allocation3 + $0x48] ss:$36 sps:$4 sm:$0xff]   ;;  %913 = vst [vmem:[#allocation3 + $0x43c] sm:$0xf] %v5523_v12  ;;  %914 = vst [vmem:[#allocation3 + $0x460] sm:$0xf] %v5524_v13  ;;  %3868 = vmatprep.mubr.bf16.mxu1 %v6531_v18 }
  0x3d   : > { %6069 = vmatprep.subr.bf16.mxu1 %v6526_v53  ;;  %1269 = vst [vmem:[#allocation3 + $0x54] sm:$0xf] %v5465_v10  ;;  %1270 = vst [vmem:[#allocation3 + $0x78] sm:$0xf] %v5466_v11  ;;  %3773 = vmatmul.mubr.bf16.gmra.mxu0 %v6530_v14  ;;  %v6570_v32 = vld [vmem:[%s7625_s1 + $0x160] sm:$0xff]   ;;  %v561_v38 = vld [vmem:[#allocation2 + $0x168] sm:$0xff]  ;;  %v5501_v40 = vpack.c.bf16 %v418_v30, %v418_v30  ;;  %v5502_v41 = vpack.c.bf16 %v419_v31, %v419_v31 }
  0x3e   : > { %v6534_v19 = vld [vmem:[#allocation3 + $0x3a8] ss:$36 sps:$4 sm:$0xff]   ;;  %719 = vst [vmem:[#allocation3 + $0x3f0] sm:$0xf] %v5489_v24  ;;  %v6571_v33 = vld [vmem:[%s7625_s1 + $0x120] sm:$0xff]   ;;  %505 = vst [vmem:[#allocation2 + $0x61] sm:$0xff] %v418_v30  ;;  %v5491_v43 = vpack.c.bf16 %v561_v38, %v561_v38  ;;  %6185 = vmatprep.subr.bf16.mxu0 %v6570_v32 }
  0x3f   : > { %720 = vst [vmem:[#allocation3 + $0x414] sm:$0xf] %v5490_v28  ;;  %v537_v34 = vld [vmem:[#allocation2 + $0x48] sm:$0xff]  ;;  %v538_v35 = vld [vmem:[#allocation2 + $0x50] sm:$0xff]  ;;  %506 = vst [vmem:[#allocation2 + $0x69] sm:$0xff] %v419_v31  ;;  %6186 = vmatpush3.bf16.msra.mxu0 %v6571_v33 }
  0x40   : > { %6070 = vmatpush3.bf16.msra.mxu1 %v6527_v56  ;;  %v5467_v36 = vpack.c.bf16 %v537_v34, %v537_v34  ;;  %v5468_v37 = vpack.c.bf16 %v538_v35, %v538_v35  ;;  %v562_v39 = vld [vmem:[#allocation2 + $0x170] sm:$0xff]  ;;  %v6545_v42 = vld [vmem:[%s7625_s1 + $0xd8] sm:$0xff]   ;;  %v6540_v45 = vld [vmem:[#allocation3 + $0x94] ss:$36 sps:$4 sm:$0xff]   ;;  %891 = vst [vmem:[#allocation3 + $0x124] sm:$0xf] %v5501_v40 }
  0x41   : > { %6071 = vmatprep.subr.bf16.mxu1 %v6533_v60  ;;  %v5492_v44 = vpack.c.bf16 %v562_v39, %v562_v39  ;;  %v6547_v46 = vld [vmem:[%s7625_s1 + $0x98] sm:$0xff]   ;;  %892 = vst [vmem:[#allocation3 + $0x148] sm:$0xf] %v5502_v41  ;;  %721 = vst [vmem:[#allocation3 + $0x438] sm:$0xf] %v5491_v43  ;;  %v5928_v49 = vld [vmem:[%s6875_s20 + $0x20] sm:$0xff]   ;;  %3780 = vmatprep.mubr.bf16.mxu0 %v6540_v45 }
  0x42   : > { %697 = vst [vmem:[#allocation3 + $0xd8] sm:$0xf] %v5467_v36  ;;  %698 = vst [vmem:[#allocation3 + $0xfc] sm:$0xf] %v5468_v37  ;;  %v6542_v47 = vld [vmem:[#allocation3 + $0x90] ss:$36 sps:$4 sm:$0xff]   ;;  %v5799_v50 = vunpack.c.l.bf16 %v5928_v49  ;;  %v5800_v51 = vunpack.c.h.bf16 %v5928_v49 }
  0x43   : > { %3869 = vmatmul.mubr.bf16.gmra.mxu1 %v6534_v19  ;;  %1271 = vst [vmem:[#allocation3 + $0x9c] sm:$0xf] %v5467_v36  ;;  %1272 = vst [vmem:[#allocation3 + $0xc0] sm:$0xf] %v5468_v37  ;;  %v917_v52 = vld [vmem:[#allocation2 + $0x1a] sm:$0xff]  ;;  %v918_v53 = vld [vmem:[#allocation2 + $0x22] sm:$0xff] }
  0x44   : > { %6072 = vmatpush3.bf16.msra.mxu1 %v6535_v21  ;;  %722 = vst [vmem:[#allocation3 + $0x45c] sm:$0xf] %v5492_v44  ;;  %v5929_v54 = vld [vmem:[%s6875_s20 + $0x28] sm:$0xff]   ;;  %v5527_v55 = vpack.c.bf16 %v917_v52, %v917_v52  ;;  %v5528_v56 = vpack.c.bf16 %v918_v53, %v918_v53  ;;  %v919_v59 = vld [vmem:[#allocation2 + $0x32] sm:$0xff]  ;;  %v920_v60 = vld [vmem:[#allocation2 + $0x3a] sm:$0xff]  ;;  %v350_v0 = vmul.f32 %v5799_v50, %v6886_v17 }
  0x45   : > { %6073 = vmatprep.subr.bf16.mxu1 %v6536_v27  ;;  %3781 = vmatmul.mubr.bf16.gmra.mxu0 %v6542_v47  ;;  %v5803_v57 = vunpack.c.l.bf16 %v5929_v54  ;;  %v5804_v58 = vunpack.c.h.bf16 %v5929_v54  ;;  %v6543_v61 = vld [vmem:[#allocation3 + $0x3f4] ss:$36 sps:$4 sm:$0xff]   ;;  %v6549_v63 = vld [vmem:[%s7625_s1 + $0x90] sm:$0xff]   ;;  %v351_v1 = vmul.f32 %v5800_v51, %v6886_v17  ;;  %v5529_v2 = vpack.c.bf16 %v919_v59, %v919_v59  ;;  %v6583_v12 = vld [vmem:[%s7625_s1 + $0x158] sm:$0xff]  }
  0x46   : > { %v6546_v62 = vld [vmem:[#allocation3 + $0x3f0] ss:$36 sps:$4 sm:$0xff]   ;;  %v5530_v3 = vpack.c.bf16 %v920_v60, %v920_v60  ;;  %v540_v5 = vld [vmem:[#allocation2 + $0x68] sm:$0xff]  ;;  %1077 = vst [vmem:[#allocation3 + $0x50] sm:$0xf] %v5527_v55  ;;  %3876 = vmatprep.mubr.bf16.mxu1 %v6543_v61  ;;  %v388_v11 = vadd.f32 %v6895_v22, %v350_v0  ;;  %6187 = vmatprep.subr.bf16.mxu0 %v6583_v12  ;;  %v6586_v31 = vld [vmem:[%s7625_s1 + $0x118] sm:$0xff]  }
  0x47   : > { %v539_v4 = vld [vmem:[#allocation2 + $0x60] sm:$0xff]  ;;  %1078 = vst [vmem:[#allocation3 + $0x74] sm:$0xf] %v5528_v56  ;;  %v352_v6 = vmul.f32 %v5803_v57, %v6886_v17  ;;  %v353_v7 = vmul.f32 %v5804_v58, %v6886_v17  ;;  %1651 = vst [vmem:[#allocation3 + $0x14] sm:$0xf] %v5527_v55  ;;  %v6555_v8 = vld [vmem:[%s7625_s1 + $0xc8] sm:$0xff]   ;;  %v5470_v10 = vpack.c.bf16 %v540_v5, %v540_v5  ;;  %6188 = vmatpush3.bf16.msra.mxu0 %v6586_v31 }
  0x48   : > { %6074 = vmatpush3.bf16.msra.mxu1 %v6538_v29  ;;  %1652 = vst [vmem:[#allocation3 + $0x38] sm:$0xf] %v5528_v56  ;;  %v5469_v9 = vpack.c.bf16 %v539_v4, %v539_v4  ;;  %1079 = vst [vmem:[#allocation3 + $0x98] sm:$0xf] %v5529_v2  ;;  %v6550_v13 = vld [vmem:[#allocation3 + $0xdc] ss:$36 sps:$4 sm:$0xff]   ;;  %v389_v14 = vadd.f32 %v6895_v22, %v351_v1 }
  0x49   : > { %6075 = vmatprep.subr.bf16.mxu1 %v6545_v42  ;;  %1080 = vst [vmem:[#allocation3 + $0xbc] sm:$0xf] %v5530_v3  ;;  %1653 = vst [vmem:[#allocation3 + $0x5c] sm:$0xf] %v5529_v2  ;;  %v390_v15 = vadd.f32 %v6895_v22, %v352_v6  ;;  %v391_v16 = vadd.f32 %v6895_v22, %v353_v7  ;;  %v6552_v18 = vld [vmem:[#allocation3 + $0xd8] ss:$36 sps:$4 sm:$0xff]   ;;  %3788 = vmatprep.mubr.bf16.mxu0 %v6550_v13 }
  0x4a   : > { %1654 = vst [vmem:[#allocation3 + $0x80] sm:$0xf] %v5530_v3  ;;  %v6558_v19 = vld [vmem:[%s7625_s1 + $0x88] sm:$0xff]   ;;  %699 = vst [vmem:[#allocation3 + $0x120] sm:$0xf] %v5469_v9  ;;  %v420_v20 = vmax.f32 %v388_v11, 0.0 }
  0x4b   : > { %3877 = vmatmul.mubr.bf16.gmra.mxu1 %v6546_v62  ;;  %700 = vst [vmem:[#allocation3 + $0x144] sm:$0xf] %v5470_v10  ;;  %1273 = vst [vmem:[#allocation3 + $0xe4] sm:$0xf] %v5469_v9  ;;  %v6553_v21 = vld [vmem:[#allocation3 + $0x43c] ss:$36 sps:$4 sm:$0xff]  }
  0x4c   : > { %6076 = vmatpush3.bf16.msra.mxu1 %v6547_v46  ;;  %1274 = vst [vmem:[#allocation3 + $0x108] sm:$0xf] %v5470_v10  ;;  %v6557_v23 = vld [vmem:[#allocation3 + $0x438] ss:$36 sps:$4 sm:$0xff]   ;;  %v421_v24 = vmax.f32 %v389_v14, 0.0  ;;  %v422_v25 = vmax.f32 %v390_v15, 0.0  ;;  %v5503_v27 = vpack.c.bf16 %v420_v20, %v420_v20  ;;  %3884 = vmatprep.mubr.bf16.mxu1 %v6553_v21 }
  0x4d   : > { %6077 = vmatprep.subr.bf16.mxu1 %v6548_v48  ;;  %v6560_v26 = vld [vmem:[%s7625_s1 + $0xc0] sm:$0xff]   ;;  %507 = vst [vmem:[#allocation2 + $0x79] sm:$0xff] %v420_v20  ;;  %v423_v28 = vmax.f32 %v391_v16, 0.0  ;;  %3789 = vmatmul.mubr.bf16.gmra.mxu0 %v6552_v18  ;;  %v6568_v35 = vld [vmem:[%s7625_s1 + $0x1f8] sm:$0xff]   ;;  %v5930_v38 = vld [vmem:[%s6875_s20 + $0x30] sm:$0xff]  }
  0x4e   : > { %508 = vst [vmem:[#allocation2 + $0x81] sm:$0xff] %v421_v24  ;;  %v5504_v29 = vpack.c.bf16 %v421_v24, %v421_v24  ;;  %509 = vst [vmem:[#allocation2 + $0x91] sm:$0xff] %v422_v25  ;;  %v5505_v30 = vpack.c.bf16 %v422_v25, %v422_v25  ;;  %v6567_v32 = vld [vmem:[#allocation3 + $0xc] ss:$36 sps:$4 sm:$0xff]   ;;  %v6562_v36 = vld [vmem:[#allocation3 + $0x124] ss:$36 sps:$4 sm:$0xff]   ;;  %v5807_v41 = vunpack.c.l.bf16 %v5930_v38  ;;  %v5808_v42 = vunpack.c.h.bf16 %v5930_v38 }
  0x4f   : > { %893 = vst [vmem:[#allocation3 + $0x16c] sm:$0xf] %v5503_v27  ;;  %510 = vst [vmem:[#allocation2 + $0x99] sm:$0xff] %v423_v28  ;;  %v5506_v33 = vpack.c.bf16 %v423_v28, %v423_v28  ;;  %v6561_v34 = vld [vmem:[%s7625_s1 + $0x80] sm:$0xff]   ;;  %3796 = vmatprep.mubr.bf16.mxu0 %v6562_v36  ;;  %v6565_v39 = vld [vmem:[#allocation3 + $0x8] ss:$36 sps:$4 sm:$0xff]  }
  0x50   : > { %6078 = vmatpush3.bf16.msra.mxu1 %v6549_v63  ;;  %894 = vst [vmem:[#allocation3 + $0x190] sm:$0xf] %v5504_v29  ;;  %895 = vst [vmem:[#allocation3 + $0x1b4] sm:$0xf] %v5505_v30  ;;  %v921_v43 = vld [vmem:[#allocation2 + $0x4a] sm:$0xff]  ;;  %v922_v44 = vld [vmem:[#allocation2 + $0x52] sm:$0xff]  ;;  %v354_v56 = vmul.f32 %v5807_v41, %v6886_v17  ;;  %v355_v59 = vmul.f32 %v5808_v42, %v6886_v17 }
  0x51   : > { %6079 = vmatprep.subr.bf16.mxu1 %v6555_v8  ;;  %896 = vst [vmem:[#allocation3 + $0x1d8] sm:$0xf] %v5506_v33  ;;  %v6569_v45 = vld [vmem:[%s7625_s1 + $0x1b8] sm:$0xff]   ;;  %v6575_v48 = vld [vmem:[#allocation3 + $0x54] ss:$36 sps:$4 sm:$0xff]   ;;  %v5531_v50 = vpack.c.bf16 %v921_v43, %v921_v43  ;;  %v5532_v51 = vpack.c.bf16 %v922_v44, %v922_v44  ;;  %v6584_v55 = vld [vmem:[%s7625_s1 + $0x1f0] sm:$0xff]  }
  0x52   : > { %v6564_v37 = vld [vmem:[#allocation3 + $0x120] ss:$36 sps:$4 sm:$0xff]   ;;  %v392_v61 = vadd.f32 %v6895_v22, %v354_v56  ;;  %v5931_v62 = vld [vmem:[%s6875_s20 + $0x38] sm:$0xff]   ;;  %v923_v63 = vld [vmem:[#allocation2 + $0x62] sm:$0xff]  ;;  %v393_v2 = vadd.f32 %v6895_v22, %v355_v59 }
  0x53   : > { %3885 = vmatmul.mubr.bf16.gmra.mxu1 %v6557_v23  ;;  %v6594_v57 = vld [vmem:[%s7625_s1 + $0x150] sm:$0xff]   ;;  %1081 = vst [vmem:[#allocation3 + $0xe0] sm:$0xf] %v5531_v50  ;;  %1082 = vst [vmem:[#allocation3 + $0x104] sm:$0xf] %v5532_v51  ;;  %v5811_v3 = vunpack.c.l.bf16 %v5931_v62  ;;  %v5812_v4 = vunpack.c.h.bf16 %v5931_v62  ;;  %v5533_v5 = vpack.c.bf16 %v923_v63, %v923_v63  ;;  %v6601_v8 = vld [vmem:[%s7625_s1 + $0x1e8] sm:$0xff]  }
  0x54   : > { %6080 = vmatpush3.bf16.msra.mxu1 %v6558_v19  ;;  %3925 = vmatprep.mubr.bf16.mxu1 %v6567_v32  ;;  %v541_v40 = vld [vmem:[#allocation2 + $0x78] sm:$0xff]  ;;  %v6595_v60 = vld [vmem:[%s7625_s1 + $0x110] sm:$0xff]   ;;  %1655 = vst [vmem:[#allocation3 + $0xa4] sm:$0xf] %v5531_v50  ;;  %1656 = vst [vmem:[#allocation3 + $0xc8] sm:$0xf] %v5532_v51 }
  0x55   : > { %6081 = vmatprep.subr.bf16.mxu1 %v6560_v26  ;;  %v542_v46 = vld [vmem:[#allocation2 + $0x80] sm:$0xff]  ;;  %v5471_v47 = vpack.c.bf16 %v541_v40, %v541_v40  ;;  %v543_v49 = vld [vmem:[#allocation2 + $0x90] sm:$0xff]  ;;  %3797 = vmatmul.mubr.bf16.gmra.mxu0 %v6564_v37  ;;  %v424_v6 = vmax.f32 %v392_v61, 0.0  ;;  %v425_v9 = vmax.f32 %v393_v2, 0.0  ;;  %v356_v10 = vmul.f32 %v5811_v3, %v6886_v17  ;;  %1083 = vst [vmem:[#allocation3 + $0x128] sm:$0xf] %v5533_v5 }
  0x56   : > { %v5472_v52 = vpack.c.bf16 %v542_v46, %v542_v46  ;;  %v544_v53 = vld [vmem:[#allocation2 + $0x98] sm:$0xff]  ;;  %v5473_v54 = vpack.c.bf16 %v543_v49, %v543_v49  ;;  %6189 = vmatprep.subr.bf16.mxu0 %v6594_v57  ;;  %v924_v0 = vld [vmem:[#allocation2 + $0x6a] sm:$0xff]  ;;  %v357_v11 = vmul.f32 %v5812_v4, %v6886_v17  ;;  %v5932_v12 = vld [vmem:[%s6875_s20 + $0x40] sm:$0xff]   ;;  %1657 = vst [vmem:[#allocation3 + $0xec] sm:$0xf] %v5533_v5 }
  0x57   : > { %701 = vst [vmem:[#allocation3 + $0x168] sm:$0xf] %v5471_v47  ;;  %v5474_v58 = vpack.c.bf16 %v544_v53, %v544_v53  ;;  %1275 = vst [vmem:[#allocation3 + $0x12c] sm:$0xf] %v5471_v47  ;;  %v6587_v1 = vld [vmem:[%s7625_s1 + $0x1b0] sm:$0xff]   ;;  %6190 = vmatpush3.bf16.msra.mxu0 %v6595_v60  ;;  %v5534_v7 = vpack.c.bf16 %v924_v0, %v924_v0  ;;  %v925_v13 = vld [vmem:[#allocation2 + $0x7a] sm:$0xff]  ;;  %v5507_v16 = vpack.c.bf16 %v424_v6, %v424_v6 }
  0x58   : > { %6082 = vmatpush3.bf16.msra.mxu1 %v6561_v34  ;;  %702 = vst [vmem:[#allocation3 + $0x18c] sm:$0xf] %v5472_v52  ;;  %703 = vst [vmem:[#allocation3 + $0x1b0] sm:$0xf] %v5473_v54  ;;  %v926_v14 = vld [vmem:[#allocation2 + $0x82] sm:$0xff]  ;;  %v5815_v18 = vunpack.c.l.bf16 %v5932_v12  ;;  %v5816_v19 = vunpack.c.h.bf16 %v5932_v12  ;;  %v5535_v20 = vpack.c.bf16 %v925_v13, %v925_v13  ;;  %v5508_v17 = vpack.c.bf16 %v425_v9, %v425_v9  ;;  %v927_v44 = vld [vmem:[#allocation2 + $0x92] sm:$0xff] }
  0x59   : > { %6291 = vmatprep.subr.bf16.mxu1 %v6568_v35  ;;  %1276 = vst [vmem:[#allocation3 + $0x150] sm:$0xf] %v5472_v52  ;;  %1277 = vst [vmem:[#allocation3 + $0x174] sm:$0xf] %v5473_v54  ;;  %v6577_v15 = vld [vmem:[#allocation3 + $0x50] ss:$36 sps:$4 sm:$0xff]   ;;  %v394_v24 = vadd.f32 %v6895_v22, %v356_v10  ;;  %v395_v25 = vadd.f32 %v6895_v22, %v357_v11  ;;  %v5536_v26 = vpack.c.bf16 %v926_v14, %v926_v14 }
  0x5a   : > { %704 = vst [vmem:[#allocation3 + $0x1d4] sm:$0xf] %v5474_v58  ;;  %1278 = vst [vmem:[#allocation3 + $0x198] sm:$0xf] %v5474_v58  ;;  %v6609_v21 = vld [vmem:[%s7625_s1 + $0x148] sm:$0xff]   ;;  %v928_v54 = vld [vmem:[#allocation2 + $0x9a] sm:$0xff] }
  0x5b   : > { %3926 = vmatmul.mubr.bf16.vlgmr.msra.gmra.mxu1 %v6565_v39  ;;  %511 = vst [vmem:[#allocation2 + $0xa9] sm:$0xff] %v424_v6  ;;  %1084 = vst [vmem:[#allocation3 + $0x14c] sm:$0xf] %v5534_v7  ;;  %v6581_v23 = vld [vmem:[#allocation3 + $0x9c] ss:$36 sps:$4 sm:$0xff]   ;;  %6191 = vmatprep.subr.bf16.mxu0 %v6609_v21  ;;  %v426_v33 = vmax.f32 %v394_v24, 0.0  ;;  %v5538_v58 = vpack.c.bf16 %v928_v54, %v928_v54 }
  0x5c   : > { %6292 = vmatpush3.bf16.msra.mxu1 %v6569_v45  ;;  %3933 = vmatprep.mubr.bf16.mxu1 %v6575_v48  ;;  %1658 = vst [vmem:[#allocation3 + $0x110] sm:$0xf] %v5534_v7  ;;  %512 = vst [vmem:[#allocation2 + $0xb1] sm:$0xff] %v425_v9  ;;  %v6611_v27 = vld [vmem:[%s7625_s1 + $0x108] sm:$0xff]   ;;  %v7080_v29 = vld [vmem:[%s7626_s2] ss:$0 sm:$0xff]  ;;  %v5537_v48 = vpack.c.bf16 %v927_v44, %v927_v44 }
  0x5d   : > { %6293 = vmatprep.subr.bf16.mxu1 %v6584_v55  ;;  %897 = vst [vmem:[#allocation3 + $0x1fc] sm:$0xf] %v5507_v16  ;;  %v6603_v28 = vld [vmem:[%s7625_s1 + $0x1a8] sm:$0xff]   ;;  %v358_v30 = vmul.f32 %v7080_v29, %v5815_v18  ;;  %v359_v31 = vmul.f32 %v7080_v29, %v5816_v19  ;;  %1085 = vst [vmem:[#allocation3 + $0x170] sm:$0xf] %v5535_v20  ;;  %6192 = vmatpush3.bf16.msra.mxu0 %v6611_v27  ;;  %v427_v35 = vmax.f32 %v395_v25, 0.0 }
  0x5e   : > { %1659 = vst [vmem:[#allocation3 + $0x134] sm:$0xf] %v5535_v20  ;;  %v6572_v22 = vld [vmem:[#allocation3 + $0x16c] ss:$36 sps:$4 sm:$0xff]   ;;  %898 = vst [vmem:[#allocation3 + $0x220] sm:$0xf] %v5508_v17  ;;  %v5509_v39 = vpack.c.bf16 %v426_v33, %v426_v33 }
  0x5f   : > { %v6574_v32 = vld [vmem:[#allocation3 + $0x168] ss:$36 sps:$4 sm:$0xff]   ;;  %1086 = vst [vmem:[#allocation3 + $0x194] sm:$0xf] %v5536_v26  ;;  %1660 = vst [vmem:[#allocation3 + $0x158] sm:$0xf] %v5536_v26  ;;  %3804 = vmatprep.mubr.bf16.mxu0 %v6572_v22  ;;  %v5510_v40 = vpack.c.bf16 %v427_v35, %v427_v35 }
  0x60   : > { %6294 = vmatpush3.bf16.msra.mxu1 %v6587_v1  ;;  %v6578_v34 = vld [vmem:[#allocation3 + $0x1b4] ss:$36 sps:$4 sm:$0xff]   ;;  %v7087_v36 = vld [vmem:[%s7627_s3] ss:$0 sm:$0xff]  ;;  %513 = vst [vmem:[#allocation2 + $0xc1] sm:$0xff] %v426_v33  ;;  %3805 = vmatmul.mubr.bf16.gmra.mxu0 %v6574_v32  ;;  %514 = vst [vmem:[#allocation2 + $0xc9] sm:$0xff] %v427_v35 }
  0x61   : > { %6295 = vmatprep.subr.bf16.mxu1 %v6601_v8  ;;  %v396_v37 = vadd.f32 %v7087_v36, %v358_v30  ;;  %v397_v38 = vadd.f32 %v7087_v36, %v359_v31  ;;  %v5933_v43 = vld [vmem:[%s6875_s20 + $0x48] sm:$0xff]   ;;  %3812 = vmatprep.mubr.bf16.mxu0 %v6578_v34  ;;  %899 = vst [vmem:[#allocation3 + $0x244] sm:$0xf] %v5509_v39  ;;  %900 = vst [vmem:[#allocation3 + $0x268] sm:$0xf] %v5510_v40  ;;  %v6617_v63 = vld [vmem:[%s7625_s1 + $0x1e0] sm:$0xff]  }
  0x62   : > { %v545_v45 = vld [vmem:[#allocation2 + $0xa8] sm:$0xff]  ;;  %v5819_v46 = vunpack.c.l.bf16 %v5933_v43  ;;  %v5820_v47 = vunpack.c.h.bf16 %v5933_v43  ;;  %1087 = vst [vmem:[#allocation3 + $0x1b8] sm:$0xf] %v5537_v48  ;;  %1661 = vst [vmem:[#allocation3 + $0x17c] sm:$0xf] %v5537_v48  ;;  %v6619_v1 = vld [vmem:[%s7625_s1 + $0x1a0] sm:$0xff]  }
  0x63   : > { %3934 = vmatmul.mubr.bf16.gmra.mxu1 %v6577_v15  ;;  %v428_v41 = vmax.f32 %v396_v37, 0.0  ;;  %v429_v42 = vmax.f32 %v397_v38, 0.0  ;;  %v6585_v49 = vld [vmem:[#allocation3 + $0x98] ss:$36 sps:$4 sm:$0xff]   ;;  %v546_v50 = vld [vmem:[#allocation2 + $0xb0] sm:$0xff]  ;;  %v5475_v51 = vpack.c.bf16 %v545_v45, %v545_v45  ;;  %v6620_v6 = vld [vmem:[%s7625_s1 + $0x140] sm:$0xff]  }
  0x64   : > { %3941 = vmatprep.mubr.bf16.mxu1 %v6581_v23  ;;  %6296 = vmatpush3.bf16.msra.mxu1 %v6603_v28  ;;  %v5476_v55 = vpack.c.bf16 %v546_v50, %v546_v50  ;;  %v360_v56 = vmul.f32 %v7080_v29, %v5819_v46  ;;  %v361_v57 = vmul.f32 %v7080_v29, %v5820_v47  ;;  %v6580_v59 = vld [vmem:[#allocation3 + $0x1b0] ss:$36 sps:$4 sm:$0xff]   ;;  %v6591_v60 = vld [vmem:[#allocation3 + $0xe4] ss:$36 sps:$4 sm:$0xff]   ;;  %v929_v20 = vld [vmem:[#allocation2 + $0xaa] sm:$0xff] }
  0x65   : > { %515 = vst [vmem:[#allocation2 + $0xd9] sm:$0xff] %v428_v41  ;;  %516 = vst [vmem:[#allocation2 + $0xe1] sm:$0xff] %v429_v42  ;;  %v5511_v52 = vpack.c.bf16 %v428_v41, %v428_v41  ;;  %v5512_v53 = vpack.c.bf16 %v429_v42, %v429_v42  ;;  %6297 = vmatprep.subr.bf16.mxu1 %v6617_v63  ;;  %v6621_v8 = vld [vmem:[%s7625_s1 + $0x100] sm:$0xff]   ;;  %v5934_v13 = vld [vmem:[%s6875_s20 + $0x50] sm:$0xff]   ;;  %6193 = vmatprep.subr.bf16.mxu0 %v6620_v6 }
  0x66   : > { %705 = vst [vmem:[#allocation3 + $0x1f8] sm:$0xf] %v5475_v51  ;;  %1279 = vst [vmem:[#allocation3 + $0x1bc] sm:$0xf] %v5475_v51  ;;  %v398_v61 = vadd.f32 %v7087_v36, %v360_v56  ;;  %v399_v62 = vadd.f32 %v7087_v36, %v361_v57  ;;  %v6593_v14 = vld [vmem:[#allocation3 + $0xe0] ss:$36 sps:$4 sm:$0xff]   ;;  %v5823_v18 = vunpack.c.l.bf16 %v5934_v13  ;;  %v5824_v19 = vunpack.c.h.bf16 %v5934_v13  ;;  %6194 = vmatpush3.bf16.msra.mxu0 %v6621_v8 }
  0x67   : > { %901 = vst [vmem:[#allocation3 + $0x28c] sm:$0xf] %v5511_v52  ;;  %902 = vst [vmem:[#allocation3 + $0x2b0] sm:$0xf] %v5512_v53  ;;  %v547_v0 = vld [vmem:[#allocation2 + $0xc0] sm:$0xff]  ;;  %v548_v2 = vld [vmem:[#allocation2 + $0xc8] sm:$0xff]  ;;  %v5539_v17 = vpack.c.bf16 %v929_v20, %v929_v20 }
  0x68   : > { %1475 = vst [vmem:[#allocation3 + $0x250] sm:$0xf] %v5511_v52  ;;  %1476 = vst [vmem:[#allocation3 + $0x274] sm:$0xf] %v5512_v53  ;;  %v5477_v3 = vpack.c.bf16 %v547_v0, %v547_v0  ;;  %v430_v4 = vmax.f32 %v398_v61, 0.0  ;;  %v431_v5 = vmax.f32 %v399_v62, 0.0  ;;  %3813 = vmatmul.mubr.bf16.gmra.mxu0 %v6580_v59  ;;  %v5478_v7 = vpack.c.bf16 %v548_v2, %v548_v2 }
  0x69   : > { %706 = vst [vmem:[#allocation3 + $0x21c] sm:$0xf] %v5476_v55  ;;  %1088 = vst [vmem:[#allocation3 + $0x1dc] sm:$0xf] %v5538_v58  ;;  %6298 = vmatpush3.bf16.msra.mxu1 %v6619_v1  ;;  %v930_v21 = vld [vmem:[#allocation2 + $0xb2] sm:$0xff]  ;;  %v1300_v25 = vld [vmem:[#allocation2 + $0x21] sm:$0xff]  ;;  %v362_v30 = vmul.f32 %v7080_v29, %v5823_v18  ;;  %v363_v31 = vmul.f32 %v7080_v29, %v5824_v19 }
  0x6a   : > { %1280 = vst [vmem:[#allocation3 + $0x1e0] sm:$0xf] %v5476_v55  ;;  %1662 = vst [vmem:[#allocation3 + $0x1a0] sm:$0xf] %v5538_v58  ;;  %v5513_v11 = vpack.c.bf16 %v430_v4, %v430_v4  ;;  %v5514_v12 = vpack.c.bf16 %v431_v5, %v431_v5  ;;  %v1299_v23 = vld [vmem:[#allocation2 + $0x19] sm:$0xff]  ;;  %v5540_v24 = vpack.c.bf16 %v930_v21, %v930_v21  ;;  %v931_v35 = vld [vmem:[#allocation2 + $0xc2] sm:$0xff] }
  0x6b   : > { %3942 = vmatmul.mubr.bf16.gmra.mxu1 %v6585_v49  ;;  %707 = vst [vmem:[#allocation3 + $0x240] sm:$0xf] %v5477_v3  ;;  %517 = vst [vmem:[#allocation2 + $0xf1] sm:$0xff] %v430_v4  ;;  %v5589_v26 = vpack.c.bf16 %v1299_v23, %v1299_v23  ;;  %v6588_v27 = vld [vmem:[#allocation3 + $0x1fc] ss:$36 sps:$4 sm:$0xff]   ;;  %v5590_v22 = vpack.c.bf16 %v1300_v25, %v1300_v25  ;;  %v400_v33 = vadd.f32 %v7087_v36, %v362_v30  ;;  %v6633_v40 = vld [vmem:[%s7625_s1 + $0x1d8] sm:$0xff]  }
  0x6c   : > { %3949 = vmatprep.mubr.bf16.mxu1 %v6591_v60  ;;  %v549_v9 = vld [vmem:[#allocation2 + $0xd8] sm:$0xff]  ;;  %v550_v10 = vld [vmem:[#allocation2 + $0xe0] sm:$0xff]  ;;  %518 = vst [vmem:[#allocation2 + $0xf9] sm:$0xff] %v431_v5  ;;  %1281 = vst [vmem:[#allocation3 + $0x204] sm:$0xf] %v5477_v3  ;;  %3820 = vmatprep.mubr.bf16.mxu0 %v6588_v27  ;;  %v401_v34 = vadd.f32 %v7087_v36, %v363_v31  ;;  %v5541_v38 = vpack.c.bf16 %v931_v35, %v931_v35 }
  0x6d   : > { %708 = vst [vmem:[#allocation3 + $0x264] sm:$0xf] %v5478_v7  ;;  %v5479_v15 = vpack.c.bf16 %v549_v9, %v549_v9  ;;  %v5480_v16 = vpack.c.bf16 %v550_v10, %v550_v10  ;;  %1282 = vst [vmem:[#allocation3 + $0x228] sm:$0xf] %v5478_v7  ;;  %v6599_v32 = vld [vmem:[#allocation3 + $0x12c] ss:$36 sps:$4 sm:$0xff]   ;;  %6299 = vmatprep.subr.bf16.mxu1 %v6633_v40 }
  0x6e   : > { %903 = vst [vmem:[#allocation3 + $0x2d4] sm:$0xf] %v5513_v11  ;;  %904 = vst [vmem:[#allocation3 + $0x2f8] sm:$0xf] %v5514_v12  ;;  %v932_v37 = vld [vmem:[#allocation2 + $0xca] sm:$0xff]  ;;  %v432_v43 = vmax.f32 %v400_v33, 0.0 }
  0x6f   : > { %1477 = vst [vmem:[#allocation3 + $0x298] sm:$0xf] %v5513_v11  ;;  %1478 = vst [vmem:[#allocation3 + $0x2bc] sm:$0xf] %v5514_v12  ;;  %v5542_v39 = vpack.c.bf16 %v932_v37, %v932_v37  ;;  %v433_v44 = vmax.f32 %v401_v34, 0.0  ;;  %v7119_v50 = vld [vmem:[%s7625_s1 + $0x238] sm:$0xff]  }
  0x70   : > { %v6590_v28 = vld [vmem:[#allocation3 + $0x1f8] ss:$36 sps:$4 sm:$0xff]   ;;  %709 = vst [vmem:[#allocation3 + $0x288] sm:$0xf] %v5479_v15  ;;  %710 = vst [vmem:[#allocation3 + $0x2ac] sm:$0xf] %v5480_v16  ;;  %v5515_v48 = vpack.c.bf16 %v432_v43, %v432_v43  ;;  %6427 = vmatprep.subr.bf16.mxu0 %v7119_v50 }
  0x71   : > { %1283 = vst [vmem:[#allocation3 + $0x24c] sm:$0xf] %v5479_v15  ;;  %1284 = vst [vmem:[#allocation3 + $0x270] sm:$0xf] %v5480_v16  ;;  %3821 = vmatmul.mubr.bf16.gmra.mxu0 %v6590_v28  ;;  %v6596_v45 = vld [vmem:[#allocation3 + $0x244] ss:$36 sps:$4 sm:$0xff]   ;;  %v5516_v49 = vpack.c.bf16 %v433_v44, %v433_v44 }
  0x72   : > { %1089 = vst [vmem:[#allocation3 + $0x200] sm:$0xf] %v5539_v17  ;;  %1090 = vst [vmem:[#allocation3 + $0x224] sm:$0xf] %v5540_v24  ;;  %v551_v41 = vld [vmem:[#allocation2 + $0xf0] sm:$0xff]  ;;  %3828 = vmatprep.mubr.bf16.mxu0 %v6596_v45  ;;  %v6636_v55 = vld [vmem:[%s7625_s1 + $0x198] sm:$0xff]  }
  0x73   : > { %1459 = vst [vmem:[#allocation3 + $0x10] sm:$0xf] %v5589_v26  ;;  %1663 = vst [vmem:[#allocation3 + $0x1c4] sm:$0xf] %v5539_v17  ;;  %3950 = vmatmul.mubr.bf16.gmra.mxu1 %v6593_v14  ;;  %v552_v42 = vld [vmem:[#allocation2 + $0xf8] sm:$0xff]  ;;  %v5481_v46 = vpack.c.bf16 %v551_v41, %v551_v41  ;;  %v934_v5 = vld [vmem:[#allocation2 + $0xe2] sm:$0xff] }
  0x74   : > { %1664 = vst [vmem:[#allocation3 + $0x1e8] sm:$0xf] %v5540_v24  ;;  %1460 = vst [vmem:[#allocation3 + $0x34] sm:$0xf] %v5590_v22  ;;  %3957 = vmatprep.mubr.bf16.mxu1 %v6599_v32  ;;  %v5482_v47 = vpack.c.bf16 %v552_v42, %v552_v42  ;;  %v6602_v51 = vld [vmem:[#allocation3 + $0x128] ss:$36 sps:$4 sm:$0xff]   ;;  %6300 = vmatpush3.bf16.msra.mxu1 %v6636_v55  ;;  %v5544_v9 = vpack.c.bf16 %v934_v5, %v934_v5 }
  0x75   : > { %1091 = vst [vmem:[#allocation3 + $0x248] sm:$0xf] %v5541_v38  ;;  %1092 = vst [vmem:[#allocation3 + $0x26c] sm:$0xf] %v5542_v39  ;;  %v6598_v52 = vld [vmem:[#allocation3 + $0x240] ss:$36 sps:$4 sm:$0xff]  }
  0x76   : > { %1665 = vst [vmem:[#allocation3 + $0x20c] sm:$0xf] %v5541_v38  ;;  %1666 = vst [vmem:[#allocation3 + $0x230] sm:$0xf] %v5542_v39  ;;  %v6604_v53 = vld [vmem:[#allocation3 + $0x28c] ss:$36 sps:$4 sm:$0xff]  }
  0x77   : > { %519 = vst [vmem:[#allocation2 + $0x109] sm:$0xff] %v432_v43  ;;  %520 = vst [vmem:[#allocation2 + $0x111] sm:$0xff] %v433_v44  ;;  %v6607_v54 = vld [vmem:[#allocation3 + $0x174] ss:$36 sps:$4 sm:$0xff]   ;;  %v1301_v56 = vld [vmem:[#allocation2 + $0x31] sm:$0xff] }
  0x78   : > { %711 = vst [vmem:[#allocation3 + $0x2d0] sm:$0xf] %v5481_v46  ;;  %712 = vst [vmem:[#allocation3 + $0x2f4] sm:$0xf] %v5482_v47  ;;  %v5591_v57 = vpack.c.bf16 %v1301_v56, %v1301_v56  ;;  %v6606_v60 = vld [vmem:[#allocation3 + $0x288] ss:$36 sps:$4 sm:$0xff]  }
  0x79   : > { %1285 = vst [vmem:[#allocation3 + $0x294] sm:$0xf] %v5481_v46  ;;  %1286 = vst [vmem:[#allocation3 + $0x2b8] sm:$0xf] %v5482_v47  ;;  %3829 = vmatmul.mubr.bf16.gmra.mxu0 %v6598_v52  ;;  %v6610_v61 = vld [vmem:[#allocation3 + $0x170] ss:$36 sps:$4 sm:$0xff]  }
  0x7a   : > { %905 = vst [vmem:[#allocation3 + $0x31c] sm:$0xf] %v5515_v48  ;;  %906 = vst [vmem:[#allocation3 + $0x340] sm:$0xf] %v5516_v49  ;;  %3836 = vmatprep.mubr.bf16.mxu0 %v6604_v53  ;;  %v6612_v0 = vld [vmem:[#allocation3 + $0x2d4] ss:$36 sps:$4 sm:$0xff]  }
  0x7b   : > { %1479 = vst [vmem:[#allocation3 + $0x2e0] sm:$0xf] %v5515_v48  ;;  %1480 = vst [vmem:[#allocation3 + $0x304] sm:$0xf] %v5516_v49  ;;  %3958 = vmatmul.mubr.bf16.gmra.mxu1 %v6602_v51  ;;  %v6615_v1 = vld [vmem:[#allocation3 + $0x1bc] ss:$36 sps:$4 sm:$0xff]  }
  0x7c   : > { %3965 = vmatprep.mubr.bf16.mxu1 %v6607_v54  ;;  %1461 = vst [vmem:[#allocation3 + $0x58] sm:$0xf] %v5591_v57  ;;  %2036 = vst [vmem:[#allocation3 + $0x1c] sm:$0xf] %v5591_v57  ;;  %v1302_v2 = vld [vmem:[#allocation2 + $0x39] sm:$0xff]  ;;  %v1303_v7 = vld [vmem:[#allocation2 + $0x49] sm:$0xff] }
  0x7d   : > { %v933_v3 = vld [vmem:[#allocation2 + $0xda] sm:$0xff]  ;;  %v5592_v4 = vpack.c.bf16 %v1302_v2, %v1302_v2  ;;  %v1304_v8 = vld [vmem:[#allocation2 + $0x51] sm:$0xff]  ;;  %v5593_v10 = vpack.c.bf16 %v1303_v7, %v1303_v7  ;;  %1094 = vst [vmem:[#allocation3 + $0x2b4] sm:$0xf] %v5544_v9  ;;  %1668 = vst [vmem:[#allocation3 + $0x278] sm:$0xf] %v5544_v9 }
  0x7e   : > { %v553_v58 = vld [vmem:[#allocation2 + $0x108] sm:$0xff]  ;;  %v554_v59 = vld [vmem:[#allocation2 + $0x110] sm:$0xff]  ;;  %v5543_v6 = vpack.c.bf16 %v933_v3, %v933_v3  ;;  %v5594_v11 = vpack.c.bf16 %v1304_v8, %v1304_v8  ;;  %v936_v13 = vld [vmem:[#allocation2 + $0xfa] sm:$0xff] }
  0x7f   : > { %v5483_v62 = vpack.c.bf16 %v553_v58, %v553_v58  ;;  %v5484_v63 = vpack.c.bf16 %v554_v59, %v554_v59  ;;  %v935_v12 = vld [vmem:[#allocation2 + $0xf2] sm:$0xff]  ;;  %1462 = vst [vmem:[#allocation3 + $0x7c] sm:$0xf] %v5592_v4  ;;  %v5546_v15 = vpack.c.bf16 %v936_v13, %v936_v13  ;;  %2037 = vst [vmem:[#allocation3 + $0x40] sm:$0xf] %v5592_v4  ;;  %v1305_v19 = vld [vmem:[#allocation2 + $0x61] sm:$0xff] }
  0x80   : > { %1093 = vst [vmem:[#allocation3 + $0x290] sm:$0xf] %v5543_v6  ;;  %v5545_v14 = vpack.c.bf16 %v935_v12, %v935_v12  ;;  %v6648_v16 = vld [vmem:[%s7625_s1 + $0x1d0] sm:$0xff]   ;;  %1667 = vst [vmem:[#allocation3 + $0x254] sm:$0xf] %v5543_v6  ;;  %v5595_v21 = vpack.c.bf16 %v1305_v19, %v1305_v19  ;;  %v1129_v27 = vld [vmem:[#allocation2 + $0x120] sm:$0xff] }
  0x81   : > { %713 = vst [vmem:[#allocation3 + $0x318] sm:$0xf] %v5483_v62  ;;  %714 = vst [vmem:[#allocation3 + $0x33c] sm:$0xf] %v5484_v63  ;;  %3837 = vmatmul.mubr.bf16.gmra.mxu0 %v6606_v60  ;;  %v6651_v18 = vld [vmem:[%s7625_s1 + $0x190] sm:$0xff]   ;;  %6301 = vmatprep.subr.bf16.mxu1 %v6648_v16  ;;  %v1130_v28 = vld [vmem:[#allocation2 + $0x128] sm:$0xff]  ;;  %v5579_v22 = vpack.c.bf16 %v1129_v27, %v1129_v27 }
  0x82   : > { %1287 = vst [vmem:[#allocation3 + $0x2dc] sm:$0xf] %v5483_v62  ;;  %1288 = vst [vmem:[#allocation3 + $0x300] sm:$0xf] %v5484_v63  ;;  %3844 = vmatprep.mubr.bf16.mxu0 %v6612_v0  ;;  %v1306_v20 = vld [vmem:[#allocation2 + $0x69] sm:$0xff]  ;;  %v938_v25 = vld [vmem:[#allocation2 + $0x112] sm:$0xff]  ;;  %6302 = vmatpush3.bf16.msra.mxu1 %v6651_v18  ;;  %v5580_v32 = vpack.c.bf16 %v1130_v28, %v1130_v28 }
  0x83   : > { %1463 = vst [vmem:[#allocation3 + $0xa0] sm:$0xf] %v5593_v10  ;;  %1464 = vst [vmem:[#allocation3 + $0xc4] sm:$0xf] %v5594_v11  ;;  %3966 = vmatmul.mubr.bf16.gmra.mxu1 %v6610_v61  ;;  %v937_v23 = vld [vmem:[#allocation2 + $0x10a] sm:$0xff]  ;;  %v5596_v24 = vpack.c.bf16 %v1306_v20, %v1306_v20  ;;  %v5548_v31 = vpack.c.bf16 %v938_v25, %v938_v25  ;;  %v1307_v34 = vld [vmem:[#allocation2 + $0x79] sm:$0xff] }
  0x84   : > { %2038 = vst [vmem:[#allocation3 + $0x64] sm:$0xf] %v5593_v10  ;;  %2039 = vst [vmem:[#allocation3 + $0x88] sm:$0xf] %v5594_v11  ;;  %3973 = vmatprep.mubr.bf16.mxu1 %v6615_v1  ;;  %v6618_v17 = vld [vmem:[#allocation3 + $0x1b8] ss:$36 sps:$4 sm:$0xff]   ;;  %v5547_v26 = vpack.c.bf16 %v937_v23, %v937_v23  ;;  %v5597_v38 = vpack.c.bf16 %v1307_v34, %v1307_v34 }
  0x85   : > { %1095 = vst [vmem:[#allocation3 + $0x2d8] sm:$0xf] %v5545_v14  ;;  %1096 = vst [vmem:[#allocation3 + $0x2fc] sm:$0xf] %v5546_v15  ;;  %v6625_v30 = vld [vmem:[#allocation3 + $0x204] ss:$36 sps:$4 sm:$0xff]  }
  0x86   : > { %1669 = vst [vmem:[#allocation3 + $0x29c] sm:$0xf] %v5545_v14  ;;  %1670 = vst [vmem:[#allocation3 + $0x2c0] sm:$0xf] %v5546_v15  ;;  %v6614_v33 = vld [vmem:[#allocation3 + $0x2d0] ss:$36 sps:$4 sm:$0xff]  }
  0x87   : > { %1465 = vst [vmem:[#allocation3 + $0xe8] sm:$0xf] %v5595_v21  ;;  %2040 = vst [vmem:[#allocation3 + $0xac] sm:$0xf] %v5595_v21  ;;  %v1308_v35 = vld [vmem:[#allocation2 + $0x81] sm:$0xff]  ;;  %v940_v41 = vld [vmem:[#allocation2 + $0x12a] sm:$0xff] }
  0x88   : > { %1466 = vst [vmem:[#allocation3 + $0x10c] sm:$0xf] %v5596_v24  ;;  %1097 = vst [vmem:[#allocation3 + $0x320] sm:$0xf] %v5547_v26  ;;  %v6622_v37 = vld [vmem:[#allocation3 + $0x31c] ss:$36 sps:$4 sm:$0xff]   ;;  %v5598_v39 = vpack.c.bf16 %v1308_v35, %v1308_v35  ;;  %v5550_v45 = vpack.c.bf16 %v940_v41, %v940_v41 }
  0x89   : > { %1671 = vst [vmem:[#allocation3 + $0x2e4] sm:$0xf] %v5547_v26  ;;  %2041 = vst [vmem:[#allocation3 + $0xd0] sm:$0xf] %v5596_v24  ;;  %3845 = vmatmul.mubr.bf16.gmra.mxu0 %v6614_v33  ;;  %v939_v40 = vld [vmem:[#allocation2 + $0x122] sm:$0xff]  ;;  %v1131_v48 = vld [vmem:[#allocation2 + $0x138] sm:$0xff] }
  0x8a   : > { %1098 = vst [vmem:[#allocation3 + $0x344] sm:$0xf] %v5548_v31  ;;  %1289 = vst [vmem:[#allocation3 + $0x324] sm:$0xf] %v5579_v22  ;;  %3852 = vmatprep.mubr.bf16.mxu0 %v6622_v37  ;;  %v6627_v42 = vld [vmem:[#allocation3 + $0x200] ss:$36 sps:$4 sm:$0xff]   ;;  %v5549_v44 = vpack.c.bf16 %v939_v40, %v939_v40  ;;  %v5581_v51 = vpack.c.bf16 %v1131_v48, %v1131_v48 }
  0x8b   : > { %1290 = vst [vmem:[#allocation3 + $0x348] sm:$0xf] %v5580_v32  ;;  %1672 = vst [vmem:[#allocation3 + $0x308] sm:$0xf] %v5548_v31  ;;  %3974 = vmatmul.mubr.bf16.gmra.mxu1 %v6618_v17  ;;  %v6630_v43 = vld [vmem:[#allocation3 + $0x14] ss:$36 sps:$4 sm:$0xff]  }
  0x8c   : > { %1467 = vst [vmem:[#allocation3 + $0x130] sm:$0xf] %v5597_v38  ;;  %1468 = vst [vmem:[#allocation3 + $0x154] sm:$0xf] %v5598_v39  ;;  %3981 = vmatprep.mubr.bf16.mxu1 %v6625_v30  ;;  %v6624_v46 = vld [vmem:[#allocation3 + $0x318] ss:$36 sps:$4 sm:$0xff]  }
  0x8d   : > { %2042 = vst [vmem:[#allocation3 + $0xf4] sm:$0xf] %v5597_v38  ;;  %2043 = vst [vmem:[#allocation3 + $0x118] sm:$0xf] %v5598_v39  ;;  %v6631_v47 = vld [vmem:[#allocation3 + $0x24c] ss:$36 sps:$4 sm:$0xff]  }
  0x8e   : > { %1099 = vst [vmem:[#allocation3 + $0x368] sm:$0xf] %v5549_v44  ;;  %1100 = vst [vmem:[#allocation3 + $0x38c] sm:$0xf] %v5550_v45  ;;  %v1132_v49 = vld [vmem:[#allocation2 + $0x140] sm:$0xff]  ;;  %v6663_v53 = vld [vmem:[%s7625_s1 + $0x1c8] sm:$0xff]  }
  0x8f   : > { %1673 = vst [vmem:[#allocation3 + $0x32c] sm:$0xf] %v5549_v44  ;;  %1674 = vst [vmem:[#allocation3 + $0x350] sm:$0xf] %v5550_v45  ;;  %v5582_v52 = vpack.c.bf16 %v1132_v49, %v1132_v49  ;;  %v6628_v54 = vld [vmem:[#allocation3 + $0x10] ss:$36 sps:$4 sm:$0xff]   ;;  %6303 = vmatprep.subr.bf16.mxu1 %v6663_v53 }
  0x90   : > { %1291 = vst [vmem:[#allocation3 + $0x36c] sm:$0xf] %v5581_v51  ;;  %v6635_v55 = vld [vmem:[#allocation3 + $0x248] ss:$36 sps:$4 sm:$0xff]   ;;  %v6666_v56 = vld [vmem:[%s7625_s1 + $0x188] sm:$0xff]   ;;  %v1133_v0 = vld [vmem:[#allocation2 + $0x150] sm:$0xff] }
  0x91   : > { %3853 = vmatmul.mubr.bf16.gmra.mxu0 %v6624_v46  ;;  %1292 = vst [vmem:[#allocation3 + $0x390] sm:$0xf] %v5582_v52  ;;  %v1309_v57 = vld [vmem:[#allocation2 + $0x91] sm:$0xff]  ;;  %v1310_v58 = vld [vmem:[#allocation2 + $0x99] sm:$0xff]  ;;  %v942_v63 = vld [vmem:[#allocation2 + $0x142] sm:$0xff]  ;;  %6304 = vmatpush3.bf16.msra.mxu1 %v6666_v56  ;;  %v5583_v6 = vpack.c.bf16 %v1133_v0, %v1133_v0 }
  0x92   : > { %4086 = vmatprep.mubr.bf16.mxu0 %v6630_v43  ;;  %v6637_v59 = vld [vmem:[#allocation3 + $0x5c] ss:$36 sps:$4 sm:$0xff]   ;;  %v5599_v60 = vpack.c.bf16 %v1309_v57, %v1309_v57  ;;  %v5600_v61 = vpack.c.bf16 %v1310_v58, %v1310_v58  ;;  %v941_v62 = vld [vmem:[#allocation2 + $0x13a] sm:$0xff]  ;;  %v6639_v1 = vld [vmem:[#allocation3 + $0x294] ss:$36 sps:$4 sm:$0xff]   ;;  %v5552_v4 = vpack.c.bf16 %v942_v63, %v942_v63 }
  0x93   : > { %3982 = vmatmul.mubr.bf16.gmra.mxu1 %v6627_v42  ;;  %v6649_v2 = vld [vmem:[%s7625_s1 + $0x230] sm:$0xff]   ;;  %v5551_v3 = vpack.c.bf16 %v941_v62, %v941_v62  ;;  %v1134_v5 = vld [vmem:[#allocation2 + $0x158] sm:$0xff]  ;;  %v1135_v14 = vld [vmem:[#allocation2 + $0x168] sm:$0xff]  ;;  %1293 = vst [vmem:[#allocation3 + $0x3b4] sm:$0xf] %v5583_v6 }
  0x94   : > { %3989 = vmatprep.mubr.bf16.mxu1 %v6631_v47  ;;  %v1311_v7 = vld [vmem:[#allocation2 + $0xa9] sm:$0xff]  ;;  %v1312_v8 = vld [vmem:[#allocation2 + $0xb1] sm:$0xff]  ;;  %1469 = vst [vmem:[#allocation3 + $0x178] sm:$0xf] %v5599_v60  ;;  %1470 = vst [vmem:[#allocation3 + $0x19c] sm:$0xf] %v5600_v61  ;;  %v5584_v9 = vpack.c.bf16 %v1134_v5, %v1134_v5  ;;  %v5585_v19 = vpack.c.bf16 %v1135_v14, %v1135_v14 }
  0x95   : > { %v5601_v10 = vpack.c.bf16 %v1311_v7, %v1311_v7  ;;  %v5602_v11 = vpack.c.bf16 %v1312_v8, %v1312_v8  ;;  %v943_v12 = vld [vmem:[#allocation2 + $0x152] sm:$0xff]  ;;  %v944_v13 = vld [vmem:[#allocation2 + $0x15a] sm:$0xff]  ;;  %2044 = vst [vmem:[#allocation3 + $0x13c] sm:$0xf] %v5599_v60  ;;  %2045 = vst [vmem:[#allocation3 + $0x160] sm:$0xf] %v5600_v61 }
  0x96   : > { %1101 = vst [vmem:[#allocation3 + $0x3b0] sm:$0xf] %v5551_v3  ;;  %1102 = vst [vmem:[#allocation3 + $0x3d4] sm:$0xf] %v5552_v4  ;;  %v5553_v15 = vpack.c.bf16 %v943_v12, %v943_v12  ;;  %v5554_v16 = vpack.c.bf16 %v944_v13, %v944_v13  ;;  %v1136_v18 = vld [vmem:[#allocation2 + $0x170] sm:$0xff]  ;;  %v6678_v21 = vld [vmem:[%s7625_s1 + $0x1c0] sm:$0xff]  }
  0x97   : > { %1675 = vst [vmem:[#allocation3 + $0x374] sm:$0xf] %v5551_v3  ;;  %1676 = vst [vmem:[#allocation3 + $0x398] sm:$0xf] %v5552_v4  ;;  %v5586_v20 = vpack.c.bf16 %v1136_v18, %v1136_v18  ;;  %v6664_v23 = vld [vmem:[%s7625_s1 + $0x228] sm:$0xff]   ;;  %v6681_v25 = vld [vmem:[%s7625_s1 + $0x180] sm:$0xff]   ;;  %6305 = vmatprep.subr.bf16.mxu1 %v6678_v21 }
  0x98   : > { %1294 = vst [vmem:[#allocation3 + $0x3d8] sm:$0xf] %v5584_v9  ;;  %1471 = vst [vmem:[#allocation3 + $0x1c0] sm:$0xf] %v5601_v10  ;;  %v6641_v17 = vld [vmem:[#allocation3 + $0x58] ss:$36 sps:$4 sm:$0xff]   ;;  %6306 = vmatpush3.bf16.msra.mxu1 %v6681_v25 }
  0x99   : > { %1472 = vst [vmem:[#allocation3 + $0x1e4] sm:$0xf] %v5602_v11  ;;  %2046 = vst [vmem:[#allocation3 + $0x184] sm:$0xf] %v5601_v10  ;;  %4087 = vmatmul.mubr.bf16.vlgmr.msra.gmra.mxu0 %v6628_v54  ;;  %v6642_v24 = vld [vmem:[#allocation3 + $0x290] ss:$36 sps:$4 sm:$0xff]  }
  0x9a   : > { %2047 = vst [vmem:[#allocation3 + $0x1a8] sm:$0xf] %v5602_v11  ;;  %1103 = vst [vmem:[#allocation3 + $0x3f8] sm:$0xf] %v5553_v15  ;;  %6428 = vmatpush3.bf16.msra.mxu0 %v7119_v50  ;;  %4094 = vmatprep.mubr.bf16.mxu0 %v6637_v59  ;;  %v1313_v26 = vld [vmem:[#allocation2 + $0xc1] sm:$0xff]  ;;  %v1314_v27 = vld [vmem:[#allocation2 + $0xc9] sm:$0xff] }
  0x9b   : > { %3990 = vmatmul.mubr.bf16.gmra.mxu1 %v6635_v55  ;;  %1104 = vst [vmem:[#allocation3 + $0x41c] sm:$0xf] %v5554_v16  ;;  %1295 = vst [vmem:[#allocation3 + $0x3fc] sm:$0xf] %v5585_v19  ;;  %6429 = vmatprep.subr.bf16.mxu0 %v6649_v2  ;;  %v5603_v28 = vpack.c.bf16 %v1313_v26, %v1313_v26  ;;  %v5939_v30 = vld [vmem:[%s6875_s20 + $0x78] sm:$0xff]   ;;  %v945_v50 = vld [vmem:[#allocation2 + $0x16a] sm:$0xff]  ;;  %v5604_v22 = vpack.c.bf16 %v1314_v27, %v1314_v27 }
  0x9c   : > { %1677 = vst [vmem:[#allocation3 + $0x3bc] sm:$0xf] %v5553_v15  ;;  %1678 = vst [vmem:[#allocation3 + $0x3e0] sm:$0xf] %v5554_v16  ;;  %3997 = vmatprep.mubr.bf16.mxu1 %v6639_v1  ;;  %v6643_v31 = vld [vmem:[#allocation3 + $0xa4] ss:$36 sps:$4 sm:$0xff]   ;;  %v5843_v32 = vunpack.c.l.bf16 %v5939_v30  ;;  %v5844_v33 = vunpack.c.h.bf16 %v5939_v30  ;;  %v5555_v34 = vpack.c.bf16 %v945_v50, %v945_v50 }
  0x9d   : > { %1296 = vst [vmem:[#allocation3 + $0x420] sm:$0xf] %v5586_v20  ;;  %v6645_v35 = vld [vmem:[#allocation3 + $0x2dc] ss:$36 sps:$4 sm:$0xff]   ;;  %1473 = vst [vmem:[#allocation3 + $0x208] sm:$0xf] %v5603_v28 }
  0x9e   : > { %6430 = vmatpush3.bf16.msra.mxu0 %v6649_v2  ;;  %v946_v37 = vld [vmem:[#allocation2 + $0x172] sm:$0xff]  ;;  %2048 = vst [vmem:[#allocation3 + $0x1cc] sm:$0xf] %v5603_v28  ;;  %1474 = vst [vmem:[#allocation3 + $0x22c] sm:$0xf] %v5604_v22  ;;  %v372_v38 = vmul.f32 %v7080_v29, %v5843_v32  ;;  %v373_v39 = vmul.f32 %v7080_v29, %v5844_v33  ;;  %v6679_v41 = vld [vmem:[%s7625_s1 + $0x220] sm:$0xff]  }
  0x9f   : > { %6431 = vmatprep.subr.bf16.mxu0 %v6664_v23  ;;  %v5556_v40 = vpack.c.bf16 %v946_v37, %v946_v37  ;;  %1105 = vst [vmem:[#allocation3 + $0x440] sm:$0xf] %v5555_v34  ;;  %1679 = vst [vmem:[#allocation3 + $0x404] sm:$0xf] %v5555_v34  ;;  %v6647_v44 = vld [vmem:[#allocation3 + $0xa0] ss:$36 sps:$4 sm:$0xff]  }
  0xa0   : > { %2049 = vst [vmem:[#allocation3 + $0x1f0] sm:$0xf] %v5604_v22  ;;  %v410_v42 = vadd.f32 %v7087_v36, %v372_v38  ;;  %v411_v43 = vadd.f32 %v7087_v36, %v373_v39  ;;  %v1684_v46 = vld [vmem:[#allocation2 + $0x30] sm:$0xff]  ;;  %v6650_v47 = vld [vmem:[#allocation3 + $0x2d8] ss:$36 sps:$4 sm:$0xff]   ;;  %v1685_v48 = vld [vmem:[#allocation2 + $0x38] sm:$0xff] }
  0xa1   : > { %4095 = vmatmul.mubr.bf16.gmra.mxu0 %v6641_v17  ;;  %1106 = vst [vmem:[#allocation3 + $0x464] sm:$0xf] %v5556_v40  ;;  %1680 = vst [vmem:[#allocation3 + $0x428] sm:$0xf] %v5556_v40  ;;  %v5653_v49 = vpack.c.bf16 %v1684_v46, %v1684_v46  ;;  %v5654_v51 = vpack.c.bf16 %v1685_v48, %v1685_v48  ;;  %v6694_v36 = vld [vmem:[%s7625_s1 + $0x218] sm:$0xff]   ;;  %v1686_v56 = vld [vmem:[#allocation2 + $0x48] sm:$0xff] }
  0xa2   : > { %4102 = vmatprep.mubr.bf16.mxu0 %v6643_v31  ;;  %6432 = vmatpush3.bf16.msra.mxu0 %v6664_v23  ;;  %v442_v29 = vmax.f32 %v410_v42, 0.0  ;;  %v443_v45 = vmax.f32 %v411_v43, 0.0  ;;  %v6652_v54 = vld [vmem:[#allocation3 + $0xec] ss:$36 sps:$4 sm:$0xff]   ;;  %v6654_v55 = vld [vmem:[#allocation3 + $0x324] ss:$36 sps:$4 sm:$0xff]   ;;  %v5655_v58 = vpack.c.bf16 %v1686_v56, %v1686_v56 }
  0xa3   : > { %3998 = vmatmul.mubr.bf16.gmra.mxu1 %v6642_v24  ;;  %6433 = vmatprep.subr.bf16.mxu0 %v6679_v41  ;;  %1844 = vst [vmem:[#allocation3 + $0x18] sm:$0xf] %v5653_v49  ;;  %1845 = vst [vmem:[#allocation3 + $0x3c] sm:$0xf] %v5654_v51  ;;  %v1687_v57 = vld [vmem:[#allocation2 + $0x50] sm:$0xff]  ;;  %v1688_v60 = vld [vmem:[#allocation2 + $0x60] sm:$0xff] }
  0xa4   : > { %4005 = vmatprep.mubr.bf16.mxu1 %v6645_v35  ;;  %529 = vst [vmem:[#allocation2 + $0x181] sm:$0xff] %v442_v29  ;;  %530 = vst [vmem:[#allocation2 + $0x189] sm:$0xff] %v443_v45  ;;  %v5619_v52 = vpack.c.bf16 %v442_v29, %v442_v29  ;;  %v5620_v53 = vpack.c.bf16 %v443_v45, %v443_v45  ;;  %v5656_v59 = vpack.c.bf16 %v1687_v57, %v1687_v57  ;;  %v1689_v61 = vld [vmem:[#allocation2 + $0x68] sm:$0xff]  ;;  %v6656_v62 = vld [vmem:[#allocation3 + $0xe8] ss:$36 sps:$4 sm:$0xff]  }
  0xa5   : > { %v6657_v63 = vld [vmem:[#allocation3 + $0x320] ss:$36 sps:$4 sm:$0xff]   ;;  %1846 = vst [vmem:[#allocation3 + $0x60] sm:$0xf] %v5655_v58  ;;  %v5657_v0 = vpack.c.bf16 %v1688_v60, %v1688_v60  ;;  %v5658_v1 = vpack.c.bf16 %v1689_v61, %v1689_v61  ;;  %v1321_v5 = vld [vmem:[#allocation2 + $0x121] sm:$0xff]  ;;  %v1690_v10 = vld [vmem:[#allocation2 + $0x78] sm:$0xff] }
  0xa6   : > { %6434 = vmatpush3.bf16.msra.mxu0 %v6679_v41  ;;  %1489 = vst [vmem:[#allocation3 + $0x448] sm:$0xf] %v5619_v52  ;;  %1490 = vst [vmem:[#allocation3 + $0x46c] sm:$0xf] %v5620_v53  ;;  %v6706_v2 = vld [vmem:[%s7625_s1 + $0x210] sm:$0xff]   ;;  %v5611_v9 = vpack.c.bf16 %v1321_v5, %v1321_v5  ;;  %v5659_v14 = vpack.c.bf16 %v1690_v10, %v1690_v10  ;;  %v1691_v15 = vld [vmem:[#allocation2 + $0x80] sm:$0xff] }
  0xa7   : > { %6435 = vmatprep.subr.bf16.mxu0 %v6694_v36  ;;  %1847 = vst [vmem:[#allocation3 + $0x84] sm:$0xf] %v5656_v59  ;;  %1848 = vst [vmem:[#allocation3 + $0xa8] sm:$0xf] %v5657_v0  ;;  %v1322_v8 = vld [vmem:[#allocation2 + $0x129] sm:$0xff]  ;;  %v1323_v16 = vld [vmem:[#allocation2 + $0x139] sm:$0xff]  ;;  %v5660_v19 = vpack.c.bf16 %v1691_v15, %v1691_v15 }
  0xa8   : > { %1849 = vst [vmem:[#allocation3 + $0xcc] sm:$0xf] %v5658_v1  ;;  %v6658_v11 = vld [vmem:[#allocation3 + $0x134] ss:$36 sps:$4 sm:$0xff]   ;;  %v6660_v12 = vld [vmem:[#allocation3 + $0x36c] ss:$36 sps:$4 sm:$0xff]   ;;  %v5612_v13 = vpack.c.bf16 %v1322_v8, %v1322_v8  ;;  %v5613_v20 = vpack.c.bf16 %v1323_v16, %v1323_v16 }
  0xa9   : > { %4103 = vmatmul.mubr.bf16.gmra.mxu0 %v6647_v44  ;;  %1481 = vst [vmem:[#allocation3 + $0x328] sm:$0xf] %v5611_v9  ;;  %v1324_v18 = vld [vmem:[#allocation2 + $0x141] sm:$0xff]  ;;  %2056 = vst [vmem:[#allocation3 + $0x2ec] sm:$0xf] %v5611_v9  ;;  %v1692_v23 = vld [vmem:[#allocation2 + $0x90] sm:$0xff] }
  0xaa   : > { %4110 = vmatprep.mubr.bf16.mxu0 %v6652_v54  ;;  %6436 = vmatpush3.bf16.msra.mxu0 %v6694_v36  ;;  %1482 = vst [vmem:[#allocation3 + $0x34c] sm:$0xf] %v5612_v13  ;;  %1850 = vst [vmem:[#allocation3 + $0xf0] sm:$0xf] %v5659_v14  ;;  %v5614_v21 = vpack.c.bf16 %v1324_v18, %v1324_v18  ;;  %v1693_v17 = vld [vmem:[#allocation2 + $0x98] sm:$0xff]  ;;  %v5661_v24 = vpack.c.bf16 %v1692_v23, %v1692_v23  ;;  %v6719_v26 = vld [vmem:[%s7625_s1 + $0x208] sm:$0xff]  }
  0xab   : > { %4006 = vmatmul.mubr.bf16.gmra.mxu1 %v6650_v47  ;;  %v1137_v3 = vld [vmem:[#allocation2 + $0x180] sm:$0xff]  ;;  %v1138_v4 = vld [vmem:[#allocation2 + $0x188] sm:$0xff]  ;;  %6437 = vmatprep.subr.bf16.mxu0 %v6706_v2  ;;  %2057 = vst [vmem:[#allocation3 + $0x310] sm:$0xf] %v5612_v13  ;;  %v5662_v25 = vpack.c.bf16 %v1693_v17, %v1693_v17  ;;  %v1325_v27 = vld [vmem:[#allocation2 + $0x151] sm:$0xff] }
  0xac   : > { %4013 = vmatprep.mubr.bf16.mxu1 %v6654_v55  ;;  %v5587_v6 = vpack.c.bf16 %v1137_v3, %v1137_v3  ;;  %v5588_v7 = vpack.c.bf16 %v1138_v4, %v1138_v4  ;;  %1851 = vst [vmem:[#allocation3 + $0x114] sm:$0xf] %v5660_v19  ;;  %1483 = vst [vmem:[#allocation3 + $0x370] sm:$0xf] %v5613_v20  ;;  %v5615_v28 = vpack.c.bf16 %v1325_v27, %v1325_v27  ;;  %v6662_v30 = vld [vmem:[#allocation3 + $0x130] ss:$36 sps:$4 sm:$0xff]  }
  0xad   : > { %1484 = vst [vmem:[#allocation3 + $0x394] sm:$0xf] %v5614_v21  ;;  %2058 = vst [vmem:[#allocation3 + $0x334] sm:$0xf] %v5613_v20  ;;  %v1326_v50 = vld [vmem:[#allocation2 + $0x159] sm:$0xff]  ;;  %v1694_v31 = vld [vmem:[#allocation2 + $0xa8] sm:$0xff] }
  0xae   : > { %1297 = vst [vmem:[#allocation3 + $0x444] sm:$0xf] %v5587_v6  ;;  %1298 = vst [vmem:[#allocation3 + $0x468] sm:$0xf] %v5588_v7  ;;  %6438 = vmatpush3.bf16.msra.mxu0 %v6706_v2  ;;  %v6665_v22 = vld [vmem:[#allocation3 + $0x368] ss:$36 sps:$4 sm:$0xff]   ;;  %v5616_v32 = vpack.c.bf16 %v1326_v50, %v1326_v50  ;;  %v5663_v33 = vpack.c.bf16 %v1694_v31, %v1694_v31 }
  0xaf   : > { %2059 = vst [vmem:[#allocation3 + $0x358] sm:$0xf] %v5614_v21  ;;  %1852 = vst [vmem:[#allocation3 + $0x138] sm:$0xf] %v5661_v24  ;;  %6439 = vmatprep.subr.bf16.mxu0 %v6719_v26  ;;  %v6667_v34 = vld [vmem:[#allocation3 + $0x17c] ss:$36 sps:$4 sm:$0xff]  }
  0xb0   : > { %1853 = vst [vmem:[#allocation3 + $0x15c] sm:$0xf] %v5662_v25  ;;  %1485 = vst [vmem:[#allocation3 + $0x3b8] sm:$0xf] %v5615_v28  ;;  %v1695_v35 = vld [vmem:[#allocation2 + $0xb0] sm:$0xff]  ;;  %v1696_v45 = vld [vmem:[#allocation2 + $0xc0] sm:$0xff] }
  0xb1   : > { %4111 = vmatmul.mubr.bf16.gmra.mxu0 %v6656_v62  ;;  %2060 = vst [vmem:[#allocation3 + $0x37c] sm:$0xf] %v5615_v28  ;;  %v1327_v37 = vld [vmem:[#allocation2 + $0x169] sm:$0xff]  ;;  %1486 = vst [vmem:[#allocation3 + $0x3dc] sm:$0xf] %v5616_v32  ;;  %v5664_v39 = vpack.c.bf16 %v1695_v35, %v1695_v35  ;;  %v1328_v29 = vld [vmem:[#allocation2 + $0x171] sm:$0xff]  ;;  %v5665_v47 = vpack.c.bf16 %v1696_v45, %v1696_v45 }
  0xb2   : > { %4118 = vmatprep.mubr.bf16.mxu0 %v6658_v11  ;;  %6440 = vmatpush3.bf16.msra.mxu0 %v6719_v26  ;;  %v6669_v38 = vld [vmem:[#allocation3 + $0x3b4] ss:$36 sps:$4 sm:$0xff]   ;;  %1854 = vst [vmem:[#allocation3 + $0x180] sm:$0xf] %v5663_v33  ;;  %v5617_v40 = vpack.c.bf16 %v1327_v37, %v1327_v37  ;;  %2061 = vst [vmem:[#allocation3 + $0x3a0] sm:$0xf] %v5616_v32  ;;  %v5618_v46 = vpack.c.bf16 %v1328_v29, %v1328_v29 }
  0xb3   : > { %4014 = vmatmul.mubr.bf16.gmra.mxu1 %v6657_v63  ;;  %1855 = vst [vmem:[#allocation3 + $0x1a4] sm:$0xf] %v5664_v39  ;;  %v6671_v41 = vld [vmem:[#allocation3 + $0x178] ss:$36 sps:$4 sm:$0xff]   ;;  %v6672_v42 = vld [vmem:[#allocation3 + $0x3b0] ss:$36 sps:$4 sm:$0xff]  }
  0xb4   : > { %4021 = vmatprep.mubr.bf16.mxu1 %v6660_v12  ;;  %1487 = vst [vmem:[#allocation3 + $0x400] sm:$0xf] %v5617_v40  ;;  %2062 = vst [vmem:[#allocation3 + $0x3c4] sm:$0xf] %v5617_v40  ;;  %v6673_v43 = vld [vmem:[#allocation3 + $0x1c4] ss:$36 sps:$4 sm:$0xff]  }
  0xb5   : > { %v6675_v44 = vld [vmem:[#allocation3 + $0x3fc] ss:$36 sps:$4 sm:$0xff]   ;;  %1488 = vst [vmem:[#allocation3 + $0x424] sm:$0xf] %v5618_v46  ;;  %1856 = vst [vmem:[#allocation3 + $0x1c8] sm:$0xf] %v5665_v47 }
  0xb6   : > { %v1697_v48 = vld [vmem:[#allocation2 + $0xc8] sm:$0xff]  ;;  %v6732_v51 = vld [vmem:[%s7625_s1 + $0x200] sm:$0xff]   ;;  %2063 = vst [vmem:[#allocation3 + $0x3e8] sm:$0xf] %v5618_v46  ;;  %v1698_v54 = vld [vmem:[#allocation2 + $0xd8] sm:$0xff] }
  0xb7   : > { %v5666_v49 = vpack.c.bf16 %v1697_v48, %v1697_v48  ;;  %v1521_v36 = vld [vmem:[#allocation2 + $0x182] sm:$0xff]  ;;  %v1522_v52 = vld [vmem:[#allocation2 + $0x18a] sm:$0xff]  ;;  %6441 = vmatprep.subr.bf16.mxu0 %v6732_v51  ;;  %v5667_v59 = vpack.c.bf16 %v1698_v54, %v1698_v54  ;;  %v1890_v61 = vld [vmem:[#allocation2 + $0xd9] sm:$0xff] }
  0xb8   : > { %v5651_v53 = vpack.c.bf16 %v1521_v36, %v1521_v36  ;;  %v1699_v55 = vld [vmem:[#allocation2 + $0xe0] sm:$0xff]  ;;  %v6677_v56 = vld [vmem:[#allocation3 + $0x1c0] ss:$36 sps:$4 sm:$0xff]   ;;  %v6680_v57 = vld [vmem:[#allocation3 + $0x3f8] ss:$36 sps:$4 sm:$0xff]   ;;  %v5652_v58 = vpack.c.bf16 %v1522_v52, %v1522_v52  ;;  %6442 = vmatpush3.bf16.msra.mxu0 %v6732_v51  ;;  %v5699_v2 = vpack.c.bf16 %v1890_v61, %v1890_v61 }
  0xb9   : > { %4119 = vmatmul.mubr.bf16.gmra.mxu0 %v6662_v30  ;;  %1857 = vst [vmem:[#allocation3 + $0x1ec] sm:$0xf] %v5666_v49  ;;  %v5668_v60 = vpack.c.bf16 %v1699_v55, %v1699_v55  ;;  %v1891_v62 = vld [vmem:[#allocation2 + $0xe1] sm:$0xff]  ;;  %v2068_v63 = vld [vmem:[#allocation2 + $0x32] sm:$0xff]  ;;  %1858 = vst [vmem:[#allocation3 + $0x210] sm:$0xf] %v5667_v59 }
  0xba   : > { %4126 = vmatprep.mubr.bf16.mxu0 %v6667_v34  ;;  %v6682_v0 = vld [vmem:[#allocation3 + $0x20c] ss:$36 sps:$4 sm:$0xff]   ;;  %v6684_v1 = vld [vmem:[#allocation3 + $0x444] ss:$36 sps:$4 sm:$0xff]   ;;  %1681 = vst [vmem:[#allocation3 + $0x44c] sm:$0xf] %v5651_v53  ;;  %v5700_v3 = vpack.c.bf16 %v1891_v62, %v1891_v62  ;;  %v5717_v5 = vpack.c.bf16 %v2068_v63, %v2068_v63 }
  0xbb   : > { %4022 = vmatmul.mubr.bf16.gmra.mxu1 %v6665_v22  ;;  %v2069_v4 = vld [vmem:[#allocation2 + $0x3a] sm:$0xff]  ;;  %v1700_v6 = vld [vmem:[#allocation2 + $0xf0] sm:$0xff]  ;;  %2256 = vst [vmem:[#allocation3 + $0x410] sm:$0xf] %v5651_v53  ;;  %1682 = vst [vmem:[#allocation3 + $0x470] sm:$0xf] %v5652_v58 }
  0xbc   : > { %4029 = vmatprep.mubr.bf16.mxu1 %v6669_v38  ;;  %v1701_v7 = vld [vmem:[#allocation2 + $0xf8] sm:$0xff]  ;;  %1859 = vst [vmem:[#allocation3 + $0x234] sm:$0xf] %v5668_v60  ;;  %v5718_v8 = vpack.c.bf16 %v2069_v4, %v2069_v4  ;;  %v5669_v9 = vpack.c.bf16 %v1700_v6, %v1700_v6  ;;  %v2070_v13 = vld [vmem:[#allocation2 + $0x4a] sm:$0xff]  ;;  %2257 = vst [vmem:[#allocation3 + $0x434] sm:$0xf] %v5652_v58 }
  0xbd   : > { %v5670_v10 = vpack.c.bf16 %v1701_v7, %v1701_v7  ;;  %v1892_v11 = vld [vmem:[#allocation2 + $0xf1] sm:$0xff]  ;;  %v1893_v12 = vld [vmem:[#allocation2 + $0xf9] sm:$0xff]  ;;  %2050 = vst [vmem:[#allocation3 + $0x214] sm:$0xf] %v5699_v2  ;;  %2051 = vst [vmem:[#allocation3 + $0x238] sm:$0xf] %v5700_v3  ;;  %v5719_v18 = vpack.c.bf16 %v2070_v13, %v2070_v13 }
  0xbe   : > { %2228 = vst [vmem:[#allocation3 + $0x20] sm:$0xf] %v5717_v5  ;;  %v5701_v14 = vpack.c.bf16 %v1892_v11, %v1892_v11  ;;  %v5702_v15 = vpack.c.bf16 %v1893_v12, %v1893_v12  ;;  %v2071_v16 = vld [vmem:[#allocation2 + $0x52] sm:$0xff]  ;;  %v2072_v19 = vld [vmem:[#allocation2 + $0x62] sm:$0xff]  ;;  %v2073_v20 = vld [vmem:[#allocation2 + $0x6a] sm:$0xff] }
  0xbf   : > { %v6782_v21 = vld [vmem:[#allocation2] sm:$0xff]  ;;  %2229 = vst [vmem:[#allocation3 + $0x44] sm:$0xf] %v5718_v8  ;;  %1860 = vst [vmem:[#allocation3 + $0x258] sm:$0xf] %v5669_v9  ;;  %v5720_v17 = vpack.c.bf16 %v2071_v16, %v2071_v16  ;;  %v5721_v24 = vpack.c.bf16 %v2072_v19, %v2072_v19  ;;  %v5722_v25 = vpack.c.bf16 %v2073_v20, %v2073_v20  ;;  %v1702_v26 = vld [vmem:[#allocation2 + $0x108] sm:$0xff] }
  0xc0   : > { %v5683_v23 = vpack.c.bf16 %v6782_v21, %v6782_v21  ;;  %1861 = vst [vmem:[#allocation3 + $0x27c] sm:$0xf] %v5670_v10  ;;  %v1703_v27 = vld [vmem:[#allocation2 + $0x110] sm:$0xff]  ;;  %2052 = vst [vmem:[#allocation3 + $0x25c] sm:$0xf] %v5701_v14  ;;  %v5671_v30 = vpack.c.bf16 %v1702_v26, %v1702_v26  ;;  %v2074_v32 = vld [vmem:[#allocation2 + $0x7a] sm:$0xff] }
  0xc1   : > { %4127 = vmatmul.mubr.bf16.gmra.mxu0 %v6671_v41  ;;  %v1894_v28 = vld [vmem:[#allocation2 + $0x109] sm:$0xff]  ;;  %2053 = vst [vmem:[#allocation3 + $0x280] sm:$0xf] %v5702_v15  ;;  %2230 = vst [vmem:[#allocation3 + $0x68] sm:$0xf] %v5719_v18  ;;  %v5672_v50 = vpack.c.bf16 %v1703_v27, %v1703_v27  ;;  %v1895_v22 = vld [vmem:[#allocation2 + $0x111] sm:$0xff]  ;;  %v5723_v34 = vpack.c.bf16 %v2074_v32, %v2074_v32 }
  0xc2   : > { %4134 = vmatprep.mubr.bf16.mxu0 %v6673_v43  ;;  %v5703_v31 = vpack.c.bf16 %v1894_v28, %v1894_v28  ;;  %1874 = vst [vmem:[#allocation3 + $0x450] sm:$0xf] %v5683_v23  ;;  %1875 = vst [vmem:[#allocation3 + $0x474] sm:$0xf] %v5683_v23  ;;  %v5704_v33 = vpack.c.bf16 %v1895_v22, %v1895_v22  ;;  %v2075_v35 = vld [vmem:[#allocation2 + $0x82] sm:$0xff]  ;;  %v2076_v37 = vld [vmem:[#allocation2 + $0x92] sm:$0xff] }
  0xc3   : > { %4030 = vmatmul.mubr.bf16.gmra.mxu1 %v6672_v42  ;;  %2231 = vst [vmem:[#allocation3 + $0x8c] sm:$0xf] %v5720_v17  ;;  %2232 = vst [vmem:[#allocation3 + $0xb0] sm:$0xf] %v5721_v24  ;;  %v6686_v38 = vld [vmem:[#allocation3 + $0x208] ss:$36 sps:$4 sm:$0xff]   ;;  %v5724_v40 = vpack.c.bf16 %v2075_v35, %v2075_v35  ;;  %v5725_v41 = vpack.c.bf16 %v2076_v37, %v2076_v37 }
  0xc4   : > { %4037 = vmatprep.mubr.bf16.mxu1 %v6675_v44  ;;  %2233 = vst [vmem:[#allocation3 + $0xd4] sm:$0xf] %v5722_v25  ;;  %1862 = vst [vmem:[#allocation3 + $0x2a0] sm:$0xf] %v5671_v30  ;;  %v6688_v39 = vld [vmem:[#allocation3 + $0x254] ss:$36 sps:$4 sm:$0xff]  }
  0xc5   : > { %1863 = vst [vmem:[#allocation3 + $0x2c4] sm:$0xf] %v5672_v50  ;;  %2054 = vst [vmem:[#allocation3 + $0x2a4] sm:$0xf] %v5703_v31  ;;  %v6687_v42 = vld [vmem:[#allocation3 + $0x440] ss:$36 sps:$4 sm:$0xff]  }
  0xc6   : > { %2055 = vst [vmem:[#allocation3 + $0x2c8] sm:$0xf] %v5704_v33  ;;  %2234 = vst [vmem:[#allocation3 + $0xf8] sm:$0xf] %v5723_v34  ;;  %v6693_v43 = vld [vmem:[#allocation3 + $0x1c] ss:$36 sps:$4 sm:$0xff]  }
  0xc7   : > { %2235 = vst [vmem:[#allocation3 + $0x11c] sm:$0xf] %v5724_v40  ;;  %2236 = vst [vmem:[#allocation3 + $0x140] sm:$0xf] %v5725_v41  ;;  %v6690_v44 = vld [vmem:[#allocation3 + $0x250] ss:$36 sps:$4 sm:$0xff]  }
  0xc8   : > { %v6691_v29 = vld [vmem:[#allocation3 + $0x18] ss:$36 sps:$4 sm:$0xff]   ;;  %v2077_v46 = vld [vmem:[#allocation2 + $0x9a] sm:$0xff]  ;;  %v2079_v53 = vld [vmem:[#allocation2 + $0xb2] sm:$0xff] }
  0xc9   : > { %4135 = vmatmul.mubr.bf16.gmra.mxu0 %v6677_v56  ;;  %v6695_v45 = vld [vmem:[#allocation3 + $0x29c] ss:$36 sps:$4 sm:$0xff]   ;;  %v1704_v47 = vld [vmem:[#allocation2 + $0x120] sm:$0xff]  ;;  %v6698_v48 = vld [vmem:[#allocation3 + $0x64] ss:$36 sps:$4 sm:$0xff]   ;;  %v5726_v49 = vpack.c.bf16 %v2077_v46, %v2077_v46  ;;  %v5728_v56 = vpack.c.bf16 %v2079_v53, %v2079_v53 }
  0xca   : > { %4142 = vmatprep.mubr.bf16.mxu0 %v6682_v0  ;;  %v5673_v51 = vpack.c.bf16 %v1704_v47, %v1704_v47  ;;  %v1705_v36 = vld [vmem:[#allocation2 + $0x128] sm:$0xff]  ;;  %v1706_v59 = vld [vmem:[#allocation2 + $0x138] sm:$0xff]  ;;  %v1707_v62 = vld [vmem:[#allocation2 + $0x140] sm:$0xff] }
  0xcb   : > { %4038 = vmatmul.mubr.bf16.gmra.mxu1 %v6680_v57  ;;  %v2078_v52 = vld [vmem:[#allocation2 + $0xaa] sm:$0xff]  ;;  %2237 = vst [vmem:[#allocation3 + $0x164] sm:$0xf] %v5726_v49  ;;  %v5674_v54 = vpack.c.bf16 %v1705_v36, %v1705_v36  ;;  %v2080_v57 = vld [vmem:[#allocation2 + $0xc2] sm:$0xff]  ;;  %v5675_v63 = vpack.c.bf16 %v1706_v59, %v1706_v59  ;;  %v2082_v0 = vld [vmem:[#allocation2 + $0xda] sm:$0xff]  ;;  %v5676_v2 = vpack.c.bf16 %v1707_v62, %v1707_v62 }
  0xcc   : > { %4045 = vmatprep.mubr.bf16.mxu1 %v6684_v1  ;;  %1864 = vst [vmem:[#allocation3 + $0x2e8] sm:$0xf] %v5673_v51  ;;  %v5727_v55 = vpack.c.bf16 %v2078_v52, %v2078_v52  ;;  %v2081_v58 = vld [vmem:[#allocation2 + $0xca] sm:$0xff]  ;;  %v5729_v60 = vpack.c.bf16 %v2080_v57, %v2080_v57  ;;  %v2083_v1 = vld [vmem:[#allocation2 + $0xe2] sm:$0xff]  ;;  %2239 = vst [vmem:[#allocation3 + $0x1ac] sm:$0xf] %v5728_v56  ;;  %v5731_v3 = vpack.c.bf16 %v2082_v0, %v2082_v0 }
  0xcd   : > { %v5730_v61 = vpack.c.bf16 %v2081_v58, %v2081_v58  ;;  %1865 = vst [vmem:[#allocation3 + $0x30c] sm:$0xf] %v5674_v54  ;;  %v5732_v4 = vpack.c.bf16 %v2083_v1, %v2083_v1  ;;  %v2084_v5 = vld [vmem:[#allocation2 + $0xf2] sm:$0xff]  ;;  %v2085_v6 = vld [vmem:[#allocation2 + $0xfa] sm:$0xff]  ;;  %1866 = vst [vmem:[#allocation3 + $0x330] sm:$0xf] %v5675_v63 }
  0xce   : > { %2238 = vst [vmem:[#allocation3 + $0x188] sm:$0xf] %v5727_v55  ;;  %v1708_v7 = vld [vmem:[#allocation2 + $0x150] sm:$0xff]  ;;  %2240 = vst [vmem:[#allocation3 + $0x1d0] sm:$0xf] %v5729_v60  ;;  %v5733_v8 = vpack.c.bf16 %v2084_v5, %v2084_v5  ;;  %v5734_v9 = vpack.c.bf16 %v2085_v6, %v2085_v6  ;;  %v1709_v10 = vld [vmem:[#allocation2 + $0x158] sm:$0xff] }
  0xcf   : > { %2241 = vst [vmem:[#allocation3 + $0x1f4] sm:$0xf] %v5730_v61  ;;  %v5677_v11 = vpack.c.bf16 %v1708_v7, %v1708_v7  ;;  %v2086_v12 = vld [vmem:[#allocation2 + $0x10a] sm:$0xff]  ;;  %v2087_v13 = vld [vmem:[#allocation2 + $0x112] sm:$0xff]  ;;  %1867 = vst [vmem:[#allocation3 + $0x354] sm:$0xf] %v5676_v2  ;;  %v5678_v16 = vpack.c.bf16 %v1709_v10, %v1709_v10 }
  0xd0   : > { %v6697_v14 = vld [vmem:[#allocation3 + $0x298] ss:$36 sps:$4 sm:$0xff]   ;;  %v6700_v15 = vld [vmem:[#allocation3 + $0x60] ss:$36 sps:$4 sm:$0xff]   ;;  %2242 = vst [vmem:[#allocation3 + $0x218] sm:$0xf] %v5731_v3  ;;  %v5735_v18 = vpack.c.bf16 %v2086_v12, %v2086_v12  ;;  %v5736_v19 = vpack.c.bf16 %v2087_v13, %v2087_v13 }
  0xd1   : > { %4143 = vmatmul.mubr.bf16.gmra.mxu0 %v6686_v38  ;;  %2243 = vst [vmem:[#allocation3 + $0x23c] sm:$0xf] %v5732_v4  ;;  %v2088_v20 = vld [vmem:[#allocation2 + $0x122] sm:$0xff]  ;;  %v2089_v21 = vld [vmem:[#allocation2 + $0x12a] sm:$0xff]  ;;  %v6701_v17 = vld [vmem:[#allocation3 + $0x2e4] ss:$36 sps:$4 sm:$0xff]  }
  0xd2   : > { %4150 = vmatprep.mubr.bf16.mxu0 %v6688_v39  ;;  %v1710_v23 = vld [vmem:[#allocation2 + $0x168] sm:$0xff]  ;;  %2244 = vst [vmem:[#allocation3 + $0x260] sm:$0xf] %v5733_v8  ;;  %2245 = vst [vmem:[#allocation3 + $0x284] sm:$0xf] %v5734_v9  ;;  %v5737_v24 = vpack.c.bf16 %v2088_v20, %v2088_v20  ;;  %v5738_v25 = vpack.c.bf16 %v2089_v21, %v2089_v21  ;;  %v1711_v26 = vld [vmem:[#allocation2 + $0x170] sm:$0xff] }
  0xd3   : > { %4046 = vmatmul.mubr.bf16.gmra.mxu1 %v6687_v42  ;;  %1868 = vst [vmem:[#allocation3 + $0x378] sm:$0xf] %v5677_v11  ;;  %v5679_v27 = vpack.c.bf16 %v1710_v23, %v1710_v23  ;;  %v2090_v28 = vld [vmem:[#allocation2 + $0x13a] sm:$0xff]  ;;  %v2091_v30 = vld [vmem:[#allocation2 + $0x142] sm:$0xff]  ;;  %1869 = vst [vmem:[#allocation3 + $0x39c] sm:$0xf] %v5678_v16  ;;  %v5680_v50 = vpack.c.bf16 %v1711_v26, %v1711_v26 }
  0xd4   : > { %4247 = vmatprep.mubr.bf16.mxu1 %v6693_v43  ;;  %2246 = vst [vmem:[#allocation3 + $0x2a8] sm:$0xf] %v5735_v18  ;;  %2247 = vst [vmem:[#allocation3 + $0x2cc] sm:$0xf] %v5736_v19  ;;  %v5739_v31 = vpack.c.bf16 %v2090_v28, %v2090_v28  ;;  %v5740_v22 = vpack.c.bf16 %v2091_v30, %v2091_v30  ;;  %v2092_v32 = vld [vmem:[#allocation2 + $0x152] sm:$0xff]  ;;  %v2093_v33 = vld [vmem:[#allocation2 + $0x15a] sm:$0xff] }
  0xd5   : > { %v1712_v34 = vld [vmem:[#allocation2 + $0x180] sm:$0xff]  ;;  %2248 = vst [vmem:[#allocation3 + $0x2f0] sm:$0xf] %v5737_v24  ;;  %2249 = vst [vmem:[#allocation3 + $0x314] sm:$0xf] %v5738_v25  ;;  %v5741_v37 = vpack.c.bf16 %v2092_v32, %v2092_v32  ;;  %v5742_v38 = vpack.c.bf16 %v2093_v33, %v2093_v33  ;;  %v1713_v40 = vld [vmem:[#allocation2 + $0x188] sm:$0xff] }
  0xd6   : > { %v6704_v35 = vld [vmem:[#allocation3 + $0xac] ss:$36 sps:$4 sm:$0xff]   ;;  %1870 = vst [vmem:[#allocation3 + $0x3c0] sm:$0xf] %v5679_v27  ;;  %v5681_v39 = vpack.c.bf16 %v1712_v34, %v1712_v34  ;;  %1871 = vst [vmem:[#allocation3 + $0x3e4] sm:$0xf] %v5680_v50  ;;  %v5682_v43 = vpack.c.bf16 %v1713_v40, %v1713_v40 }
  0xd7   : > { %2250 = vst [vmem:[#allocation3 + $0x338] sm:$0xf] %v5739_v31  ;;  %2251 = vst [vmem:[#allocation3 + $0x35c] sm:$0xf] %v5740_v22  ;;  %v1904_v41 = vld [vmem:[#allocation2 + $0x181] sm:$0xff]  ;;  %v1905_v42 = vld [vmem:[#allocation2 + $0x189] sm:$0xff] }
  0xd8   : > { %2252 = vst [vmem:[#allocation3 + $0x380] sm:$0xf] %v5741_v37  ;;  %2253 = vst [vmem:[#allocation3 + $0x3a4] sm:$0xf] %v5742_v38  ;;  %v6707_v46 = vld [vmem:[#allocation3 + $0xa8] ss:$36 sps:$4 sm:$0xff]  }
  0xd9   : > { %4151 = vmatmul.mubr.bf16.gmra.mxu0 %v6690_v44  ;;  %1872 = vst [vmem:[#allocation3 + $0x408] sm:$0xf] %v5681_v39  ;;  %v5713_v44 = vpack.c.bf16 %v1904_v41, %v1904_v41  ;;  %1873 = vst [vmem:[#allocation3 + $0x42c] sm:$0xf] %v5682_v43  ;;  %v6708_v47 = vld [vmem:[#allocation3 + $0x32c] ss:$36 sps:$4 sm:$0xff]  }
  0xda   : > { %4158 = vmatprep.mubr.bf16.mxu0 %v6695_v45  ;;  %v6703_v45 = vld [vmem:[#allocation3 + $0x2e0] ss:$36 sps:$4 sm:$0xff]   ;;  %v6710_v51 = vld [vmem:[#allocation3 + $0x328] ss:$36 sps:$4 sm:$0xff]   ;;  %v6713_v36 = vld [vmem:[#allocation3 + $0xf0] ss:$36 sps:$4 sm:$0xff]  }
  0xdb   : > { %4248 = vmatmul.mubr.bf16.vlgmr.msra.gmra.mxu1 %v6691_v29  ;;  %v5714_v29 = vpack.c.bf16 %v1905_v42, %v1905_v42  ;;  %2064 = vst [vmem:[#allocation3 + $0x40c] sm:$0xf] %v5713_v44  ;;  %v6714_v53 = vld [vmem:[#allocation3 + $0x374] ss:$36 sps:$4 sm:$0xff]   ;;  %v6717_v55 = vld [vmem:[#allocation3 + $0x13c] ss:$36 sps:$4 sm:$0xff]  }
  0xdc   : > { %4255 = vmatprep.mubr.bf16.mxu1 %v6698_v48  ;;  %v6711_v48 = vld [vmem:[#allocation3 + $0xf4] ss:$36 sps:$4 sm:$0xff]   ;;  %v2095_v58 = vld [vmem:[#allocation2 + $0x172] sm:$0xff]  ;;  %v2098_v0 = vld [vmem:[#allocation2 + $0x19a] sm:$0xff] }
  0xdd   : > { %2065 = vst [vmem:[#allocation3 + $0x430] sm:$0xf] %v5714_v29  ;;  %v2094_v57 = vld [vmem:[#allocation2 + $0x16a] sm:$0xff]  ;;  %v5744_v60 = vpack.c.bf16 %v2095_v58, %v2095_v58  ;;  %v1906_v62 = vld [vmem:[#allocation2 + $0x199] sm:$0xff]  ;;  %v1907_v63 = vld [vmem:[#allocation2 + $0x1a1] sm:$0xff]  ;;  %v5747_v5 = vpack.c.bf16 %v2098_v0, %v2098_v0 }
  0xde   : > { %v5743_v59 = vpack.c.bf16 %v2094_v57, %v2094_v57  ;;  %v5715_v2 = vpack.c.bf16 %v1906_v62, %v1906_v62  ;;  %v5716_v3 = vpack.c.bf16 %v1907_v63, %v1907_v63  ;;  %v2099_v4 = vld [vmem:[#allocation2 + $0x1a2] sm:$0xff]  ;;  %v6721_v9 = vld [vmem:[#allocation3 + $0x3bc] ss:$36 sps:$4 sm:$0xff]   ;;  %v6724_v10 = vld [vmem:[#allocation3 + $0x184] ss:$36 sps:$4 sm:$0xff]  }
  0xdf   : > { %2255 = vst [vmem:[#allocation3 + $0x3ec] sm:$0xf] %v5744_v60  ;;  %v5748_v6 = vpack.c.bf16 %v2099_v4, %v2099_v4  ;;  %2258 = vst [vmem:[#allocation3 + $0x458] sm:$0xf] %v5747_v5  ;;  %v6716_v7 = vld [vmem:[#allocation3 + $0x370] ss:$36 sps:$4 sm:$0xff]  }
  0xe0   : > { %2254 = vst [vmem:[#allocation3 + $0x3c8] sm:$0xf] %v5743_v59  ;;  %2066 = vst [vmem:[#allocation3 + $0x454] sm:$0xf] %v5715_v2  ;;  %v6720_v8 = vld [vmem:[#allocation3 + $0x138] ss:$36 sps:$4 sm:$0xff]  }
  0xe1   : > { %4159 = vmatmul.mubr.bf16.gmra.mxu0 %v6697_v14  ;;  %2067 = vst [vmem:[#allocation3 + $0x478] sm:$0xf] %v5716_v3  ;;  %2259 = vst [vmem:[#allocation3 + $0x47c] sm:$0xf] %v5748_v6  ;;  %v6723_v18 = vld [vmem:[#allocation3 + $0x3b8] ss:$36 sps:$4 sm:$0xff]  }
  0xe2   : > { %4166 = vmatprep.mubr.bf16.mxu0 %v6701_v17  ;;  %v6726_v19 = vld [vmem:[#allocation3 + $0x180] ss:$36 sps:$4 sm:$0xff]   ;;  %v6730_v17 = vld [vmem:[#allocation3 + $0x1cc] ss:$36 sps:$4 sm:$0xff]   ;;  %v6737_v38 = vld [vmem:[#allocation3 + $0x214] ss:$36 sps:$4 sm:$0xff]  }
  0xe3   : > { %4256 = vmatmul.mubr.bf16.gmra.mxu1 %v6700_v15  ;;  %v6727_v23 = vld [vmem:[#allocation3 + $0x404] ss:$36 sps:$4 sm:$0xff]   ;;  %v6734_v37 = vld [vmem:[#allocation3 + $0x44c] ss:$36 sps:$4 sm:$0xff]   ;;  %v6741_v2 = vld [vmem:[#allocation3 + $0x258] ss:$36 sps:$4 sm:$0xff]  }
  0xe4   : > { %4263 = vmatprep.mubr.bf16.mxu1 %v6704_v35  ;;  %v6729_v33 = vld [vmem:[#allocation3 + $0x400] ss:$36 sps:$4 sm:$0xff]   ;;  %v6733_v34 = vld [vmem:[#allocation3 + $0x1c8] ss:$36 sps:$4 sm:$0xff]   ;;  %v6745_v4 = vld [vmem:[#allocation3 + $0xb0] ss:$36 sps:$4 sm:$0xff]  }
  0xe5   : > { %v6744_v3 = vld [vmem:[#allocation3 + $0x68] ss:$36 sps:$4 sm:$0xff]  }
  0xe6   : > { %v6748_v5 = vld [vmem:[#allocation3 + $0x2a4] ss:$36 sps:$4 sm:$0xff]  }
  0xe9   : > { %4167 = vmatmul.mubr.bf16.gmra.mxu0 %v6703_v45 }
  0xea   : > { %4174 = vmatprep.mubr.bf16.mxu0 %v6708_v47 }
  0xeb   : > { %4264 = vmatmul.mubr.bf16.gmra.mxu1 %v6707_v46 }
  0xec   : > { %4271 = vmatprep.mubr.bf16.mxu1 %v6711_v48  ;;  %v6736_v48 = vld [vmem:[#allocation3 + $0x448] ss:$36 sps:$4 sm:$0xff]  }
  0xf1   : > { %v5971_v49 = vpop.f32.mrf.mxu0  ;;  %4175 = vmatmul.mubr.bf16.gmra.mxu0 %v6710_v51  ;;  %v6740_v51 = vld [vmem:[#allocation3 + $0x20] ss:$36 sps:$4 sm:$0xff]  }
  0xf2   : > { %4182 = vmatprep.mubr.bf16.mxu0 %v6714_v53 }
  0xf3   : > { %v5972_v52 = vpop.f32.mrf.mxu0  ;;  %4272 = vmatmul.mubr.bf16.gmra.mxu1 %v6713_v36  ;;  %v6743_v36 = vld [vmem:[#allocation3 + $0x25c] ss:$36 sps:$4 sm:$0xff]  }
  0xf4   : > { %v7170_v54 = vadd.f32 %v5972_v52, %v5971_v49  ;;  %4279 = vmatprep.mubr.bf16.mxu1 %v6717_v55  ;;  %v6739_v49 = vld [vmem:[#allocation3 + $0x210] ss:$36 sps:$4 sm:$0xff]  }
  0xf5   : > { %v5974_v56 = vpop.f32.mrf.mxu0 }
  0xf7   : > { %v5975_v61 = vpop.f32.mrf.mxu0 }
  0xf8   : > { %v7172_v1 = vadd.f32 %v5975_v61, %v5974_v56 }
  0xf9   : > { %4183 = vmatmul.mubr.bf16.gmra.mxu0 %v6716_v7 }
  0xfa   : > { %4190 = vmatprep.mubr.bf16.mxu0 %v6721_v9 }
  0xfb   : > { %v6043_v11 = vpop.f32.mrf.mxu1  ;;  %4280 = vmatmul.mubr.bf16.gmra.mxu1 %v6720_v8 }
  0xfc   : > { %4287 = vmatprep.mubr.bf16.mxu1 %v6724_v10 }
  0xfd   : > { %v6044_v12 = vpop.f32.mrf.mxu1  ;;  %v5977_v15 = vpop.f32.mrf.mxu0 }
  0xfe   : > { %v7174_v13 = vadd.f32 %v6044_v12, %v6043_v11 }
  0xff   : > { %v6046_v14 = vpop.f32.mrf.mxu1  ;;  %v5978_v21 = vpop.f32.mrf.mxu0 }
 0x100   : > { %v7178_v25 = vadd.f32 %v5978_v21, %v5977_v15  ;;  %v6749_v21 = vld [vmem:[#allocation3 + $0xf8] ss:$36 sps:$4 sm:$0xff]  }
 0x101   : > { %v6047_v16 = vpop.f32.mrf.mxu1  ;;  %v5980_v26 = vpop.f32.mrf.mxu0  ;;  %4191 = vmatmul.mubr.bf16.gmra.mxu0 %v6723_v18 }
 0x102   : > { %v7176_v20 = vadd.f32 %v6047_v16, %v6046_v14  ;;  %4198 = vmatprep.mubr.bf16.mxu0 %v6727_v23 }
 0x103   : > { %v6049_v24 = vpop.f32.mrf.mxu1  ;;  %4288 = vmatmul.mubr.bf16.gmra.mxu1 %v6726_v19  ;;  %v5981_v30 = vpop.f32.mrf.mxu0  ;;  %v6746_v19 = vld [vmem:[#allocation3 + $0x2a0] ss:$36 sps:$4 sm:$0xff]  }
 0x104   : > { %4295 = vmatprep.mubr.bf16.mxu1 %v6730_v17  ;;  %v7182_v31 = vadd.f32 %v5981_v30, %v5980_v26  ;;  %v6750_v17 = vld [vmem:[#allocation3 + $0x140] ss:$36 sps:$4 sm:$0xff]  }
 0x105   : > { %v6050_v27 = vpop.f32.mrf.mxu1  ;;  %v5983_v32 = vpop.f32.mrf.mxu0 }
 0x106   : > { %v7180_v28 = vadd.f32 %v6050_v27, %v6049_v24  ;;  %v6753_v24 = vld [vmem:[#allocation3 + $0x2ec] ss:$36 sps:$4 sm:$0xff]  }
 0x107   : > { %v6052_v50 = vpop.f32.mrf.mxu1  ;;  %v5984_v39 = vpop.f32.mrf.mxu0 }
 0x108   : > { %v7186_v40 = vadd.f32 %v5984_v39, %v5983_v32  ;;  %v6751_v39 = vld [vmem:[#allocation3 + $0x2e8] ss:$36 sps:$4 sm:$0xff]  }
 0x109   : > { %v6053_v22 = vpop.f32.mrf.mxu1  ;;  %4199 = vmatmul.mubr.bf16.gmra.mxu0 %v6729_v33  ;;  %v5986_v42 = vpop.f32.mrf.mxu0 }
 0x10a   : > { %v7184_v35 = vadd.f32 %v6053_v22, %v6052_v50  ;;  %4206 = vmatprep.mubr.bf16.mxu0 %v6734_v37 }
 0x10b   : > { %v6055_v41 = vpop.f32.mrf.mxu1  ;;  %4296 = vmatmul.mubr.bf16.gmra.mxu1 %v6733_v34  ;;  %v5987_v44 = vpop.f32.mrf.mxu0 }
 0x10c   : > { %4303 = vmatprep.mubr.bf16.mxu1 %v6737_v38  ;;  %v7190_v45 = vadd.f32 %v5987_v44, %v5986_v42  ;;  %v6758_v44 = vld [vmem:[#allocation3 + $0x334] ss:$36 sps:$4 sm:$0xff]  }
 0x10d   : > { %v6056_v43 = vpop.f32.mrf.mxu1  ;;  %v5989_v47 = vpop.f32.mrf.mxu0 }
 0x10e   : > { %v7188_v29 = vadd.f32 %v6056_v43, %v6055_v41  ;;  %v6754_v41 = vld [vmem:[#allocation3 + $0x188] ss:$36 sps:$4 sm:$0xff]   ;;  %v6755_v43 = vld [vmem:[#allocation3 + $0x1d0] ss:$36 sps:$4 sm:$0xff]  }
 0x10f   : > { %v6058_v46 = vpop.f32.mrf.mxu1  ;;  %v5990_v53 = vpop.f32.mrf.mxu0 }
 0x110   : > { %v7194_v56 = vadd.f32 %v5990_v53, %v5989_v47 }
 0x111   : > { %v6059_v52 = vpop.f32.mrf.mxu1  ;;  %4207 = vmatmul.mubr.bf16.gmra.mxu0 %v6736_v48  ;;  %v5992_v58 = vpop.f32.mrf.mxu0 }
 0x112   : > { %v7192_v55 = vadd.f32 %v6059_v52, %v6058_v46  ;;  %6443 = vmatprep.mubr.bf16.mxu0 %v6740_v51 }
 0x113   : > { %v6061_v57 = vpop.f32.mrf.mxu1  ;;  %4304 = vmatmul.mubr.bf16.gmra.mxu1 %v6739_v49  ;;  %v5993_v60 = vpop.f32.mrf.mxu0 }
 0x114   : > { %4311 = vmatprep.mubr.bf16.mxu1 %v6743_v36  ;;  %v7198_v62 = vadd.f32 %v5993_v60, %v5992_v58  ;;  %v6756_v60 = vld [vmem:[#allocation3 + $0x330] ss:$36 sps:$4 sm:$0xff]  }
 0x115   : > { %v6062_v59 = vpop.f32.mrf.mxu1  ;;  %v5995_v0 = vpop.f32.mrf.mxu0 }
 0x116   : > { %v7196_v61 = vadd.f32 %v6062_v59, %v6061_v57 }
 0x117   : > { %v6064_v63 = vpop.f32.mrf.mxu1  ;;  %v5996_v7 = vpop.f32.mrf.mxu0 }
 0x118   : > { %v7202_v9 = vadd.f32 %v5996_v7, %v5995_v0 }
 0x119   : > { %v6065_v6 = vpop.f32.mrf.mxu1  ;;  %6444 = vmatmul.mubr.bf16.vlgmr.msra.gmra.mxu0 %v6744_v3  ;;  %v5998_v11 = vpop.f32.mrf.mxu0  ;;  %v6763_v3 = vld [vmem:[#allocation3 + $0x37c] ss:$36 sps:$4 sm:$0xff]  }
 0x11a   : > { %v7200_v8 = vadd.f32 %v6065_v6, %v6064_v63  ;;  %6447 = vmatprep.mubr.bf16.mxu0 %v6745_v4  ;;  %v6759_v63 = vld [vmem:[#allocation3 + $0x218] ss:$36 sps:$4 sm:$0xff]  }
 0x11b   : > { %v6083_v10 = vpop.f32.mrf.mxu1  ;;  %4312 = vmatmul.mubr.bf16.gmra.mxu1 %v6741_v2  ;;  %v5999_v14 = vpop.f32.mrf.mxu0  ;;  %v6760_v2 = vld [vmem:[#allocation3 + $0x260] ss:$36 sps:$4 sm:$0xff]  }
 0x11c   : > { %4319 = vmatprep.mubr.bf16.mxu1 %v6748_v5  ;;  %v7204_v16 = vadd.f32 %v5999_v14, %v5998_v11 }
 0x11d   : > { %v6084_v12 = vpop.f32.mrf.mxu1 }
 0x11e   : > { %v6085_v15 = vadd.f32 %v6084_v12, %v6083_v10 }
 0x11f   : > { %v6086_v18 = vpop.f32.mrf.mxu1 }
 0x120   : > { %v7207_v23 = vadd.f32 %v6085_v15, %v7170_v54  ;;  %v6001_v30 = vpop.f32.mrf.mxu0 }
 0x121   : > { %v6087_v26 = vpop.f32.mrf.mxu1  ;;  %6448 = vmatmul.mubr.bf16.gmra.mxu0 %v6749_v21  ;;  %v6761_v21 = vld [vmem:[#allocation3 + $0x378] ss:$36 sps:$4 sm:$0xff]  }
 0x122   : > { %v6088_v27 = vadd.f32 %v6087_v26, %v6086_v18  ;;  %6451 = vmatprep.mubr.bf16.mxu0 %v6750_v17  ;;  %v6002_v32 = vpop.f32.mrf.mxu0  ;;  %v6764_v17 = vld [vmem:[#allocation3 + $0x2a8] ss:$36 sps:$4 sm:$0xff]   ;;  %v6765_v26 = vld [vmem:[#allocation3 + $0x2f0] ss:$36 sps:$4 sm:$0xff]  }
 0x123   : > { %v6089_v50 = vpop.f32.mrf.mxu1  ;;  %4320 = vmatmul.mubr.bf16.gmra.mxu1 %v6746_v19  ;;  %v7212_v34 = vadd.f32 %v6002_v32, %v6001_v30 }
 0x124   : > { %v7210_v22 = vadd.f32 %v6088_v27, %v7172_v1  ;;  %4327 = vmatprep.mubr.bf16.mxu1 %v6753_v24  ;;  %v6004_v54 = vpop.f32.mrf.mxu0  ;;  %v6768_v27 = vld [vmem:[#allocation3 + $0x3c4] ss:$36 sps:$4 sm:$0xff]  }
 0x125   : > { %v6090_v33 = vpop.f32.mrf.mxu1 }
 0x126   : > { %v6091_v37 = vadd.f32 %v6090_v33, %v6089_v50  ;;  %v6005_v46 = vpop.f32.mrf.mxu0 }
 0x127   : > { %v6092_v38 = vpop.f32.mrf.mxu1  ;;  %v7217_v1 = vadd.f32 %v6005_v46, %v6004_v54  ;;  %v6766_v46 = vld [vmem:[#allocation3 + $0x3c0] ss:$36 sps:$4 sm:$0xff]  }
 0x128   : > { %v7215_v42 = vadd.f32 %v6091_v37, %v7178_v25  ;;  %v6007_v49 = vpop.f32.mrf.mxu0 }
 0x129   : > { %v6093_v47 = vpop.f32.mrf.mxu1  ;;  %6452 = vmatmul.mubr.bf16.gmra.mxu0 %v6754_v41 }
 0x12a   : > { %v6094_v48 = vadd.f32 %v6093_v47, %v6092_v38  ;;  %6455 = vmatprep.mubr.bf16.mxu0 %v6755_v43  ;;  %v6008_v52 = vpop.f32.mrf.mxu0  ;;  %v6769_v47 = vld [vmem:[#allocation3 + $0x338] ss:$36 sps:$4 sm:$0xff]  }
 0x12b   : > { %v6095_v51 = vpop.f32.mrf.mxu1  ;;  %4328 = vmatmul.mubr.bf16.gmra.mxu1 %v6751_v39  ;;  %v7222_v25 = vadd.f32 %v6008_v52, %v6007_v49  ;;  %v6770_v49 = vld [vmem:[#allocation3 + $0x380] ss:$36 sps:$4 sm:$0xff]  }
 0x12c   : > { %v7220_v36 = vadd.f32 %v6094_v48, %v7182_v31  ;;  %4335 = vmatprep.mubr.bf16.mxu1 %v6758_v44  ;;  %v6010_v58 = vpop.f32.mrf.mxu0 }
 0x12d   : > { %v6096_v53 = vpop.f32.mrf.mxu1 }
 0x12e   : > { %v6097_v57 = vadd.f32 %v6096_v53, %v6095_v51  ;;  %v6011_v4 = vpop.f32.mrf.mxu0  ;;  %v6773_v51 = vld [vmem:[#allocation3 + $0x40c] ss:$36 sps:$4 sm:$0xff]  }
 0x12f   : > { %v6098_v59 = vpop.f32.mrf.mxu1  ;;  %v7227_v31 = vadd.f32 %v6011_v4, %v6010_v58 }
 0x130   : > { %v7225_v0 = vadd.f32 %v6097_v57, %v7186_v40 }
 0x131   : > { %v6099_v5 = vpop.f32.mrf.mxu1  ;;  %v6013_v7 = vpop.f32.mrf.mxu0  ;;  %6456 = vmatmul.mubr.bf16.gmra.mxu0 %v6759_v63 }
 0x132   : > { %v6100_v6 = vadd.f32 %v6099_v5, %v6098_v59  ;;  %6459 = vmatprep.mubr.bf16.mxu0 %v6760_v2 }
 0x133   : > { %v6101_v10 = vpop.f32.mrf.mxu1  ;;  %4336 = vmatmul.mubr.bf16.gmra.mxu1 %v6756_v60  ;;  %v6014_v12 = vpop.f32.mrf.mxu0 }
 0x134   : > { %v7230_v11 = vadd.f32 %v6100_v6, %v7190_v45  ;;  %4343 = vmatprep.mubr.bf16.mxu1 %v6763_v3  ;;  %v7232_v40 = vadd.f32 %v6014_v12, %v6013_v7  ;;  %v6771_v6 = vld [vmem:[#allocation3 + $0x408] ss:$36 sps:$4 sm:$0xff]   ;;  %v6775_v12 = vld [vmem:[#allocation3 + $0x410] ss:$36 sps:$4 sm:$0xff]  }
 0x135   : > { %v6102_v14 = vpop.f32.mrf.mxu1  ;;  %v6016_v18 = vpop.f32.mrf.mxu0  ;;  %v6774_v7 = vld [vmem:[#allocation3 + $0x3c8] ss:$36 sps:$4 sm:$0xff]  }
 0x136   : > { %v6103_v15 = vadd.f32 %v6102_v14, %v6101_v10  ;;  %v6778_v14 = vld [vmem:[#allocation3 + $0x454] ss:$36 sps:$4 sm:$0xff]  }
 0x137   : > { %v6104_v19 = vpop.f32.mrf.mxu1  ;;  %v6017_v30 = vpop.f32.mrf.mxu0 }
 0x138   : > { %v7235_v24 = vadd.f32 %v6103_v15, %v7194_v56  ;;  %v7237_v45 = vadd.f32 %v6017_v30, %v6016_v18 }
 0x139   : > { %v6105_v50 = vpop.f32.mrf.mxu1  ;;  %v6019_v33 = vpop.f32.mrf.mxu0  ;;  %6460 = vmatmul.mubr.bf16.gmra.mxu0 %v6764_v17 }
 0x13a   : > { %v6106_v32 = vadd.f32 %v6105_v50, %v6104_v19  ;;  %6463 = vmatprep.mubr.bf16.mxu0 %v6765_v26 }
 0x13b   : > { %v6107_v37 = vpop.f32.mrf.mxu1  ;;  %4344 = vmatmul.mubr.bf16.gmra.mxu1 %v6761_v21  ;;  %v6020_v38 = vpop.f32.mrf.mxu0 }
 0x13c   : > { %v7240_v54 = vadd.f32 %v6106_v32, %v7198_v62  ;;  %4351 = vmatprep.mubr.bf16.mxu1 %v6768_v27  ;;  %v7242_v56 = vadd.f32 %v6020_v38, %v6019_v33  ;;  %v6779_v38 = vld [vmem:[#allocation3 + $0x458] ss:$36 sps:$4 sm:$0xff]  }
 0x13d   : > { %v6108_v39 = vpop.f32.mrf.mxu1  ;;  %v6022_v43 = vpop.f32.mrf.mxu0 }
 0x13e   : > { %v6109_v41 = vadd.f32 %v6108_v39, %v6107_v37  ;;  %v6776_v37 = vld [vmem:[#allocation3 + $0x450] ss:$36 sps:$4 sm:$0xff]  }
 0x13f   : > { %v6110_v44 = vpop.f32.mrf.mxu1  ;;  %v6023_v52 = vpop.f32.mrf.mxu0 }
 0x140   : > { %v7245_v48 = vadd.f32 %v6109_v41, %v7202_v9  ;;  %v7247_v62 = vadd.f32 %v6023_v52, %v6022_v43 }
 0x141   : > { %v6111_v53 = vpop.f32.mrf.mxu1  ;;  %v6025_v58 = vpop.f32.mrf.mxu0  ;;  %6464 = vmatmul.mubr.bf16.gmra.mxu0 %v6769_v47 }
 0x142   : > { %v6112_v57 = vadd.f32 %v6111_v53, %v6110_v44  ;;  %6467 = vmatprep.mubr.bf16.mxu0 %v6770_v49 }
 0x143   : > { %v6113_v59 = vpop.f32.mrf.mxu1  ;;  %4352 = vmatmul.mubr.bf16.gmra.mxu1 %v6766_v46  ;;  %v6026_v63 = vpop.f32.mrf.mxu0 }
 0x144   : > { %v7250_v60 = vadd.f32 %v6112_v57, %v7204_v16  ;;  %4359 = vmatprep.mubr.bf16.mxu1 %v6773_v51  ;;  %v7252_v9 = vadd.f32 %v6026_v63, %v6025_v58 }
 0x145   : > { %v6114_v2 = vpop.f32.mrf.mxu1  ;;  %v6028_v4 = vpop.f32.mrf.mxu0 }
 0x146   : > { %v6115_v3 = vadd.f32 %v6114_v2, %v6113_v59 }
 0x147   : > { %v6116_v5 = vpop.f32.mrf.mxu1  ;;  %v6029_v15 = vpop.f32.mrf.mxu0 }
 0x148   : > { %v7255_v10 = vadd.f32 %v6115_v3, %v7212_v34  ;;  %v7257_v16 = vadd.f32 %v6029_v15, %v6028_v4 }
 0x149   : > { %v6117_v18 = vpop.f32.mrf.mxu1  ;;  %v6031_v21 = vpop.f32.mrf.mxu0  ;;  %6468 = vmatmul.mubr.bf16.gmra.mxu0 %v6774_v7 }
 0x14a   : > { %v6118_v19 = vadd.f32 %v6117_v18, %v6116_v5  ;;  %6471 = vmatprep.mubr.bf16.mxu0 %v6775_v12 }
 0x14b   : > { %v6119_v17 = vpop.f32.mrf.mxu1  ;;  %4360 = vmatmul.mubr.bf16.gmra.mxu1 %v6771_v6  ;;  %v6032_v27 = vpop.f32.mrf.mxu0 }
 0x14c   : > { %v7260_v26 = vadd.f32 %v6118_v19, %v7217_v1  ;;  %4367 = vmatprep.mubr.bf16.mxu1 %v6778_v14  ;;  %v7262_v34 = vadd.f32 %v6032_v27, %v6031_v21 }
 0x14d   : > { %v6120_v30 = vpop.f32.mrf.mxu1  ;;  %v6034_v32 = vpop.f32.mrf.mxu0 }
 0x14e   : > { %v6121_v50 = vadd.f32 %v6120_v30, %v6119_v17 }
 0x14f   : > { %v6122_v33 = vpop.f32.mrf.mxu1  ;;  %v6035_v41 = vpop.f32.mrf.mxu0 }
 0x150   : > { %v7265_v39 = vadd.f32 %v6121_v50, %v7222_v25  ;;  %v7267_v44 = vadd.f32 %v6035_v41, %v6034_v32 }
 0x151   : > { %v6123_v43 = vpop.f32.mrf.mxu1  ;;  %v6037_v46 = vpop.f32.mrf.mxu0  ;;  %6472 = vmatmul.mubr.bf16.gmra.mxu0 %v6779_v38 }
 0x152   : > { %v6124_v1 = vadd.f32 %v6123_v43, %v6122_v33 }
 0x153   : > { %v6125_v47 = vpop.f32.mrf.mxu1  ;;  %4368 = vmatmul.mubr.bf16.gmra.mxu1 %v6776_v37  ;;  %v6038_v51 = vpop.f32.mrf.mxu0 }
 0x154   : > { %v7270_v49 = vadd.f32 %v6124_v1, %v7227_v31  ;;  %v7272_v53 = vadd.f32 %v6038_v51, %v6037_v46 }
 0x155   : > { %v6126_v52 = vpop.f32.mrf.mxu1  ;;  %v6040_v58 = vpop.f32.mrf.mxu0 }
 0x156   : > { %v6127_v57 = vadd.f32 %v6126_v52, %v6125_v47 }
 0x157   : > { %v6128_v25 = vpop.f32.mrf.mxu1  ;;  %v6041_v63 = vpop.f32.mrf.mxu0 }
 0x158   : > { %v7275_v59 = vadd.f32 %v6127_v57, %v7232_v40  ;;  %v7277_v3 = vadd.f32 %v6041_v63, %v6040_v58 }
 0x159   : > { %v6129_v2 = vpop.f32.mrf.mxu1  ;;  %v6195_v5 = vpop.f32.mrf.mxu0 }
 0x15a   : > { %v6130_v4 = vadd.f32 %v6129_v2, %v6128_v25 }
 0x15b   : > { %v6131_v6 = vpop.f32.mrf.mxu1  ;;  %v6196_v7 = vpop.f32.mrf.mxu0 }
 0x15c   : > { %v7280_v31 = vadd.f32 %v6130_v4, %v7237_v45  ;;  %v6197_v14 = vadd.f32 %v6196_v7, %v6195_v5 }
 0x15d   : > { %v6132_v12 = vpop.f32.mrf.mxu1  ;;  %v6198_v18 = vpop.f32.mrf.mxu0 }
 0x15e   : > { %v6133_v15 = vadd.f32 %v6132_v12, %v6131_v6  ;;  %v7283_v21 = vadd.f32 %v6197_v14, %v7207_v23 }
 0x15f   : > { %v6134_v19 = vpop.f32.mrf.mxu1  ;;  %v6199_v17 = vpop.f32.mrf.mxu0 }
 0x160   : > { %v7286_v40 = vadd.f32 %v6133_v15, %v7242_v56  ;;  %v6200_v30 = vadd.f32 %v6199_v17, %v6198_v18 }
 0x161   : > { %v6135_v27 = vpop.f32.mrf.mxu1  ;;  %v6201_v32 = vpop.f32.mrf.mxu0 }
 0x162   : > { %v6136_v50 = vadd.f32 %v6135_v27, %v6134_v19  ;;  %v7289_v45 = vadd.f32 %v6200_v30, %v7210_v22 }
 0x163   : > { %v6137_v33 = vpop.f32.mrf.mxu1  ;;  %v6202_v38 = vpop.f32.mrf.mxu0 }
 0x164   : > { %v7292_v37 = vadd.f32 %v6136_v50, %v7247_v62  ;;  %v6203_v43 = vadd.f32 %v6202_v38, %v6201_v32 }
 0x165   : > { %v6138_v41 = vpop.f32.mrf.mxu1  ;;  %v6204_v1 = vpop.f32.mrf.mxu0 }
 0x166   : > { %v6139_v23 = vadd.f32 %v6138_v41, %v6137_v33  ;;  %v7295_v56 = vadd.f32 %v6203_v43, %v7215_v42 }
 0x167   : > { %v6140_v46 = vpop.f32.mrf.mxu1  ;;  %v6205_v51 = vpop.f32.mrf.mxu0 }
 0x168   : > { %v7298_v47 = vadd.f32 %v6139_v23, %v7252_v9  ;;  %v6206_v57 = vadd.f32 %v6205_v51, %v6204_v1 }
 0x169   : > { %v6141_v52 = vpop.f32.mrf.mxu1  ;;  %v6207_v58 = vpop.f32.mrf.mxu0 }
 0x16a   : > { %v6142_v22 = vadd.f32 %v6141_v52, %v6140_v46  ;;  %v7301_v62 = vadd.f32 %v6206_v57, %v7220_v36 }
 0x16b   : > { %v6143_v25 = vpop.f32.mrf.mxu1  ;;  %v6208_v2 = vpop.f32.mrf.mxu0 }
 0x16c   : > { %v7304_v63 = vadd.f32 %v6142_v22, %v7257_v16  ;;  %v6209_v5 = vadd.f32 %v6208_v2, %v6207_v58 }
 0x16d   : > { %v6144_v4 = vpop.f32.mrf.mxu1  ;;  %v6210_v6 = vpop.f32.mrf.mxu0 }
 0x16e   : > { %v6145_v42 = vadd.f32 %v6144_v4, %v6143_v25  ;;  %v7307_v9 = vadd.f32 %v6209_v5, %v7225_v0 }
 0x16f   : > { %v6146_v7 = vpop.f32.mrf.mxu1  ;;  %v6211_v14 = vpop.f32.mrf.mxu0 }
 0x170   : > { %v7310_v12 = vadd.f32 %v6145_v42, %v7262_v34  ;;  %v6212_v18 = vadd.f32 %v6211_v14, %v6210_v6 }
 0x171   : > { %v6147_v15 = vpop.f32.mrf.mxu1  ;;  %v6213_v19 = vpop.f32.mrf.mxu0 }
 0x172   : > { %v6148_v36 = vadd.f32 %v6147_v15, %v6146_v7  ;;  %v7313_v16 = vadd.f32 %v6212_v18, %v7230_v11 }
 0x173   : > { %v6149_v17 = vpop.f32.mrf.mxu1  ;;  %v6214_v30 = vpop.f32.mrf.mxu0 }
 0x174   : > { %v7316_v27 = vadd.f32 %v6148_v36, %v7267_v44  ;;  %v6215_v32 = vadd.f32 %v6214_v30, %v6213_v19 }
 0x175   : > { %v6150_v50 = vpop.f32.mrf.mxu1  ;;  %v6216_v33 = vpop.f32.mrf.mxu0 }
 0x176   : > { %v6151_v0 = vadd.f32 %v6150_v50, %v6149_v17  ;;  %v7319_v34 = vadd.f32 %v6215_v32, %v7235_v24 }
 0x177   : > { %v6152_v38 = vpop.f32.mrf.mxu1  ;;  %v6217_v43 = vpop.f32.mrf.mxu0 }
 0x178   : > { %v7322_v41 = vadd.f32 %v6151_v0, %v7272_v53  ;;  %v6218_v1 = vadd.f32 %v6217_v43, %v6216_v33 }
 0x179   : > { %v6153_v23 = vpop.f32.mrf.mxu1  ;;  %v6219_v46 = vpop.f32.mrf.mxu0 }
 0x17a   : > { %v6154_v11 = vadd.f32 %v6153_v23, %v6152_v38  ;;  %v7325_v44 = vadd.f32 %v6218_v1, %v7240_v54 }
 0x17b   : > { %v6155_v51 = vpop.f32.mrf.mxu1  ;;  %v6220_v57 = vpop.f32.mrf.mxu0 }
 0x17c   : > { %v7328_v52 = vadd.f32 %v6154_v11, %v7277_v3  ;;  %v6221_v58 = vadd.f32 %v6220_v57, %v6219_v46 }
 0x17d   : > { %v6156_v22 = vpop.f32.mrf.mxu1  ;;  %v6222_v25 = vpop.f32.mrf.mxu0 }
 0x17e   : > { %v6157_v24 = vadd.f32 %v6156_v22, %v6155_v51  ;;  %v7331_v53 = vadd.f32 %v6221_v58, %v7245_v48 }
 0x17f   : > { %v6158_v2 = vpop.f32.mrf.mxu1  ;;  %v6223_v5 = vpop.f32.mrf.mxu0 }
 0x180   : > { %v7334_v4 = vadd.f32 %v6157_v24, %v7174_v13  ;;  %v6224_v6 = vadd.f32 %v6223_v5, %v6222_v25 }
 0x181   : > { %v6159_v42 = vpop.f32.mrf.mxu1  ;;  %v6225_v7 = vpop.f32.mrf.mxu0 }
 0x182   : > { %v6160_v54 = vadd.f32 %v6159_v42, %v6158_v2  ;;  %v7337_v3 = vadd.f32 %v6224_v6, %v7250_v60 }
 0x183   : > { %v6161_v14 = vpop.f32.mrf.mxu1  ;;  %v6226_v18 = vpop.f32.mrf.mxu0 }
 0x184   : > { %v7340_v15 = vadd.f32 %v6160_v54, %v7176_v20  ;;  %v6227_v19 = vadd.f32 %v6226_v18, %v6225_v7 }
 0x185   : > { %v6162_v36 = vpop.f32.mrf.mxu1  ;;  %v6228_v17 = vpop.f32.mrf.mxu0 }
 0x186   : > { %v6163_v48 = vadd.f32 %v6162_v36, %v6161_v14  ;;  %v7343_v13 = vadd.f32 %v6227_v19, %v7255_v10 }
 0x187   : > { %v6164_v30 = vpop.f32.mrf.mxu1  ;;  %v6229_v32 = vpop.f32.mrf.mxu0 }
 0x188   : > { %v7346_v50 = vadd.f32 %v6163_v48, %v7180_v28  ;;  %v6230_v33 = vadd.f32 %v6229_v32, %v6228_v17 }
 0x189   : > { %v6165_v0 = vpop.f32.mrf.mxu1  ;;  %v6231_v38 = vpop.f32.mrf.mxu0 }
 0x18a   : > { %v6166_v60 = vadd.f32 %v6165_v0, %v6164_v30  ;;  %v7349_v20 = vadd.f32 %v6230_v33, %v7260_v26 }
 0x18b   : > { %v6167_v43 = vpop.f32.mrf.mxu1  ;;  %v6232_v1 = vpop.f32.mrf.mxu0 }
 0x18c   : > { %v7352_v23 = vadd.f32 %v6166_v60, %v7184_v35  ;;  %v6233_v46 = vadd.f32 %v6232_v1, %v6231_v38 }
 0x18d   : > { %v6168_v11 = vpop.f32.mrf.mxu1  ;;  %v6234_v51 = vpop.f32.mrf.mxu0 }
 0x18e   : > { %v6169_v10 = vadd.f32 %v6168_v11, %v6167_v43  ;;  %v7355_v28 = vadd.f32 %v6233_v46, %v7265_v39 }
 0x18f   : > { %v6170_v57 = vpop.f32.mrf.mxu1  ;;  %v6235_v58 = vpop.f32.mrf.mxu0 }
 0x190   : > { %v7358_v22 = vadd.f32 %v6169_v10, %v7188_v29  ;;  %v6236_v25 = vadd.f32 %v6235_v58, %v6234_v51 }
 0x191   : > { %v6171_v24 = vpop.f32.mrf.mxu1  ;;  %v6237_v2 = vpop.f32.mrf.mxu0 }
 0x192   : > { %v6172_v26 = vadd.f32 %v6171_v24, %v6170_v57  ;;  %v7361_v35 = vadd.f32 %v6236_v25, %v7270_v49 }
 0x193   : > { %v6173_v5 = vpop.f32.mrf.mxu1  ;;  %v6238_v6 = vpop.f32.mrf.mxu0 }
 0x194   : > { %v7364_v42 = vadd.f32 %v6172_v26, %v7192_v55  ;;  %v6239_v7 = vadd.f32 %v6238_v6, %v6237_v2 }
 0x195   : > { %v6174_v54 = vpop.f32.mrf.mxu1  ;;  %v6240_v14 = vpop.f32.mrf.mxu0 }
 0x196   : > { %v6175_v39 = vadd.f32 %v6174_v54, %v6173_v5  ;;  %v7367_v29 = vadd.f32 %v6239_v7, %v7275_v59 }
 0x197   : > { %v6176_v18 = vpop.f32.mrf.mxu1  ;;  %v6241_v19 = vpop.f32.mrf.mxu0 }
 0x198   : > { %v7370_v36 = vadd.f32 %v6175_v39, %v7196_v61  ;;  %v6242_v17 = vadd.f32 %v6241_v19, %v6240_v14 }
 0x199   : > { %v6177_v48 = vpop.f32.mrf.mxu1  ;;  %v6243_v30 = vpop.f32.mrf.mxu0 }
 0x19a   : > { %v6178_v49 = vadd.f32 %v6177_v48, %v6176_v18  ;;  %v7373_v55 = vadd.f32 %v6242_v17, %v7280_v31 }
 0x19b   : > { %v6307_v32 = vpop.f32.mrf.mxu1  ;;  %v6244_v33 = vpop.f32.mrf.mxu0 }
 0x19c   : > { %v7376_v0 = vadd.f32 %v6178_v49, %v7200_v8  ;;  %v6245_v38 = vadd.f32 %v6244_v33, %v6243_v30 }
 0x19d   : > { %v6308_v60 = vpop.f32.mrf.mxu1  ;;  %v6246_v43 = vpop.f32.mrf.mxu0 }
 0x19e   : > { %v6309_v59 = vadd.f32 %v6308_v60, %v6307_v32  ;;  %v7381_v61 = vadd.f32 %v6245_v38, %v7286_v40 }
 0x19f   : > { %v7378_v1 = vpop.f32.mrf.mxu1  ;;  %v6247_v46 = vpop.f32.mrf.mxu0 }
 0x1a0   : > { %v7384_v11 = vadd.f32 %v6309_v59, %v7283_v21  ;;  %v6248_v31 = vadd.f32 %v6247_v46, %v6246_v43 }
 0x1a1   : > { %v7386_v10 = vpop.f32.mrf.mxu1  ;;  %v6249_v51 = vpop.f32.mrf.mxu0 }
 0x1a2   : > { %v7391_v57 = vadd.f32 %v6248_v31, %v7292_v37 }
 0x1a3   : > { %v7388_v8 = vpop.f32.mrf.mxu1  ;;  %v6250_v58 = vpop.f32.mrf.mxu0 }
 0x1a4   : > { %v6251_v25 = vadd.f32 %v6250_v58, %v6249_v51 }
 0x1a5   : > { %v7393_v24 = vpop.f32.mrf.mxu1  ;;  %v6252_v26 = vpop.f32.mrf.mxu0 }
 0x1a6   : > { %v7398_v21 = vadd.f32 %v6251_v25, %v7298_v47 }
 0x1a7   : > { %v7395_v40 = vpop.f32.mrf.mxu1  ;;  %v6253_v2 = vpop.f32.mrf.mxu0 }
 0x1a8   : > { %v6254_v6 = vadd.f32 %v6253_v2, %v6252_v26 }
 0x1a9   : > { %v7400_v5 = vpop.f32.mrf.mxu1  ;;  %v6255_v54 = vpop.f32.mrf.mxu0 }
 0x1aa   : > { %v7405_v37 = vadd.f32 %v6254_v6, %v7304_v63 }
 0x1ab   : > { %v7402_v7 = vpop.f32.mrf.mxu1  ;;  %v6256_v39 = vpop.f32.mrf.mxu0 }
 0x1ac   : > { %v6257_v18 = vadd.f32 %v6256_v39, %v6255_v54 }
 0x1ad   : > { %v7407_v14 = vpop.f32.mrf.mxu1  ;;  %v6258_v19 = vpop.f32.mrf.mxu0 }
 0x1ae   : > { %v7412_v47 = vadd.f32 %v6257_v18, %v7310_v12 }
 0x1af   : > { %v7409_v48 = vpop.f32.mrf.mxu1  ;;  %v6259_v17 = vpop.f32.mrf.mxu0 }
 0x1b0   : > { %v6260_v30 = vadd.f32 %v6259_v17, %v6258_v19 }
 0x1b1   : > { %v7414_v49 = vpop.f32.mrf.mxu1  ;;  %v6261_v32 = vpop.f32.mrf.mxu0 }
 0x1b2   : > { %v7419_v63 = vadd.f32 %v6260_v30, %v7316_v27 }
 0x1b3   : > { %v7416_v33 = vpop.f32.mrf.mxu1  ;;  %v6262_v60 = vpop.f32.mrf.mxu0 }
 0x1b4   : > { %7631 = vst [vmem:[#allocation4_spill] sm:$0xff] %v7419_v63  ;;  %v6263_v59 = vadd.f32 %v6262_v60, %v6261_v32 }
 0x1b5   : > { %v7421_v38 = vpop.f32.mrf.mxu1  ;;  %v6264_v43 = vpop.f32.mrf.mxu0 }
 0x1b6   : > { %v7426_v12 = vadd.f32 %v6263_v59, %v7322_v41 }
 0x1b7   : > { %v7423_v46 = vpop.f32.mrf.mxu1  ;;  %v6265_v31 = vpop.f32.mrf.mxu0 }
 0x1b8   : > { %7632 = vst [vmem:[#allocation5_spill] sm:$0xff] %v7426_v12  ;;  %v6266_v58 = vadd.f32 %v6265_v31, %v6264_v43 }
 0x1b9   : > { %v7428_v51 = vpop.f32.mrf.mxu1  ;;  %v6267_v25 = vpop.f32.mrf.mxu0 }
 0x1ba   : > { %v7433_v27 = vadd.f32 %v6266_v58, %v7328_v52 }
 0x1bb   : > { %v7430_v26 = vpop.f32.mrf.mxu1  ;;  %v6268_v2 = vpop.f32.mrf.mxu0 }
 0x1bc   : > { %7633 = vst [vmem:[#allocation6_spill] sm:$0xff] %v7433_v27  ;;  %v6269_v54 = vadd.f32 %v6268_v2, %v6267_v25 }
 0x1bd   : > { %v7435_v6 = vpop.f32.mrf.mxu1  ;;  %v6270_v39 = vpop.f32.mrf.mxu0 }
 0x1be   : > { %v7440_v41 = vadd.f32 %v6269_v54, %v7334_v4 }
 0x1bf   : > { %v7437_v18 = vpop.f32.mrf.mxu1  ;;  %v6271_v19 = vpop.f32.mrf.mxu0 }
 0x1c0   : > { %7634 = vst [vmem:[#allocation7_spill] sm:$0xff] %v7440_v41  ;;  %v6272_v30 = vadd.f32 %v6271_v19, %v6270_v39 }
 0x1c1   : > { %v7442_v17 = vpop.f32.mrf.mxu1  ;;  %v6273_v32 = vpop.f32.mrf.mxu0 }
 0x1c2   : > { %v7447_v52 = vadd.f32 %v6272_v30, %v7340_v15 }
 0x1c3   : > { %v7444_v60 = vpop.f32.mrf.mxu1  ;;  %v6274_v59 = vpop.f32.mrf.mxu0 }
 0x1c4   : > { %7635 = vst [vmem:[#allocation8_spill] sm:$0xff] %v7447_v52  ;;  %v6275_v31 = vadd.f32 %v6274_v59, %v6273_v32 }
 0x1c5   : > { %v7449_v43 = vpop.f32.mrf.mxu1  ;;  %v6276_v58 = vpop.f32.mrf.mxu0 }
 0x1c6   : > { %v7454_v4 = vadd.f32 %v6275_v31, %v7346_v50 }
 0x1c7   : > { %v7451_v25 = vpop.f32.mrf.mxu1  ;;  %v6277_v2 = vpop.f32.mrf.mxu0 }
 0x1c8   : > { %7636 = vst [vmem:[#allocation9_spill] sm:$0xff] %v7454_v4  ;;  %v6278_v39 = vadd.f32 %v6277_v2, %v6276_v58 }
 0x1c9   : > { %v7456_v54 = vpop.f32.mrf.mxu1  ;;  %v6279_v19 = vpop.f32.mrf.mxu0 }
 0x1ca   : > { %v7461_v15 = vadd.f32 %v6278_v39, %v7352_v23 }
 0x1cb   : > { %v7458_v41 = vpop.f32.mrf.mxu1  ;;  %v6280_v30 = vpop.f32.mrf.mxu0 }
 0x1cc   : > { %7637 = vst [vmem:[#allocation10_spill] sm:$0xff] %v7461_v15  ;;  %v6281_v32 = vadd.f32 %v6280_v30, %v6279_v19 }
 0x1cd   : > { %v7463_v52 = vpop.f32.mrf.mxu1  ;;  %v6282_v59 = vpop.f32.mrf.mxu0 }
 0x1ce   : > { %v7468_v50 = vadd.f32 %v6281_v32, %v7358_v22 }
 0x1cf   : > { %v7465_v63 = vpop.f32.mrf.mxu1  ;;  %v6283_v31 = vpop.f32.mrf.mxu0 }
 0x1d0   : > { %7638 = vst [vmem:[#allocation11_spill] sm:$0xff] %v7468_v50  ;;  %v6284_v58 = vadd.f32 %v6283_v31, %v6282_v59  ;;  %v6315_v59 = vadd.f32 %v7393_v24, %v7388_v8  ;;  %v6321_v24 = vadd.f32 %v7407_v14, %v7402_v7 }
 0x1d1   : > { %v7470_v4 = vpop.f32.mrf.mxu1  ;;  %v6285_v2 = vpop.f32.mrf.mxu0 }
 0x1d2   : > { %v7475_v23 = vadd.f32 %v6284_v58, %v7364_v42  ;;  %v6318_v42 = vadd.f32 %v7400_v5, %v7395_v40 }
 0x1d3   : > { %v7472_v27 = vpop.f32.mrf.mxu1  ;;  %v6286_v39 = vpop.f32.mrf.mxu0 }
 0x1d4   : > { %7639 = vst [vmem:[#allocation12_spill] sm:$0xff] %v7475_v23  ;;  %v6287_v19 = vadd.f32 %v6286_v39, %v6285_v2  ;;  %v6312_v2 = vadd.f32 %v7386_v10, %v7378_v1  ;;  %v4261_v8 = vadd.f32 %v6318_v42, %v7301_v62  ;;  %v6327_v10 = vadd.f32 %v7421_v38, %v7416_v33 }
 0x1d5   : > { %v7477_v15 = vpop.f32.mrf.mxu1  ;;  %v6288_v30 = vpop.f32.mrf.mxu0  ;;  %v4266_v33 = vadd.f32 %v6321_v24, %v7307_v9  ;;  %v6324_v42 = vadd.f32 %v7414_v49, %v7409_v48  ;;  %v6342_v49 = vadd.f32 %v7456_v54, %v7451_v25 }
 0x1d6   : > { %v7482_v22 = vadd.f32 %v6287_v19, %v7370_v36 }
 0x1d7   : > { %v7479_v12 = vpop.f32.mrf.mxu1  ;;  %v6289_v32 = vpop.f32.mrf.mxu0 }
 0x1d8   : > { %7640 = vst [vmem:[#allocation13_spill] sm:$0xff] %v7482_v22  ;;  %v6290_v31 = vadd.f32 %v6289_v32, %v6288_v30  ;;  %v4258_v22 = vadd.f32 %v6315_v59, %v7295_v56  ;;  %v6330_v56 = vadd.f32 %v7428_v51, %v7423_v46 }
 0x1d9   : > { %v7484_v50 = vpop.f32.mrf.mxu1  ;;  %v6445_v58 = vpop.f32.mrf.mxu0 }
 0x1da   : > { %v7495_v36 = vadd.f32 %v6290_v31, %v7376_v0  ;;  %v4419_v30 = vadd.f32 %v6445_v58, %v4258_v22  ;;  %v4253_v0 = vadd.f32 %v6312_v2, %v7289_v45  ;;  %v4274_v31 = vadd.f32 %v6327_v10, %v7319_v34 }
 0x1db   : > { %v7490_v23 = vpop.f32.mrf.mxu1  ;;  %v4410_v39 = vpop.f32.mrf.mxu0  ;;  %v6333_v34 = vadd.f32 %v7435_v6, %v7430_v26  ;;  %v6336_v26 = vadd.f32 %v7442_v17, %v7437_v18 }
 0x1dc   : > { %7641 = vst [vmem:[#allocation14_spill] sm:$0xff] %v7495_v36  ;;  %v4411_v32 = vadd.f32 %v4410_v39, %v7384_v11  ;;  %v4277_v39 = vadd.f32 %v6330_v56, %v7325_v44  ;;  %v6339_v44 = vadd.f32 %v7449_v43, %v7444_v60 }
 0x1dd   : > { %v7497_v19 = vpop.f32.mrf.mxu1  ;;  %v6446_v40 = vpop.f32.mrf.mxu0  ;;  %v4282_v25 = vadd.f32 %v6333_v34, %v7331_v53  ;;  %v6345_v53 = vadd.f32 %v7463_v52, %v7458_v41 }
 0x1de   : > { %v4422_v1 = vadd.f32 %v6446_v40, %v4261_v8  ;;  %v4735_v38 = vmul.f32 %v4411_v32, %v4411_v32  ;;  %v4737_v8 = vmul.f32 %v4419_v30, %v4419_v30 }
 0x1df   : > { %v7503_v5 = vpop.f32.mrf.mxu1  ;;  %v4413_v62 = vpop.f32.mrf.mxu0 }
 0x1e0   : > { %v5853_v11 = vpack.c.bf16 %v4422_v1, %v4419_v30  ;;  %v4414_v14 = vadd.f32 %v4413_v62, %v4253_v0  ;;  %v4738_v24 = vmul.f32 %v4422_v1, %v4422_v1 }
 0x1e1   : > { %v7518_v7 = vpop.f32.mrf.mxu1  ;;  %v6449_v45 = vpop.f32.mrf.mxu0 }
 0x1e2   : > { %5940 = vst [vmem:[%s7516_s14 + $0x8] sm:$0xff] %v5853_v11   ;;  %v5848_v46 = vpack.c.bf16 %v4414_v14, %v4411_v32  ;;  %v4697_v51 = vadd.f32 %v4414_v14, %v4411_v32  ;;  %v4736_v59 = vmul.f32 %v4414_v14, %v4414_v14  ;;  %v4435_v14 = vadd.f32 %v6449_v45, %v4274_v31 }
 0x1e3   : > { %v7520_v22 = vpop.f32.mrf.mxu1  ;;  %v4426_v58 = vpop.f32.mrf.mxu0  ;;  %v4293_v31 = vadd.f32 %v6342_v49, %v7349_v20 }
 0x1e4   : > { %5849 = vst [vmem:[%s7516_s14] sm:$0xff] %v5848_v46   ;;  %v4698_v40 = vadd.f32 %v4697_v51, %v4419_v30  ;;  %v4767_v0 = vadd.f32 %v4736_v59, %v4735_v38  ;;  %v4427_v9 = vadd.f32 %v4426_v58, %v4266_v33  ;;  %v4269_v30 = vadd.f32 %v6324_v42, %v7313_v16 }
 0x1e5   : > { %v7527_v2 = vpop.f32.mrf.mxu1  ;;  %v6450_v62 = vpop.f32.mrf.mxu0  ;;  %v4290_v42 = vadd.f32 %v6339_v44, %v7343_v13  ;;  %v4741_v58 = vmul.f32 %v4435_v14, %v4435_v14  ;;  %v6354_v44 = vadd.f32 %v7484_v50, %v7479_v12 }
 0x1e6   : > { %v4768_v32 = vadd.f32 %v4767_v0, %v4737_v8  ;;  %v4699_v36 = vadd.f32 %v4698_v40, %v4422_v1  ;;  %v4438_v48 = vadd.f32 %v6450_v62, %v4277_v39  ;;  %v4739_v38 = vmul.f32 %v4427_v9, %v4427_v9 }
 0x1e7   : > { %v7531_v11 = vpop.f32.mrf.mxu1  ;;  %v4429_v10 = vpop.f32.mrf.mxu0 }
 0x1e8   : > { %v4700_v33 = vadd.f32 %v4699_v36, %v4427_v9  ;;  %v4769_v45 = vadd.f32 %v4768_v32, %v4738_v24  ;;  %v5863_v1 = vpack.c.bf16 %v4438_v48, %v4435_v14  ;;  %v4430_v46 = vadd.f32 %v4429_v10, %v4269_v30 }
 0x1e9   : > { %v7540_v56 = vpop.f32.mrf.mxu1  ;;  %v6453_v51 = vpop.f32.mrf.mxu0  ;;  %v4285_v24 = vadd.f32 %v6336_v26, %v7337_v3  ;;  %v4742_v62 = vmul.f32 %v4438_v48, %v4438_v48 }
 0x1ea   : > { %v4770_v6 = vadd.f32 %v4769_v45, %v4739_v38  ;;  %5942 = vst [vmem:[%s7516_s14 + $0x18] sm:$0xff] %v5863_v1   ;;  %v5858_v60 = vpack.c.bf16 %v4430_v46, %v4427_v9  ;;  %v4701_v43 = vadd.f32 %v4700_v33, %v4430_v46  ;;  %v4740_v16 = vmul.f32 %v4430_v46, %v4430_v46 }
 0x1eb   : > { %v7542_v59 = vpop.f32.mrf.mxu1  ;;  %v4442_v54 = vpop.f32.mrf.mxu0  ;;  %v4451_v0 = vadd.f32 %v6453_v51, %v4290_v42  ;;  %v4309_v51 = vadd.f32 %v6354_v44, %v7373_v55  ;;  %v6363_v55 = vadd.f32 %v7527_v2, %v7520_v22 }
 0x1ec   : > { %5941 = vst [vmem:[%s7516_s14 + $0x10] sm:$0xff] %v5858_v60   ;;  %v4702_v39 = vadd.f32 %v4701_v43, %v4435_v14  ;;  %v4771_v8 = vadd.f32 %v4770_v6, %v4740_v16  ;;  %v4443_v40 = vadd.f32 %v4442_v54, %v4282_v25  ;;  %v6351_v14 = vadd.f32 %v7477_v15, %v7472_v27 }
 0x1ed   : > { %v7548_v36 = vpop.f32.mrf.mxu1  ;;  %v6454_v18 = vpop.f32.mrf.mxu0  ;;  %v4298_v15 = vadd.f32 %v6345_v53, %v7355_v28  ;;  %v4745_v26 = vmul.f32 %v4451_v0, %v4451_v0  ;;  %v6357_v28 = vadd.f32 %v7497_v19, %v7490_v23  ;;  %v6360_v19 = vadd.f32 %v7518_v7, %v7503_v5 }
 0x1ee   : > { %v4454_v9 = vadd.f32 %v6454_v18, %v4293_v31  ;;  %v4772_v13 = vadd.f32 %v4771_v8, %v4741_v58  ;;  %v4703_v32 = vadd.f32 %v4702_v39, %v4438_v48  ;;  %v4743_v10 = vmul.f32 %v4443_v40, %v4443_v40 }
 0x1ef   : > { %v7553_v17 = vpop.f32.mrf.mxu1  ;;  %v4445_v20 = vpop.f32.mrf.mxu0  ;;  %v6348_v48 = vadd.f32 %v7470_v4, %v7465_v63  ;;  %v4306_v46 = vadd.f32 %v6351_v14, %v7367_v29  ;;  %v6366_v8 = vadd.f32 %v7540_v56, %v7531_v11  ;;  %v4314_v22 = vadd.f32 %v6357_v28, %v7381_v61 }
 0x1f0   : > { %v5873_v49 = vpack.c.bf16 %v4454_v9, %v4451_v0  ;;  %v4446_v30 = vadd.f32 %v4445_v20, %v4285_v24  ;;  %v4704_v3 = vadd.f32 %v4703_v32, %v4443_v40  ;;  %v4773_v33 = vadd.f32 %v4772_v13, %v4742_v62 }
 0x1f1   : > { %v7558_v34 = vpop.f32.mrf.mxu1  ;;  %v6457_v41 = vpop.f32.mrf.mxu0  ;;  %v4301_v54 = vadd.f32 %v6348_v48, %v7361_v35  ;;  %v4746_v42 = vmul.f32 %v4454_v9, %v4454_v9  ;;  %v4322_v56 = vadd.f32 %v6363_v55, %v7398_v21  ;;  %v4325_v20 = vadd.f32 %v6366_v8, %v7405_v37  ;;  %v7644_v8 = vld [vmem:[#allocation4_spill] sm:$0xff] }
 0x1f2   : > { %5944 = vst [vmem:[%s7516_s14 + $0x28] sm:$0xff] %v5873_v49   ;;  %v5868_v38 = vpack.c.bf16 %v4446_v30, %v4443_v40  ;;  %v4744_v45 = vmul.f32 %v4446_v30, %v4446_v30  ;;  %v4774_v1 = vadd.f32 %v4773_v33, %v4743_v10  ;;  %v4705_v27 = vadd.f32 %v4704_v3, %v4446_v30 }
 0x1f3   : > { %v7564_v52 = vpop.f32.mrf.mxu1  ;;  %v4458_v12 = vpop.f32.mrf.mxu0  ;;  %v4467_v4 = vadd.f32 %v6457_v41, %v4306_v46  ;;  %v4317_v33 = vadd.f32 %v6360_v19, %v7391_v57  ;;  %v6369_v61 = vadd.f32 %v7548_v36, %v7542_v59  ;;  %v6372_v59 = vadd.f32 %v7558_v34, %v7553_v17 }
 0x1f4   : > { %5943 = vst [vmem:[%s7516_s14 + $0x20] sm:$0xff] %v5868_v38   ;;  %v4706_v6 = vadd.f32 %v4705_v27, %v4451_v0  ;;  %v4775_v60 = vadd.f32 %v4774_v1, %v4744_v45  ;;  %v4459_v43 = vadd.f32 %v4458_v12, %v4298_v15 }
 0x1f5   : > { %v6374_v50 = vpop.f32.mrf.mxu1  ;;  %v6458_v16 = vpop.f32.mrf.mxu0  ;;  %v4749_v14 = vmul.f32 %v4467_v4, %v4467_v4 }
 0x1f6   : > { %v4470_v25 = vadd.f32 %v6458_v16, %v4309_v51  ;;  %v4776_v31 = vadd.f32 %v4775_v60, %v4745_v26  ;;  %v4707_v58 = vadd.f32 %v4706_v6, %v4454_v9  ;;  %v4747_v35 = vmul.f32 %v4459_v43, %v4459_v43 }
 0x1f7   : > { %v6376_v63 = vpop.f32.mrf.mxu1  ;;  %v4461_v29 = vpop.f32.mrf.mxu0  ;;  %v6375_v37 = vadd.f32 %v6374_v50, %v7564_v52  ;;  %v4330_v16 = vadd.f32 %v6369_v61, %v7412_v47 }
 0x1f8   : > { %v5883_v40 = vpack.c.bf16 %v4470_v25, %v4467_v4  ;;  %v4462_v18 = vadd.f32 %v4461_v29, %v4301_v54  ;;  %v4708_v0 = vadd.f32 %v4707_v58, %v4459_v43  ;;  %v4777_v24 = vadd.f32 %v4776_v31, %v4746_v42 }
 0x1f9   : > { %v6377_v39 = vpop.f32.mrf.mxu1  ;;  %v6461_v53 = vpop.f32.mrf.mxu0  ;;  %v4750_v41 = vmul.f32 %v4470_v25, %v4470_v25 }
 0x1fa   : > { %5946 = vst [vmem:[%s7516_s14 + $0x38] sm:$0xff] %v5883_v40   ;;  %v5878_v9 = vpack.c.bf16 %v4462_v18, %v4459_v43  ;;  %v4748_v62 = vmul.f32 %v4462_v18, %v4462_v18  ;;  %v4778_v13 = vadd.f32 %v4777_v24, %v4747_v35  ;;  %v4709_v32 = vadd.f32 %v4708_v0, %v4462_v18 }
 0x1fb   : > { %v6379_v23 = vpop.f32.mrf.mxu1  ;;  %v4474_v2 = vpop.f32.mrf.mxu0  ;;  %v4483_v7 = vadd.f32 %v6461_v53, %v4322_v56  ;;  %v6378_v1 = vadd.f32 %v6377_v39, %v6376_v63  ;;  %v7642_v63 = vld [vmem:[#allocation5_spill] sm:$0xff]  ;;  %v4333_v40 = vadd.f32 %v6372_v59, %v7644_v8 }
 0x1fc   : > { %5945 = vst [vmem:[%s7516_s14 + $0x30] sm:$0xff] %v5878_v9   ;;  %v4710_v44 = vadd.f32 %v4709_v32, %v4467_v4  ;;  %v4779_v49 = vadd.f32 %v4778_v13, %v4748_v62  ;;  %v4475_v30 = vadd.f32 %v4474_v2, %v4314_v22  ;;  %v4338_v4 = vadd.f32 %v6375_v37, %v7642_v63 }
 0x1fd   : > { %v6380_v11 = vpop.f32.mrf.mxu1  ;;  %v6462_v3 = vpop.f32.mrf.mxu0  ;;  %v4753_v28 = vmul.f32 %v4483_v7, %v4483_v7 }
 0x1fe   : > { %v4486_v10 = vadd.f32 %v6462_v3, %v4325_v20  ;;  %v4780_v48 = vadd.f32 %v4779_v49, %v4749_v14  ;;  %v4711_v38 = vadd.f32 %v4710_v44, %v4470_v25  ;;  %v4751_v46 = vmul.f32 %v4475_v30, %v4475_v30  ;;  %v7643_v25 = vld [vmem:[#allocation6_spill] sm:$0xff]  ;;  %v7645_v49 = vld [vmem:[#allocation9_spill] sm:$0xff] }
 0x1ff   : > { %v6382_v5 = vpop.f32.mrf.mxu1  ;;  %v4477_v21 = vpop.f32.mrf.mxu0  ;;  %v4341_v54 = vadd.f32 %v6378_v1, %v7643_v25  ;;  %v6381_v47 = vadd.f32 %v6380_v11, %v6379_v23  ;;  %v7646_v11 = vld [vmem:[#allocation10_spill] sm:$0xff] }
 0x200   : > { %v5893_v27 = vpack.c.bf16 %v4486_v10, %v4483_v7  ;;  %v4478_v15 = vadd.f32 %v4477_v21, %v4317_v33  ;;  %v4712_v12 = vadd.f32 %v4711_v38, %v4475_v30  ;;  %v4781_v51 = vadd.f32 %v4780_v48, %v4750_v41 }
 0x201   : > { %v6383_v45 = vpop.f32.mrf.mxu1  ;;  %v6465_v26 = vpop.f32.mrf.mxu0  ;;  %v4754_v18 = vmul.f32 %v4486_v10, %v4486_v10 }
 0x202   : > { %5948 = vst [vmem:[%s7516_s14 + $0x48] sm:$0xff] %v5893_v27   ;;  %v5888_v36 = vpack.c.bf16 %v4478_v15, %v4475_v30  ;;  %v4752_v6 = vmul.f32 %v4478_v15, %v4478_v15  ;;  %v4782_v60 = vadd.f32 %v4781_v51, %v4751_v46  ;;  %v4713_v43 = vadd.f32 %v4712_v12, %v4478_v15  ;;  %v7648_v15 = vld [vmem:[#allocation8_spill] sm:$0xff] }
 0x203   : > { %v6385_v57 = vpop.f32.mrf.mxu1  ;;  %v4490_v52 = vpop.f32.mrf.mxu0  ;;  %v4499_v34 = vadd.f32 %v6465_v26, %v4338_v4  ;;  %v6384_v13 = vadd.f32 %v6383_v45, %v6382_v5 }
 0x204   : > { %5947 = vst [vmem:[%s7516_s14 + $0x40] sm:$0xff] %v5888_v36   ;;  %v4714_v42 = vadd.f32 %v4713_v43, %v4483_v7  ;;  %v4783_v31 = vadd.f32 %v4782_v60, %v4752_v6  ;;  %v4491_v58 = vadd.f32 %v4490_v52, %v4330_v16 }
 0x205   : > { %v6386_v50 = vpop.f32.mrf.mxu1  ;;  %v6466_v29 = vpop.f32.mrf.mxu0  ;;  %v4757_v5 = vmul.f32 %v4499_v34, %v4499_v34  ;;  %v4349_v12 = vadd.f32 %v6384_v13, %v7648_v15 }
 0x206   : > { %v6387_v39 = vadd.f32 %v6386_v50, %v6385_v57  ;;  %v4502_v55 = vadd.f32 %v6466_v29, %v4341_v54  ;;  %v4784_v0 = vadd.f32 %v4783_v31, %v4753_v28  ;;  %v4715_v35 = vadd.f32 %v4714_v42, %v4486_v10  ;;  %v7647_v10 = vld [vmem:[#allocation7_spill] sm:$0xff] }
 0x207   : > { %v6388_v17 = vpop.f32.mrf.mxu1  ;;  %v4493_v24 = vpop.f32.mrf.mxu0  ;;  %v4755_v22 = vmul.f32 %v4491_v58, %v4491_v58  ;;  %v4346_v33 = vadd.f32 %v6381_v47, %v7647_v10  ;;  %v7649_v31 = vld [vmem:[#allocation11_spill] sm:$0xff] }
 0x208   : > { %v5903_v19 = vpack.c.bf16 %v4502_v55, %v4499_v34  ;;  %v4494_v9 = vadd.f32 %v4493_v24, %v4333_v40  ;;  %v4716_v32 = vadd.f32 %v4715_v35, %v4491_v58  ;;  %v4785_v2 = vadd.f32 %v4784_v0, %v4754_v18  ;;  %v7650_v0 = vld [vmem:[#allocation13_spill] sm:$0xff]  ;;  %v7651_v24 = vld [vmem:[#allocation12_spill] sm:$0xff] }
 0x209   : > { %v6389_v53 = vpop.f32.mrf.mxu1  ;;  %v6469_v56 = vpop.f32.mrf.mxu0  ;;  %v4354_v23 = vadd.f32 %v6387_v39, %v7645_v49  ;;  %v4758_v46 = vmul.f32 %v4502_v55, %v4502_v55 }
 0x20a   : > { %v6390_v62 = vadd.f32 %v6389_v53, %v6388_v17  ;;  %5950 = vst [vmem:[%s7516_s14 + $0x58] sm:$0xff] %v5903_v19   ;;  %v5898_v14 = vpack.c.bf16 %v4494_v9, %v4491_v58  ;;  %v4756_v44 = vmul.f32 %v4494_v9, %v4494_v9  ;;  %v4786_v3 = vadd.f32 %v4785_v2, %v4755_v22 }
 0x20b   : > { %v6391_v20 = vpop.f32.mrf.mxu1  ;;  %v4717_v7 = vadd.f32 %v4716_v32, %v4494_v9  ;;  %v4506_v61 = vpop.f32.mrf.mxu0  ;;  %v4515_v1 = vadd.f32 %v6469_v56, %v4354_v23 }
 0x20c   : > { %v4357_v30 = vadd.f32 %v6390_v62, %v7646_v11  ;;  %5949 = vst [vmem:[%s7516_s14 + $0x50] sm:$0xff] %v5898_v14   ;;  %v4787_v38 = vadd.f32 %v4786_v3, %v4756_v44  ;;  %v4507_v21 = vadd.f32 %v4506_v61, %v4346_v33  ;;  %v7652_v11 = vld [vmem:[#allocation14_spill] sm:$0xff] }
 0x20d   : > { %v6392_v41 = vpop.f32.mrf.mxu1  ;;  %v4718_v48 = vadd.f32 %v4717_v7, %v4499_v34  ;;  %v6470_v45 = vpop.f32.mrf.mxu0  ;;  %v4761_v39 = vmul.f32 %v4515_v1, %v4515_v1 }
 0x20e   : > { %v4518_v27 = vadd.f32 %v6470_v45, %v4357_v30  ;;  %v4788_v51 = vadd.f32 %v4787_v38, %v4757_v5  ;;  %v6393_v57 = vadd.f32 %v6392_v41, %v6391_v20  ;;  %v4759_v16 = vmul.f32 %v4507_v21, %v4507_v21 }
 0x20f   : > { %v6394_v37 = vpop.f32.mrf.mxu1  ;;  %v4719_v26 = vadd.f32 %v4718_v48, %v4502_v55  ;;  %v4509_v59 = vpop.f32.mrf.mxu0 }
 0x210   : > { %v5913_v6 = vpack.c.bf16 %v4518_v27, %v4515_v1  ;;  %v4510_v60 = vadd.f32 %v4509_v59, %v4349_v12  ;;  %v4789_v52 = vadd.f32 %v4788_v51, %v4758_v46  ;;  %v4362_v58 = vadd.f32 %v6393_v57, %v7649_v31 }
 0x211   : > { %v6395_v36 = vpop.f32.mrf.mxu1  ;;  %v4720_v43 = vadd.f32 %v4719_v26, %v4507_v21  ;;  %v6473_v50 = vpop.f32.mrf.mxu0  ;;  %v4762_v19 = vmul.f32 %v4518_v27, %v4518_v27 }
 0x212   : > { %5952 = vst [vmem:[%s7516_s14 + $0x68] sm:$0xff] %v5913_v6   ;;  %v5908_v4 = vpack.c.bf16 %v4510_v60, %v4507_v21  ;;  %v4760_v25 = vmul.f32 %v4510_v60, %v4510_v60  ;;  %v6396_v54 = vadd.f32 %v6395_v36, %v6394_v37  ;;  %v4790_v28 = vadd.f32 %v4789_v52, %v4759_v16 }
 0x213   : > { %v6397_v63 = vpop.f32.mrf.mxu1  ;;  %v4721_v42 = vadd.f32 %v4720_v43, %v4510_v60  ;;  %v4522_v29 = vpop.f32.mrf.mxu0 }
 0x214   : > { %5951 = vst [vmem:[%s7516_s14 + $0x60] sm:$0xff] %v5908_v4   ;;  %v4791_v8 = vadd.f32 %v4790_v28, %v4760_v25  ;;  %v4523_v40 = vadd.f32 %v4522_v29, %v4362_v58  ;;  %v4365_v53 = vadd.f32 %v6396_v54, %v7651_v24 }
 0x215   : > { %v6398_v17 = vpop.f32.mrf.mxu1  ;;  %v4722_v55 = vadd.f32 %v4721_v42, %v4515_v1  ;;  %v6474_v47 = vpop.f32.mrf.mxu0 }
 0x216   : > { %v6399_v34 = vadd.f32 %v6398_v17, %v6397_v63  ;;  %v4792_v9 = vadd.f32 %v4791_v8, %v4761_v39  ;;  %v4763_v14 = vmul.f32 %v4523_v40, %v4523_v40 }
 0x217   : > { %v6400_v18 = vpop.f32.mrf.mxu1  ;;  %v4723_v62 = vadd.f32 %v4722_v55, %v4518_v27  ;;  %v4525_v13 = vpop.f32.mrf.mxu0 }
 0x218   : > { %v4370_v35 = vadd.f32 %v6399_v34, %v7650_v0  ;;  %v4526_v2 = vadd.f32 %v4525_v13, %v4365_v53  ;;  %v4793_v44 = vadd.f32 %v4792_v9, %v4762_v19 }
 0x219   : > { %v6401_v32 = vpop.f32.mrf.mxu1  ;;  %v4724_v20 = vadd.f32 %v4723_v62, %v4523_v40 }
 0x21a   : > { %v4531_v22 = vadd.f32 %v6473_v50, %v4370_v35  ;;  %v6402_v56 = vadd.f32 %v6401_v32, %v6400_v18  ;;  %v5918_v49 = vpack.c.bf16 %v4526_v2, %v4523_v40  ;;  %v4764_v23 = vmul.f32 %v4526_v2, %v4526_v2 }
 0x21b   : > { %v4794_v3 = vadd.f32 %v4793_v44, %v4763_v14  ;;  %v4725_v10 = vadd.f32 %v4724_v20, %v4526_v2 }
 0x21c   : > { %v4373_v30 = vadd.f32 %v6402_v56, %v7652_v11  ;;  %v4765_v7 = vmul.f32 %v4531_v22, %v4531_v22  ;;  %5953 = vst [vmem:[%s7516_s14 + $0x70] sm:$0xff] %v5918_v49  }
 0x21d   : > { %v4726_v61 = vadd.f32 %v4725_v10, %v4531_v22  ;;  %v4795_v41 = vadd.f32 %v4794_v3, %v4764_v23 }
 0x21e   : > { %v4534_v33 = vadd.f32 %v6474_v47, %v4373_v30 }
 0x21f   : > { %v4796_v38 = vadd.f32 %v4795_v41, %v4765_v7 }
 0x220   : > { %v5923_v5 = vpack.c.bf16 %v4534_v33, %v4531_v22  ;;  %v4766_v48 = vmul.f32 %v4534_v33, %v4534_v33  ;;  %v4727_v21 = vadd.f32 %v4726_v61, %v4534_v33 }
 0x222   : > { %5954 = vst [vmem:[%s7516_s14 + $0x78] sm:$0xff] %v5923_v5   ;;  %v4728_v45 = vrot.slane %v4727_v21, 4  ;;  %v4797_v37 = vadd.f32 %v4796_v38, %v4766_v48 }
 0x224   : > { %v4729_v1 = vadd.f32 %v4728_v45, %v4727_v21  ;;  %v4798_v27 = vrot.slane %v4797_v37, 4 }
 0x226   : > { %v4730_v15 = vrot.slane %v4729_v1, 2  ;;  %v4799_v12 = vadd.f32 %v4798_v27, %v4797_v37 }
 0x228   : > { %v4731_v46 = vadd.f32 %v4730_v15, %v4729_v1  ;;  %v4800_v51 = vrot.slane %v4799_v12, 2 }
 0x22a   : > { %v4732_v26 = vrot.slane %v4731_v46, 1  ;;  %v4801_v57 = vadd.f32 %v4800_v51, %v4799_v12 }
 0x22c   : > { %v4733_v59 = vadd.f32 %v4732_v26, %v4731_v46  ;;  %v4802_v36 = vrot.slane %v4801_v57, 1 }
 0x22e   : > { %4734 = vst [vmem:[%s265_s17] sm:$0x1] %v4733_v59  ;;  %v4803_v6 = vadd.f32 %v4802_v36, %v4801_v57 }
 0x230   : > { %4804 = vst [vmem:[%s268_s23] sm:$0x1] %v4803_v6 }
 0x231 PF: > { %s17_s21 = sadd.s32 1, %s6789_s21  }
 0x232   : > { %p14_p4 = scmp.ge.s32.totalorder %s17_s21, 4  }
 0x234   :  { %16 = sbr.rel (!%p14_p4) target bundleno = 1 (0x1), region = 92 }

</bundles_post_ra>
